<compile_context>
chip_gen: v5e
topology: v5e:2x2
jax: 0.10.0
libtpu: 0.0.40
codegen_flags: <defaults>
</compile_context>

<pallas_src>
import functools

import numpy as np
import jax
import jax.numpy as jnp
from jax.experimental import pallas as pl
from jax.experimental.pallas import tpu as pltpu

STRIDES = (2, 1, 2, 1)                         # conv0..conv3
CHANNELS = ((24, 64), (64, 64), (64, 32), (32, 64))
KSIZE = 3
CPAD = 128                                     # lane-dense channel padding
BN_EPS = 1e-3


def _round_up(x, m):
    return (x + m - 1) // m * m


# ----------------------------------------------------------------------------
# geometry for the shifted-flat conv scheme
# ----------------------------------------------------------------------------
def build_geometry(h, w):
    layers = []
    for s in STRIDES:
        hp, wp = h + 2, w + 2                                  # pad = 1 each side
        rows = hp * wp                                         # dense (stride-1) flat rows
        in_rows = _round_up(rows + 2 * wp + 2, 8)              # + max tap offset, 8-aligned
        ho = (h + 2 - KSIZE) // s + 1
        wo = (w + 2 - KSIZE) // s + 1
        layers.append(dict(hin=h, win=w, hp=hp, wp=wp, rows=rows,
                           in_rows=in_rows, stride=s, ho=ho, wo=wo))
        h, w = ho, wo
    return layers


def build_selection(prev, cur):
    """0/1 matrix: prev layer dense flat output -> cur layer padded flat input.

    Encodes stride-decimation, spatial crop and zero re-padding exactly."""
    S = np.zeros((cur['in_rows'], prev['rows']), np.float32)
    for hp in range(1, cur['hin'] + 1):
        for wp in range(1, cur['win'] + 1):
            j = hp * cur['wp'] + wp
            src = prev['stride'] * (hp - 1) * prev['wp'] + prev['stride'] * (wp - 1)
            S[j, src] = 1.0
    return S


def build_pool_vec(last):
    pv = np.zeros((1, last['rows']), np.float32)
    inv = 1.0 / (last['ho'] * last['wo'])
    for h in range(last['ho']):
        for w in range(last['wo']):
            pv[0, last['stride'] * h * last['wp'] + last['stride'] * w] = inv
    return pv


# ----------------------------------------------------------------------------
# the fused kernel: conv0..conv3 (+BN+ReLU6) + avgpool + fc1 + fc2, per image
# ----------------------------------------------------------------------------
def _aux_kernel(x_ref, w_ref, sc_ref, bi_ref, s1_ref, s2_ref, s3_ref,
                pv_ref, f1w_ref, f1b_ref, f2w_ref, f2b_ref, o_ref, *, geom):
    sel_refs = (s1_ref, s2_ref, s3_ref)
    xin = x_ref[0]                                            # [in_rows0, 128] f32
    y = None
    for l, (wp, rows) in enumerate(geom):
        if l > 0:
            # crop / stride-decimate / re-pad the previous bf16 activation (exact 0/1 matmul)
            xin = jnp.dot(sel_refs[l - 1][...], y,
                          preferred_element_type=jnp.float32)  # [in_rows_l, 128] f32
        acc = None
        for kh in range(KSIZE):
            for kw in range(KSIZE):
                off = kh * wp + kw
                xs = jax.lax.slice(xin, (off, 0), (off + rows, CPAD))
                d = jnp.dot(xs.astype(jnp.bfloat16),
                            w_ref[l * (KSIZE * KSIZE) + kh * KSIZE + kw],
                            preferred_element_type=jnp.float32)
                acc = d if acc is None else acc + d
        # fused BN (folded scale/bias) + ReLU6 epilogue in f32, store activation as bf16
        y = jnp.clip(acc * sc_ref[l:l + 1, :] + bi_ref[l:l + 1, :], 0.0, 6.0)
        y = y.astype(jnp.bfloat16)

    # global average pool (matmul with 1/(Ho*Wo) selection row) + fc1 + fc2, all in-kernel
    pooled = jnp.dot(pv_ref[...], y, preferred_element_type=jnp.float32)        # [1, 128]
    h = jnp.dot(pooled.astype(jnp.bfloat16), f1w_ref[...],
                preferred_element_type=jnp.float32) + f1b_ref[...]              # [1, 128]
    out = jnp.dot(h.astype(jnp.bfloat16), f2w_ref[...],
                  preferred_element_type=jnp.float32) + f2b_ref[...]            # [1, 128]
    o_ref[0] = out


def aux_forward(x_nhwc, packed, geom_layers):
    n, h, w, c = x_nhwc.shape
    g0 = geom_layers[0]
    # one-time glue: spatial pad, channel pad to 128, flatten per image, tail-pad rows
    xp = jnp.pad(x_nhwc, ((0, 0), (1, 1), (1, 1), (0, CPAD - c)))
    flat = xp.reshape(n, g0['rows'], CPAD)
    flat = jnp.pad(flat, ((0, 0), (0, g0['in_rows'] - g0['rows']), (0, 0)))

    geom_static = tuple((g['wp'], g['rows']) for g in geom_layers)
    kernel = functools.partial(_aux_kernel, geom=geom_static)

    def _bcast(shape):            # whole-array block, identical for every grid step
        nd = len(shape)
        return pl.BlockSpec(shape, lambda i, _nd=nd: (0,) * _nd)

    out = pl.pallas_call(
        kernel,
        out_shape=jax.ShapeDtypeStruct((n, 1, CPAD), jnp.float32),
        grid=(n,),
        in_specs=[
            pl.BlockSpec((1, g0['in_rows'], CPAD), lambda i: (i, 0, 0)),
            _bcast(packed['w'].shape),
            _bcast(packed['scales'].shape),
            _bcast(packed['biases'].shape),
            _bcast(packed['s1'].shape),
            _bcast(packed['s2'].shape),
            _bcast(packed['s3'].shape),
            _bcast(packed['pvec'].shape),
            _bcast(packed['fc1w'].shape),
            _bcast(packed['fc1b'].shape),
            _bcast(packed['fc2w'].shape),
            _bcast(packed['fc2b'].shape),
        ],
        out_specs=pl.BlockSpec((1, 1, CPAD), lambda i: (i, 0, 0)),
        compiler_params=pltpu.CompilerParams(
            dimension_semantics=("parallel",)),       # 2nd TensorCore on v7x
    )(flat, packed['w'], packed['scales'], packed['biases'],
      packed['s1'], packed['s2'], packed['s3'], packed['pvec'],
      packed['fc1w'], packed['fc1b'], packed['fc2w'], packed['fc2b'])
    return out.reshape(n, CPAD)[:, :3]


# ----------------------------------------------------------------------------
# deterministic synthetic parameters (eval-mode folded BatchNorm)
# ----------------------------------------------------------------------------
class ParamGen:
    def __init__(self, seed=0):
        self.key = jax.random.PRNGKey(seed)

    def next(self, shape, scale=0.1):
        self.key, sub = jax.random.split(self.key)
        return jax.random.normal(sub, shape, jnp.float32) * scale


def fold_bn(pg, cout):
    gamma = 1.0 + pg.next((cout,), 0.05)
    beta = pg.next((cout,), 0.05)
    mean = pg.next((cout,), 0.05)
    var = 1.0 + jnp.abs(pg.next((cout,), 0.05))
    scale = gamma / jnp.sqrt(var + BN_EPS)
    bias = beta - mean * scale
    return scale, bias


def build_params(pg):
    raw = {'conv_w': [], 'scale': [], 'bias': []}
    for cin, cout in CHANNELS:
        raw['conv_w'].append(pg.next((KSIZE, KSIZE, cin, cout), 0.1))   # HWIO
        s, b = fold_bn(pg, cout)
        raw['scale'].append(s)
        raw['bias'].append(b)
    raw['fc1_w'] = pg.next((64, 16), 0.05)
    raw['fc1_b'] = pg.next((16,), 0.05)
    raw['fc2_w'] = pg.next((16, 3), 0.05)
    raw['fc2_b'] = pg.next((3,), 0.05)
    return raw


def pack_params(raw, geom):
    nl = len(CHANNELS)
    w_all = np.zeros((nl * KSIZE * KSIZE, CPAD, CPAD), np.float32)
    scales = np.zeros((nl, CPAD), np.float32)
    biases = np.zeros((nl, CPAD), np.float32)
    for l, (cin, cout) in enumerate(CHANNELS):
        taps = np.asarray(raw['conv_w'][l]).reshape(KSIZE * KSIZE, cin, cout)
        w_all[l * 9:(l + 1) * 9, :cin, :cout] = taps
        scales[l, :cout] = np.asarray(raw['scale'][l])
        biases[l, :cout] = np.asarray(raw['bias'][l])
    fc1w = np.zeros((CPAD, CPAD), np.float32); fc1w[:64, :16] = np.asarray(raw['fc1_w'])
    fc1b = np.zeros((1, CPAD), np.float32);    fc1b[0, :16] = np.asarray(raw['fc1_b'])
    fc2w = np.zeros((CPAD, CPAD), np.float32); fc2w[:16, :3] = np.asarray(raw['fc2_w'])
    fc2b = np.zeros((1, CPAD), np.float32);    fc2b[0, :3] = np.asarray(raw['fc2_b'])
    sels = [build_selection(geom[l - 1], geom[l]) for l in range(1, nl)]
    pvec = build_pool_vec(geom[-1])
    bf = jnp.bfloat16
    return dict(
        w=jnp.asarray(w_all, bf),
        scales=jnp.asarray(scales, jnp.float32),
        biases=jnp.asarray(biases, jnp.float32),
        s1=jnp.asarray(sels[0], bf), s2=jnp.asarray(sels[1], bf), s3=jnp.asarray(sels[2], bf),
        pvec=jnp.asarray(pvec, bf),
        fc1w=jnp.asarray(fc1w, bf), fc1b=jnp.asarray(fc1b, jnp.float32),
        fc2w=jnp.asarray(fc2w, bf), fc2b=jnp.asarray(fc2b, jnp.float32),
    )


# ----------------------------------------------------------------------------
# pure-JAX reference (mimics the kernel's bf16 rounding points) for validation
# ----------------------------------------------------------------------------
def reference_forward(x_nhwc, raw):
    f32 = jnp.float32
    bf = jnp.bfloat16
    y = x_nhwc.astype(f32)
    for l, s in enumerate(STRIDES):
        w = raw['conv_w'][l].astype(bf).astype(f32)
        y = jax.lax.conv_general_dilated(
            y, w, window_strides=(s, s), padding=((1, 1), (1, 1)),
            dimension_numbers=('NHWC', 'HWIO', 'NHWC'))
        y = jnp.clip(y * raw['scale'][l] + raw['bias'][l], 0.0, 6.0)
        y = y.astype(bf).astype(f32)
    pooled = jnp.mean(y, axis=(1, 2)).astype(bf).astype(f32)
    h = pooled @ raw['fc1_w'].astype(bf).astype(f32) + raw['fc1_b']
    h = h.astype(bf).astype(f32)
    return h @ raw['fc2_w'].astype(bf).astype(f32) + raw['fc2_b']


# ----------------------------------------------------------------------------
if __name__ == "__main__":
    N, H, W = 2, 16, 16
    geom = build_geometry(H, W)
    pg = ParamGen(seed=0)
    raw = build_params(pg)
    packed = pack_params(raw, geom)

    key = jax.random.PRNGKey(0)
    x_nchw = jax.random.normal(key, (N, 24, H, W), jnp.float32)   # PyTorch NCHW input
    x_nhwc = jnp.transpose(x_nchw, (0, 2, 3, 1))                  # kernel layout NHWC

    fwd = jax.jit(functools.partial(aux_forward, geom_layers=geom))
    out = jax.block_until_ready(fwd(x_nhwc, packed))
    assert out.shape == (N, 3), out.shape
    assert bool(jnp.all(jnp.isfinite(out)))

    ref = jax.block_until_ready(reference_forward(x_nhwc, raw))
    max_err = float(jnp.max(jnp.abs(out - ref)))
    assert max_err < 2e-2, f"max |err| = {max_err}"

    print("KERNEL_OK")
</pallas_src>

<mosaic_0001>
module attributes {stable_mosaic.version = 11 : i64} {
  func.func @_aux_kernel(%arg0: i32, %arg1: memref<1x368x128xf32, #tpu.memory_space<vmem>>, %arg2: memref<36x128x128xbf16, #tpu.memory_space<vmem>>, %arg3: memref<4x128xf32, #tpu.memory_space<vmem>>, %arg4: memref<4x128xf32, #tpu.memory_space<vmem>>, %arg5: memref<128x324xbf16, #tpu.memory_space<vmem>>, %arg6: memref<128x100xbf16, #tpu.memory_space<vmem>>, %arg7: memref<56x100xbf16, #tpu.memory_space<vmem>>, %arg8: memref<1x36xbf16, #tpu.memory_space<vmem>>, %arg9: memref<128x128xbf16, #tpu.memory_space<vmem>>, %arg10: memref<1x128xf32, #tpu.memory_space<vmem>>, %arg11: memref<128x128xbf16, #tpu.memory_space<vmem>>, %arg12: memref<1x128xf32, #tpu.memory_space<vmem>>, %arg13: memref<1x1x128xf32, #tpu.memory_space<vmem>>) attributes {dimension_semantics = [#tpu.dimension_semantics<parallel>], iteration_bounds = array<i64: 2>, scalar_prefetch = 0 : i64, scratch_operands = 0 : i64, tpu.core_type = #tpu.core_type<tc>, window_params = [{transform_indices = @transform_0, window_bounds = array<i64: 1, 368, 128>}, {pipeline_mode = #tpu.pipeline_mode<synchronous>, transform_indices = @transform_1, window_bounds = array<i64: 36, 128, 128>}, {pipeline_mode = #tpu.pipeline_mode<synchronous>, transform_indices = @transform_2, window_bounds = array<i64: 4, 128>}, {pipeline_mode = #tpu.pipeline_mode<synchronous>, transform_indices = @transform_3, window_bounds = array<i64: 4, 128>}, {pipeline_mode = #tpu.pipeline_mode<synchronous>, transform_indices = @transform_4, window_bounds = array<i64: 128, 324>}, {pipeline_mode = #tpu.pipeline_mode<synchronous>, transform_indices = @transform_5, window_bounds = array<i64: 128, 100>}, {pipeline_mode = #tpu.pipeline_mode<synchronous>, transform_indices = @transform_6, window_bounds = array<i64: 56, 100>}, {pipeline_mode = #tpu.pipeline_mode<synchronous>, transform_indices = @transform_7, window_bounds = array<i64: 1, 36>}, {pipeline_mode = #tpu.pipeline_mode<synchronous>, transform_indices = @transform_8, window_bounds = array<i64: 128, 128>}, {pipeline_mode = #tpu.pipeline_mode<synchronous>, transform_indices = @transform_9, window_bounds = array<i64: 1, 128>}, {pipeline_mode = #tpu.pipeline_mode<synchronous>, transform_indices = @transform_10, window_bounds = array<i64: 128, 128>}, {pipeline_mode = #tpu.pipeline_mode<synchronous>, transform_indices = @transform_11, window_bounds = array<i64: 1, 128>}, {transform_indices = @transform_12, window_bounds = array<i64: 1, 1, 128>}]} {
    %c0 = arith.constant 0 : index
    %c0_0 = arith.constant 0 : index
    %c0_1 = arith.constant 0 : index
    %0 = vector.load %arg1[%c0, %c0_0, %c0_1] : memref<1x368x128xf32, #tpu.memory_space<vmem>>, vector<1x368x128xf32>
    %1 = vector.shape_cast %0 : vector<1x368x128xf32> to vector<368x128xf32>
    %2 = vector.extract_strided_slice %1 {offsets = [0, 0], sizes = [324, 128], strides = [1, 1]} : vector<368x128xf32> to vector<324x128xf32>
    %3 = arith.truncf %2 : vector<324x128xf32> to vector<324x128xbf16>
    %c0_2 = arith.constant 0 : index
    %c0_3 = arith.constant 0 : index
    %c0_4 = arith.constant 0 : index
    %4 = vector.load %arg2[%c0_2, %c0_3, %c0_4] : memref<36x128x128xbf16, #tpu.memory_space<vmem>>, vector<1x128x128xbf16>
    %5 = vector.shape_cast %4 : vector<1x128x128xbf16> to vector<128x128xbf16>
    %cst = arith.constant dense<0.000000e+00> : vector<324x128xf32>
    %6 = tpu.matmul %3, %5, %cst {dimension_numbers = #tpu.dot_dimension_numbers<[1], [0], [0], [1], [0, 0, 1, 1], [], []>} : vector<324x128xbf16>, vector<128x128xbf16>, vector<324x128xf32> -> vector<324x128xf32>
    %7 = vector.extract_strided_slice %1 {offsets = [1, 0], sizes = [324, 128], strides = [1, 1]} : vector<368x128xf32> to vector<324x128xf32>
    %8 = arith.truncf %7 : vector<324x128xf32> to vector<324x128xbf16>
    %c1 = arith.constant 1 : index
    %c0_5 = arith.constant 0 : index
    %c0_6 = arith.constant 0 : index
    %9 = vector.load %arg2[%c1, %c0_5, %c0_6] : memref<36x128x128xbf16, #tpu.memory_space<vmem>>, vector<1x128x128xbf16>
    %10 = vector.shape_cast %9 : vector<1x128x128xbf16> to vector<128x128xbf16>
    %cst_7 = arith.constant dense<0.000000e+00> : vector<324x128xf32>
    %11 = tpu.matmul %8, %10, %cst_7 {dimension_numbers = #tpu.dot_dimension_numbers<[1], [0], [0], [1], [0, 0, 1, 1], [], []>} : vector<324x128xbf16>, vector<128x128xbf16>, vector<324x128xf32> -> vector<324x128xf32>
    %12 = arith.addf %6, %11 : vector<324x128xf32>
    %13 = vector.extract_strided_slice %1 {offsets = [2, 0], sizes = [324, 128], strides = [1, 1]} : vector<368x128xf32> to vector<324x128xf32>
    %14 = arith.truncf %13 : vector<324x128xf32> to vector<324x128xbf16>
    %c2 = arith.constant 2 : index
    %c0_8 = arith.constant 0 : index
    %c0_9 = arith.constant 0 : index
    %15 = vector.load %arg2[%c2, %c0_8, %c0_9] : memref<36x128x128xbf16, #tpu.memory_space<vmem>>, vector<1x128x128xbf16>
    %16 = vector.shape_cast %15 : vector<1x128x128xbf16> to vector<128x128xbf16>
    %cst_10 = arith.constant dense<0.000000e+00> : vector<324x128xf32>
    %17 = tpu.matmul %14, %16, %cst_10 {dimension_numbers = #tpu.dot_dimension_numbers<[1], [0], [0], [1], [0, 0, 1, 1], [], []>} : vector<324x128xbf16>, vector<128x128xbf16>, vector<324x128xf32> -> vector<324x128xf32>
    %18 = arith.addf %12, %17 : vector<324x128xf32>
    %19 = vector.extract_strided_slice %1 {offsets = [18, 0], sizes = [324, 128], strides = [1, 1]} : vector<368x128xf32> to vector<324x128xf32>
    %20 = arith.truncf %19 : vector<324x128xf32> to vector<324x128xbf16>
    %c3 = arith.constant 3 : index
    %c0_11 = arith.constant 0 : index
    %c0_12 = arith.constant 0 : index
    %21 = vector.load %arg2[%c3, %c0_11, %c0_12] : memref<36x128x128xbf16, #tpu.memory_space<vmem>>, vector<1x128x128xbf16>
    %22 = vector.shape_cast %21 : vector<1x128x128xbf16> to vector<128x128xbf16>
    %cst_13 = arith.constant dense<0.000000e+00> : vector<324x128xf32>
    %23 = tpu.matmul %20, %22, %cst_13 {dimension_numbers = #tpu.dot_dimension_numbers<[1], [0], [0], [1], [0, 0, 1, 1], [], []>} : vector<324x128xbf16>, vector<128x128xbf16>, vector<324x128xf32> -> vector<324x128xf32>
    %24 = arith.addf %18, %23 : vector<324x128xf32>
    %25 = vector.extract_strided_slice %1 {offsets = [19, 0], sizes = [324, 128], strides = [1, 1]} : vector<368x128xf32> to vector<324x128xf32>
    %26 = arith.truncf %25 : vector<324x128xf32> to vector<324x128xbf16>
    %c4 = arith.constant 4 : index
    %c0_14 = arith.constant 0 : index
    %c0_15 = arith.constant 0 : index
    %27 = vector.load %arg2[%c4, %c0_14, %c0_15] : memref<36x128x128xbf16, #tpu.memory_space<vmem>>, vector<1x128x128xbf16>
    %28 = vector.shape_cast %27 : vector<1x128x128xbf16> to vector<128x128xbf16>
    %cst_16 = arith.constant dense<0.000000e+00> : vector<324x128xf32>
    %29 = tpu.matmul %26, %28, %cst_16 {dimension_numbers = #tpu.dot_dimension_numbers<[1], [0], [0], [1], [0, 0, 1, 1], [], []>} : vector<324x128xbf16>, vector<128x128xbf16>, vector<324x128xf32> -> vector<324x128xf32>
    %30 = arith.addf %24, %29 : vector<324x128xf32>
    %31 = vector.extract_strided_slice %1 {offsets = [20, 0], sizes = [324, 128], strides = [1, 1]} : vector<368x128xf32> to vector<324x128xf32>
    %32 = arith.truncf %31 : vector<324x128xf32> to vector<324x128xbf16>
    %c5 = arith.constant 5 : index
    %c0_17 = arith.constant 0 : index
    %c0_18 = arith.constant 0 : index
    %33 = vector.load %arg2[%c5, %c0_17, %c0_18] : memref<36x128x128xbf16, #tpu.memory_space<vmem>>, vector<1x128x128xbf16>
    %34 = vector.shape_cast %33 : vector<1x128x128xbf16> to vector<128x128xbf16>
    %cst_19 = arith.constant dense<0.000000e+00> : vector<324x128xf32>
    %35 = tpu.matmul %32, %34, %cst_19 {dimension_numbers = #tpu.dot_dimension_numbers<[1], [0], [0], [1], [0, 0, 1, 1], [], []>} : vector<324x128xbf16>, vector<128x128xbf16>, vector<324x128xf32> -> vector<324x128xf32>
    %36 = arith.addf %30, %35 : vector<324x128xf32>
    %37 = vector.extract_strided_slice %1 {offsets = [36, 0], sizes = [324, 128], strides = [1, 1]} : vector<368x128xf32> to vector<324x128xf32>
    %38 = arith.truncf %37 : vector<324x128xf32> to vector<324x128xbf16>
    %c6 = arith.constant 6 : index
    %c0_20 = arith.constant 0 : index
    %c0_21 = arith.constant 0 : index
    %39 = vector.load %arg2[%c6, %c0_20, %c0_21] : memref<36x128x128xbf16, #tpu.memory_space<vmem>>, vector<1x128x128xbf16>
    %40 = vector.shape_cast %39 : vector<1x128x128xbf16> to vector<128x128xbf16>
    %cst_22 = arith.constant dense<0.000000e+00> : vector<324x128xf32>
    %41 = tpu.matmul %38, %40, %cst_22 {dimension_numbers = #tpu.dot_dimension_numbers<[1], [0], [0], [1], [0, 0, 1, 1], [], []>} : vector<324x128xbf16>, vector<128x128xbf16>, vector<324x128xf32> -> vector<324x128xf32>
    %42 = arith.addf %36, %41 : vector<324x128xf32>
    %43 = vector.extract_strided_slice %1 {offsets = [37, 0], sizes = [324, 128], strides = [1, 1]} : vector<368x128xf32> to vector<324x128xf32>
    %44 = arith.truncf %43 : vector<324x128xf32> to vector<324x128xbf16>
    %c7 = arith.constant 7 : index
    %c0_23 = arith.constant 0 : index
    %c0_24 = arith.constant 0 : index
    %45 = vector.load %arg2[%c7, %c0_23, %c0_24] : memref<36x128x128xbf16, #tpu.memory_space<vmem>>, vector<1x128x128xbf16>
    %46 = vector.shape_cast %45 : vector<1x128x128xbf16> to vector<128x128xbf16>
    %cst_25 = arith.constant dense<0.000000e+00> : vector<324x128xf32>
    %47 = tpu.matmul %44, %46, %cst_25 {dimension_numbers = #tpu.dot_dimension_numbers<[1], [0], [0], [1], [0, 0, 1, 1], [], []>} : vector<324x128xbf16>, vector<128x128xbf16>, vector<324x128xf32> -> vector<324x128xf32>
    %48 = arith.addf %42, %47 : vector<324x128xf32>
    %49 = vector.extract_strided_slice %1 {offsets = [38, 0], sizes = [324, 128], strides = [1, 1]} : vector<368x128xf32> to vector<324x128xf32>
    %50 = arith.truncf %49 : vector<324x128xf32> to vector<324x128xbf16>
    %c8 = arith.constant 8 : index
    %c0_26 = arith.constant 0 : index
    %c0_27 = arith.constant 0 : index
    %51 = vector.load %arg2[%c8, %c0_26, %c0_27] : memref<36x128x128xbf16, #tpu.memory_space<vmem>>, vector<1x128x128xbf16>
    %52 = vector.shape_cast %51 : vector<1x128x128xbf16> to vector<128x128xbf16>
    %cst_28 = arith.constant dense<0.000000e+00> : vector<324x128xf32>
    %53 = tpu.matmul %50, %52, %cst_28 {dimension_numbers = #tpu.dot_dimension_numbers<[1], [0], [0], [1], [0, 0, 1, 1], [], []>} : vector<324x128xbf16>, vector<128x128xbf16>, vector<324x128xf32> -> vector<324x128xf32>
    %54 = arith.addf %48, %53 : vector<324x128xf32>
    %c0_29 = arith.constant 0 : index
    %c0_30 = arith.constant 0 : index
    %55 = vector.load %arg3[%c0_29, %c0_30] : memref<4x128xf32, #tpu.memory_space<vmem>>, vector<1x128xf32>
    %56 = vector.broadcast %55 : vector<1x128xf32> to vector<324x128xf32>
    %57 = arith.mulf %54, %56 : vector<324x128xf32>
    %c0_31 = arith.constant 0 : index
    %c0_32 = arith.constant 0 : index
    %58 = vector.load %arg4[%c0_31, %c0_32] : memref<4x128xf32, #tpu.memory_space<vmem>>, vector<1x128xf32>
    %59 = vector.broadcast %58 : vector<1x128xf32> to vector<324x128xf32>
    %60 = arith.addf %57, %59 : vector<324x128xf32>
    %cst_33 = arith.constant 0.000000e+00 : f32
    %cst_34 = arith.constant 6.000000e+00 : f32
    %61 = vector.broadcast %cst_33 : f32 to vector<324x128xf32>
    %62 = arith.maximumf %61, %60 : vector<324x128xf32>
    %63 = vector.broadcast %cst_34 : f32 to vector<324x128xf32>
    %64 = arith.minimumf %63, %62 : vector<324x128xf32>
    %65 = arith.truncf %64 : vector<324x128xf32> to vector<324x128xbf16>
    %c0_35 = arith.constant 0 : index
    %c0_36 = arith.constant 0 : index
    %66 = vector.load %arg5[%c0_35, %c0_36] : memref<128x324xbf16, #tpu.memory_space<vmem>>, vector<128x324xbf16>
    %cst_37 = arith.constant dense<0.000000e+00> : vector<128x128xf32>
    %67 = tpu.matmul %66, %65, %cst_37 {dimension_numbers = #tpu.dot_dimension_numbers<[1], [0], [0], [1], [0, 0, 1, 1], [], []>} : vector<128x324xbf16>, vector<324x128xbf16>, vector<128x128xf32> -> vector<128x128xf32>
    %68 = vector.extract_strided_slice %67 {offsets = [0, 0], sizes = [100, 128], strides = [1, 1]} : vector<128x128xf32> to vector<100x128xf32>
    %69 = arith.truncf %68 : vector<100x128xf32> to vector<100x128xbf16>
    %c9 = arith.constant 9 : index
    %c0_38 = arith.constant 0 : index
    %c0_39 = arith.constant 0 : index
    %70 = vector.load %arg2[%c9, %c0_38, %c0_39] : memref<36x128x128xbf16, #tpu.memory_space<vmem>>, vector<1x128x128xbf16>
    %71 = vector.shape_cast %70 : vector<1x128x128xbf16> to vector<128x128xbf16>
    %cst_40 = arith.constant dense<0.000000e+00> : vector<100x128xf32>
    %72 = tpu.matmul %69, %71, %cst_40 {dimension_numbers = #tpu.dot_dimension_numbers<[1], [0], [0], [1], [0, 0, 1, 1], [], []>} : vector<100x128xbf16>, vector<128x128xbf16>, vector<100x128xf32> -> vector<100x128xf32>
    %73 = vector.extract_strided_slice %67 {offsets = [1, 0], sizes = [100, 128], strides = [1, 1]} : vector<128x128xf32> to vector<100x128xf32>
    %74 = arith.truncf %73 : vector<100x128xf32> to vector<100x128xbf16>
    %c10 = arith.constant 10 : index
    %c0_41 = arith.constant 0 : index
    %c0_42 = arith.constant 0 : index
    %75 = vector.load %arg2[%c10, %c0_41, %c0_42] : memref<36x128x128xbf16, #tpu.memory_space<vmem>>, vector<1x128x128xbf16>
    %76 = vector.shape_cast %75 : vector<1x128x128xbf16> to vector<128x128xbf16>
    %cst_43 = arith.constant dense<0.000000e+00> : vector<100x128xf32>
    %77 = tpu.matmul %74, %76, %cst_43 {dimension_numbers = #tpu.dot_dimension_numbers<[1], [0], [0], [1], [0, 0, 1, 1], [], []>} : vector<100x128xbf16>, vector<128x128xbf16>, vector<100x128xf32> -> vector<100x128xf32>
    %78 = arith.addf %72, %77 : vector<100x128xf32>
    %79 = vector.extract_strided_slice %67 {offsets = [2, 0], sizes = [100, 128], strides = [1, 1]} : vector<128x128xf32> to vector<100x128xf32>
    %80 = arith.truncf %79 : vector<100x128xf32> to vector<100x128xbf16>
    %c11 = arith.constant 11 : index
    %c0_44 = arith.constant 0 : index
    %c0_45 = arith.constant 0 : index
    %81 = vector.load %arg2[%c11, %c0_44, %c0_45] : memref<36x128x128xbf16, #tpu.memory_space<vmem>>, vector<1x128x128xbf16>
    %82 = vector.shape_cast %81 : vector<1x128x128xbf16> to vector<128x128xbf16>
    %cst_46 = arith.constant dense<0.000000e+00> : vector<100x128xf32>
    %83 = tpu.matmul %80, %82, %cst_46 {dimension_numbers = #tpu.dot_dimension_numbers<[1], [0], [0], [1], [0, 0, 1, 1], [], []>} : vector<100x128xbf16>, vector<128x128xbf16>, vector<100x128xf32> -> vector<100x128xf32>
    %84 = arith.addf %78, %83 : vector<100x128xf32>
    %85 = vector.extract_strided_slice %67 {offsets = [10, 0], sizes = [100, 128], strides = [1, 1]} : vector<128x128xf32> to vector<100x128xf32>
    %86 = arith.truncf %85 : vector<100x128xf32> to vector<100x128xbf16>
    %c12 = arith.constant 12 : index
    %c0_47 = arith.constant 0 : index
    %c0_48 = arith.constant 0 : index
    %87 = vector.load %arg2[%c12, %c0_47, %c0_48] : memref<36x128x128xbf16, #tpu.memory_space<vmem>>, vector<1x128x128xbf16>
    %88 = vector.shape_cast %87 : vector<1x128x128xbf16> to vector<128x128xbf16>
    %cst_49 = arith.constant dense<0.000000e+00> : vector<100x128xf32>
    %89 = tpu.matmul %86, %88, %cst_49 {dimension_numbers = #tpu.dot_dimension_numbers<[1], [0], [0], [1], [0, 0, 1, 1], [], []>} : vector<100x128xbf16>, vector<128x128xbf16>, vector<100x128xf32> -> vector<100x128xf32>
    %90 = arith.addf %84, %89 : vector<100x128xf32>
    %91 = vector.extract_strided_slice %67 {offsets = [11, 0], sizes = [100, 128], strides = [1, 1]} : vector<128x128xf32> to vector<100x128xf32>
    %92 = arith.truncf %91 : vector<100x128xf32> to vector<100x128xbf16>
    %c13 = arith.constant 13 : index
    %c0_50 = arith.constant 0 : index
    %c0_51 = arith.constant 0 : index
    %93 = vector.load %arg2[%c13, %c0_50, %c0_51] : memref<36x128x128xbf16, #tpu.memory_space<vmem>>, vector<1x128x128xbf16>
    %94 = vector.shape_cast %93 : vector<1x128x128xbf16> to vector<128x128xbf16>
    %cst_52 = arith.constant dense<0.000000e+00> : vector<100x128xf32>
    %95 = tpu.matmul %92, %94, %cst_52 {dimension_numbers = #tpu.dot_dimension_numbers<[1], [0], [0], [1], [0, 0, 1, 1], [], []>} : vector<100x128xbf16>, vector<128x128xbf16>, vector<100x128xf32> -> vector<100x128xf32>
    %96 = arith.addf %90, %95 : vector<100x128xf32>
    %97 = vector.extract_strided_slice %67 {offsets = [12, 0], sizes = [100, 128], strides = [1, 1]} : vector<128x128xf32> to vector<100x128xf32>
    %98 = arith.truncf %97 : vector<100x128xf32> to vector<100x128xbf16>
    %c14 = arith.constant 14 : index
    %c0_53 = arith.constant 0 : index
    %c0_54 = arith.constant 0 : index
    %99 = vector.load %arg2[%c14, %c0_53, %c0_54] : memref<36x128x128xbf16, #tpu.memory_space<vmem>>, vector<1x128x128xbf16>
    %100 = vector.shape_cast %99 : vector<1x128x128xbf16> to vector<128x128xbf16>
    %cst_55 = arith.constant dense<0.000000e+00> : vector<100x128xf32>
    %101 = tpu.matmul %98, %100, %cst_55 {dimension_numbers = #tpu.dot_dimension_numbers<[1], [0], [0], [1], [0, 0, 1, 1], [], []>} : vector<100x128xbf16>, vector<128x128xbf16>, vector<100x128xf32> -> vector<100x128xf32>
    %102 = arith.addf %96, %101 : vector<100x128xf32>
    %103 = vector.extract_strided_slice %67 {offsets = [20, 0], sizes = [100, 128], strides = [1, 1]} : vector<128x128xf32> to vector<100x128xf32>
    %104 = arith.truncf %103 : vector<100x128xf32> to vector<100x128xbf16>
    %c15 = arith.constant 15 : index
    %c0_56 = arith.constant 0 : index
    %c0_57 = arith.constant 0 : index
    %105 = vector.load %arg2[%c15, %c0_56, %c0_57] : memref<36x128x128xbf16, #tpu.memory_space<vmem>>, vector<1x128x128xbf16>
    %106 = vector.shape_cast %105 : vector<1x128x128xbf16> to vector<128x128xbf16>
    %cst_58 = arith.constant dense<0.000000e+00> : vector<100x128xf32>
    %107 = tpu.matmul %104, %106, %cst_58 {dimension_numbers = #tpu.dot_dimension_numbers<[1], [0], [0], [1], [0, 0, 1, 1], [], []>} : vector<100x128xbf16>, vector<128x128xbf16>, vector<100x128xf32> -> vector<100x128xf32>
    %108 = arith.addf %102, %107 : vector<100x128xf32>
    %109 = vector.extract_strided_slice %67 {offsets = [21, 0], sizes = [100, 128], strides = [1, 1]} : vector<128x128xf32> to vector<100x128xf32>
    %110 = arith.truncf %109 : vector<100x128xf32> to vector<100x128xbf16>
    %c16 = arith.constant 16 : index
    %c0_59 = arith.constant 0 : index
    %c0_60 = arith.constant 0 : index
    %111 = vector.load %arg2[%c16, %c0_59, %c0_60] : memref<36x128x128xbf16, #tpu.memory_space<vmem>>, vector<1x128x128xbf16>
    %112 = vector.shape_cast %111 : vector<1x128x128xbf16> to vector<128x128xbf16>
    %cst_61 = arith.constant dense<0.000000e+00> : vector<100x128xf32>
    %113 = tpu.matmul %110, %112, %cst_61 {dimension_numbers = #tpu.dot_dimension_numbers<[1], [0], [0], [1], [0, 0, 1, 1], [], []>} : vector<100x128xbf16>, vector<128x128xbf16>, vector<100x128xf32> -> vector<100x128xf32>
    %114 = arith.addf %108, %113 : vector<100x128xf32>
    %115 = vector.extract_strided_slice %67 {offsets = [22, 0], sizes = [100, 128], strides = [1, 1]} : vector<128x128xf32> to vector<100x128xf32>
    %116 = arith.truncf %115 : vector<100x128xf32> to vector<100x128xbf16>
    %c17 = arith.constant 17 : index
    %c0_62 = arith.constant 0 : index
    %c0_63 = arith.constant 0 : index
    %117 = vector.load %arg2[%c17, %c0_62, %c0_63] : memref<36x128x128xbf16, #tpu.memory_space<vmem>>, vector<1x128x128xbf16>
    %118 = vector.shape_cast %117 : vector<1x128x128xbf16> to vector<128x128xbf16>
    %cst_64 = arith.constant dense<0.000000e+00> : vector<100x128xf32>
    %119 = tpu.matmul %116, %118, %cst_64 {dimension_numbers = #tpu.dot_dimension_numbers<[1], [0], [0], [1], [0, 0, 1, 1], [], []>} : vector<100x128xbf16>, vector<128x128xbf16>, vector<100x128xf32> -> vector<100x128xf32>
    %120 = arith.addf %114, %119 : vector<100x128xf32>
    %c1_65 = arith.constant 1 : index
    %c0_66 = arith.constant 0 : index
    %121 = vector.load %arg3[%c1_65, %c0_66] : memref<4x128xf32, #tpu.memory_space<vmem>>, vector<1x128xf32>
    %122 = vector.broadcast %121 : vector<1x128xf32> to vector<100x128xf32>
    %123 = arith.mulf %120, %122 : vector<100x128xf32>
    %c1_67 = arith.constant 1 : index
    %c0_68 = arith.constant 0 : index
    %124 = vector.load %arg4[%c1_67, %c0_68] : memref<4x128xf32, #tpu.memory_space<vmem>>, vector<1x128xf32>
    %125 = vector.broadcast %124 : vector<1x128xf32> to vector<100x128xf32>
    %126 = arith.addf %123, %125 : vector<100x128xf32>
    %cst_69 = arith.constant 0.000000e+00 : f32
    %cst_70 = arith.constant 6.000000e+00 : f32
    %127 = vector.broadcast %cst_69 : f32 to vector<100x128xf32>
    %128 = arith.maximumf %127, %126 : vector<100x128xf32>
    %129 = vector.broadcast %cst_70 : f32 to vector<100x128xf32>
    %130 = arith.minimumf %129, %128 : vector<100x128xf32>
    %131 = arith.truncf %130 : vector<100x128xf32> to vector<100x128xbf16>
    %c0_71 = arith.constant 0 : index
    %c0_72 = arith.constant 0 : index
    %132 = vector.load %arg6[%c0_71, %c0_72] : memref<128x100xbf16, #tpu.memory_space<vmem>>, vector<128x100xbf16>
    %cst_73 = arith.constant dense<0.000000e+00> : vector<128x128xf32>
    %133 = tpu.matmul %132, %131, %cst_73 {dimension_numbers = #tpu.dot_dimension_numbers<[1], [0], [0], [1], [0, 0, 1, 1], [], []>} : vector<128x100xbf16>, vector<100x128xbf16>, vector<128x128xf32> -> vector<128x128xf32>
    %134 = vector.extract_strided_slice %133 {offsets = [0, 0], sizes = [100, 128], strides = [1, 1]} : vector<128x128xf32> to vector<100x128xf32>
    %135 = arith.truncf %134 : vector<100x128xf32> to vector<100x128xbf16>
    %c18 = arith.constant 18 : index
    %c0_74 = arith.constant 0 : index
    %c0_75 = arith.constant 0 : index
    %136 = vector.load %arg2[%c18, %c0_74, %c0_75] : memref<36x128x128xbf16, #tpu.memory_space<vmem>>, vector<1x128x128xbf16>
    %137 = vector.shape_cast %136 : vector<1x128x128xbf16> to vector<128x128xbf16>
    %cst_76 = arith.constant dense<0.000000e+00> : vector<100x128xf32>
    %138 = tpu.matmul %135, %137, %cst_76 {dimension_numbers = #tpu.dot_dimension_numbers<[1], [0], [0], [1], [0, 0, 1, 1], [], []>} : vector<100x128xbf16>, vector<128x128xbf16>, vector<100x128xf32> -> vector<100x128xf32>
    %139 = vector.extract_strided_slice %133 {offsets = [1, 0], sizes = [100, 128], strides = [1, 1]} : vector<128x128xf32> to vector<100x128xf32>
    %140 = arith.truncf %139 : vector<100x128xf32> to vector<100x128xbf16>
    %c19 = arith.constant 19 : index
    %c0_77 = arith.constant 0 : index
    %c0_78 = arith.constant 0 : index
    %141 = vector.load %arg2[%c19, %c0_77, %c0_78] : memref<36x128x128xbf16, #tpu.memory_space<vmem>>, vector<1x128x128xbf16>
    %142 = vector.shape_cast %141 : vector<1x128x128xbf16> to vector<128x128xbf16>
    %cst_79 = arith.constant dense<0.000000e+00> : vector<100x128xf32>
    %143 = tpu.matmul %140, %142, %cst_79 {dimension_numbers = #tpu.dot_dimension_numbers<[1], [0], [0], [1], [0, 0, 1, 1], [], []>} : vector<100x128xbf16>, vector<128x128xbf16>, vector<100x128xf32> -> vector<100x128xf32>
    %144 = arith.addf %138, %143 : vector<100x128xf32>
    %145 = vector.extract_strided_slice %133 {offsets = [2, 0], sizes = [100, 128], strides = [1, 1]} : vector<128x128xf32> to vector<100x128xf32>
    %146 = arith.truncf %145 : vector<100x128xf32> to vector<100x128xbf16>
    %c20 = arith.constant 20 : index
    %c0_80 = arith.constant 0 : index
    %c0_81 = arith.constant 0 : index
    %147 = vector.load %arg2[%c20, %c0_80, %c0_81] : memref<36x128x128xbf16, #tpu.memory_space<vmem>>, vector<1x128x128xbf16>
    %148 = vector.shape_cast %147 : vector<1x128x128xbf16> to vector<128x128xbf16>
    %cst_82 = arith.constant dense<0.000000e+00> : vector<100x128xf32>
    %149 = tpu.matmul %146, %148, %cst_82 {dimension_numbers = #tpu.dot_dimension_numbers<[1], [0], [0], [1], [0, 0, 1, 1], [], []>} : vector<100x128xbf16>, vector<128x128xbf16>, vector<100x128xf32> -> vector<100x128xf32>
    %150 = arith.addf %144, %149 : vector<100x128xf32>
    %151 = vector.extract_strided_slice %133 {offsets = [10, 0], sizes = [100, 128], strides = [1, 1]} : vector<128x128xf32> to vector<100x128xf32>
    %152 = arith.truncf %151 : vector<100x128xf32> to vector<100x128xbf16>
    %c21 = arith.constant 21 : index
    %c0_83 = arith.constant 0 : index
    %c0_84 = arith.constant 0 : index
    %153 = vector.load %arg2[%c21, %c0_83, %c0_84] : memref<36x128x128xbf16, #tpu.memory_space<vmem>>, vector<1x128x128xbf16>
    %154 = vector.shape_cast %153 : vector<1x128x128xbf16> to vector<128x128xbf16>
    %cst_85 = arith.constant dense<0.000000e+00> : vector<100x128xf32>
    %155 = tpu.matmul %152, %154, %cst_85 {dimension_numbers = #tpu.dot_dimension_numbers<[1], [0], [0], [1], [0, 0, 1, 1], [], []>} : vector<100x128xbf16>, vector<128x128xbf16>, vector<100x128xf32> -> vector<100x128xf32>
    %156 = arith.addf %150, %155 : vector<100x128xf32>
    %157 = vector.extract_strided_slice %133 {offsets = [11, 0], sizes = [100, 128], strides = [1, 1]} : vector<128x128xf32> to vector<100x128xf32>
    %158 = arith.truncf %157 : vector<100x128xf32> to vector<100x128xbf16>
    %c22 = arith.constant 22 : index
    %c0_86 = arith.constant 0 : index
    %c0_87 = arith.constant 0 : index
    %159 = vector.load %arg2[%c22, %c0_86, %c0_87] : memref<36x128x128xbf16, #tpu.memory_space<vmem>>, vector<1x128x128xbf16>
    %160 = vector.shape_cast %159 : vector<1x128x128xbf16> to vector<128x128xbf16>
    %cst_88 = arith.constant dense<0.000000e+00> : vector<100x128xf32>
    %161 = tpu.matmul %158, %160, %cst_88 {dimension_numbers = #tpu.dot_dimension_numbers<[1], [0], [0], [1], [0, 0, 1, 1], [], []>} : vector<100x128xbf16>, vector<128x128xbf16>, vector<100x128xf32> -> vector<100x128xf32>
    %162 = arith.addf %156, %161 : vector<100x128xf32>
    %163 = vector.extract_strided_slice %133 {offsets = [12, 0], sizes = [100, 128], strides = [1, 1]} : vector<128x128xf32> to vector<100x128xf32>
    %164 = arith.truncf %163 : vector<100x128xf32> to vector<100x128xbf16>
    %c23 = arith.constant 23 : index
    %c0_89 = arith.constant 0 : index
    %c0_90 = arith.constant 0 : index
    %165 = vector.load %arg2[%c23, %c0_89, %c0_90] : memref<36x128x128xbf16, #tpu.memory_space<vmem>>, vector<1x128x128xbf16>
    %166 = vector.shape_cast %165 : vector<1x128x128xbf16> to vector<128x128xbf16>
    %cst_91 = arith.constant dense<0.000000e+00> : vector<100x128xf32>
    %167 = tpu.matmul %164, %166, %cst_91 {dimension_numbers = #tpu.dot_dimension_numbers<[1], [0], [0], [1], [0, 0, 1, 1], [], []>} : vector<100x128xbf16>, vector<128x128xbf16>, vector<100x128xf32> -> vector<100x128xf32>
    %168 = arith.addf %162, %167 : vector<100x128xf32>
    %169 = vector.extract_strided_slice %133 {offsets = [20, 0], sizes = [100, 128], strides = [1, 1]} : vector<128x128xf32> to vector<100x128xf32>
    %170 = arith.truncf %169 : vector<100x128xf32> to vector<100x128xbf16>
    %c24 = arith.constant 24 : index
    %c0_92 = arith.constant 0 : index
    %c0_93 = arith.constant 0 : index
    %171 = vector.load %arg2[%c24, %c0_92, %c0_93] : memref<36x128x128xbf16, #tpu.memory_space<vmem>>, vector<1x128x128xbf16>
    %172 = vector.shape_cast %171 : vector<1x128x128xbf16> to vector<128x128xbf16>
    %cst_94 = arith.constant dense<0.000000e+00> : vector<100x128xf32>
    %173 = tpu.matmul %170, %172, %cst_94 {dimension_numbers = #tpu.dot_dimension_numbers<[1], [0], [0], [1], [0, 0, 1, 1], [], []>} : vector<100x128xbf16>, vector<128x128xbf16>, vector<100x128xf32> -> vector<100x128xf32>
    %174 = arith.addf %168, %173 : vector<100x128xf32>
    %175 = vector.extract_strided_slice %133 {offsets = [21, 0], sizes = [100, 128], strides = [1, 1]} : vector<128x128xf32> to vector<100x128xf32>
    %176 = arith.truncf %175 : vector<100x128xf32> to vector<100x128xbf16>
    %c25 = arith.constant 25 : index
    %c0_95 = arith.constant 0 : index
    %c0_96 = arith.constant 0 : index
    %177 = vector.load %arg2[%c25, %c0_95, %c0_96] : memref<36x128x128xbf16, #tpu.memory_space<vmem>>, vector<1x128x128xbf16>
    %178 = vector.shape_cast %177 : vector<1x128x128xbf16> to vector<128x128xbf16>
    %cst_97 = arith.constant dense<0.000000e+00> : vector<100x128xf32>
    %179 = tpu.matmul %176, %178, %cst_97 {dimension_numbers = #tpu.dot_dimension_numbers<[1], [0], [0], [1], [0, 0, 1, 1], [], []>} : vector<100x128xbf16>, vector<128x128xbf16>, vector<100x128xf32> -> vector<100x128xf32>
    %180 = arith.addf %174, %179 : vector<100x128xf32>
    %181 = vector.extract_strided_slice %133 {offsets = [22, 0], sizes = [100, 128], strides = [1, 1]} : vector<128x128xf32> to vector<100x128xf32>
    %182 = arith.truncf %181 : vector<100x128xf32> to vector<100x128xbf16>
    %c26 = arith.constant 26 : index
    %c0_98 = arith.constant 0 : index
    %c0_99 = arith.constant 0 : index
    %183 = vector.load %arg2[%c26, %c0_98, %c0_99] : memref<36x128x128xbf16, #tpu.memory_space<vmem>>, vector<1x128x128xbf16>
    %184 = vector.shape_cast %183 : vector<1x128x128xbf16> to vector<128x128xbf16>
    %cst_100 = arith.constant dense<0.000000e+00> : vector<100x128xf32>
    %185 = tpu.matmul %182, %184, %cst_100 {dimension_numbers = #tpu.dot_dimension_numbers<[1], [0], [0], [1], [0, 0, 1, 1], [], []>} : vector<100x128xbf16>, vector<128x128xbf16>, vector<100x128xf32> -> vector<100x128xf32>
    %186 = arith.addf %180, %185 : vector<100x128xf32>
    %c2_101 = arith.constant 2 : index
    %c0_102 = arith.constant 0 : index
    %187 = vector.load %arg3[%c2_101, %c0_102] : memref<4x128xf32, #tpu.memory_space<vmem>>, vector<1x128xf32>
    %188 = vector.broadcast %187 : vector<1x128xf32> to vector<100x128xf32>
    %189 = arith.mulf %186, %188 : vector<100x128xf32>
    %c2_103 = arith.constant 2 : index
    %c0_104 = arith.constant 0 : index
    %190 = vector.load %arg4[%c2_103, %c0_104] : memref<4x128xf32, #tpu.memory_space<vmem>>, vector<1x128xf32>
    %191 = vector.broadcast %190 : vector<1x128xf32> to vector<100x128xf32>
    %192 = arith.addf %189, %191 : vector<100x128xf32>
    %cst_105 = arith.constant 0.000000e+00 : f32
    %cst_106 = arith.constant 6.000000e+00 : f32
    %193 = vector.broadcast %cst_105 : f32 to vector<100x128xf32>
    %194 = arith.maximumf %193, %192 : vector<100x128xf32>
    %195 = vector.broadcast %cst_106 : f32 to vector<100x128xf32>
    %196 = arith.minimumf %195, %194 : vector<100x128xf32>
    %197 = arith.truncf %196 : vector<100x128xf32> to vector<100x128xbf16>
    %c0_107 = arith.constant 0 : index
    %c0_108 = arith.constant 0 : index
    %198 = vector.load %arg7[%c0_107, %c0_108] : memref<56x100xbf16, #tpu.memory_space<vmem>>, vector<56x100xbf16>
    %cst_109 = arith.constant dense<0.000000e+00> : vector<56x128xf32>
    %199 = tpu.matmul %198, %197, %cst_109 {dimension_numbers = #tpu.dot_dimension_numbers<[1], [0], [0], [1], [0, 0, 1, 1], [], []>} : vector<56x100xbf16>, vector<100x128xbf16>, vector<56x128xf32> -> vector<56x128xf32>
    %200 = vector.extract_strided_slice %199 {offsets = [0, 0], sizes = [36, 128], strides = [1, 1]} : vector<56x128xf32> to vector<36x128xf32>
    %201 = arith.truncf %200 : vector<36x128xf32> to vector<36x128xbf16>
    %c27 = arith.constant 27 : index
    %c0_110 = arith.constant 0 : index
    %c0_111 = arith.constant 0 : index
    %202 = vector.load %arg2[%c27, %c0_110, %c0_111] : memref<36x128x128xbf16, #tpu.memory_space<vmem>>, vector<1x128x128xbf16>
    %203 = vector.shape_cast %202 : vector<1x128x128xbf16> to vector<128x128xbf16>
    %cst_112 = arith.constant dense<0.000000e+00> : vector<36x128xf32>
    %204 = tpu.matmul %201, %203, %cst_112 {dimension_numbers = #tpu.dot_dimension_numbers<[1], [0], [0], [1], [0, 0, 1, 1], [], []>} : vector<36x128xbf16>, vector<128x128xbf16>, vector<36x128xf32> -> vector<36x128xf32>
    %205 = vector.extract_strided_slice %199 {offsets = [1, 0], sizes = [36, 128], strides = [1, 1]} : vector<56x128xf32> to vector<36x128xf32>
    %206 = arith.truncf %205 : vector<36x128xf32> to vector<36x128xbf16>
    %c28 = arith.constant 28 : index
    %c0_113 = arith.constant 0 : index
    %c0_114 = arith.constant 0 : index
    %207 = vector.load %arg2[%c28, %c0_113, %c0_114] : memref<36x128x128xbf16, #tpu.memory_space<vmem>>, vector<1x128x128xbf16>
    %208 = vector.shape_cast %207 : vector<1x128x128xbf16> to vector<128x128xbf16>
    %cst_115 = arith.constant dense<0.000000e+00> : vector<36x128xf32>
    %209 = tpu.matmul %206, %208, %cst_115 {dimension_numbers = #tpu.dot_dimension_numbers<[1], [0], [0], [1], [0, 0, 1, 1], [], []>} : vector<36x128xbf16>, vector<128x128xbf16>, vector<36x128xf32> -> vector<36x128xf32>
    %210 = arith.addf %204, %209 : vector<36x128xf32>
    %211 = vector.extract_strided_slice %199 {offsets = [2, 0], sizes = [36, 128], strides = [1, 1]} : vector<56x128xf32> to vector<36x128xf32>
    %212 = arith.truncf %211 : vector<36x128xf32> to vector<36x128xbf16>
    %c29 = arith.constant 29 : index
    %c0_116 = arith.constant 0 : index
    %c0_117 = arith.constant 0 : index
    %213 = vector.load %arg2[%c29, %c0_116, %c0_117] : memref<36x128x128xbf16, #tpu.memory_space<vmem>>, vector<1x128x128xbf16>
    %214 = vector.shape_cast %213 : vector<1x128x128xbf16> to vector<128x128xbf16>
    %cst_118 = arith.constant dense<0.000000e+00> : vector<36x128xf32>
    %215 = tpu.matmul %212, %214, %cst_118 {dimension_numbers = #tpu.dot_dimension_numbers<[1], [0], [0], [1], [0, 0, 1, 1], [], []>} : vector<36x128xbf16>, vector<128x128xbf16>, vector<36x128xf32> -> vector<36x128xf32>
    %216 = arith.addf %210, %215 : vector<36x128xf32>
    %217 = vector.extract_strided_slice %199 {offsets = [6, 0], sizes = [36, 128], strides = [1, 1]} : vector<56x128xf32> to vector<36x128xf32>
    %218 = arith.truncf %217 : vector<36x128xf32> to vector<36x128xbf16>
    %c30 = arith.constant 30 : index
    %c0_119 = arith.constant 0 : index
    %c0_120 = arith.constant 0 : index
    %219 = vector.load %arg2[%c30, %c0_119, %c0_120] : memref<36x128x128xbf16, #tpu.memory_space<vmem>>, vector<1x128x128xbf16>
    %220 = vector.shape_cast %219 : vector<1x128x128xbf16> to vector<128x128xbf16>
    %cst_121 = arith.constant dense<0.000000e+00> : vector<36x128xf32>
    %221 = tpu.matmul %218, %220, %cst_121 {dimension_numbers = #tpu.dot_dimension_numbers<[1], [0], [0], [1], [0, 0, 1, 1], [], []>} : vector<36x128xbf16>, vector<128x128xbf16>, vector<36x128xf32> -> vector<36x128xf32>
    %222 = arith.addf %216, %221 : vector<36x128xf32>
    %223 = vector.extract_strided_slice %199 {offsets = [7, 0], sizes = [36, 128], strides = [1, 1]} : vector<56x128xf32> to vector<36x128xf32>
    %224 = arith.truncf %223 : vector<36x128xf32> to vector<36x128xbf16>
    %c31 = arith.constant 31 : index
    %c0_122 = arith.constant 0 : index
    %c0_123 = arith.constant 0 : index
    %225 = vector.load %arg2[%c31, %c0_122, %c0_123] : memref<36x128x128xbf16, #tpu.memory_space<vmem>>, vector<1x128x128xbf16>
    %226 = vector.shape_cast %225 : vector<1x128x128xbf16> to vector<128x128xbf16>
    %cst_124 = arith.constant dense<0.000000e+00> : vector<36x128xf32>
    %227 = tpu.matmul %224, %226, %cst_124 {dimension_numbers = #tpu.dot_dimension_numbers<[1], [0], [0], [1], [0, 0, 1, 1], [], []>} : vector<36x128xbf16>, vector<128x128xbf16>, vector<36x128xf32> -> vector<36x128xf32>
    %228 = arith.addf %222, %227 : vector<36x128xf32>
    %229 = vector.extract_strided_slice %199 {offsets = [8, 0], sizes = [36, 128], strides = [1, 1]} : vector<56x128xf32> to vector<36x128xf32>
    %230 = arith.truncf %229 : vector<36x128xf32> to vector<36x128xbf16>
    %c32 = arith.constant 32 : index
    %c0_125 = arith.constant 0 : index
    %c0_126 = arith.constant 0 : index
    %231 = vector.load %arg2[%c32, %c0_125, %c0_126] : memref<36x128x128xbf16, #tpu.memory_space<vmem>>, vector<1x128x128xbf16>
    %232 = vector.shape_cast %231 : vector<1x128x128xbf16> to vector<128x128xbf16>
    %cst_127 = arith.constant dense<0.000000e+00> : vector<36x128xf32>
    %233 = tpu.matmul %230, %232, %cst_127 {dimension_numbers = #tpu.dot_dimension_numbers<[1], [0], [0], [1], [0, 0, 1, 1], [], []>} : vector<36x128xbf16>, vector<128x128xbf16>, vector<36x128xf32> -> vector<36x128xf32>
    %234 = arith.addf %228, %233 : vector<36x128xf32>
    %235 = vector.extract_strided_slice %199 {offsets = [12, 0], sizes = [36, 128], strides = [1, 1]} : vector<56x128xf32> to vector<36x128xf32>
    %236 = arith.truncf %235 : vector<36x128xf32> to vector<36x128xbf16>
    %c33 = arith.constant 33 : index
    %c0_128 = arith.constant 0 : index
    %c0_129 = arith.constant 0 : index
    %237 = vector.load %arg2[%c33, %c0_128, %c0_129] : memref<36x128x128xbf16, #tpu.memory_space<vmem>>, vector<1x128x128xbf16>
    %238 = vector.shape_cast %237 : vector<1x128x128xbf16> to vector<128x128xbf16>
    %cst_130 = arith.constant dense<0.000000e+00> : vector<36x128xf32>
    %239 = tpu.matmul %236, %238, %cst_130 {dimension_numbers = #tpu.dot_dimension_numbers<[1], [0], [0], [1], [0, 0, 1, 1], [], []>} : vector<36x128xbf16>, vector<128x128xbf16>, vector<36x128xf32> -> vector<36x128xf32>
    %240 = arith.addf %234, %239 : vector<36x128xf32>
    %241 = vector.extract_strided_slice %199 {offsets = [13, 0], sizes = [36, 128], strides = [1, 1]} : vector<56x128xf32> to vector<36x128xf32>
    %242 = arith.truncf %241 : vector<36x128xf32> to vector<36x128xbf16>
    %c34 = arith.constant 34 : index
    %c0_131 = arith.constant 0 : index
    %c0_132 = arith.constant 0 : index
    %243 = vector.load %arg2[%c34, %c0_131, %c0_132] : memref<36x128x128xbf16, #tpu.memory_space<vmem>>, vector<1x128x128xbf16>
    %244 = vector.shape_cast %243 : vector<1x128x128xbf16> to vector<128x128xbf16>
    %cst_133 = arith.constant dense<0.000000e+00> : vector<36x128xf32>
    %245 = tpu.matmul %242, %244, %cst_133 {dimension_numbers = #tpu.dot_dimension_numbers<[1], [0], [0], [1], [0, 0, 1, 1], [], []>} : vector<36x128xbf16>, vector<128x128xbf16>, vector<36x128xf32> -> vector<36x128xf32>
    %246 = arith.addf %240, %245 : vector<36x128xf32>
    %247 = vector.extract_strided_slice %199 {offsets = [14, 0], sizes = [36, 128], strides = [1, 1]} : vector<56x128xf32> to vector<36x128xf32>
    %248 = arith.truncf %247 : vector<36x128xf32> to vector<36x128xbf16>
    %c35 = arith.constant 35 : index
    %c0_134 = arith.constant 0 : index
    %c0_135 = arith.constant 0 : index
    %249 = vector.load %arg2[%c35, %c0_134, %c0_135] : memref<36x128x128xbf16, #tpu.memory_space<vmem>>, vector<1x128x128xbf16>
    %250 = vector.shape_cast %249 : vector<1x128x128xbf16> to vector<128x128xbf16>
    %cst_136 = arith.constant dense<0.000000e+00> : vector<36x128xf32>
    %251 = tpu.matmul %248, %250, %cst_136 {dimension_numbers = #tpu.dot_dimension_numbers<[1], [0], [0], [1], [0, 0, 1, 1], [], []>} : vector<36x128xbf16>, vector<128x128xbf16>, vector<36x128xf32> -> vector<36x128xf32>
    %252 = arith.addf %246, %251 : vector<36x128xf32>
    %c3_137 = arith.constant 3 : index
    %c0_138 = arith.constant 0 : index
    %253 = vector.load %arg3[%c3_137, %c0_138] : memref<4x128xf32, #tpu.memory_space<vmem>>, vector<1x128xf32>
    %254 = vector.broadcast %253 : vector<1x128xf32> to vector<36x128xf32>
    %255 = arith.mulf %252, %254 : vector<36x128xf32>
    %c3_139 = arith.constant 3 : index
    %c0_140 = arith.constant 0 : index
    %256 = vector.load %arg4[%c3_139, %c0_140] : memref<4x128xf32, #tpu.memory_space<vmem>>, vector<1x128xf32>
    %257 = vector.broadcast %256 : vector<1x128xf32> to vector<36x128xf32>
    %258 = arith.addf %255, %257 : vector<36x128xf32>
    %cst_141 = arith.constant 0.000000e+00 : f32
    %cst_142 = arith.constant 6.000000e+00 : f32
    %259 = vector.broadcast %cst_141 : f32 to vector<36x128xf32>
    %260 = arith.maximumf %259, %258 : vector<36x128xf32>
    %261 = vector.broadcast %cst_142 : f32 to vector<36x128xf32>
    %262 = arith.minimumf %261, %260 : vector<36x128xf32>
    %263 = arith.truncf %262 : vector<36x128xf32> to vector<36x128xbf16>
    %c0_143 = arith.constant 0 : index
    %c0_144 = arith.constant 0 : index
    %264 = vector.load %arg8[%c0_143, %c0_144] : memref<1x36xbf16, #tpu.memory_space<vmem>>, vector<1x36xbf16>
    %cst_145 = arith.constant dense<0.000000e+00> : vector<1x128xf32>
    %265 = tpu.matmul %264, %263, %cst_145 {dimension_numbers = #tpu.dot_dimension_numbers<[1], [0], [0], [1], [0, 0, 1, 1], [], []>} : vector<1x36xbf16>, vector<36x128xbf16>, vector<1x128xf32> -> vector<1x128xf32>
    %266 = arith.truncf %265 : vector<1x128xf32> to vector<1x128xbf16>
    %c0_146 = arith.constant 0 : index
    %c0_147 = arith.constant 0 : index
    %267 = vector.load %arg9[%c0_146, %c0_147] : memref<128x128xbf16, #tpu.memory_space<vmem>>, vector<128x128xbf16>
    %cst_148 = arith.constant dense<0.000000e+00> : vector<1x128xf32>
    %268 = tpu.matmul %266, %267, %cst_148 {dimension_numbers = #tpu.dot_dimension_numbers<[1], [0], [0], [1], [0, 0, 1, 1], [], []>} : vector<1x128xbf16>, vector<128x128xbf16>, vector<1x128xf32> -> vector<1x128xf32>
    %c0_149 = arith.constant 0 : index
    %c0_150 = arith.constant 0 : index
    %269 = vector.load %arg10[%c0_149, %c0_150] : memref<1x128xf32, #tpu.memory_space<vmem>>, vector<1x128xf32>
    %270 = arith.addf %268, %269 : vector<1x128xf32>
    %271 = arith.truncf %270 : vector<1x128xf32> to vector<1x128xbf16>
    %c0_151 = arith.constant 0 : index
    %c0_152 = arith.constant 0 : index
    %272 = vector.load %arg11[%c0_151, %c0_152] : memref<128x128xbf16, #tpu.memory_space<vmem>>, vector<128x128xbf16>
    %cst_153 = arith.constant dense<0.000000e+00> : vector<1x128xf32>
    %273 = tpu.matmul %271, %272, %cst_153 {dimension_numbers = #tpu.dot_dimension_numbers<[1], [0], [0], [1], [0, 0, 1, 1], [], []>} : vector<1x128xbf16>, vector<128x128xbf16>, vector<1x128xf32> -> vector<1x128xf32>
    %c0_154 = arith.constant 0 : index
    %c0_155 = arith.constant 0 : index
    %274 = vector.load %arg12[%c0_154, %c0_155] : memref<1x128xf32, #tpu.memory_space<vmem>>, vector<1x128xf32>
    %275 = arith.addf %273, %274 : vector<1x128xf32>
    %c0_156 = arith.constant 0 : index
    %c0_157 = arith.constant 0 : index
    %c0_158 = arith.constant 0 : index
    %276 = vector.load %arg13[%c0_156, %c0_157, %c0_158] : memref<1x1x128xf32, #tpu.memory_space<vmem>>, vector<1x1x128xf32>
    %277 = vector.shape_cast %276 : vector<1x1x128xf32> to vector<1x128xf32>
    %278 = vector.shape_cast %275 : vector<1x128xf32> to vector<1x1x128xf32>
    tpu.vector_store %arg13[%c0_156, %c0_157, %c0_158], %278 {strides = array<i32>} : memref<1x1x128xf32, #tpu.memory_space<vmem>>, vector<1x1x128xf32>,
    return
  }
  func.func @transform_0(%arg0: i32) -> (i32, i32, i32) {
    %c0_i32 = arith.constant 0 : i32
    %c0_i32_0 = arith.constant 0 : i32
    %c0_i32_1 = arith.constant 0 : i32
    return %arg0, %c0_i32, %c0_i32_0 : i32, i32, i32
  }
  func.func @transform_1(%arg0: i32) -> (i32, i32, i32) {
    %c0_i32 = arith.constant 0 : i32
    %c0_i32_0 = arith.constant 0 : i32
    %c0_i32_1 = arith.constant 0 : i32
    %c0_i32_2 = arith.constant 0 : i32
    return %c0_i32, %c0_i32_0, %c0_i32_1 : i32, i32, i32
  }
  func.func @transform_2(%arg0: i32) -> (i32, i32) {
    %c0_i32 = arith.constant 0 : i32
    %c0_i32_0 = arith.constant 0 : i32
    %c0_i32_1 = arith.constant 0 : i32
    return %c0_i32, %c0_i32_0 : i32, i32
  }
  func.func @transform_3(%arg0: i32) -> (i32, i32) {
    %c0_i32 = arith.constant 0 : i32
    %c0_i32_0 = arith.constant 0 : i32
    %c0_i32_1 = arith.constant 0 : i32
    return %c0_i32, %c0_i32_0 : i32, i32
  }
  func.func @transform_4(%arg0: i32) -> (i32, i32) {
    %c0_i32 = arith.constant 0 : i32
    %c0_i32_0 = arith.constant 0 : i32
    %c0_i32_1 = arith.constant 0 : i32
    return %c0_i32, %c0_i32_0 : i32, i32
  }
  func.func @transform_5(%arg0: i32) -> (i32, i32) {
    %c0_i32 = arith.constant 0 : i32
    %c0_i32_0 = arith.constant 0 : i32
    %c0_i32_1 = arith.constant 0 : i32
    return %c0_i32, %c0_i32_0 : i32, i32
  }
  func.func @transform_6(%arg0: i32) -> (i32, i32) {
    %c0_i32 = arith.constant 0 : i32
    %c0_i32_0 = arith.constant 0 : i32
    %c0_i32_1 = arith.constant 0 : i32
    return %c0_i32, %c0_i32_0 : i32, i32
  }
  func.func @transform_7(%arg0: i32) -> (i32, i32) {
    %c0_i32 = arith.constant 0 : i32
    %c0_i32_0 = arith.constant 0 : i32
    %c0_i32_1 = arith.constant 0 : i32
    return %c0_i32, %c0_i32_0 : i32, i32
  }
  func.func @transform_8(%arg0: i32) -> (i32, i32) {
    %c0_i32 = arith.constant 0 : i32
    %c0_i32_0 = arith.constant 0 : i32
    %c0_i32_1 = arith.constant 0 : i32
    return %c0_i32, %c0_i32_0 : i32, i32
  }
  func.func @transform_9(%arg0: i32) -> (i32, i32) {
    %c0_i32 = arith.constant 0 : i32
    %c0_i32_0 = arith.constant 0 : i32
    %c0_i32_1 = arith.constant 0 : i32
    return %c0_i32, %c0_i32_0 : i32, i32
  }
  func.func @transform_10(%arg0: i32) -> (i32, i32) {
    %c0_i32 = arith.constant 0 : i32
    %c0_i32_0 = arith.constant 0 : i32
    %c0_i32_1 = arith.constant 0 : i32
    return %c0_i32, %c0_i32_0 : i32, i32
  }
  func.func @transform_11(%arg0: i32) -> (i32, i32) {
    %c0_i32 = arith.constant 0 : i32
    %c0_i32_0 = arith.constant 0 : i32
    %c0_i32_1 = arith.constant 0 : i32
    return %c0_i32, %c0_i32_0 : i32, i32
  }
  func.func @transform_12(%arg0: i32) -> (i32, i32, i32) {
    %c0_i32 = arith.constant 0 : i32
    %c0_i32_0 = arith.constant 0 : i32
    %c0_i32_1 = arith.constant 0 : i32
    return %arg0, %c0_i32, %c0_i32_0 : i32, i32, i32
  }
}

</mosaic_0001>

<bundles_post_ra>
// kernel: aux_forward.1
= control target key start
LH: loop header
LB: loop body
LE: loop exit
PB: predicated region body
PF: predicated region fallthrough
CT: control target
= control target key end

     0   :  { %17 = vsyncpa [#allocation3], 0  ;;  %s13687_s0 = inlined_call_operand.vmem [shape: f32[2,368,128], index: 0, kind: input, shape index: {}]   ;;  %s13688_s1 = inlined_call_operand.vmem [shape: bf16[36,128,128], index: 1, kind: input, shape index: {}]   ;;  %s13689_s2 = inlined_call_operand.vmem [shape: f32[4,128], index: 2, kind: input, shape index: {}]   ;;  %s13690_s3 = inlined_call_operand.vmem [shape: f32[4,128], index: 3, kind: input, shape index: {}]   ;;  %s13691_s4 = inlined_call_operand.vmem [shape: bf16[128,324], index: 4, kind: input, shape index: {}]   ;;  %s13692_s5 = inlined_call_operand.vmem [shape: bf16[128,100], index: 5, kind: input, shape index: {}]   ;;  %s13693_s6 = inlined_call_operand.vmem [shape: bf16[56,100], index: 6, kind: input, shape index: {}]   ;;  %s13694_s7 = inlined_call_operand.vmem [shape: bf16[1,36], index: 7, kind: input, shape index: {}]   ;;  %s13695_s8 = inlined_call_operand.vmem [shape: bf16[128,128], index: 8, kind: input, shape index: {}]   ;;  %s13696_s9 = inlined_call_operand.vmem [shape: f32[1,128], index: 9, kind: input, shape index: {}]   ;;  %s13697_s10 = inlined_call_operand.vmem [shape: bf16[128,128], index: 10, kind: input, shape index: {}]   ;;  %s13698_s11 = inlined_call_operand.vmem [shape: f32[1,128], index: 11, kind: input, shape index: {}]   ;;  %s13699_s12 = inlined_call_operand.hbm [shape: f32[2,1,128], index: 12, kind: output, shape index: {}]  }
   0x1   :  { %19 = vsyncpa [#allocation3 + $0x1], 0  ;;  %s10294_s21 = smov 0   ;;  %s10296_s22 = smov 0  }
   0x2   :  { %s10298_s23 = smov 0   ;;  %s10300_s24 = smov 0  }
   0x3 LB: > { %13752 = sst [smem:[#allocation5_spill]] %s10223_s23  ;;  %s10315_s25 = sadd.s32 4294967295, %s10227_s24   ;;  %s10227_s24 = sphi %s10300_s24, %s13938_s24   ;;  %s10223_s23 = sphi %s10298_s23, %s13940_s23   ;;  %s10219_s22 = sphi %s10296_s22, %s13942_s22   ;;  %s10215_s21 = sphi %s10294_s21, %s13941_s21  }
   0x4   : > { %s7833_s26 = sadd.s32 4294967294, %s10227_s24   ;;  %s10319_s27 = sadd.s32 1, %s10227_s24  }
   0x5   : > { %13753 = sst [smem:[#allocation6_spill]] %s10319_s27  ;;  %s289_s28 = sadd.s32 1, %s10223_s23 }
   0x6   : > { %s286_s29 = ssub.s32 %s10227_s24, %s10319_s27  ;;  %p299_p0 = scmp.ne.s32.totalorder %s10223_s23, %s10219_s22 }
   0x7   : > { %p287_p1 = scmp.eq.s32.totalorder %s286_s29, 0  ;;  %p300_p2 = scmp.eq.s32.totalorder %s10315_s25, 1 }
   0x8   : > { %p305_p3 = scmp.ne.s32.totalorder %s10219_s22, %s10215_s21  ;;  %p306_p4 = scmp.eq.s32.totalorder %s7833_s26, 1 }
   0x9   : > { %s10330_s30 = scalar_select %p287_p1, %s10223_s23, %s289_s28  }
   0xa   : > { %p10332_p5 = por %p300_p2, %p299_p0  ;;  %p10336_p6 = por %p306_p4, %p305_p3 }
   0xb   : > { %13754 = sst [smem:[#allocation7_spill]] %s10330_s30  ;;  %p7836_p7 = scmp.ge.s32.totalorder %s10227_s24, 1 }
   0xc   : > { %p365_p8 = scmp.lt.s32.totalorder %s10227_s24, 3 }
   0xe   : > { %p366_p9 = pnand %p7836_p7, %p365_p8 }
  0x10   : > { %369 = sbr.rel (%p366_p9) target bundleno = 3348 (0xd14), region = 68 }
  0x15   : > { %v9792_v0 = vld [vmem:[%s13688_s1 + $0x78] sm:$0xff]  ;;  %p406_p10 = scmp.lt.s32.totalorder %s10315_s25, 1  ;;  %v9791_v4 = vld [vmem:[%s13688_s1 + $0x70] sm:$0xff]  ;;  %v9790_v8 = vld [vmem:[%s13688_s1 + $0x68] sm:$0xff]  ;;  %vm512_vm0 = vsmask.f32 7424  ;;  %s7774_s16 = scalar_lea.hbm %s13699_s12, %s10315_s25 }
  0x16   : > { %v9784_v1 = vld [vmem:[%s13688_s1 + $0x38] sm:$0xff]  ;;  %749 = vmatpush.bf16.msra.mxu0 %v9792_v0  ;;  %v9783_v5 = vld [vmem:[%s13688_s1 + $0x30] sm:$0xff]  ;;  %v9782_v9 = vld [vmem:[%s13688_s1 + $0x28] sm:$0xff]  ;;  %vm1061_vm1 = vcmask 1046528   ;;  %vm1573_vm2 = vsmask.f32 6400 }
  0x17   : > { %v9800_v2 = vld [vmem:[%s13688_s1 + $0xb8] sm:$0xff]  ;;  %910 = vmatpush.bf16.msra.mxu1 %v9784_v1  ;;  %s407_s17 = scalar_select %p406_p10, %s10315_s25, 1  ;;  %v9799_v6 = vld [vmem:[%s13688_s1 + $0xb0] sm:$0xff]  ;;  %v9798_v10 = vld [vmem:[%s13688_s1 + $0xa8] sm:$0xff]  ;;  %vm1907_vm3 = vcmask 1045504   ;;  %vm2755_vm5 = vcmask 1044480  }
  0x18   : > { %v9808_v3 = vld [vmem:[%s13688_s1 + $0xf8] sm:$0xff]  ;;  %1172 = vmatpush.bf16.msra.mxu2 %v9800_v2  ;;  %v9807_v7 = vld [vmem:[%s13688_s1 + $0xf0] sm:$0xff]  ;;  %v9806_v11 = vld [vmem:[%s13688_s1 + $0xe8] sm:$0xff]  ;;  %vm2420_vm4 = vsmask.f32 5376  ;;  %vm3386_vm6 = vcmask 1041408  }
  0x19   : > { %1402 = vmatpush.bf16.msra.mxu3 %v9808_v3  ;;  %s10116_s28 = smul.u32 368, %s407_s17  ;;  %v9789_v12 = vld [vmem:[%s13688_s1 + $0x60] sm:$0xff]  ;;  %v9788_v18 = vld [vmem:[%s13688_s1 + $0x58] sm:$0xff]  ;;  %v9787_v25 = vld [vmem:[%s13688_s1 + $0x50] sm:$0xff]  ;;  %vm3361_vm7 = vcmask 556032   ;;  %vm5028_vm8 = vcmask 818176  }
  0x1a   : > { %750 = vmatpush.bf16.msra.mxu0 %v9791_v4  ;;  %v9781_v13 = vld [vmem:[%s13688_s1 + $0x20] sm:$0xff]  ;;  %v9780_v19 = vld [vmem:[%s13688_s1 + $0x18] sm:$0xff]  ;;  %v9779_v26 = vld [vmem:[%s13688_s1 + $0x10] sm:$0xff]  ;;  %vm7037_vm9 = vsmask.f32 4352  ;;  %vm7586_vm10 = vcmask 293888  }
  0x1b   : > { %911 = vmatpush.bf16.msra.mxu1 %v9783_v5  ;;  %s10383_s27 = scalar_lea.vmem %s13687_s0, %s10116_s28  ;;  %v9797_v14 = vld [vmem:[%s13688_s1 + $0xa0] sm:$0xff]  ;;  %v9796_v20 = vld [vmem:[%s13688_s1 + $0x98] sm:$0xff]  ;;  %v9795_v29 = vld [vmem:[%s13688_s1 + $0x90] sm:$0xff]  ;;  %s7778_s17 = sshll.u32 %s7774_s16, 4  ;;  %s7779_s17 = int_to_ptr.hbm [resolvable:$true] %s7778_s17 }
  0x1c   : > { %1173 = vmatpush.bf16.msra.mxu2 %v9799_v6  ;;  %v9805_v15 = vld [vmem:[%s13688_s1 + $0xe0] sm:$0xff]  ;;  %v413_v17 = vld [vmem:[%s10383_s27 + $0x8] sm:$0xff]  ;;  %v9804_v21 = vld [vmem:[%s13688_s1 + $0xd8] sm:$0xff]  ;;  %s10179_s29 = sshra.s32 %s7779_s17, 4  ;;  %s10185_s23 = scalar_lea.hbm %s13699_s12, 2  ;;  %s10180_s29 = int_to_ptr.hbm [resolvable:$true] %s10179_s29 }
  0x1d   : > { %1403 = vmatpush.bf16.msra.mxu3 %v9807_v7  ;;  %v412_v16 = vld [vmem:[%s10383_s27] sm:$0xff]  ;;  %v414_v23 = vld [vmem:[%s10383_s27 + $0x10] sm:$0xff]  ;;  %v415_v24 = vld [vmem:[%s10383_s27 + $0x18] sm:$0xff]  ;;  %s10181_s15 = scalar_lea.hbm %s10180_s29, 1  ;;  %p10186_p0 = scmp.lt.s32.totalorder %s10180_s29, %s13699_s12 }
  0x1e   : > { %751 = vmatpush.bf16.msra.mxu0 %v9790_v8  ;;  %v458_v22 = vpack.c.bf16 %v413_v17, %v412_v16  ;;  %v10419_v27 = vpack.c.bf16 %v415_v24, %v414_v23  ;;  %v9803_v30 = vld [vmem:[%s13688_s1 + $0xd0] sm:$0xff]  ;;  %v416_v31 = vld [vmem:[%s10383_s27 + $0x20] sm:$0xff]  ;;  %v417_v32 = vld [vmem:[%s10383_s27 + $0x28] sm:$0xff]  ;;  %p10182_p11 = scmp.ne.s32.totalorder %s10180_s29, %s10181_s15  ;;  %p10187_p1 = scmp.lt.s32.totalorder %s10185_s23, %s10181_s15 }
  0x1f   : > { %912 = vmatpush.bf16.msra.mxu1 %v9782_v9  ;;  %v9786_v33 = vld [vmem:[%s13688_s1 + $0x48] sm:$0xff]  ;;  %v10442_v40 = vpack.c.bf16 %v417_v32, %v416_v31  ;;  %v9785_v41 = vld [vmem:[%s13688_s1 + $0x40] sm:$0xff]  ;;  %v418_v53 = vld [vmem:[%s10383_s27 + $0x30] sm:$0xff] }
  0x20   : > { %1174 = vmatpush.bf16.msra.mxu2 %v9798_v10  ;;  %v516_v28 = vshll.u32 %v458_v22, 16  ;;  %v9778_v34 = vld [vmem:[%s13688_s1 + $0x8] sm:$0xff]  ;;  %v514_v35 = vshrl.u32 %v458_v22, 16  ;;  %v13704_v37 = vshll.u32 %v10419_v27, 16  ;;  %v9777_v42 = vld [vmem:[%s13688_s1] sm:$0xff]  ;;  %v1062_v47 = vrot.slane %v458_v22, 1  ;;  %p10183_p12 = pnand %p10182_p11, %p10332_p5  ;;  %p10188_p2 = por %p10187_p1, %p10186_p0 }
  0x21   : > { %1404 = vmatpush.bf16.msra.mxu3 %v9806_v11  ;;  %v9794_v38 = vld [vmem:[%s13688_s1 + $0x88] sm:$0xff]  ;;  %v9793_v45 = vld [vmem:[%s13688_s1 + $0x80] sm:$0xff]  ;;  %v1063_v48 = vrot.slane %v10419_v27, 1  ;;  %v1065_v49 = vrot.slane %v10442_v40, 1  ;;  %v419_v54 = vld [vmem:[%s10383_s27 + $0x38] sm:$0xff]  ;;  %v13703_v55 = vshrl.u32 %v10419_v27, 16 }
  0x22   : > { %752 = vmatpush.bf16.msra.mxu0 %v9789_v12  ;;  %v518_v36 = vrot.slane %v516_v28, 1  ;;  %v9802_v39 = vld [vmem:[%s13688_s1 + $0xc8] sm:$0xff]  ;;  %v523_v44 = vrot.slane %v13704_v37, 1  ;;  %v9801_v46 = vld [vmem:[%s13688_s1 + $0xc0] sm:$0xff]  ;;  %v10467_v56 = vshll.u32 %v10442_v40, 16  ;;  %v10469_v57 = vpack.c.bf16 %v419_v54, %v418_v53  ;;  %v422_v9 = vld [vmem:[%s10383_s27 + $0x50] sm:$0xff]  ;;  %p10184_p13 = pneg %p10183_p12 }
  0x23   : > { %913 = vmatpush.bf16.msra.mxu1 %v9781_v13  ;;  %v1064_v51 = vsel %vm1061_vm1, %v1062_v47, %v1063_v48  ;;  %v1066_v52 = vsel %vm1061_vm1, %v1063_v48, %v1065_v49  ;;  %v420_v63 = vld [vmem:[%s10383_s27 + $0x40] sm:$0xff]  ;;  %v421_v0 = vld [vmem:[%s10383_s27 + $0x48] sm:$0xff]  ;;  %v10481_v1 = vshrl.u32 %v10442_v40, 16  ;;  %v423_v10 = vld [vmem:[%s10383_s27 + $0x58] sm:$0xff] }
  0x24   : > { %1175 = vmatpush.bf16.msra.mxu2 %v9797_v14  ;;  %v519_v43 = vor.u32 %v518_v36, %v514_v35  ;;  %v527_v58 = vor.u32 %v13703_v55, %v523_v44  ;;  %v531_v59 = vrot.slane %v10467_v56, 1  ;;  %v1067_v60 = vrot.slane %v10469_v57, 1  ;;  %v427_v31 = vld [vmem:[%s10383_s27 + $0x78] sm:$0xff]  ;;  %p10189_p3 = pnand %p10188_p2, %p10184_p13 }
  0x25   : > { %1405 = vmatpush.bf16.msra.mxu3 %v9805_v15  ;;  %v10484_v2 = vshll.u32 %v10469_v57, 16  ;;  %v10486_v3 = vpack.c.bf16 %v421_v0, %v420_v63  ;;  %v10497_v11 = vshrl.u32 %v10469_v57, 16  ;;  %v10502_v13 = vpack.c.bf16 %v423_v10, %v422_v9  ;;  %v431_v53 = vld [vmem:[%s10383_s27 + $0x98] sm:$0xff] }
  0x26   : > { %753 = vmatpush.bf16.msra.mxu0 %v9788_v18  ;;  %v524_v50 = vsel %vm512_vm0, %v519_v43, %v523_v44  ;;  %v532_v61 = vsel %vm512_vm0, %v527_v58, %v531_v59  ;;  %v1068_v62 = vsel %vm1061_vm1, %v1065_v49, %v1067_v60  ;;  %v535_v4 = vor.u32 %v10481_v1, %v531_v59  ;;  %v429_v43 = vld [vmem:[%s10383_s27 + $0x88] sm:$0xff] }
  0x27   : > { %914 = vmatpush.bf16.msra.mxu1 %v9780_v19  ;;  %v539_v5 = vrot.slane %v10484_v2, 1  ;;  %v1069_v6 = vrot.slane %v10486_v3, 1  ;;  %v10500_v12 = vshll.u32 %v10486_v3, 16  ;;  %v1071_v16 = vrot.slane %v10502_v13, 1  ;;  %v424_v19 = vld [vmem:[%s10383_s27 + $0x60] sm:$0xff] }
  0x28   : > { %1176 = vmatpush.bf16.msra.mxu2 %v9796_v20  ;;  %v425_v20 = vld [vmem:[%s10383_s27 + $0x68] sm:$0xff]  ;;  %v10529_v32 = vshrl.u32 %v10502_v13, 16 }
  0x29   : > { %1406 = vmatpush.bf16.msra.mxu3 %v9804_v21  ;;  %v540_v7 = vsel %vm512_vm0, %v535_v4, %v539_v5  ;;  %v1070_v8 = vsel %vm1061_vm1, %v1067_v60, %v1069_v6  ;;  %v543_v14 = vor.u32 %v10497_v11, %v539_v5  ;;  %v547_v15 = vrot.slane %v10500_v12, 1  ;;  %v432_v4 = vld [vmem:[%s10383_s27 + $0xa0] sm:$0xff]  ;;  %v433_v5 = vld [vmem:[%s10383_s27 + $0xa8] sm:$0xff] }
  0x2a   : > { %754 = vmatpush.bf16.msra.mxu0 %v9787_v25  ;;  %v1072_v18 = vsel %vm1061_vm1, %v1069_v6, %v1071_v16  ;;  %v10513_v21 = vshrl.u32 %v10486_v3, 16  ;;  %v10518_v23 = vpack.c.bf16 %v425_v20, %v424_v19  ;;  %v434_v20 = vld [vmem:[%s10383_s27 + $0xb0] sm:$0xff] }
  0x2b   : > { %915 = vmatpush.bf16.msra.mxu1 %v9779_v26  ;;  %v548_v17 = vsel %vm512_vm0, %v543_v14, %v547_v15 }
  0x2c   : > { %1177 = vmatpush.bf16.msra.mxu2 %v9795_v29  ;;  %v551_v24 = vor.u32 %v10513_v21, %v547_v15  ;;  %v1073_v26 = vrot.slane %v10518_v23, 1  ;;  %v10545_v44 = vshrl.u32 %v10518_v23, 16 }
  0x2d   : > { %1407 = vmatpush.bf16.msra.mxu3 %v9803_v30  ;;  %v426_v30 = vld [vmem:[%s10383_s27 + $0x70] sm:$0xff] }
  0x2e   : > { %755 = vmatpush.bf16.msra.mxu0 %v9786_v33  ;;  %v1074_v29 = vsel %vm1061_vm1, %v1071_v16, %v1073_v26  ;;  %v10532_v33 = vshll.u32 %v10518_v23, 16 }
  0x2f   : > { %916 = vmatpush.bf16.msra.mxu1 %v9778_v34  ;;  %v10534_v34 = vpack.c.bf16 %v427_v31, %v426_v30 }
  0x30   : > { %1178 = vmatpush.bf16.msra.mxu2 %v9794_v38  ;;  %v563_v36 = vrot.slane %v10532_v33, 1 }
  0x31   : > { %1408 = vmatpush.bf16.msra.mxu3 %v9802_v39  ;;  %v1075_v38 = vrot.slane %v10534_v34, 1  ;;  %v10561_v54 = vshrl.u32 %v10534_v34, 16 }
  0x32   : > { %756 = vmatpush.bf16.msra.mxu0 %v9785_v41  ;;  %v567_v47 = vor.u32 %v10545_v44, %v563_v36 }
  0x33   : > { %917 = vmatpush.bf16.msra.mxu1 %v9777_v42  ;;  %v1076_v41 = vsel %vm1061_vm1, %v1073_v26, %v1075_v38  ;;  %v428_v42 = vld [vmem:[%s10383_s27 + $0x80] sm:$0xff] }
  0x34   : > { %1179 = vmatpush.bf16.msra.mxu2 %v9793_v45  ;;  %v10548_v45 = vshll.u32 %v10534_v34, 16 }
  0x35   : > { %1409 = vmatpush.bf16.msra.mxu3 %v9801_v46  ;;  %757 = vmatmul.bf16.vlgmr.msra.gmra.mxu0 %v524_v50  ;;  %v10550_v46 = vpack.c.bf16 %v429_v43, %v428_v42 }
  0x36   : > { %918 = vmatmul.bf16.vlgmr.msra.gmra.mxu1 %v458_v22  ;;  %v10516_v22 = vshll.u32 %v10502_v13, 16  ;;  %v571_v48 = vrot.slane %v10548_v45, 1 }
  0x37   : > { %1180 = vmatmul.bf16.vlgmr.msra.gmra.mxu2 %v1064_v51  ;;  %v1077_v49 = vrot.slane %v10550_v46, 1  ;;  %v10564_v58 = vshll.u32 %v10550_v46, 16  ;;  %v10577_v6 = vshrl.u32 %v10550_v46, 16 }
  0x38   : > { %1410 = vmatmul.bf16.vlgmr.msra.gmra.mxu3 %v1066_v52  ;;  %v555_v25 = vrot.slane %v10516_v22, 1  ;;  %v572_v50 = vsel %vm512_vm0, %v567_v47, %v571_v48  ;;  %v575_v60 = vor.u32 %v10561_v54, %v571_v48 }
  0x39   : > { %v1078_v51 = vsel %vm1061_vm1, %v1075_v38, %v1077_v49 }
  0x3a   : > { %v556_v28 = vsel %vm512_vm0, %v551_v24, %v555_v25  ;;  %v559_v35 = vor.u32 %v10529_v32, %v555_v25  ;;  %v435_v24 = vld [vmem:[%s10383_s27 + $0xb8] sm:$0xff] }
  0x3b   : > { %v10598_v38 = vpack.c.bf16 %v435_v24, %v434_v20 }
  0x3c   : > { %v564_v39 = vsel %vm512_vm0, %v559_v35, %v563_v36 }
  0x3d   : > { %v1083_v43 = vrot.slane %v10598_v38, 1 }
  0x45   : > { %762 = vmatmul.bf16.gmra.mxu0 %v532_v61  ;;  %v579_v61 = vrot.slane %v10564_v58, 1 }
  0x46   : > { %923 = vmatmul.bf16.gmra.mxu1 %v10419_v27 }
  0x47   : > { %1185 = vmatmul.bf16.gmra.mxu2 %v1066_v52  ;;  %v430_v52 = vld [vmem:[%s10383_s27 + $0x90] sm:$0xff]  ;;  %v580_v63 = vsel %vm512_vm0, %v575_v60, %v579_v61  ;;  %v583_v9 = vor.u32 %v10577_v6, %v579_v61 }
  0x48   : > { %1415 = vmatmul.bf16.gmra.mxu3 %v1068_v62  ;;  %v10566_v59 = vpack.c.bf16 %v431_v53, %v430_v52 }
  0x4a   : > { %v10593_v31 = vshrl.u32 %v10566_v59, 16 }
  0x55   : > { %767 = vmatmul.bf16.gmra.mxu0 %v540_v7  ;;  %v10580_v7 = vshll.u32 %v10566_v59, 16 }
  0x56   : > { %928 = vmatmul.bf16.gmra.mxu1 %v10442_v40 }
  0x57   : > { %1190 = vmatmul.bf16.gmra.mxu2 %v1068_v62  ;;  %v1079_v62 = vrot.slane %v10566_v59, 1  ;;  %v587_v10 = vrot.slane %v10580_v7, 1 }
  0x58   : > { %1420 = vmatmul.bf16.gmra.mxu3 %v1070_v8 }
  0x59   : > { %v1080_v0 = vsel %vm1061_vm1, %v1077_v49, %v1079_v62 }
  0x65   : > { %772 = vmatmul.bf16.gmra.mxu0 %v548_v17  ;;  %v588_v17 = vsel %vm512_vm0, %v583_v9, %v587_v10 }
  0x66   : > { %933 = vmatmul.bf16.gmra.mxu1 %v10469_v57 }
  0x67   : > { %1195 = vmatmul.bf16.gmra.mxu2 %v1070_v8  ;;  %v10582_v8 = vpack.c.bf16 %v433_v5, %v432_v4 }
  0x68   : > { %1425 = vmatmul.bf16.gmra.mxu3 %v1072_v18 }
  0x69   : > { %v1081_v14 = vrot.slane %v10582_v8, 1  ;;  %v10596_v35 = vshll.u32 %v10582_v8, 16 }
  0x6b   : > { %v1082_v19 = vsel %vm1061_vm1, %v1079_v62, %v1081_v14  ;;  %v595_v42 = vrot.slane %v10596_v35, 1  ;;  %v1084_v60 = vsel %vm1061_vm1, %v1081_v14, %v1083_v43  ;;  %v436_v62 = vld [vmem:[%s10383_s27 + $0xc0] sm:$0xff] }
  0x75   : > { %777 = vmatmul.bf16.gmra.mxu0 %v556_v28 }
  0x76   : > { %938 = vmatmul.bf16.gmra.mxu1 %v10486_v3 }
  0x77   : > { %1200 = vmatmul.bf16.gmra.mxu2 %v1072_v18 }
  0x78   : > { %1430 = vmatmul.bf16.gmra.mxu3 %v1074_v29 }
  0x85   : > { %782 = vmatmul.bf16.gmra.mxu0 %v564_v39 }
  0x86   : > { %943 = vmatmul.bf16.gmra.mxu1 %v10502_v13 }
  0x87   : > { %1205 = vmatmul.bf16.gmra.mxu2 %v1074_v29 }
  0x88   : > { %1435 = vmatmul.bf16.gmra.mxu3 %v1076_v41 }
  0x95   : > { %787 = vmatmul.bf16.gmra.mxu0 %v572_v50 }
  0x96   : > { %948 = vmatmul.bf16.gmra.mxu1 %v10518_v23 }
  0x97   : > { %1210 = vmatmul.bf16.gmra.mxu2 %v1076_v41  ;;  %v591_v41 = vor.u32 %v10593_v31, %v587_v10 }
  0x98   : > { %1440 = vmatmul.bf16.gmra.mxu3 %v1078_v51 }
  0x99   : > { %v596_v52 = vsel %vm512_vm0, %v591_v41, %v595_v42 }
  0xa5   : > { %792 = vmatmul.bf16.gmra.mxu0 %v580_v63  ;;  %v437_v63 = vld [vmem:[%s10383_s27 + $0xc8] sm:$0xff] }
  0xa6   : > { %953 = vmatmul.bf16.gmra.mxu1 %v10534_v34 }
  0xa7   : > { %1215 = vmatmul.bf16.gmra.mxu2 %v1078_v51 }
  0xa8   : > { %1445 = vmatmul.bf16.gmra.mxu3 %v1080_v0 }
  0xb2   : > { %v758_v15 = vpop.f32.mrf.mxu0 }
  0xb3   : > { %v919_v16 = vpop.f32.mrf.mxu1 }
  0xb4   : > { %v920_v18 = vadd.f32 %v919_v16, %v758_v15  ;;  %v10613_v15 = vshrl.u32 %v10582_v8, 16  ;;  %v10616_v16 = vshll.u32 %v10598_v38, 16 }
  0xb5   : > { %797 = vmatmul.bf16.gmra.mxu0 %v588_v17  ;;  %v10618_v17 = vpack.c.bf16 %v437_v63, %v436_v62  ;;  %v10633_v63 = vshrl.u32 %v10598_v38, 16 }
  0xb6   : > { %958 = vmatmul.bf16.gmra.mxu1 %v10550_v46  ;;  %v603_v20 = vrot.slane %v10616_v16, 1 }
  0xb7   : > { %1220 = vmatmul.bf16.gmra.mxu2 %v1080_v0  ;;  %v1085_v24 = vrot.slane %v10618_v17, 1 }
  0xb8   : > { %1450 = vmatmul.bf16.gmra.mxu3 %v1082_v19 }
  0xba   : > { %v1181_v25 = vpop.f32.mrf.mxu2  ;;  %v760_v29 = vpop.f32.mrf.mxu0 }
  0xbb   : > { %v1411_v26 = vpop.f32.mrf.mxu3  ;;  %v1285_v28 = vadd.f32 %v1181_v25, %v920_v18  ;;  %v921_v30 = vpop.f32.mrf.mxu1 }
  0xbc   : > { %v922_v36 = vadd.f32 %v921_v30, %v760_v29 }
  0xbd   : > { %v10600_v39 = vadd.f32 %v1411_v26, %v1285_v28 }
  0xc2   : > { %v1183_v47 = vpop.f32.mrf.mxu2  ;;  %v763_v50 = vpop.f32.mrf.mxu0 }
  0xc3   : > { %v1413_v48 = vpop.f32.mrf.mxu3  ;;  %v1286_v49 = vadd.f32 %v1183_v47, %v922_v36  ;;  %v924_v51 = vpop.f32.mrf.mxu1  ;;  %v1086_v47 = vsel %vm1061_vm1, %v1083_v43, %v1085_v24 }
  0xc4   : > { %v925_v53 = vadd.f32 %v924_v51, %v763_v50 }
  0xc5   : > { %v10607_v61 = vadd.f32 %v1413_v48, %v1286_v49  ;;  %802 = vmatmul.bf16.gmra.mxu0 %v596_v52  ;;  %v439_v49 = vld [vmem:[%s10383_s27 + $0xd8] sm:$0xff] }
  0xc6   : > { %963 = vmatmul.bf16.gmra.mxu1 %v10566_v59 }
  0xc7   : > { %1225 = vmatmul.bf16.gmra.mxu2 %v1082_v19  ;;  %v599_v19 = vor.u32 %v10613_v15, %v595_v42  ;;  %v438_v42 = vld [vmem:[%s10383_s27 + $0xd0] sm:$0xff] }
  0xc8   : > { %1455 = vmatmul.bf16.gmra.mxu3 %v1084_v60 }
  0xc9   : > { %v604_v36 = vsel %vm512_vm0, %v599_v19, %v603_v20 }
  0xca   : > { %v1186_v0 = vpop.f32.mrf.mxu2  ;;  %v765_v9 = vpop.f32.mrf.mxu0 }
  0xcb   : > { %v1416_v4 = vpop.f32.mrf.mxu3  ;;  %v1287_v5 = vadd.f32 %v1186_v0, %v925_v53  ;;  %v926_v10 = vpop.f32.mrf.mxu1  ;;  %v10636_v0 = vshll.u32 %v10618_v17, 16 }
  0xcc   : > { %v927_v14 = vadd.f32 %v926_v10, %v765_v9 }
  0xcd   : > { %v10620_v18 = vadd.f32 %v1416_v4, %v1287_v5  ;;  %v10638_v4 = vpack.c.bf16 %v439_v49, %v438_v42  ;;  %v611_v9 = vrot.slane %v10636_v0, 1  ;;  %v441_v42 = vld [vmem:[%s10383_s27 + $0xe8] sm:$0xff] }
  0xcf   : > { %13757 = vst [vmem:[#allocation8_spill] sm:$0xff] %v10638_v4  ;;  %v1087_v10 = vrot.slane %v10638_v4, 1 }
  0xd2   : > { %v1188_v25 = vpop.f32.mrf.mxu2  ;;  %v768_v29 = vpop.f32.mrf.mxu0 }
  0xd3   : > { %v1418_v26 = vpop.f32.mrf.mxu3  ;;  %v1288_v28 = vadd.f32 %v1188_v25, %v927_v14  ;;  %v929_v30 = vpop.f32.mrf.mxu1 }
  0xd4   : > { %v930_v41 = vadd.f32 %v929_v30, %v768_v29 }
  0xd5   : > { %v10627_v48 = vadd.f32 %v1418_v26, %v1288_v28  ;;  %807 = vmatmul.bf16.gmra.mxu0 %v604_v36  ;;  %v1088_v36 = vsel %vm1061_vm1, %v1085_v24, %v1087_v10 }
  0xd6   : > { %968 = vmatmul.bf16.gmra.mxu1 %v10582_v8 }
  0xd7   : > { %1230 = vmatmul.bf16.gmra.mxu2 %v1084_v60  ;;  %v607_v60 = vor.u32 %v10633_v63, %v603_v20  ;;  %v440_v20 = vld [vmem:[%s10383_s27 + $0xe0] sm:$0xff] }
  0xd8   : > { %1460 = vmatmul.bf16.gmra.mxu3 %v1086_v47 }
  0xd9   : > { %v612_v29 = vsel %vm512_vm0, %v607_v60, %v611_v9  ;;  %v10658_v60 = vpack.c.bf16 %v441_v42, %v440_v20 }
  0xda   : > { %v1191_v50 = vpop.f32.mrf.mxu2  ;;  %v770_v53 = vpop.f32.mrf.mxu0 }
  0xdb   : > { %v1421_v51 = vpop.f32.mrf.mxu3  ;;  %v1289_v52 = vadd.f32 %v1191_v50, %v930_v41  ;;  %v931_v62 = vpop.f32.mrf.mxu1  ;;  %13761 = vst [vmem:[#allocation12_spill] sm:$0xff] %v10658_v60 }
  0xdc   : > { %v932_v43 = vadd.f32 %v931_v62, %v770_v53  ;;  %v10653_v62 = vshrl.u32 %v10618_v17, 16 }
  0xdd   : > { %v10640_v5 = vadd.f32 %v1421_v51, %v1289_v52 }
  0xdf   : > { %13758 = vst [vmem:[#allocation9_spill] sm:$0xff] %v10640_v5 }
  0xe2   : > { %v1193_v14 = vpop.f32.mrf.mxu2  ;;  %v773_v26 = vpop.f32.mrf.mxu0 }
  0xe3   : > { %v1423_v19 = vpop.f32.mrf.mxu3  ;;  %v1290_v25 = vadd.f32 %v1193_v14, %v932_v43  ;;  %v934_v28 = vpop.f32.mrf.mxu1  ;;  %v10656_v43 = vshll.u32 %v10638_v4, 16 }
  0xe4   : > { %v935_v30 = vadd.f32 %v934_v28, %v773_v26 }
  0xe5   : > { %v10647_v41 = vadd.f32 %v1423_v19, %v1290_v25  ;;  %812 = vmatmul.bf16.gmra.mxu0 %v612_v29  ;;  %13760 = vst [vmem:[#allocation11_spill] sm:$0xff] %v10656_v43  ;;  %v619_v19 = vrot.slane %v10656_v43, 1  ;;  %v1089_v25 = vrot.slane %v10658_v60, 1 }
  0xe6   : > { %973 = vmatmul.bf16.gmra.mxu1 %v10598_v38 }
  0xe7   : > { %13759 = vst [vmem:[#allocation10_spill] sm:$0xff] %v10647_v41  ;;  %1235 = vmatmul.bf16.gmra.mxu2 %v1086_v47  ;;  %v615_v47 = vor.u32 %v10653_v62, %v611_v9  ;;  %v1090_v20 = vsel %vm1061_vm1, %v1087_v10, %v1089_v25  ;;  %v442_v9 = vld [vmem:[%s10383_s27 + $0xf0] sm:$0xff] }
  0xe8   : > { %1465 = vmatmul.bf16.gmra.mxu3 %v1088_v36 }
  0xe9   : > { %v620_v55 = vsel %vm512_vm0, %v615_v47, %v619_v19  ;;  %v10676_v47 = vshll.u32 %v10658_v60, 16 }
  0xea   : > { %v1196_v49 = vpop.f32.mrf.mxu2  ;;  %v775_v52 = vpop.f32.mrf.mxu0 }
  0xeb   : > { %v1426_v50 = vpop.f32.mrf.mxu3  ;;  %v1291_v51 = vadd.f32 %v1196_v49, %v935_v30  ;;  %v936_v53 = vpop.f32.mrf.mxu1  ;;  %13765 = vst [vmem:[#allocation16_spill] sm:$0xff] %v10676_v47 }
  0xec   : > { %v937_v24 = vadd.f32 %v936_v53, %v775_v52 }
  0xed   : > { %v10660_v14 = vadd.f32 %v1426_v50, %v1291_v51  ;;  %v443_v50 = vld [vmem:[%s10383_s27 + $0xf8] sm:$0xff] }
  0xef   : > { %13762 = vst [vmem:[#allocation13_spill] sm:$0xff] %v10660_v14  ;;  %v10673_v14 = vshrl.u32 %v10638_v4, 16 }
  0xf1   : > { %13764 = vst [vmem:[#allocation15_spill] sm:$0xff] %v10673_v14 }
  0xf2   : > { %v1198_v26 = vpop.f32.mrf.mxu2  ;;  %v778_v30 = vpop.f32.mrf.mxu0 }
  0xf3   : > { %v1428_v28 = vpop.f32.mrf.mxu3  ;;  %v1292_v29 = vadd.f32 %v1198_v26, %v937_v24  ;;  %v939_v49 = vpop.f32.mrf.mxu1 }
  0xf4   : > { %v940_v52 = vadd.f32 %v939_v49, %v778_v30 }
  0xf5   : > { %v10667_v42 = vadd.f32 %v1428_v28, %v1292_v29  ;;  %817 = vmatmul.bf16.gmra.mxu0 %v620_v55  ;;  %v10678_v28 = vpack.c.bf16 %v443_v50, %v442_v9  ;;  %v627_v29 = vrot.slane %v10676_v47, 1  ;;  %v445_v50 = vld [vmem:[%s10383_s27 + $0x108] sm:$0xff]  ;;  %v10693_v47 = vshrl.u32 %v10658_v60, 16 }
  0xf6   : > { %978 = vmatmul.bf16.gmra.mxu1 %v10618_v17 }
  0xf7   : > { %13763 = vst [vmem:[#allocation14_spill] sm:$0xff] %v10667_v42  ;;  %1240 = vmatmul.bf16.gmra.mxu2 %v1088_v36  ;;  %v623_v36 = vor.u32 %v10673_v14, %v619_v19  ;;  %v1091_v30 = vrot.slane %v10678_v28, 1  ;;  %v444_v19 = vld [vmem:[%s10383_s27 + $0x100] sm:$0xff] }
  0xf8   : > { %1470 = vmatmul.bf16.gmra.mxu3 %v1090_v20  ;;  %13766 = vst [vmem:[#allocation17_spill] sm:$0xff] %v10678_v28  ;;  %v9817_v14 = vld [vmem:[%s13688_s1 + $0x140] sm:$0xff] }
  0xf9   : > { %v628_v5 = vsel %vm512_vm0, %v623_v36, %v627_v29  ;;  %v1092_v9 = vsel %vm1061_vm1, %v1089_v25, %v1091_v30  ;;  %13769 = vst [vmem:[#allocation20_spill] sm:$0xff] %v10693_v47 }
  0xfa   : > { %v1201_v51 = vpop.f32.mrf.mxu2  ;;  %v780_v24 = vpop.f32.mrf.mxu0 }
  0xfb   : > { %v1431_v53 = vpop.f32.mrf.mxu3  ;;  %v1293_v37 = vadd.f32 %v1201_v51, %v940_v52  ;;  %v941_v26 = vpop.f32.mrf.mxu1 }
  0xfc   : > { %v942_v10 = vadd.f32 %v941_v26, %v780_v24 }
  0xfd   : > { %v10680_v55 = vadd.f32 %v1431_v53, %v1293_v37 }
  0xff   : > { %13767 = vst [vmem:[#allocation18_spill] sm:$0xff] %v10680_v55 }
 0x102   : > { %v1203_v49 = vpop.f32.mrf.mxu2  ;;  %v783_v42 = vpop.f32.mrf.mxu0 }
 0x103   : > { %v1433_v52 = vpop.f32.mrf.mxu3  ;;  %v1294_v51 = vadd.f32 %v1203_v49, %v942_v10  ;;  %v944_v41 = vpop.f32.mrf.mxu1 }
 0x104   : > { %v945_v24 = vadd.f32 %v944_v41, %v783_v42  ;;  %v10696_v41 = vshll.u32 %v10678_v28, 16  ;;  %v10698_v42 = vpack.c.bf16 %v445_v50, %v444_v19  ;;  %v447_v50 = vld [vmem:[%s10383_s27 + $0x118] sm:$0xff] }
 0x105   : > { %v10687_v37 = vadd.f32 %v1433_v52, %v1294_v51  ;;  %822 = vmatmul.bf16.gmra.mxu0 %v628_v5 }
 0x106   : > { %983 = vmatmul.bf16.gmra.mxu1 %v10638_v4  ;;  %13770 = vst [vmem:[#allocation21_spill] sm:$0xff] %v10696_v41  ;;  %v635_v36 = vrot.slane %v10696_v41, 1  ;;  %v1093_v52 = vrot.slane %v10698_v42, 1  ;;  %v10713_v41 = vshrl.u32 %v10678_v28, 16 }
 0x107   : > { %13768 = vst [vmem:[#allocation19_spill] sm:$0xff] %v10687_v37  ;;  %1245 = vmatmul.bf16.gmra.mxu2 %v1090_v20  ;;  %v631_v20 = vor.u32 %v10693_v47, %v627_v29  ;;  %v446_v29 = vld [vmem:[%s10383_s27 + $0x110] sm:$0xff] }
 0x108   : > { %1475 = vmatmul.bf16.gmra.mxu3 %v1092_v9  ;;  %13771 = vst [vmem:[#allocation22_spill] sm:$0xff] %v10698_v42  ;;  %v1094_v19 = vsel %vm1061_vm1, %v1091_v30, %v1093_v52 }
 0x109   : > { %v636_v43 = vsel %vm512_vm0, %v631_v20, %v635_v36  ;;  %13774 = vst [vmem:[#allocation25_spill] sm:$0xff] %v10713_v41 }
 0x10a   : > { %v1206_v53 = vpop.f32.mrf.mxu2  ;;  %v785_v10 = vpop.f32.mrf.mxu0 }
 0x10b   : > { %v1436_v26 = vpop.f32.mrf.mxu3  ;;  %v1295_v55 = vadd.f32 %v1206_v53, %v945_v24  ;;  %v946_v49 = vpop.f32.mrf.mxu1 }
 0x10c   : > { %v947_v25 = vadd.f32 %v946_v49, %v785_v10 }
 0x10d   : > { %v10700_v5 = vadd.f32 %v1436_v26, %v1295_v55 }
 0x10f   : > { %13772 = vst [vmem:[#allocation23_spill] sm:$0xff] %v10700_v5 }
 0x112   : > { %v1208_v51 = vpop.f32.mrf.mxu2  ;;  %v788_v37 = vpop.f32.mrf.mxu0 }
 0x113   : > { %v1438_v24 = vpop.f32.mrf.mxu3  ;;  %v1296_v53 = vadd.f32 %v1208_v51, %v947_v25  ;;  %v949_v4 = vpop.f32.mrf.mxu1 }
 0x114   : > { %v950_v10 = vadd.f32 %v949_v4, %v788_v37  ;;  %v10716_v4 = vshll.u32 %v10698_v42, 16  ;;  %v10718_v37 = vpack.c.bf16 %v447_v50, %v446_v29  ;;  %v449_v50 = vld [vmem:[%s10383_s27 + $0x128] sm:$0xff] }
 0x115   : > { %v10707_v55 = vadd.f32 %v1438_v24, %v1296_v53  ;;  %827 = vmatmul.bf16.gmra.mxu0 %v636_v43 }
 0x116   : > { %988 = vmatmul.bf16.gmra.mxu1 %v10658_v60  ;;  %13775 = vst [vmem:[#allocation26_spill] sm:$0xff] %v10716_v4  ;;  %v643_v20 = vrot.slane %v10716_v4, 1  ;;  %v1095_v24 = vrot.slane %v10718_v37, 1  ;;  %v10733_v4 = vshrl.u32 %v10698_v42, 16 }
 0x117   : > { %13773 = vst [vmem:[#allocation24_spill] sm:$0xff] %v10707_v55  ;;  %1250 = vmatmul.bf16.gmra.mxu2 %v1092_v9  ;;  %v639_v9 = vor.u32 %v10713_v41, %v635_v36  ;;  %v448_v36 = vld [vmem:[%s10383_s27 + $0x120] sm:$0xff] }
 0x118   : > { %1480 = vmatmul.bf16.gmra.mxu3 %v1094_v19  ;;  %13776 = vst [vmem:[#allocation27_spill] sm:$0xff] %v10718_v37  ;;  %v1096_v29 = vsel %vm1061_vm1, %v1093_v52, %v1095_v24 }
 0x119   : > { %v644_v47 = vsel %vm512_vm0, %v639_v9, %v643_v20  ;;  %13779 = vst [vmem:[#allocation30_spill] sm:$0xff] %v10733_v4 }
 0x11a   : > { %v1211_v26 = vpop.f32.mrf.mxu2  ;;  %v790_v25 = vpop.f32.mrf.mxu0 }
 0x11b   : > { %v1441_v49 = vpop.f32.mrf.mxu3  ;;  %v1297_v5 = vadd.f32 %v1211_v26, %v950_v10  ;;  %v951_v51 = vpop.f32.mrf.mxu1 }
 0x11c   : > { %v952_v30 = vadd.f32 %v951_v51, %v790_v25 }
 0x11d   : > { %v10720_v43 = vadd.f32 %v1441_v49, %v1297_v5 }
 0x11f   : > { %13777 = vst [vmem:[#allocation28_spill] sm:$0xff] %v10720_v43 }
 0x122   : > { %v1213_v53 = vpop.f32.mrf.mxu2  ;;  %v793_v55 = vpop.f32.mrf.mxu0 }
 0x123   : > { %v1443_v10 = vpop.f32.mrf.mxu3  ;;  %v1298_v26 = vadd.f32 %v1213_v53, %v952_v30  ;;  %v954_v60 = vpop.f32.mrf.mxu1 }
 0x124   : > { %v955_v25 = vadd.f32 %v954_v60, %v793_v55  ;;  %v10736_v60 = vshll.u32 %v10718_v37, 16  ;;  %v10738_v55 = vpack.c.bf16 %v449_v50, %v448_v36  ;;  %v451_v50 = vld [vmem:[%s10383_s27 + $0x138] sm:$0xff] }
 0x125   : > { %v10727_v5 = vadd.f32 %v1443_v10, %v1298_v26  ;;  %832 = vmatmul.bf16.gmra.mxu0 %v644_v47 }
 0x126   : > { %993 = vmatmul.bf16.gmra.mxu1 %v10678_v28  ;;  %13780 = vst [vmem:[#allocation31_spill] sm:$0xff] %v10736_v60  ;;  %v651_v9 = vrot.slane %v10736_v60, 1  ;;  %v1097_v10 = vrot.slane %v10738_v55, 1  ;;  %v10753_v60 = vshrl.u32 %v10718_v37, 16 }
 0x127   : > { %13778 = vst [vmem:[#allocation29_spill] sm:$0xff] %v10727_v5  ;;  %1255 = vmatmul.bf16.gmra.mxu2 %v1094_v19  ;;  %v647_v19 = vor.u32 %v10733_v4, %v643_v20  ;;  %v450_v20 = vld [vmem:[%s10383_s27 + $0x130] sm:$0xff] }
 0x128   : > { %1485 = vmatmul.bf16.gmra.mxu3 %v1096_v29  ;;  %13781 = vst [vmem:[#allocation32_spill] sm:$0xff] %v10738_v55  ;;  %v1098_v36 = vsel %vm1061_vm1, %v1095_v24, %v1097_v10 }
 0x129   : > { %v652_v41 = vsel %vm512_vm0, %v647_v19, %v651_v9  ;;  %13784 = vst [vmem:[#allocation35_spill] sm:$0xff] %v10753_v60 }
 0x12a   : > { %v1216_v49 = vpop.f32.mrf.mxu2  ;;  %v795_v30 = vpop.f32.mrf.mxu0 }
 0x12b   : > { %v1446_v51 = vpop.f32.mrf.mxu3  ;;  %v1299_v43 = vadd.f32 %v1216_v49, %v955_v25  ;;  %v956_v53 = vpop.f32.mrf.mxu1 }
 0x12c   : > { %v957_v52 = vadd.f32 %v956_v53, %v795_v30 }
 0x12d   : > { %v10740_v47 = vadd.f32 %v1446_v51, %v1299_v43 }
 0x12f   : > { %13782 = vst [vmem:[#allocation33_spill] sm:$0xff] %v10740_v47 }
 0x132   : > { %v1218_v26 = vpop.f32.mrf.mxu2  ;;  %v798_v5 = vpop.f32.mrf.mxu0 }
 0x133   : > { %v1448_v25 = vpop.f32.mrf.mxu3  ;;  %v1300_v49 = vadd.f32 %v1218_v26, %v957_v52  ;;  %v959_v28 = vpop.f32.mrf.mxu1 }
 0x134   : > { %v960_v30 = vadd.f32 %v959_v28, %v798_v5  ;;  %v10756_v28 = vshll.u32 %v10738_v55, 16  ;;  %v10758_v5 = vpack.c.bf16 %v451_v50, %v450_v20  ;;  %v9816_v50 = vld [vmem:[%s13688_s1 + $0x138] sm:$0xff] }
 0x135   : > { %v10747_v43 = vadd.f32 %v1448_v25, %v1300_v49  ;;  %837 = vmatmul.bf16.gmra.mxu0 %v652_v41 }
 0x136   : > { %998 = vmatmul.bf16.gmra.mxu1 %v10698_v42  ;;  %13785 = vst [vmem:[#allocation36_spill] sm:$0xff] %v10756_v28  ;;  %v659_v19 = vrot.slane %v10756_v28, 1  ;;  %v10765_v25 = vrot.slane %v10758_v5, 1  ;;  %1736 = vmatpush.bf16.msrb.mxu0 %v9816_v50  ;;  %v10797_v50 = vshrl.u32 %v10738_v55, 16 }
 0x137   : > { %13783 = vst [vmem:[#allocation34_spill] sm:$0xff] %v10747_v43  ;;  %1260 = vmatmul.bf16.gmra.mxu2 %v1096_v29  ;;  %v655_v29 = vor.u32 %v10753_v60, %v651_v9 }
 0x138   : > { %1490 = vmatmul.bf16.gmra.mxu3 %v1098_v36  ;;  %13786 = vst [vmem:[#allocation37_spill] sm:$0xff] %v10758_v5 }
 0x139   : > { %13789 = vst [vmem:[#allocation40_spill] sm:$0xff] %v10797_v50 }
 0x13a   : > { %v1221_v51 = vpop.f32.mrf.mxu2  ;;  %v800_v52 = vpop.f32.mrf.mxu0 }
 0x13b   : > { %v1451_v53 = vpop.f32.mrf.mxu3  ;;  %v1301_v47 = vadd.f32 %v1221_v51, %v960_v30  ;;  %v961_v26 = vpop.f32.mrf.mxu1 }
 0x13c   : > { %v962_v24 = vadd.f32 %v961_v26, %v800_v52  ;;  %v660_v52 = vsel %vm512_vm0, %v655_v29, %v659_v19  ;;  %v453_v26 = vld [vmem:[%s10383_s27 + $0x148] sm:$0xff] }
 0x13d   : > { %v10760_v41 = vadd.f32 %v1451_v53, %v1301_v47  ;;  %v10770_v47 = vsel %vm1061_vm1, %v1097_v10, %v10765_v25  ;;  %v9832_v53 = vld [vmem:[%s13688_s1 + $0x1b8] sm:$0xff] }
 0x13e   : > { %2248 = vmatpush.bf16.msrb.mxu2 %v9832_v53  ;;  %v9840_v10 = vld [vmem:[%s13688_s1 + $0x1f8] sm:$0xff]  ;;  %v10800_v53 = vshll.u32 %v10758_v5, 16 }
 0x13f   : > { %13787 = vst [vmem:[#allocation38_spill] sm:$0xff] %v10760_v41  ;;  %2583 = vmatpush.bf16.msrb.mxu3 %v9840_v10  ;;  %v9823_v10 = vld [vmem:[%s13688_s1 + $0x170] sm:$0xff]  ;;  %v9814_v41 = vld [vmem:[%s13688_s1 + $0x128] sm:$0xff] }
 0x140   : > { %13790 = vst [vmem:[#allocation41_spill] sm:$0xff] %v10800_v53 }
 0x142   : > { %v1223_v49 = vpop.f32.mrf.mxu2  ;;  %v803_v43 = vpop.f32.mrf.mxu0 }
 0x143   : > { %v1453_v30 = vpop.f32.mrf.mxu3  ;;  %v1302_v51 = vadd.f32 %v1223_v49, %v962_v24  ;;  %v964_v42 = vpop.f32.mrf.mxu1  ;;  %v9831_v49 = vld [vmem:[%s13688_s1 + $0x1b0] sm:$0xff] }
 0x144   : > { %v965_v20 = vadd.f32 %v964_v42, %v803_v43  ;;  %v9824_v42 = vld [vmem:[%s13688_s1 + $0x178] sm:$0xff]  ;;  %v452_v43 = vld [vmem:[%s10383_s27 + $0x140] sm:$0xff]  ;;  %2249 = vmatpush.bf16.msrb.mxu2 %v9831_v49  ;;  %v667_v49 = vrot.slane %v10800_v53, 1 }
 0x145   : > { %v10772_v9 = vadd.f32 %v1453_v30, %v1302_v51  ;;  %842 = vmatmul.bf16.gmra.mxu0 %v660_v52  ;;  %2018 = vmatpush.bf16.msrb.mxu1 %v9824_v42  ;;  %v10802_v42 = vpack.c.bf16 %v453_v26, %v452_v43  ;;  %v9830_v26 = vld [vmem:[%s13688_s1 + $0x1a8] sm:$0xff] }
 0x146   : > { %1003 = vmatmul.bf16.gmra.mxu1 %v10718_v37 }
 0x147   : > { %13788 = vst [vmem:[#allocation39_spill] sm:$0xff] %v10772_v9  ;;  %1265 = vmatmul.bf16.gmra.mxu2 %v1098_v36  ;;  %v9815_v36 = vld [vmem:[%s13688_s1 + $0x130] sm:$0xff]  ;;  %v13793_v28 = vrot.slane %v10802_v42, 1 }
 0x148   : > { %1495 = vmatmul.bf16.gmra.mxu3 %v10770_v47  ;;  %13791 = vst [vmem:[#allocation42_spill] sm:$0xff] %v10802_v42  ;;  %1737 = vmatpush.bf16.msrb.mxu0 %v9815_v36  ;;  %v663_v36 = vor.u32 %v10797_v50, %v659_v19  ;;  %v9813_v19 = vld [vmem:[%s13688_s1 + $0x120] sm:$0xff]  ;;  %v13798_v50 = vshll.u32 %v10419_v27, 16 }
 0x149   : > { %2019 = vmatpush.bf16.msrb.mxu1 %v9823_v10  ;;  %2250 = vmatpush.bf16.msrb.mxu2 %v9830_v26 }
 0x14a   : > { %v1226_v24 = vpop.f32.mrf.mxu2  ;;  %v805_v51 = vpop.f32.mrf.mxu0  ;;  %v10893_v37 = vrot.slane %v13798_v50, 2 }
 0x14b   : > { %v1456_v29 = vpop.f32.mrf.mxu3  ;;  %v1303_v30 = vadd.f32 %v1226_v24, %v965_v20  ;;  %v966_v52 = vpop.f32.mrf.mxu1  ;;  %v9839_v20 = vld [vmem:[%s13688_s1 + $0x1f0] sm:$0xff] }
 0x14c   : > { %v967_v9 = vadd.f32 %v966_v52, %v805_v51  ;;  %2584 = vmatpush.bf16.msrb.mxu3 %v9839_v20  ;;  %1738 = vmatpush.bf16.msrb.mxu0 %v9814_v41  ;;  %v9829_v41 = vld [vmem:[%s13688_s1 + $0x1a0] sm:$0xff]  ;;  %v668_v51 = vsel %vm512_vm0, %v663_v36, %v667_v49  ;;  %v9828_v36 = vld [vmem:[%s13688_s1 + $0x198] sm:$0xff] }
 0x14d   : > { %v10810_v24 = vadd.f32 %v1456_v29, %v1303_v30  ;;  %v9822_v29 = vld [vmem:[%s13688_s1 + $0x168] sm:$0xff]  ;;  %2251 = vmatpush.bf16.msrb.mxu2 %v9829_v41  ;;  %v454_v41 = vld [vmem:[%s10383_s27 + $0x150] sm:$0xff] }
 0x14e   : > { %v9838_v30 = vld [vmem:[%s13688_s1 + $0x1e8] sm:$0xff]  ;;  %2020 = vmatpush.bf16.msrb.mxu1 %v9822_v29  ;;  %v1348_v29 = vsel %vm1061_vm1, %v10765_v25, %v13793_v28  ;;  %v9812_v28 = vld [vmem:[%s13688_s1 + $0x118] sm:$0xff] }
 0x14f   : > { %13792 = vst [vmem:[#allocation43_spill] sm:$0xff] %v10810_v24 }
 0x150   : > { %2585 = vmatpush.bf16.msrb.mxu3 %v9838_v30  ;;  %1739 = vmatpush.bf16.msrb.mxu0 %v9813_v19  ;;  %v9821_v30 = vld [vmem:[%s13688_s1 + $0x160] sm:$0xff]  ;;  %v10854_v19 = vpack.c.bf16 %v452_v43, %v452_v43  ;;  %v9827_v43 = vld [vmem:[%s13688_s1 + $0x190] sm:$0xff] }
 0x151   : > { %2252 = vmatpush.bf16.msrb.mxu2 %v9828_v36  ;;  %v10873_v36 = vpack.c.bf16 %v454_v41, %v454_v41 }
 0x152   : > { %v1228_v52 = vpop.f32.mrf.mxu2  ;;  %v808_v20 = vpop.f32.mrf.mxu0  ;;  %2021 = vmatpush.bf16.msrb.mxu1 %v9821_v30 }
 0x153   : > { %v1458_v24 = vpop.f32.mrf.mxu3  ;;  %v1304_v10 = vadd.f32 %v1228_v52, %v967_v9  ;;  %v969_v26 = vpop.f32.mrf.mxu1  ;;  %v9837_v9 = vld [vmem:[%s13688_s1 + $0x1e0] sm:$0xff]  ;;  %13796 = vst [vmem:[#allocation46_spill] sm:$0xff] %v10873_v36 }
 0x154   : > { %v970_v53 = vadd.f32 %v969_v26, %v808_v20  ;;  %2586 = vmatpush.bf16.msrb.mxu3 %v9837_v9  ;;  %1740 = vmatpush.bf16.msrb.mxu0 %v9812_v28  ;;  %v10870_v9 = vshrl.u32 %v10758_v5, 16 }
 0x155   : > { %v10844_v52 = vadd.f32 %v1458_v24, %v1304_v10  ;;  %847 = vmatmul.bf16.gmra.mxu0 %v668_v51  ;;  %v9820_v24 = vld [vmem:[%s13688_s1 + $0x158] sm:$0xff]  ;;  %2253 = vmatpush.bf16.msrb.mxu2 %v9827_v43  ;;  %v1349_v43 = vrot.slane %v10873_v36, 1 }
 0x156   : > { %1008 = vmatmul.bf16.gmra.mxu1 %v10738_v55  ;;  %v9836_v51 = vld [vmem:[%s13688_s1 + $0x1d8] sm:$0xff]  ;;  %13795 = vst [vmem:[#allocation45_spill] sm:$0xff] %v10870_v9  ;;  %v9819_v55 = vld [vmem:[%s13688_s1 + $0x150] sm:$0xff] }
 0x157   : > { %13794 = vst [vmem:[#allocation44_spill] sm:$0xff] %v10844_v52  ;;  %1270 = vmatmul.bf16.gmra.mxu2 %v10770_v47  ;;  %v9811_v47 = vld [vmem:[%s13688_s1 + $0x110] sm:$0xff]  ;;  %v673_v52 = vshll.u32 %v10854_v19, 16  ;;  %2022 = vmatpush.bf16.msrb.mxu1 %v9820_v24  ;;  %v9826_v24 = vld [vmem:[%s13688_s1 + $0x188] sm:$0xff] }
 0x158   : > { %1500 = vmatmul.bf16.gmra.mxu3 %v1348_v29  ;;  %1741 = vmatpush.bf16.msrb.mxu0 %v9811_v47 }
 0x159   : > { %2587 = vmatpush.bf16.msrb.mxu3 %v9836_v51  ;;  %v671_v51 = vor.u32 %v10870_v9, %v667_v49  ;;  %v675_v41 = vrot.slane %v673_v52, 1  ;;  %v9834_v49 = vld [vmem:[%s13688_s1 + $0x1c8] sm:$0xff]  ;;  %2254 = vmatpush.bf16.msrb.mxu2 %v9826_v24  ;;  %v13800_v24 = vrot.slane %v10802_v42, 1 }
 0x15a   : > { %v1231_v10 = vpop.f32.mrf.mxu2  ;;  %v810_v29 = vpop.f32.mrf.mxu0 }
 0x15b   : > { %v1461_v20 = vpop.f32.mrf.mxu3  ;;  %v1305_v26 = vadd.f32 %v1231_v10, %v970_v53  ;;  %v971_v30 = vpop.f32.mrf.mxu1  ;;  %v9835_v53 = vld [vmem:[%s13688_s1 + $0x1d0] sm:$0xff]  ;;  %2023 = vmatpush.bf16.msrb.mxu1 %v9819_v55  ;;  %v9825_v55 = vld [vmem:[%s13688_s1 + $0x180] sm:$0xff]  ;;  %v676_v9 = vsel %vm512_vm0, %v671_v51, %v675_v41  ;;  %v1350_v4 = vsel %vm1061_vm1, %v13800_v24, %v1349_v43 }
 0x15c   : > { %v972_v28 = vadd.f32 %v971_v30, %v810_v29  ;;  %v9810_v29 = vld [vmem:[%s13688_s1 + $0x108] sm:$0xff]  ;;  %v1101_v30 = vrot.slane %v10854_v19, 1 }
 0x15d   : > { %v10881_v10 = vadd.f32 %v1461_v20, %v1305_v26  ;;  %v13799_v20 = vshrl.u32 %v10419_v27, 16  ;;  %2588 = vmatpush.bf16.msrb.mxu3 %v9835_v53  ;;  %v9818_v26 = vld [vmem:[%s13688_s1 + $0x148] sm:$0xff]  ;;  %1742 = vmatpush.bf16.msrb.mxu0 %v9810_v29 }
 0x15e   : > { %v1102_v60 = vsel %vm1061_vm1, %v10765_v25, %v1101_v30  ;;  %2255 = vmatpush.bf16.msrb.mxu2 %v9825_v55 }
 0x15f   : > { %13797 = vst [vmem:[#allocation47_spill] sm:$0xff] %v10881_v10  ;;  %v10897_v47 = vrot.slane %v13799_v20, 1  ;;  %v9809_v20 = vld [vmem:[%s13688_s1 + $0x100] sm:$0xff]  ;;  %2024 = vmatpush.bf16.msrb.mxu1 %v9818_v26 }
 0x161   : > { %2589 = vmatpush.bf16.msrb.mxu3 %v9834_v49  ;;  %v1576_v51 = vor.u32 %v10893_v37, %v10897_v47  ;;  %1743 = vmatpush.bf16.msrb.mxu0 %v9809_v20  ;;  %v677_v37 = vshrl.u32 %v10854_v19, 16 }
 0x162   : > { %v1233_v50 = vpop.f32.mrf.mxu2  ;;  %v813_v36 = vpop.f32.mrf.mxu0 }
 0x163   : > { %v1463_v52 = vpop.f32.mrf.mxu3  ;;  %v1306_v53 = vadd.f32 %v1233_v50, %v972_v28  ;;  %v974_v10 = vpop.f32.mrf.mxu1  ;;  %v9833_v28 = vld [vmem:[%s13688_s1 + $0x1c0] sm:$0xff]  ;;  %2025 = vmatpush.bf16.msrb.mxu1 %v9817_v14  ;;  %v679_v20 = vor.u32 %v677_v37, %v675_v41  ;;  %v1578_v41 = vrot.slane %v10467_v56, 2  ;;  %v2424_v37 = vrot.slane %v10497_v11, 2 }
 0x164   : > { %v975_v29 = vadd.f32 %v974_v10, %v813_v36 }
 0x165   : > { %v10926_v50 = vadd.f32 %v1463_v52, %v1306_v53  ;;  %852 = vmatmul.bf16.gmra.mxu0 %v676_v9  ;;  %2590 = vmatpush.bf16.msrb.mxu3 %v9833_v28 }
 0x166   : > { %1013 = vmatmul.bf16.gmra.mxu1 %v10758_v5 }
 0x167   : > { %1275 = vmatmul.bf16.gmra.mxu2 %v1102_v60 }
 0x168   : > { %1505 = vmatmul.bf16.gmra.mxu3 %v1350_v4 }
 0x16a   : > { %v1236_v25 = vpop.f32.mrf.mxu2  ;;  %v815_v26 = vpop.f32.mrf.mxu0 }
 0x16b   : > { %v1466_v36 = vpop.f32.mrf.mxu3  ;;  %v1307_v10 = vadd.f32 %v1236_v25, %v975_v29  ;;  %v976_v49 = vpop.f32.mrf.mxu1 }
 0x16c   : > { %v977_v24 = vadd.f32 %v976_v49, %v815_v26  ;;  %v2421_v26 = vrot.slane %v10481_v1, 2 }
 0x16d   : > { %v10929_v42 = vadd.f32 %v1466_v36, %v1307_v10  ;;  %v1577_v10 = vrot.slane %v10481_v1, 1 }
 0x172   : > { %v1238_v47 = vpop.f32.mrf.mxu2  ;;  %v818_v55 = vpop.f32.mrf.mxu0 }
 0x173   : > { %v1468_v52 = vpop.f32.mrf.mxu3  ;;  %v1308_v9 = vadd.f32 %v1238_v47, %v977_v24  ;;  %v979_v53 = vpop.f32.mrf.mxu1  ;;  %v2422_v24 = vrot.slane %v10467_v56, 3  ;;  %v1909_v47 = vrot.slane %v10442_v40, 2 }
 0x174   : > { %v980_v60 = vadd.f32 %v979_v53, %v818_v55 }
 0x175   : > { %v10932_v4 = vadd.f32 %v1468_v52, %v1308_v9  ;;  %857 = vmatmul.bf16.gmra.mxu0 %v679_v20  ;;  %v1908_v52 = vrot.slane %v10419_v27, 2  ;;  %v1911_v20 = vrot.slane %v10469_v57, 2  ;;  %v2423_v9 = vor.u32 %v2422_v24, %v2421_v26 }
 0x176   : > { %1018 = vmatmul.bf16.gmra.mxu1 %v10854_v19  ;;  %v2425_v19 = vrot.slane %v10484_v2, 3 }
 0x177   : > { %1280 = vmatmul.bf16.gmra.mxu2 %v1101_v30 }
 0x178   : > { %1510 = vmatmul.bf16.gmra.mxu3 %v1349_v43  ;;  %v1579_v43 = vor.u32 %v1578_v41, %v1577_v10  ;;  %v2426_v55 = vor.u32 %v2425_v19, %v2424_v37  ;;  %v1582_v19 = vrot.slane %v10484_v2, 2 }
 0x17a   : > { %v1241_v14 = vpop.f32.mrf.mxu2  ;;  %v820_v25 = vpop.f32.mrf.mxu0  ;;  %v2427_v27 = vsel %vm2420_vm4, %v2423_v9, %v2426_v55  ;;  %v2429_v9 = vrot.slane %v10500_v12, 3 }
 0x17b   : > { %v1471_v29 = vpop.f32.mrf.mxu3  ;;  %v1309_v28 = vadd.f32 %v1241_v14, %v980_v60  ;;  %v981_v36 = vpop.f32.mrf.mxu1 }
 0x17c   : > { %v982_v49 = vadd.f32 %v981_v36, %v820_v25  ;;  %v1912_v36 = vsel %vm1907_vm3, %v1909_v47, %v1911_v20 }
 0x17d   : > { %v10941_v30 = vadd.f32 %v1471_v29, %v1309_v28  ;;  %v1580_v29 = vsel %vm1573_vm2, %v1576_v51, %v1579_v43  ;;  %v1910_v28 = vsel %vm1907_vm3, %v1908_v52, %v1909_v47  ;;  %v1581_v51 = vrot.slane %v10497_v11, 1 }
 0x17e   : > { %v2428_v47 = vrot.slane %v10513_v21, 2 }
 0x182   : > { %v1243_v1 = vpop.f32.mrf.mxu2  ;;  %v823_v60 = vpop.f32.mrf.mxu0 }
 0x183   : > { %v1473_v56 = vpop.f32.mrf.mxu3  ;;  %v1310_v53 = vadd.f32 %v1243_v1, %v982_v49  ;;  %v984_v14 = vpop.f32.mrf.mxu1 }
 0x184   : > { %v985_v25 = vadd.f32 %v984_v14, %v823_v60  ;;  %v2430_v60 = vor.u32 %v2429_v9, %v2428_v47  ;;  %v1585_v47 = vrot.slane %v10513_v21, 1 }
 0x185   : > { %v10950_v10 = vadd.f32 %v1473_v56, %v1310_v53  ;;  %1744 = vmatmul.bf16.vlgmr.msrb.gmra.mxu0 %v1580_v29  ;;  %v1583_v56 = vor.u32 %v1582_v19, %v1581_v51  ;;  %v1913_v53 = vrot.slane %v10486_v3, 2 }
 0x186   : > { %2026 = vmatmul.bf16.vlgmr.msrb.gmra.mxu1 %v1910_v28 }
 0x187   : > { %2256 = vmatmul.bf16.vlgmr.msrb.gmra.mxu2 %v1912_v36  ;;  %v1584_v11 = vsel %vm1573_vm2, %v1579_v43, %v1583_v56  ;;  %v1914_v2 = vsel %vm1907_vm3, %v1911_v20, %v1913_v53  ;;  %v1586_v43 = vrot.slane %v10500_v12, 2  ;;  %v2432_v20 = vrot.slane %v10529_v32, 2 }
 0x188   : > { %2591 = vmatmul.bf16.vlgmr.msrb.gmra.mxu3 %v2427_v27 }
 0x18a   : > { %v1246_v41 = vpop.f32.mrf.mxu2  ;;  %v825_v24 = vpop.f32.mrf.mxu0 }
 0x18b   : > { %v1476_v26 = vpop.f32.mrf.mxu3  ;;  %v1311_v49 = vadd.f32 %v1246_v41, %v985_v25  ;;  %v986_v37 = vpop.f32.mrf.mxu1 }
 0x18c   : > { %v987_v52 = vadd.f32 %v986_v37, %v825_v24  ;;  %v2431_v24 = vsel %vm2420_vm4, %v2426_v55, %v2430_v60  ;;  %v2433_v55 = vrot.slane %v10516_v22, 3 }
 0x18d   : > { %v10956_v1 = vadd.f32 %v1476_v26, %v1311_v49 }
 0x192   : > { %v1248_v14 = vpop.f32.mrf.mxu2  ;;  %v828_v25 = vpop.f32.mrf.mxu0 }
 0x193   : > { %v1478_v29 = vpop.f32.mrf.mxu3  ;;  %v1312_v28 = vadd.f32 %v1248_v14, %v987_v52  ;;  %v989_v27 = vpop.f32.mrf.mxu1 }
 0x194   : > { %v990_v41 = vadd.f32 %v989_v27, %v828_v25 }
 0x195   : > { %v10962_v37 = vadd.f32 %v1478_v29, %v1312_v28  ;;  %1749 = vmatmul.bf16.gmra.mxu0 %v1584_v11  ;;  %v1587_v29 = vor.u32 %v1586_v43, %v1585_v47  ;;  %v2434_v28 = vor.u32 %v2433_v55, %v2432_v20  ;;  %v1589_v20 = vrot.slane %v10529_v32, 1 }
 0x196   : > { %2031 = vmatmul.bf16.gmra.mxu1 %v1912_v36  ;;  %v1915_v36 = vrot.slane %v10502_v13, 2 }
 0x197   : > { %2261 = vmatmul.bf16.gmra.mxu2 %v1914_v2  ;;  %v1588_v21 = vsel %vm1573_vm2, %v1583_v56, %v1587_v29  ;;  %v1590_v56 = vrot.slane %v10516_v22, 2 }
 0x198   : > { %2596 = vmatmul.bf16.gmra.mxu3 %v2431_v24  ;;  %v1916_v12 = vsel %vm1907_vm3, %v1913_v53, %v1915_v36  ;;  %v2436_v53 = vrot.slane %v10545_v44, 2 }
 0x19a   : > { %v1251_v26 = vpop.f32.mrf.mxu2  ;;  %v830_v19 = vpop.f32.mrf.mxu0 }
 0x19b   : > { %v1481_v49 = vpop.f32.mrf.mxu3  ;;  %v1313_v51 = vadd.f32 %v1251_v26, %v990_v41  ;;  %v991_v52 = vpop.f32.mrf.mxu1 }
 0x19c   : > { %v992_v9 = vadd.f32 %v991_v52, %v830_v19  ;;  %v2435_v19 = vsel %vm2420_vm4, %v2430_v60, %v2434_v28  ;;  %v2437_v60 = vrot.slane %v10532_v33, 3 }
 0x19d   : > { %v10968_v14 = vadd.f32 %v1481_v49, %v1313_v51 }
 0x1a2   : > { %v1253_v25 = vpop.f32.mrf.mxu2  ;;  %v833_v41 = vpop.f32.mrf.mxu0 }
 0x1a3   : > { %v1483_v27 = vpop.f32.mrf.mxu3  ;;  %v1314_v11 = vadd.f32 %v1253_v25, %v992_v9  ;;  %v994_v24 = vpop.f32.mrf.mxu1 }
 0x1a4   : > { %v995_v26 = vadd.f32 %v994_v24, %v833_v41 }
 0x1a5   : > { %v10974_v52 = vadd.f32 %v1483_v27, %v1314_v11  ;;  %1754 = vmatmul.bf16.gmra.mxu0 %v1588_v21  ;;  %v1591_v27 = vor.u32 %v1590_v56, %v1589_v20  ;;  %v2438_v11 = vor.u32 %v2437_v60, %v2436_v53  ;;  %v1593_v53 = vrot.slane %v10545_v44, 1 }
 0x1a6   : > { %2036 = vmatmul.bf16.gmra.mxu1 %v1914_v2  ;;  %v1917_v2 = vrot.slane %v10518_v23, 2 }
 0x1a7   : > { %2266 = vmatmul.bf16.gmra.mxu2 %v1916_v12  ;;  %v1592_v32 = vsel %vm1573_vm2, %v1587_v29, %v1591_v27  ;;  %v1594_v29 = vrot.slane %v10532_v33, 2 }
 0x1a8   : > { %2601 = vmatmul.bf16.gmra.mxu3 %v2435_v19  ;;  %v1918_v22 = vsel %vm1907_vm3, %v1915_v36, %v1917_v2  ;;  %v2440_v36 = vrot.slane %v10561_v54, 2 }
 0x1aa   : > { %v1256_v49 = vpop.f32.mrf.mxu2  ;;  %v835_v43 = vpop.f32.mrf.mxu0 }
 0x1ab   : > { %v1486_v51 = vpop.f32.mrf.mxu3  ;;  %v1315_v47 = vadd.f32 %v1256_v49, %v995_v26  ;;  %v996_v9 = vpop.f32.mrf.mxu1 }
 0x1ac   : > { %v997_v55 = vadd.f32 %v996_v9, %v835_v43  ;;  %v2439_v43 = vsel %vm2420_vm4, %v2434_v28, %v2438_v11  ;;  %v2441_v28 = vrot.slane %v10548_v45, 3 }
 0x1ad   : > { %v10980_v25 = vadd.f32 %v1486_v51, %v1315_v47 }
 0x1b2   : > { %v1258_v41 = vpop.f32.mrf.mxu2  ;;  %v838_v26 = vpop.f32.mrf.mxu0 }
 0x1b3   : > { %v1488_v24 = vpop.f32.mrf.mxu3  ;;  %v1316_v21 = vadd.f32 %v1258_v41, %v997_v55  ;;  %v999_v19 = vpop.f32.mrf.mxu1 }
 0x1b4   : > { %v1000_v49 = vadd.f32 %v999_v19, %v838_v26 }
 0x1b5   : > { %v10986_v9 = vadd.f32 %v1488_v24, %v1316_v21  ;;  %1759 = vmatmul.bf16.gmra.mxu0 %v1592_v32  ;;  %v1595_v24 = vor.u32 %v1594_v29, %v1593_v53  ;;  %v2442_v21 = vor.u32 %v2441_v28, %v2440_v36  ;;  %v1597_v36 = vrot.slane %v10561_v54, 1 }
 0x1b6   : > { %2041 = vmatmul.bf16.gmra.mxu1 %v1916_v12  ;;  %v1919_v12 = vrot.slane %v10534_v34, 2 }
 0x1b7   : > { %2271 = vmatmul.bf16.gmra.mxu2 %v1918_v22  ;;  %v1596_v44 = vsel %vm1573_vm2, %v1591_v27, %v1595_v24  ;;  %v1598_v27 = vrot.slane %v10548_v45, 2 }
 0x1b8   : > { %2606 = vmatmul.bf16.gmra.mxu3 %v2439_v43  ;;  %v1920_v33 = vsel %vm1907_vm3, %v1917_v2, %v1919_v12  ;;  %v2444_v2 = vrot.slane %v10577_v6, 2 }
 0x1ba   : > { %v1261_v51 = vpop.f32.mrf.mxu2  ;;  %v840_v56 = vpop.f32.mrf.mxu0 }
 0x1bb   : > { %v1491_v47 = vpop.f32.mrf.mxu3  ;;  %v1317_v20 = vadd.f32 %v1261_v51, %v1000_v49  ;;  %v1001_v55 = vpop.f32.mrf.mxu1 }
 0x1bc   : > { %v1002_v60 = vadd.f32 %v1001_v55, %v840_v56  ;;  %v2443_v56 = vsel %vm2420_vm4, %v2438_v11, %v2442_v21  ;;  %v2445_v11 = vrot.slane %v10564_v58, 3 }
 0x1bd   : > { %v10992_v41 = vadd.f32 %v1491_v47, %v1317_v20 }
 0x1c2   : > { %v1263_v26 = vpop.f32.mrf.mxu2  ;;  %v843_v49 = vpop.f32.mrf.mxu0 }
 0x1c3   : > { %v1493_v19 = vpop.f32.mrf.mxu3  ;;  %v1318_v32 = vadd.f32 %v1263_v26, %v1002_v60  ;;  %v1004_v43 = vpop.f32.mrf.mxu1 }
 0x1c4   : > { %v1005_v51 = vadd.f32 %v1004_v43, %v843_v49 }
 0x1c5   : > { %v10998_v55 = vadd.f32 %v1493_v19, %v1318_v32  ;;  %1764 = vmatmul.bf16.gmra.mxu0 %v1596_v44  ;;  %v1599_v19 = vor.u32 %v1598_v27, %v1597_v36  ;;  %v2446_v32 = vor.u32 %v2445_v11, %v2444_v2  ;;  %v1601_v2 = vrot.slane %v10577_v6, 1 }
 0x1c6   : > { %2046 = vmatmul.bf16.gmra.mxu1 %v1918_v22  ;;  %v1921_v22 = vrot.slane %v10550_v46, 2 }
 0x1c7   : > { %2276 = vmatmul.bf16.gmra.mxu2 %v1920_v33  ;;  %v1600_v54 = vsel %vm1573_vm2, %v1595_v24, %v1599_v19  ;;  %v1602_v24 = vrot.slane %v10564_v58, 2 }
 0x1c8   : > { %2611 = vmatmul.bf16.gmra.mxu3 %v2443_v56  ;;  %v1922_v45 = vsel %vm1907_vm3, %v1919_v12, %v1921_v22  ;;  %v2448_v12 = vrot.slane %v10593_v31, 2 }
 0x1ca   : > { %v1266_v47 = vpop.f32.mrf.mxu2  ;;  %v845_v29 = vpop.f32.mrf.mxu0 }
 0x1cb   : > { %v1496_v20 = vpop.f32.mrf.mxu3  ;;  %v1319_v53 = vadd.f32 %v1266_v47, %v1005_v51  ;;  %v1006_v60 = vpop.f32.mrf.mxu1 }
 0x1cc   : > { %v1007_v28 = vadd.f32 %v1006_v60, %v845_v29  ;;  %v2447_v29 = vsel %vm2420_vm4, %v2442_v21, %v2446_v32  ;;  %v2449_v21 = vrot.slane %v10580_v7, 3 }
 0x1cd   : > { %v11004_v26 = vadd.f32 %v1496_v20, %v1319_v53 }
 0x1d2   : > { %v1268_v49 = vpop.f32.mrf.mxu2  ;;  %v848_v51 = vpop.f32.mrf.mxu0 }
 0x1d3   : > { %v1498_v43 = vpop.f32.mrf.mxu3  ;;  %v1320_v44 = vadd.f32 %v1268_v49, %v1007_v28  ;;  %v1009_v56 = vpop.f32.mrf.mxu1 }
 0x1d4   : > { %v1010_v47 = vadd.f32 %v1009_v56, %v848_v51 }
 0x1d5   : > { %v11010_v60 = vadd.f32 %v1498_v43, %v1320_v44  ;;  %1769 = vmatmul.bf16.gmra.mxu0 %v1600_v54  ;;  %v1603_v43 = vor.u32 %v1602_v24, %v1601_v2  ;;  %v2450_v44 = vor.u32 %v2449_v21, %v2448_v12  ;;  %v1605_v12 = vrot.slane %v10593_v31, 1 }
 0x1d6   : > { %2051 = vmatmul.bf16.gmra.mxu1 %v1920_v33  ;;  %v1923_v33 = vrot.slane %v10566_v59, 2 }
 0x1d7   : > { %2281 = vmatmul.bf16.gmra.mxu2 %v1922_v45  ;;  %v1604_v6 = vsel %vm1573_vm2, %v1599_v19, %v1603_v43  ;;  %v1606_v19 = vrot.slane %v10580_v7, 2 }
 0x1d8   : > { %2616 = vmatmul.bf16.gmra.mxu3 %v2447_v29  ;;  %v1924_v58 = vsel %vm1907_vm3, %v1921_v22, %v1923_v33  ;;  %v2452_v22 = vrot.slane %v10613_v15, 2 }
 0x1da   : > { %v1271_v20 = vpop.f32.mrf.mxu2  ;;  %v850_v27 = vpop.f32.mrf.mxu0 }
 0x1db   : > { %v1501_v53 = vpop.f32.mrf.mxu3  ;;  %v1321_v36 = vadd.f32 %v1271_v20, %v1010_v47  ;;  %v1011_v28 = vpop.f32.mrf.mxu1 }
 0x1dc   : > { %v1012_v11 = vadd.f32 %v1011_v28, %v850_v27  ;;  %v2451_v27 = vsel %vm2420_vm4, %v2446_v32, %v2450_v44  ;;  %v2453_v32 = vrot.slane %v10596_v35, 3 }
 0x1dd   : > { %v11016_v49 = vadd.f32 %v1501_v53, %v1321_v36 }
 0x1e2   : > { %v1273_v51 = vpop.f32.mrf.mxu2  ;;  %v853_v47 = vpop.f32.mrf.mxu0 }
 0x1e3   : > { %v1503_v56 = vpop.f32.mrf.mxu3  ;;  %v1322_v54 = vadd.f32 %v1273_v51, %v1012_v11  ;;  %v1014_v29 = vpop.f32.mrf.mxu1 }
 0x1e4   : > { %v1015_v20 = vadd.f32 %v1014_v29, %v853_v47 }
 0x1e5   : > { %v11022_v28 = vadd.f32 %v1503_v56, %v1322_v54  ;;  %1774 = vmatmul.bf16.gmra.mxu0 %v1604_v6  ;;  %v1607_v56 = vor.u32 %v1606_v19, %v1605_v12  ;;  %v2454_v54 = vor.u32 %v2453_v32, %v2452_v22  ;;  %v1609_v22 = vrot.slane %v10613_v15, 1 }
 0x1e6   : > { %2056 = vmatmul.bf16.gmra.mxu1 %v1922_v45  ;;  %v1925_v45 = vrot.slane %v10582_v8, 2  ;;  %v2456_v32 = vrot.slane %v10633_v63, 2 }
 0x1e7   : > { %2286 = vmatmul.bf16.gmra.mxu2 %v1924_v58  ;;  %v1608_v31 = vsel %vm1573_vm2, %v1603_v43, %v1607_v56  ;;  %v1610_v43 = vrot.slane %v10596_v35, 2 }
 0x1e8   : > { %2621 = vmatmul.bf16.gmra.mxu3 %v2451_v27  ;;  %v1926_v7 = vsel %vm1907_vm3, %v1923_v33, %v1925_v45  ;;  %v2457_v33 = vrot.slane %v10616_v16, 3 }
 0x1ea   : > { %v1276_v53 = vpop.f32.mrf.mxu2  ;;  %v855_v24 = vpop.f32.mrf.mxu0 }
 0x1eb   : > { %v1506_v36 = vpop.f32.mrf.mxu3  ;;  %v1323_v2 = vadd.f32 %v1276_v53, %v1015_v20  ;;  %v1016_v11 = vpop.f32.mrf.mxu1 }
 0x1ec   : > { %v1017_v21 = vadd.f32 %v1016_v11, %v855_v24  ;;  %v2455_v24 = vsel %vm2420_vm4, %v2450_v44, %v2454_v54 }
 0x1ed   : > { %v11028_v51 = vadd.f32 %v1506_v36, %v1323_v2 }
 0x1f2   : > { %v1278_v47 = vpop.f32.mrf.mxu2  ;;  %v858_v20 = vpop.f32.mrf.mxu0 }
 0x1f3   : > { %v1508_v29 = vpop.f32.mrf.mxu3  ;;  %v1324_v6 = vadd.f32 %v1278_v47, %v1017_v21  ;;  %v1019_v27 = vpop.f32.mrf.mxu1  ;;  %v1611_v47 = vor.u32 %v1610_v43, %v1609_v22  ;;  %v1613_v43 = vrot.slane %v10633_v63, 1 }
 0x1f4   : > { %v1020_v53 = vadd.f32 %v1019_v27, %v858_v20 }
 0x1f5   : > { %v11034_v11 = vadd.f32 %v1508_v29, %v1324_v6  ;;  %1779 = vmatmul.bf16.gmra.mxu0 %v1608_v31  ;;  %v2458_v29 = vor.u32 %v2457_v33, %v2456_v32 }
 0x1f6   : > { %2061 = vmatmul.bf16.gmra.mxu1 %v1924_v58  ;;  %v1927_v58 = vrot.slane %v10598_v38, 2 }
 0x1f7   : > { %2291 = vmatmul.bf16.gmra.mxu2 %v1926_v7 }
 0x1f8   : > { %2626 = vmatmul.bf16.gmra.mxu3 %v2455_v24  ;;  %v1928_v35 = vsel %vm1907_vm3, %v1925_v45, %v1927_v58  ;;  %v2459_v24 = vsel %vm2420_vm4, %v2454_v54, %v2458_v29  ;;  %v2460_v45 = vrot.slane %v10653_v62, 2  ;;  %v2461_v54 = vrot.slane %v10636_v0, 3 }
 0x1fa   : > { %v1281_v36 = vpop.f32.mrf.mxu2  ;;  %v860_v19 = vpop.f32.mrf.mxu0 }
 0x1fb   : > { %v1511_v2 = vpop.f32.mrf.mxu3  ;;  %v1325_v12 = vadd.f32 %v1281_v36, %v1020_v53  ;;  %v1021_v21 = vpop.f32.mrf.mxu1  ;;  %v1612_v53 = vsel %vm1573_vm2, %v1607_v56, %v1611_v47  ;;  %v1614_v56 = vrot.slane %v10616_v16, 2 }
 0x1fd   : > { %v11040_v44 = vadd.f32 %v1511_v2, %v1325_v12  ;;  %v1615_v33 = vor.u32 %v1614_v56, %v1613_v43 }
 0x1ff   : > { %v1616_v16 = vsel %vm1573_vm2, %v1611_v47, %v1615_v33  ;;  %v1617_v47 = vrot.slane %v10653_v62, 1 }
 0x202   : > { %v1283_v6 = vpop.f32.mrf.mxu2  ;;  %v1745_v27 = vpop.f32.mrf.mxu0 }
 0x203   : > { %v1513_v20 = vpop.f32.mrf.mxu3  ;;  %v2027_v31 = vpop.f32.mrf.mxu1  ;;  %v1849_v15 = vadd.f32 %v1745_v27, %v10600_v39  ;;  %v1929_v6 = vrot.slane %v10618_v17, 2 }
 0x204   : > { %v2462_v20 = vor.u32 %v2461_v54, %v2460_v45  ;;  %v13802_v45 = vld [vmem:[#allocation11_spill] sm:$0xff] }
 0x205   : > { %v2131_v36 = vadd.f32 %v2027_v31, %v1849_v15  ;;  %1784 = vmatmul.bf16.gmra.mxu0 %v1612_v53  ;;  %v2465_v54 = vrot.slane %v13802_v45, 3 }
 0x206   : > { %2066 = vmatmul.bf16.gmra.mxu1 %v1926_v7 }
 0x207   : > { %2296 = vmatmul.bf16.gmra.mxu2 %v1928_v35 }
 0x208   : > { %2631 = vmatmul.bf16.gmra.mxu3 %v2459_v24  ;;  %v1930_v24 = vsel %vm1907_vm3, %v1927_v58, %v1929_v6 }
 0x20a   : > { %v2257_v2 = vpop.f32.mrf.mxu2  ;;  %v1747_v21 = vpop.f32.mrf.mxu0 }
 0x20b   : > { %v2592_v12 = vpop.f32.mrf.mxu3  ;;  %v2361_v19 = vadd.f32 %v2257_v2, %v2131_v36  ;;  %v2029_v22 = vpop.f32.mrf.mxu1  ;;  %v1850_v39 = vadd.f32 %v1747_v21, %v10607_v61  ;;  %v2463_v36 = vsel %vm2420_vm4, %v2458_v29, %v2462_v20 }
 0x20d   : > { %v11052_v32 = vadd.f32 %v2592_v12, %v2361_v19  ;;  %v2132_v7 = vadd.f32 %v2029_v22, %v1850_v39  ;;  %v13801_v39 = vld [vmem:[#allocation15_spill] sm:$0xff] }
 0x20e   : > { %v2464_v29 = vrot.slane %v13801_v39, 2 }
 0x212   : > { %v2259_v27 = vpop.f32.mrf.mxu2  ;;  %v1750_v15 = vpop.f32.mrf.mxu0 }
 0x213   : > { %v2594_v31 = vpop.f32.mrf.mxu3  ;;  %v2362_v53 = vadd.f32 %v2259_v27, %v2132_v7  ;;  %v2032_v63 = vpop.f32.mrf.mxu1  ;;  %v1851_v61 = vadd.f32 %v1750_v15, %v10620_v18  ;;  %v1618_v18 = vrot.slane %v10636_v0, 2  ;;  %v2466_v15 = vor.u32 %v2465_v54, %v2464_v29 }
 0x214   : > { %v1622_v54 = vrot.slane %v13802_v45, 2 }
 0x215   : > { %v11059_v2 = vadd.f32 %v2594_v31, %v2362_v53  ;;  %v2133_v12 = vadd.f32 %v2032_v63, %v1851_v61  ;;  %1789 = vmatmul.bf16.gmra.mxu0 %v1616_v16  ;;  %v1619_v27 = vor.u32 %v1618_v18, %v1617_v47  ;;  %v13804_v31 = vld [vmem:[#allocation8_spill] sm:$0xff] }
 0x216   : > { %2071 = vmatmul.bf16.gmra.mxu1 %v1928_v35  ;;  %v1931_v53 = vrot.slane %v13804_v31, 2 }
 0x217   : > { %2301 = vmatmul.bf16.gmra.mxu2 %v1930_v24  ;;  %v1620_v0 = vsel %vm1573_vm2, %v1615_v33, %v1619_v27  ;;  %v1621_v33 = vrot.slane %v13801_v39, 1 }
 0x218   : > { %2636 = vmatmul.bf16.gmra.mxu3 %v2463_v36 }
 0x21a   : > { %v2262_v19 = vpop.f32.mrf.mxu2  ;;  %v1752_v43 = vpop.f32.mrf.mxu0 }
 0x21b   : > { %v2597_v21 = vpop.f32.mrf.mxu3  ;;  %v2363_v22 = vadd.f32 %v2262_v19, %v2133_v12  ;;  %v2034_v56 = vpop.f32.mrf.mxu1  ;;  %v1852_v58 = vadd.f32 %v1752_v43, %v10627_v48  ;;  %v13805_v12 = vld [vmem:[#allocation9_spill] sm:$0xff]  ;;  %v1932_v19 = vsel %vm1907_vm3, %v1929_v6, %v1931_v53  ;;  %v2467_v43 = vsel %vm2420_vm4, %v2462_v20, %v2466_v15 }
 0x21d   : > { %v11066_v7 = vadd.f32 %v2597_v21, %v2363_v22  ;;  %v2134_v35 = vadd.f32 %v2034_v56, %v1852_v58 }
 0x21f   : > { %13803 = vst [vmem:[#allocation15_spill] sm:$0xff] %v11066_v7 }
 0x222   : > { %v2264_v63 = vpop.f32.mrf.mxu2  ;;  %v1755_v36 = vpop.f32.mrf.mxu0 }
 0x223   : > { %v2599_v16 = vpop.f32.mrf.mxu3  ;;  %v2364_v61 = vadd.f32 %v2264_v63, %v2134_v35  ;;  %v2037_v62 = vpop.f32.mrf.mxu1  ;;  %v1853_v48 = vadd.f32 %v1755_v36, %v13805_v12  ;;  %v13807_v35 = vld [vmem:[#allocation10_spill] sm:$0xff]  ;;  %v13808_v63 = vld [vmem:[#allocation20_spill] sm:$0xff] }
 0x224   : > { %v2468_v20 = vrot.slane %v13808_v63, 2 }
 0x225   : > { %v11073_v21 = vadd.f32 %v2599_v16, %v2364_v61  ;;  %v2135_v22 = vadd.f32 %v2037_v62, %v1853_v48  ;;  %1794 = vmatmul.bf16.gmra.mxu0 %v1620_v0  ;;  %v13809_v16 = vld [vmem:[#allocation16_spill] sm:$0xff]  ;;  %v1623_v62 = vor.u32 %v1622_v54, %v1621_v33 }
 0x226   : > { %2076 = vmatmul.bf16.gmra.mxu1 %v1930_v24  ;;  %v2469_v61 = vrot.slane %v13809_v16, 3  ;;  %v13811_v0 = vld [vmem:[#allocation12_spill] sm:$0xff] }
 0x227   : > { %13806 = vst [vmem:[#allocation11_spill] sm:$0xff] %v11073_v21  ;;  %2306 = vmatmul.bf16.gmra.mxu2 %v1932_v19  ;;  %v1933_v12 = vrot.slane %v13811_v0, 2  ;;  %v1624_v45 = vsel %vm1573_vm2, %v1619_v27, %v1623_v62  ;;  %v13812_v21 = vld [vmem:[#allocation13_spill] sm:$0xff]  ;;  %v1625_v27 = vrot.slane %v13808_v63, 1 }
 0x228   : > { %2641 = vmatmul.bf16.gmra.mxu3 %v2467_v43  ;;  %v2470_v48 = vor.u32 %v2469_v61, %v2468_v20  ;;  %v13815_v61 = vld [vmem:[#allocation25_spill] sm:$0xff] }
 0x22a   : > { %v2267_v56 = vpop.f32.mrf.mxu2  ;;  %v1757_v58 = vpop.f32.mrf.mxu0  ;;  %v2471_v7 = vsel %vm2420_vm4, %v2466_v15, %v2470_v48  ;;  %v2472_v15 = vrot.slane %v13815_v61, 2 }
 0x22b   : > { %v2602_v47 = vpop.f32.mrf.mxu3  ;;  %v2365_v18 = vadd.f32 %v2267_v56, %v2135_v22  ;;  %v2039_v29 = vpop.f32.mrf.mxu1  ;;  %v1854_v6 = vadd.f32 %v1757_v58, %v13807_v35  ;;  %v1934_v35 = vsel %vm1907_vm3, %v1931_v53, %v1933_v12 }
 0x22d   : > { %v11080_v36 = vadd.f32 %v2602_v47, %v2365_v18  ;;  %v2136_v24 = vadd.f32 %v2039_v29, %v1854_v6 }
 0x22f   : > { %13810 = vst [vmem:[#allocation9_spill] sm:$0xff] %v11080_v36 }
 0x232   : > { %v2269_v43 = vpop.f32.mrf.mxu2  ;;  %v1760_v31 = vpop.f32.mrf.mxu0 }
 0x233   : > { %v2604_v22 = vpop.f32.mrf.mxu3  ;;  %v2366_v56 = vadd.f32 %v2269_v43, %v2136_v24  ;;  %v2042_v39 = vpop.f32.mrf.mxu1  ;;  %v1855_v58 = vadd.f32 %v1760_v31, %v13812_v21  ;;  %v1626_v31 = vrot.slane %v13809_v16, 2  ;;  %v13814_v21 = vld [vmem:[#allocation14_spill] sm:$0xff]  ;;  %v13816_v24 = vld [vmem:[#allocation21_spill] sm:$0xff] }
 0x234   : > { %v2473_v43 = vrot.slane %v13816_v24, 3 }
 0x235   : > { %v11087_v47 = vadd.f32 %v2604_v22, %v2366_v56  ;;  %v2137_v18 = vadd.f32 %v2042_v39, %v1855_v58  ;;  %1799 = vmatmul.bf16.gmra.mxu0 %v1624_v45  ;;  %v1627_v56 = vor.u32 %v1626_v31, %v1625_v27 }
 0x236   : > { %2081 = vmatmul.bf16.gmra.mxu1 %v1932_v19  ;;  %v2474_v45 = vor.u32 %v2473_v43, %v2472_v15  ;;  %v13822_v43 = vld [vmem:[#allocation30_spill] sm:$0xff] }
 0x237   : > { %13813 = vst [vmem:[#allocation10_spill] sm:$0xff] %v11087_v47  ;;  %2311 = vmatmul.bf16.gmra.mxu2 %v1934_v35  ;;  %v1628_v16 = vsel %vm1573_vm2, %v1623_v62, %v1627_v56  ;;  %v13819_v47 = vld [vmem:[#allocation18_spill] sm:$0xff]  ;;  %v1629_v62 = vrot.slane %v13815_v61, 1 }
 0x238   : > { %2646 = vmatmul.bf16.gmra.mxu3 %v2471_v7  ;;  %v13818_v7 = vld [vmem:[#allocation17_spill] sm:$0xff]  ;;  %v2475_v36 = vsel %vm2420_vm4, %v2470_v48, %v2474_v45  ;;  %v2476_v48 = vrot.slane %v13822_v43, 2 }
 0x239   : > { %v1935_v39 = vrot.slane %v13818_v7, 2 }
 0x23a   : > { %v2272_v29 = vpop.f32.mrf.mxu2  ;;  %v1762_v6 = vpop.f32.mrf.mxu0 }
 0x23b   : > { %v2607_v33 = vpop.f32.mrf.mxu3  ;;  %v2367_v54 = vadd.f32 %v2272_v29, %v2137_v18  ;;  %v2044_v20 = vpop.f32.mrf.mxu1  ;;  %v1856_v53 = vadd.f32 %v1762_v6, %v13814_v21  ;;  %v1936_v21 = vsel %vm1907_vm3, %v1933_v12, %v1935_v39 }
 0x23d   : > { %v11094_v22 = vadd.f32 %v2607_v33, %v2367_v54  ;;  %v2138_v19 = vadd.f32 %v2044_v20, %v1856_v53 }
 0x23f   : > { %13817 = vst [vmem:[#allocation20_spill] sm:$0xff] %v11094_v22 }
 0x242   : > { %v2274_v58 = vpop.f32.mrf.mxu2  ;;  %v1765_v0 = vpop.f32.mrf.mxu0 }
 0x243   : > { %v2609_v18 = vpop.f32.mrf.mxu3  ;;  %v2368_v29 = vadd.f32 %v2274_v58, %v2138_v19  ;;  %v2047_v63 = vpop.f32.mrf.mxu1  ;;  %v1857_v6 = vadd.f32 %v1765_v0, %v13819_v47  ;;  %v1630_v0 = vrot.slane %v13816_v24, 2  ;;  %v13821_v47 = vld [vmem:[#allocation19_spill] sm:$0xff]  ;;  %v13823_v19 = vld [vmem:[#allocation26_spill] sm:$0xff] }
 0x244   : > { %v2477_v58 = vrot.slane %v13823_v19, 3 }
 0x245   : > { %v11101_v33 = vadd.f32 %v2609_v18, %v2368_v29  ;;  %v2139_v54 = vadd.f32 %v2047_v63, %v1857_v6  ;;  %1804 = vmatmul.bf16.gmra.mxu0 %v1628_v16  ;;  %v1631_v29 = vor.u32 %v1630_v0, %v1629_v62 }
 0x246   : > { %2086 = vmatmul.bf16.gmra.mxu1 %v1934_v35  ;;  %v2478_v16 = vor.u32 %v2477_v58, %v2476_v48  ;;  %v13829_v58 = vld [vmem:[#allocation35_spill] sm:$0xff] }
 0x247   : > { %13820 = vst [vmem:[#allocation16_spill] sm:$0xff] %v11101_v33  ;;  %2316 = vmatmul.bf16.gmra.mxu2 %v1936_v21  ;;  %v1632_v24 = vsel %vm1573_vm2, %v1627_v56, %v1631_v29  ;;  %v13826_v33 = vld [vmem:[#allocation23_spill] sm:$0xff]  ;;  %v1633_v56 = vrot.slane %v13822_v43, 1 }
 0x248   : > { %2651 = vmatmul.bf16.gmra.mxu3 %v2475_v36  ;;  %v13825_v36 = vld [vmem:[#allocation22_spill] sm:$0xff]  ;;  %v2479_v22 = vsel %vm2420_vm4, %v2474_v45, %v2478_v16  ;;  %v2480_v45 = vrot.slane %v13829_v58, 2 }
 0x249   : > { %v1937_v63 = vrot.slane %v13825_v36, 2 }
 0x24a   : > { %v2277_v20 = vpop.f32.mrf.mxu2  ;;  %v1767_v53 = vpop.f32.mrf.mxu0 }
 0x24b   : > { %v2612_v27 = vpop.f32.mrf.mxu3  ;;  %v2369_v31 = vadd.f32 %v2277_v20, %v2139_v54  ;;  %v2049_v15 = vpop.f32.mrf.mxu1  ;;  %v1858_v12 = vadd.f32 %v1767_v53, %v13821_v47  ;;  %v1938_v47 = vsel %vm1907_vm3, %v1935_v39, %v1937_v63 }
 0x24d   : > { %v11108_v18 = vadd.f32 %v2612_v27, %v2369_v31  ;;  %v2140_v35 = vadd.f32 %v2049_v15, %v1858_v12 }
 0x24f   : > { %13824 = vst [vmem:[#allocation13_spill] sm:$0xff] %v11108_v18 }
 0x252   : > { %v2279_v6 = vpop.f32.mrf.mxu2  ;;  %v1770_v7 = vpop.f32.mrf.mxu0 }
 0x253   : > { %v2614_v54 = vpop.f32.mrf.mxu3  ;;  %v2370_v20 = vadd.f32 %v2279_v6, %v2140_v35  ;;  %v2052_v61 = vpop.f32.mrf.mxu1  ;;  %v1859_v53 = vadd.f32 %v1770_v7, %v13826_v33  ;;  %v1634_v7 = vrot.slane %v13823_v19, 2  ;;  %v13828_v33 = vld [vmem:[#allocation24_spill] sm:$0xff]  ;;  %v13830_v35 = vld [vmem:[#allocation31_spill] sm:$0xff] }
 0x254   : > { %v2481_v6 = vrot.slane %v13830_v35, 3 }
 0x255   : > { %v11115_v27 = vadd.f32 %v2614_v54, %v2370_v20  ;;  %v2141_v31 = vadd.f32 %v2052_v61, %v1859_v53  ;;  %1809 = vmatmul.bf16.gmra.mxu0 %v1632_v24  ;;  %v1635_v20 = vor.u32 %v1634_v7, %v1633_v56 }
 0x256   : > { %2091 = vmatmul.bf16.gmra.mxu1 %v1936_v21  ;;  %v2482_v24 = vor.u32 %v2481_v6, %v2480_v45  ;;  %v13836_v6 = vld [vmem:[#allocation40_spill] sm:$0xff] }
 0x257   : > { %13827 = vst [vmem:[#allocation14_spill] sm:$0xff] %v11115_v27  ;;  %2321 = vmatmul.bf16.gmra.mxu2 %v1938_v47  ;;  %v1636_v19 = vsel %vm1573_vm2, %v1631_v29, %v1635_v20  ;;  %v13833_v27 = vld [vmem:[#allocation28_spill] sm:$0xff]  ;;  %v1637_v29 = vrot.slane %v13829_v58, 1 }
 0x258   : > { %2656 = vmatmul.bf16.gmra.mxu3 %v2479_v22  ;;  %v13832_v22 = vld [vmem:[#allocation27_spill] sm:$0xff]  ;;  %v2483_v18 = vsel %vm2420_vm4, %v2478_v16, %v2482_v24  ;;  %v2484_v16 = vrot.slane %v13836_v6, 2 }
 0x259   : > { %v1939_v61 = vrot.slane %v13832_v22, 2 }
 0x25a   : > { %v2282_v15 = vpop.f32.mrf.mxu2  ;;  %v1772_v12 = vpop.f32.mrf.mxu0 }
 0x25b   : > { %v2617_v62 = vpop.f32.mrf.mxu3  ;;  %v2371_v0 = vadd.f32 %v2282_v15, %v2141_v31  ;;  %v2054_v48 = vpop.f32.mrf.mxu1  ;;  %v1860_v39 = vadd.f32 %v1772_v12, %v13828_v33  ;;  %v1940_v33 = vsel %vm1907_vm3, %v1937_v63, %v1939_v61 }
 0x25d   : > { %v11122_v54 = vadd.f32 %v2617_v62, %v2371_v0  ;;  %v2142_v21 = vadd.f32 %v2054_v48, %v1860_v39 }
 0x25f   : > { %13831 = vst [vmem:[#allocation25_spill] sm:$0xff] %v11122_v54 }
 0x262   : > { %v2284_v53 = vpop.f32.mrf.mxu2  ;;  %v1775_v36 = vpop.f32.mrf.mxu0 }
 0x263   : > { %v2619_v31 = vpop.f32.mrf.mxu3  ;;  %v2372_v15 = vadd.f32 %v2284_v53, %v2142_v21  ;;  %v2057_v43 = vpop.f32.mrf.mxu1  ;;  %v1861_v12 = vadd.f32 %v1775_v36, %v13833_v27  ;;  %v1638_v36 = vrot.slane %v13830_v35, 2  ;;  %v13835_v27 = vld [vmem:[#allocation29_spill] sm:$0xff]  ;;  %v13837_v21 = vld [vmem:[#allocation36_spill] sm:$0xff] }
 0x264   : > { %v2485_v53 = vrot.slane %v13837_v21, 3 }
 0x265   : > { %v11129_v62 = vadd.f32 %v2619_v31, %v2372_v15  ;;  %v2143_v0 = vadd.f32 %v2057_v43, %v1861_v12  ;;  %1814 = vmatmul.bf16.gmra.mxu0 %v1636_v19  ;;  %v1639_v15 = vor.u32 %v1638_v36, %v1637_v29 }
 0x266   : > { %2096 = vmatmul.bf16.gmra.mxu1 %v1938_v47  ;;  %v2486_v19 = vor.u32 %v2485_v53, %v2484_v16  ;;  %v13842_v53 = vld [vmem:[#allocation45_spill] sm:$0xff] }
 0x267   : > { %13834 = vst [vmem:[#allocation21_spill] sm:$0xff] %v11129_v62  ;;  %2326 = vmatmul.bf16.gmra.mxu2 %v1940_v33  ;;  %v1640_v35 = vsel %vm1573_vm2, %v1635_v20, %v1639_v15  ;;  %v13839_v62 = vld [vmem:[#allocation33_spill] sm:$0xff]  ;;  %v1641_v20 = vrot.slane %v13836_v6, 1 }
 0x268   : > { %2661 = vmatmul.bf16.gmra.mxu3 %v2483_v18  ;;  %v13838_v18 = vld [vmem:[#allocation32_spill] sm:$0xff]  ;;  %v2487_v54 = vsel %vm2420_vm4, %v2482_v24, %v2486_v19  ;;  %v2488_v24 = vrot.slane %v13842_v53, 2 }
 0x269   : > { %v1941_v43 = vrot.slane %v13838_v18, 2  ;;  %v13844_v18 = vld [vmem:[#allocation38_spill] sm:$0xff] }
 0x26a   : > { %v2287_v48 = vpop.f32.mrf.mxu2  ;;  %v1777_v39 = vpop.f32.mrf.mxu0 }
 0x26b   : > { %v2622_v56 = vpop.f32.mrf.mxu3  ;;  %v2373_v7 = vadd.f32 %v2287_v48, %v2143_v0  ;;  %v2059_v45 = vpop.f32.mrf.mxu1  ;;  %v1862_v63 = vadd.f32 %v1777_v39, %v13835_v27  ;;  %v1942_v27 = vsel %vm1907_vm3, %v1939_v61, %v1941_v43 }
 0x26d   : > { %v11136_v31 = vadd.f32 %v2622_v56, %v2373_v7  ;;  %v2144_v47 = vadd.f32 %v2059_v45, %v1862_v63 }
 0x272   : > { %v2289_v12 = vpop.f32.mrf.mxu2  ;;  %v1780_v22 = vpop.f32.mrf.mxu0 }
 0x273   : > { %v2624_v0 = vpop.f32.mrf.mxu3  ;;  %v2374_v48 = vadd.f32 %v2289_v12, %v2144_v47  ;;  %v2062_v58 = vpop.f32.mrf.mxu1  ;;  %v1863_v39 = vadd.f32 %v1780_v22, %v13839_v62  ;;  %v1642_v22 = vrot.slane %v13837_v21, 2  ;;  %v13841_v62 = vld [vmem:[#allocation34_spill] sm:$0xff]  ;;  %v13843_v47 = vld [vmem:[#allocation41_spill] sm:$0xff] }
 0x274   : > { %v2489_v12 = vrot.slane %v13843_v47, 3 }
 0x275   : > { %v11143_v56 = vadd.f32 %v2624_v0, %v2374_v48  ;;  %v2145_v7 = vadd.f32 %v2062_v58, %v1863_v39  ;;  %1819 = vmatmul.bf16.gmra.mxu0 %v1640_v35  ;;  %v1643_v48 = vor.u32 %v1642_v22, %v1641_v20 }
 0x276   : > { %2101 = vmatmul.bf16.gmra.mxu1 %v1940_v33  ;;  %v2490_v58 = vor.u32 %v2489_v12, %v2488_v24 }
 0x277   : > { %13840 = vst [vmem:[#allocation18_spill] sm:$0xff] %v11143_v56  ;;  %2331 = vmatmul.bf16.gmra.mxu2 %v1942_v27  ;;  %v1644_v21 = vsel %vm1573_vm2, %v1639_v15, %v1643_v48 }
 0x278   : > { %2666 = vmatmul.bf16.gmra.mxu3 %v2487_v54  ;;  %v1943_v54 = vrot.slane %v10758_v5, 2  ;;  %v2491_v56 = vsel %vm2420_vm4, %v2486_v19, %v2490_v58  ;;  %v1646_v19 = vrot.slane %v13843_v47, 2 }
 0x27a   : > { %v2292_v45 = vpop.f32.mrf.mxu2  ;;  %v1782_v63 = vpop.f32.mrf.mxu0 }
 0x27b   : > { %v2627_v29 = vpop.f32.mrf.mxu3  ;;  %v2375_v36 = vadd.f32 %v2292_v45, %v2145_v7  ;;  %v2064_v16 = vpop.f32.mrf.mxu1  ;;  %v1864_v61 = vadd.f32 %v1782_v63, %v13841_v62  ;;  %v1944_v62 = vsel %vm1907_vm3, %v1941_v43, %v1943_v54  ;;  %v1645_v43 = vrot.slane %v13842_v53, 1 }
 0x27d   : > { %v11150_v0 = vadd.f32 %v2627_v29, %v2375_v36  ;;  %v2146_v33 = vadd.f32 %v2064_v16, %v1864_v61  ;;  %v13846_v16 = vld [vmem:[#allocation42_spill] sm:$0xff] }
 0x27e   : > { %v1650_v20 = vshrl.u32 %v13846_v16, 16  ;;  %v1653_v22 = vshll.u32 %v13846_v16, 16 }
 0x282   : > { %v2294_v35 = vpop.f32.mrf.mxu2  ;;  %v1785_v45 = vpop.f32.mrf.mxu0 }
 0x283   : > { %v2629_v39 = vpop.f32.mrf.mxu3  ;;  %v2376_v7 = vadd.f32 %v2294_v35, %v2146_v33  ;;  %v2067_v6 = vpop.f32.mrf.mxu1  ;;  %v1865_v63 = vadd.f32 %v1785_v45, %v13844_v18  ;;  %v13847_v33 = vld [vmem:[#allocation39_spill] sm:$0xff]  ;;  %v1647_v45 = vor.u32 %v1646_v19, %v1645_v43 }
 0x285   : > { %v11157_v29 = vadd.f32 %v2629_v39, %v2376_v7  ;;  %v2147_v36 = vadd.f32 %v2067_v6, %v1865_v63  ;;  %1824 = vmatmul.bf16.gmra.mxu0 %v1644_v21  ;;  %v2492_v39 = vrot.slane %v1650_v20, 2  ;;  %v11167_v6 = vrot.slane %v13846_v16, 2  ;;  %v455_v63 = vld [vmem:[%s10383_s27 + $0x158] sm:$0xff] }
 0x286   : > { %2106 = vmatmul.bf16.gmra.mxu1 %v1942_v27  ;;  %v2493_v27 = vrot.slane %v1653_v22, 3  ;;  %v1648_v47 = vsel %vm1573_vm2, %v1643_v48, %v1647_v45 }
 0x287   : > { %13845 = vst [vmem:[#allocation19_spill] sm:$0xff] %v11157_v29  ;;  %2336 = vmatmul.bf16.gmra.mxu2 %v1944_v62 }
 0x288   : > { %2671 = vmatmul.bf16.gmra.mxu3 %v2491_v56  ;;  %v2494_v21 = vor.u32 %v2493_v27, %v2492_v39  ;;  %v9848_v39 = vld [vmem:[%s13688_s1 + $0x238] sm:$0xff] }
 0x289   : > { %2866 = vmatpush.bf16.msra.mxu0 %v9848_v39 }
 0x28a   : > { %v2297_v61 = vpop.f32.mrf.mxu2  ;;  %v1787_v18 = vpop.f32.mrf.mxu0 }
 0x28b   : > { %v2632_v15 = vpop.f32.mrf.mxu3  ;;  %v2377_v24 = vadd.f32 %v2297_v61, %v2147_v36  ;;  %v2069_v12 = vpop.f32.mrf.mxu1  ;;  %v1866_v35 = vadd.f32 %v1787_v18, %v13847_v33  ;;  %v13848_v18 = vld [vmem:[#allocation43_spill] sm:$0xff] }
 0x28d   : > { %v11164_v56 = vadd.f32 %v2632_v15, %v2377_v24  ;;  %v2148_v7 = vadd.f32 %v2069_v12, %v1866_v35  ;;  %v1946_v15 = vsel %vm1907_vm3, %v1943_v54, %v11167_v6  ;;  %v2495_v24 = vsel %vm2420_vm4, %v2490_v58, %v2494_v21  ;;  %v10164_v12 = vld [vmem:[%s10383_s27 + $0x150] sm:$0xff] }
 0x28e   : > { %v11176_v43 = vpack.c.bf16 %v455_v63, %v10164_v12  ;;  %v1652_v63 = vrot.slane %v1650_v20, 1  ;;  %v457_v20 = vld [vmem:[%s10383_s27 + $0x168] sm:$0xff] }
 0x290   : > { %13849 = vst [vmem:[#allocation30_spill] sm:$0xff] %v11176_v43  ;;  %v2497_v48 = vshrl.u32 %v11176_v43, 16  ;;  %v2500_v54 = vshll.u32 %v11176_v43, 16 }
 0x292   : > { %v2299_v36 = vpop.f32.mrf.mxu2  ;;  %v1790_v53 = vpop.f32.mrf.mxu0 }
 0x293   : > { %v2634_v61 = vpop.f32.mrf.mxu3  ;;  %v2378_v5 = vadd.f32 %v2299_v36, %v2148_v7  ;;  %v2072_v29 = vpop.f32.mrf.mxu1  ;;  %v1867_v33 = vadd.f32 %v1790_v53, %v13848_v18  ;;  %v1655_v36 = vrot.slane %v1653_v22, 2  ;;  %v2502_v18 = vrot.slane %v2500_v54, 3 }
 0x295   : > { %v11178_v19 = vadd.f32 %v2634_v61, %v2378_v5  ;;  %v2149_v35 = vadd.f32 %v2072_v29, %v1867_v33  ;;  %1829 = vmatmul.bf16.gmra.mxu0 %v1648_v47  ;;  %v9847_v5 = vld [vmem:[%s13688_s1 + $0x230] sm:$0xff]  ;;  %v13851_v61 = vld [vmem:[#allocation44_spill] sm:$0xff]  ;;  %v2499_v47 = vrot.slane %v2497_v48, 2  ;;  %v1656_v12 = vor.u32 %v1655_v36, %v1652_v63 }
 0x296   : > { %2111 = vmatmul.bf16.gmra.mxu1 %v1944_v62  ;;  %2867 = vmatpush.bf16.msra.mxu0 %v9847_v5  ;;  %v9845_v48 = vld [vmem:[%s13688_s1 + $0x220] sm:$0xff] }
 0x297   : > { %2341 = vmatmul.bf16.gmra.mxu2 %v1946_v15  ;;  %v2503_v39 = vor.u32 %v2502_v18, %v2499_v47  ;;  %v1657_v5 = vsel %vm1573_vm2, %v1647_v45, %v1656_v12  ;;  %v13858_v45 = vld [vmem:[#allocation46_spill] sm:$0xff] }
 0x298   : > { %2676 = vmatmul.bf16.gmra.mxu3 %v2495_v24  ;;  %v9846_v24 = vld [vmem:[%s13688_s1 + $0x228] sm:$0xff] }
 0x29a   : > { %v2302_v58 = vpop.f32.mrf.mxu2  ;;  %v1792_v62 = vpop.f32.mrf.mxu0  ;;  %2868 = vmatpush.bf16.msra.mxu0 %v9846_v24  ;;  %v9844_v24 = vld [vmem:[%s13688_s1 + $0x218] sm:$0xff] }
 0x29b   : > { %v2637_v27 = vpop.f32.mrf.mxu3  ;;  %v2379_v29 = vadd.f32 %v2302_v58, %v2149_v35  ;;  %v11188_v7 = vpop.f32.mrf.mxu1  ;;  %v11191_v53 = vadd.f32 %v1792_v62, %v13851_v61  ;;  %v2193_v35 = vrot.slane %v11176_v43, 2  ;;  %v456_v58 = vld [vmem:[%s10383_s27 + $0x160] sm:$0xff]  ;;  %v2504_v61 = vsel %vm2420_vm4, %v2494_v21, %v2503_v39  ;;  %s404_s27 = sand.u32 1, %s10219_s22  }
 0x29c   : > { %13850 = vst [vmem:[#allocation26_spill] sm:$0xff] %v11188_v7  ;;  %v11213_v47 = vpack.c.bf16 %v457_v20, %v456_v58  ;;  %v1659_v43 = vshrl.u32 %v13858_v45, 16  ;;  %s405_s19 = scalar_lea.vmem [#allocation2], %s404_s27  ;;  %s7766_s26 = scalar_lea.sflag [#allocation3], %s404_s27 }
 0x29d   : > { %13852 = vst [vmem:[#allocation23_spill] sm:$0xff] %v11191_v53  ;;  %v11193_v33 = vadd.f32 %v2637_v27, %v2379_v29  ;;  %v13856_v29 = vld [vmem:[#allocation47_spill] sm:$0xff]  ;;  %v2194_v36 = vsel %vm1907_vm3, %v11167_v6, %v2193_v35  ;;  %s7776_s20 = sshll.u32 %s405_s19, 4  ;;  %s7777_s20 = int_to_ptr.vmem [resolvable:$true] %s7776_s20 }
 0x29e   : > { %13857 = vst [vmem:[#allocation28_spill] sm:$0xff] %v11213_v47  ;;  %2869 = vmatpush.bf16.msra.mxu0 %v9845_v48  ;;  %v2509_v21 = vshll.u32 %v11213_v47, 16 }
 0x29f   : > { %13853 = vst [vmem:[#allocation24_spill] sm:$0xff] %v11193_v33 }
 0x2a0   : > { %v2511_v7 = vrot.slane %v2509_v21, 3 }
 0x2a2   : > { %v11201_v22 = vpop.f32.mrf.mxu2  ;;  %v1795_v54 = vpop.f32.mrf.mxu0  ;;  %2870 = vmatpush.bf16.msra.mxu0 %v9844_v24 }
 0x2a3   : > { %13854 = vst [vmem:[#allocation35_spill] sm:$0xff] %v11201_v22  ;;  %v11203_v62 = vpop.f32.mrf.mxu3  ;;  %v2077_v27 = vpop.f32.mrf.mxu1  ;;  %v1869_v63 = vadd.f32 %v1795_v54, %v13856_v29  ;;  %v1662_v54 = vshll.u32 %v13858_v45, 16  ;;  %v2506_v29 = vshrl.u32 %v11213_v47, 16  ;;  %v2173_v22 = vpack.c.bf16 %v456_v58, %v456_v58  ;;  %v9842_v47 = vld [vmem:[%s13688_s1 + $0x208] sm:$0xff]  ;;  %v9841_v58 = vld [vmem:[%s13688_s1 + $0x200] sm:$0xff] }
 0x2a4   : > { %13855 = vst [vmem:[#allocation31_spill] sm:$0xff] %v11203_v62 }
 0x2a5   : > { %v2151_v18 = vadd.f32 %v2077_v27, %v1869_v63  ;;  %1834 = vmatmul.bf16.gmra.mxu0 %v1657_v5  ;;  %v2508_v33 = vrot.slane %v2506_v29, 2 }
 0x2a6   : > { %2116 = vmatmul.bf16.gmra.mxu1 %v1946_v15  ;;  %v9843_v15 = vld [vmem:[%s13688_s1 + $0x210] sm:$0xff] }
 0x2a7   : > { %2346 = vmatmul.bf16.gmra.mxu2 %v2194_v36  ;;  %v1661_v36 = vrot.slane %v1659_v43, 1  ;;  %2871 = vmatpush.bf16.msra.mxu0 %v9843_v15 }
 0x2a8   : > { %2681 = vmatmul.bf16.gmra.mxu3 %v2504_v61  ;;  %v1664_v61 = vrot.slane %v1662_v54, 2 }
 0x2aa   : > { %v2307_v20 = vpop.f32.mrf.mxu2  ;;  %v1797_v5 = vpop.f32.mrf.mxu0  ;;  %v1665_v53 = vor.u32 %v1664_v61, %v1661_v36 }
 0x2ab   : > { %v2642_v48 = vpop.f32.mrf.mxu3  ;;  %v2381_v27 = vadd.f32 %v2307_v20, %v2151_v18  ;;  %v11225_v63 = vpop.f32.mrf.mxu1  ;;  %v11228_v62 = vadd.f32 %v1797_v5, %v10926_v50  ;;  %v1947_v18 = vrot.slane %v13858_v45, 2  ;;  %v2195_v20 = vrot.slane %v2173_v22, 2  ;;  %2872 = vmatpush.bf16.msra.mxu0 %v9842_v47 }
 0x2ac   : > { %13859 = vst [vmem:[#allocation29_spill] sm:$0xff] %v11225_v63  ;;  %v2512_v63 = vor.u32 %v2511_v7, %v2508_v33  ;;  %v1666_v21 = vsel %vm1573_vm2, %v1656_v12, %v1665_v53 }
 0x2ad   : > { %v11230_v24 = vadd.f32 %v2642_v48, %v2381_v27  ;;  %v1948_v48 = vsel %vm1907_vm3, %v11167_v6, %v1947_v18  ;;  %v2196_v7 = vsel %vm1907_vm3, %v2193_v35, %v2195_v20 }
 0x2ae   : > { %v2513_v33 = vsel %vm2420_vm4, %v2503_v39, %v2512_v63 }
 0x2af   : > { %2873 = vmatpush.bf16.msra.mxu0 %v9841_v58 }
 0x2b2   : > { %v11236_v43 = vpop.f32.mrf.mxu2  ;;  %v1800_v54 = vpop.f32.mrf.mxu0 }
 0x2b3   : > { %v11238_v50 = vpop.f32.mrf.mxu3  ;;  %v2082_v29 = vpop.f32.mrf.mxu1  ;;  %v1871_v45 = vadd.f32 %v1800_v54, %v10929_v42 }
 0x2b5   : > { %v2153_v22 = vadd.f32 %v2082_v29, %v1871_v45  ;;  %1839 = vmatmul.bf16.gmra.mxu0 %v1666_v21 }
 0x2b6   : > { %2121 = vmatmul.bf16.gmra.mxu1 %v1948_v48 }
 0x2b7   : > { %2351 = vmatmul.bf16.gmra.mxu2 %v2196_v7 }
 0x2b8   : > { %2686 = vmatmul.bf16.gmra.mxu3 %v2513_v33 }
 0x2ba   : > { %v2312_v47 = vpop.f32.mrf.mxu2  ;;  %v1802_v5 = vpop.f32.mrf.mxu0 }
 0x2bb   : > { %v2647_v15 = vpop.f32.mrf.mxu3  ;;  %v2383_v27 = vadd.f32 %v2312_v47, %v2153_v22  ;;  %v11249_v12 = vpop.f32.mrf.mxu1  ;;  %v11252_v6 = vadd.f32 %v1802_v5, %v10932_v4  ;;  %v2756_v22 = vrot.slane %v10442_v40, 3 }
 0x2bd   : > { %v11254_v42 = vadd.f32 %v2647_v15, %v2383_v27 }
 0x2c2   : > { %v11256_v35 = vpop.f32.mrf.mxu2  ;;  %v1805_v36 = vpop.f32.mrf.mxu0 }
 0x2c3   : > { %v11258_v39 = vpop.f32.mrf.mxu3  ;;  %v2087_v61 = vpop.f32.mrf.mxu1  ;;  %v1873_v58 = vadd.f32 %v1805_v36, %v10941_v30  ;;  %v2757_v30 = vrot.slane %v10469_v57, 3 }
 0x2c5   : > { %v2155_v54 = vadd.f32 %v2087_v61, %v1873_v58  ;;  %1844 = vmatmul.bf16.gmra.mxu0 %v1665_v53  ;;  %v2758_v47 = vsel %vm2755_vm5, %v2756_v22, %v2757_v30 }
 0x2c6   : > { %2126 = vmatmul.bf16.gmra.mxu1 %v1947_v18 }
 0x2c7   : > { %2356 = vmatmul.bf16.gmra.mxu2 %v2195_v20 }
 0x2c8   : > { %2691 = vmatmul.bf16.gmra.mxu3 %v2512_v63 }
 0x2ca   : > { %v2317_v29 = vpop.f32.mrf.mxu2  ;;  %v1807_v4 = vpop.f32.mrf.mxu0 }
 0x2cb   : > { %v2652_v21 = vpop.f32.mrf.mxu3  ;;  %v2385_v48 = vadd.f32 %v2317_v29, %v2155_v54  ;;  %v11261_v45 = vpop.f32.mrf.mxu1  ;;  %v11264_v7 = vadd.f32 %v1807_v4, %v10950_v10  ;;  %v2759_v54 = vrot.slane %v10486_v3, 3 }
 0x2cd   : > { %v11266_v33 = vadd.f32 %v2652_v21, %v2385_v48  ;;  %v2760_v4 = vsel %vm2755_vm5, %v2757_v30, %v2759_v54 }
 0x2d2   : > { %v11270_v53 = vpop.f32.mrf.mxu2  ;;  %v1810_v63 = vpop.f32.mrf.mxu0 }
 0x2d3   : > { %v11272_v18 = vpop.f32.mrf.mxu3  ;;  %v2092_v20 = vpop.f32.mrf.mxu1  ;;  %v1875_v15 = vadd.f32 %v1810_v63, %v10956_v1 }
 0x2d5   : > { %v2157_v27 = vadd.f32 %v2092_v20, %v1875_v15  ;;  %2874 = vmatmul.bf16.vlgmr.msra.gmra.mxu0 %v2758_v47 }
 0x2da   : > { %v2322_v10 = vpop.f32.mrf.mxu2  ;;  %v1812_v61 = vpop.f32.mrf.mxu0 }
 0x2db   : > { %v2657_v5 = vpop.f32.mrf.mxu3  ;;  %v2387_v36 = vadd.f32 %v2322_v10, %v2157_v27  ;;  %v11276_v40 = vpop.f32.mrf.mxu1  ;;  %v11279_v57 = vadd.f32 %v1812_v61, %v10962_v37 }
 0x2dd   : > { %v11281_v58 = vadd.f32 %v2657_v5, %v2387_v36  ;;  %v2761_v5 = vrot.slane %v10502_v13, 3 }
 0x2e2   : > { %v11284_v29 = vpop.f32.mrf.mxu2  ;;  %v1815_v1 = vpop.f32.mrf.mxu0 }
 0x2e3   : > { %v11286_v21 = vpop.f32.mrf.mxu3  ;;  %v2097_v48 = vpop.f32.mrf.mxu1  ;;  %v1877_v22 = vadd.f32 %v1815_v1, %v10968_v14  ;;  %v2762_v1 = vsel %vm2755_vm5, %v2759_v54, %v2761_v5 }
 0x2e5   : > { %v2159_v63 = vadd.f32 %v2097_v48, %v1877_v22  ;;  %2879 = vmatmul.bf16.gmra.mxu0 %v2760_v4 }
 0x2ea   : > { %v2327_v20 = vpop.f32.mrf.mxu2  ;;  %v1817_v15 = vpop.f32.mrf.mxu0 }
 0x2eb   : > { %v2662_v47 = vpop.f32.mrf.mxu3  ;;  %v2389_v37 = vadd.f32 %v2327_v20, %v2159_v63  ;;  %v11290_v27 = vpop.f32.mrf.mxu1  ;;  %v11293_v3 = vadd.f32 %v1817_v15, %v10974_v52  ;;  %v2763_v15 = vrot.slane %v10518_v23, 3 }
 0x2ed   : > { %v11295_v10 = vadd.f32 %v2662_v47, %v2389_v37 }
 0x2f2   : > { %v11298_v36 = vpop.f32.mrf.mxu2  ;;  %v1820_v14 = vpop.f32.mrf.mxu0 }
 0x2f3   : > { %v11300_v30 = vpop.f32.mrf.mxu3  ;;  %v2102_v61 = vpop.f32.mrf.mxu1  ;;  %v1879_v48 = vadd.f32 %v1820_v14, %v10980_v25 }
 0x2f4   : > { %13860 = vst [vmem:[#allocation40_spill] sm:$0xff] %v11300_v30 }
 0x2f5   : > { %v2161_v4 = vadd.f32 %v2102_v61, %v1879_v48  ;;  %2884 = vmatmul.bf16.gmra.mxu0 %v2762_v1  ;;  %v2764_v61 = vsel %vm2755_vm5, %v2761_v5, %v2763_v15 }
 0x2fa   : > { %v2332_v22 = vpop.f32.mrf.mxu2  ;;  %v1822_v20 = vpop.f32.mrf.mxu0 }
 0x2fb   : > { %v2667_v63 = vpop.f32.mrf.mxu3  ;;  %v2391_v52 = vadd.f32 %v2332_v22, %v2161_v4  ;;  %v11304_v47 = vpop.f32.mrf.mxu1  ;;  %v11307_v13 = vadd.f32 %v1822_v20, %v10986_v9 }
 0x2fd   : > { %v11309_v37 = vadd.f32 %v2667_v63, %v2391_v52 }
 0x302   : > { %v11312_v30 = vpop.f32.mrf.mxu2  ;;  %v1825_v25 = vpop.f32.mrf.mxu0 }
 0x303   : > { %13861 = vst [vmem:[#allocation36_spill] sm:$0xff] %v11312_v30  ;;  %v11314_v54 = vpop.f32.mrf.mxu3  ;;  %v2107_v14 = vpop.f32.mrf.mxu1  ;;  %v1881_v1 = vadd.f32 %v1825_v25, %v10992_v41 }
 0x304   : > { %13862 = vst [vmem:[#allocation33_spill] sm:$0xff] %v11314_v54  ;;  %v2765_v54 = vrot.slane %v10534_v34, 3 }
 0x305   : > { %v2163_v48 = vadd.f32 %v2107_v14, %v1881_v1  ;;  %2889 = vmatmul.bf16.gmra.mxu0 %v2764_v61 }
 0x306   : > { %v2766_v14 = vsel %vm2755_vm5, %v2763_v15, %v2765_v54 }
 0x30a   : > { %v2337_v4 = vpop.f32.mrf.mxu2  ;;  %v1827_v20 = vpop.f32.mrf.mxu0 }
 0x30b   : > { %v2672_v22 = vpop.f32.mrf.mxu3  ;;  %v2393_v9 = vadd.f32 %v2337_v4, %v2163_v48  ;;  %v11318_v63 = vpop.f32.mrf.mxu1  ;;  %v11321_v23 = vadd.f32 %v1827_v20, %v10998_v55 }
 0x30c   : > { %13863 = vst [vmem:[#allocation34_spill] sm:$0xff] %v11318_v63 }
 0x30d   : > { %v11323_v52 = vadd.f32 %v2672_v22, %v2393_v9 }
 0x30f   : > { %13864 = vst [vmem:[#allocation45_spill] sm:$0xff] %v11323_v52 }
 0x312   : > { %v11326_v30 = vpop.f32.mrf.mxu2  ;;  %v1830_v41 = vpop.f32.mrf.mxu0 }
 0x313   : > { %13865 = vst [vmem:[#allocation41_spill] sm:$0xff] %v11326_v30  ;;  %v11328_v5 = vpop.f32.mrf.mxu3  ;;  %v2112_v25 = vpop.f32.mrf.mxu1  ;;  %v1883_v61 = vadd.f32 %v1830_v41, %v11004_v26 }
 0x314   : > { %13866 = vst [vmem:[#allocation38_spill] sm:$0xff] %v11328_v5  ;;  %v2767_v5 = vrot.slane %v10550_v46, 3 }
 0x315   : > { %v2165_v1 = vadd.f32 %v2112_v25, %v1883_v61  ;;  %2894 = vmatmul.bf16.gmra.mxu0 %v2766_v14 }
 0x316   : > { %v2768_v25 = vsel %vm2755_vm5, %v2765_v54, %v2767_v5 }
 0x31a   : > { %v2342_v48 = vpop.f32.mrf.mxu2  ;;  %v1832_v20 = vpop.f32.mrf.mxu0 }
 0x31b   : > { %v2677_v4 = vpop.f32.mrf.mxu3  ;;  %v2395_v55 = vadd.f32 %v2342_v48, %v2165_v1  ;;  %v11332_v22 = vpop.f32.mrf.mxu1  ;;  %v11335_v34 = vadd.f32 %v1832_v20, %v11010_v60 }
 0x31c   : > { %13867 = vst [vmem:[#allocation42_spill] sm:$0xff] %v11332_v22 }
 0x31d   : > { %13868 = vst [vmem:[#allocation39_spill] sm:$0xff] %v11335_v34  ;;  %v11337_v9 = vadd.f32 %v2677_v4, %v2395_v55 }
 0x31f   : > { %13869 = vst [vmem:[#allocation43_spill] sm:$0xff] %v11337_v9 }
 0x322   : > { %v11340_v30 = vpop.f32.mrf.mxu2  ;;  %v1835_v26 = vpop.f32.mrf.mxu0 }
 0x323   : > { %13870 = vst [vmem:[#allocation44_spill] sm:$0xff] %v11340_v30  ;;  %v11342_v15 = vpop.f32.mrf.mxu3  ;;  %v2117_v41 = vpop.f32.mrf.mxu1  ;;  %v1885_v14 = vadd.f32 %v1835_v26, %v11016_v49 }
 0x324   : > { %13871 = vst [vmem:[#allocation47_spill] sm:$0xff] %v11342_v15  ;;  %v2769_v15 = vrot.slane %v10566_v59, 3 }
 0x325   : > { %v2167_v61 = vadd.f32 %v2117_v41, %v1885_v14  ;;  %2899 = vmatmul.bf16.gmra.mxu0 %v2768_v25 }
 0x326   : > { %v2770_v41 = vsel %vm2755_vm5, %v2767_v5, %v2769_v15 }
 0x32a   : > { %v2347_v1 = vpop.f32.mrf.mxu2  ;;  %v1837_v20 = vpop.f32.mrf.mxu0 }
 0x32b   : > { %v2682_v48 = vpop.f32.mrf.mxu3  ;;  %v2397_v60 = vadd.f32 %v2347_v1, %v2167_v61  ;;  %v11346_v4 = vpop.f32.mrf.mxu1  ;;  %v11349_v46 = vadd.f32 %v1837_v20, %v11022_v28 }
 0x32c   : > { %13872 = vst [vmem:[#allocation46_spill] sm:$0xff] %v11346_v4 }
 0x32d   : > { %13873 = vst [vmem:[#allocation48_spill] sm:$0xff] %v11349_v46  ;;  %v11351_v55 = vadd.f32 %v2682_v48, %v2397_v60 }
 0x32f   : > { %13874 = vst [vmem:[#allocation49_spill] sm:$0xff] %v11351_v55 }
 0x332   : > { %v11354_v30 = vpop.f32.mrf.mxu2  ;;  %v1840_v49 = vpop.f32.mrf.mxu0 }
 0x333   : > { %13875 = vst [vmem:[#allocation50_spill] sm:$0xff] %v11354_v30  ;;  %v11356_v54 = vpop.f32.mrf.mxu3  ;;  %v2122_v26 = vpop.f32.mrf.mxu1  ;;  %v1887_v25 = vadd.f32 %v1840_v49, %v11028_v51 }
 0x334   : > { %13876 = vst [vmem:[#allocation51_spill] sm:$0xff] %v11356_v54  ;;  %v2771_v54 = vrot.slane %v10582_v8, 3  ;;  %v2773_v8 = vrot.slane %v10598_v38, 3 }
 0x335   : > { %v2169_v14 = vadd.f32 %v2122_v26, %v1887_v25  ;;  %2904 = vmatmul.bf16.gmra.mxu0 %v2770_v41 }
 0x336   : > { %v2772_v26 = vsel %vm2755_vm5, %v2769_v15, %v2771_v54 }
 0x33a   : > { %v2352_v61 = vpop.f32.mrf.mxu2  ;;  %v1842_v20 = vpop.f32.mrf.mxu0 }
 0x33b   : > { %v2687_v1 = vpop.f32.mrf.mxu3  ;;  %v2399_v28 = vadd.f32 %v2352_v61, %v2169_v14  ;;  %v11360_v48 = vpop.f32.mrf.mxu1  ;;  %v11363_v59 = vadd.f32 %v1842_v20, %v11034_v11 }
 0x33c   : > { %13877 = vst [vmem:[#allocation52_spill] sm:$0xff] %v11360_v48  ;;  %v2774_v48 = vsel %vm2755_vm5, %v2771_v54, %v2773_v8 }
 0x33d   : > { %13878 = vst [vmem:[#allocation53_spill] sm:$0xff] %v11363_v59  ;;  %v11365_v60 = vadd.f32 %v2687_v1, %v2399_v28 }
 0x33f   : > { %13879 = vst [vmem:[#allocation54_spill] sm:$0xff] %v11365_v60 }
 0x342   : > { %v11368_v30 = vpop.f32.mrf.mxu2  ;;  %v1845_v51 = vpop.f32.mrf.mxu0 }
 0x343   : > { %13880 = vst [vmem:[#allocation55_spill] sm:$0xff] %v11368_v30  ;;  %v11370_v5 = vpop.f32.mrf.mxu3  ;;  %v2127_v49 = vpop.f32.mrf.mxu1  ;;  %v1889_v41 = vadd.f32 %v1845_v51, %v11040_v44  ;;  %v11382_v44 = vld [vmem:[%s13689_s2] ss:$0 sm:$0xff] }
 0x344   : > { %13881 = vst [vmem:[#allocation56_spill] sm:$0xff] %v11370_v5 }
 0x345   : > { %v2171_v25 = vadd.f32 %v2127_v49, %v1889_v41  ;;  %2909 = vmatmul.bf16.gmra.mxu0 %v2772_v26  ;;  %v11388_v49 = vld [vmem:[%s13690_s3] ss:$0 sm:$0xff] }
 0x34a   : > { %v2357_v14 = vpop.f32.mrf.mxu2  ;;  %v1847_v20 = vpop.f32.mrf.mxu0 }
 0x34b   : > { %v2692_v61 = vpop.f32.mrf.mxu3  ;;  %v2401_v11 = vadd.f32 %v2357_v14, %v2171_v25  ;;  %v2129_v1 = vpop.f32.mrf.mxu1 }
 0x34d   : > { %v11374_v28 = vadd.f32 %v2692_v61, %v2401_v11  ;;  %v13883_v61 = vld [vmem:[#allocation15_spill] sm:$0xff] }
 0x34f   : > { %13882 = vst [vmem:[#allocation57_spill] sm:$0xff] %v11374_v28 }
 0x352   : > { %v2359_v30 = vpop.f32.mrf.mxu2  ;;  %v2875_v5 = vpop.f32.mrf.mxu0 }
 0x353   : > { %v2694_v60 = vpop.f32.mrf.mxu3  ;;  %v2979_v15 = vadd.f32 %v2875_v5, %v11052_v32 }
 0x354   : > { %v2775_v60 = vrot.slane %v10618_v17, 3 }
 0x355   : > { %2914 = vmatmul.bf16.gmra.mxu0 %v2774_v48  ;;  %v3022_v51 = vmul.f32 %v11382_v44, %v2979_v15 }
 0x356   : > { %v2776_v25 = vsel %vm2755_vm5, %v2773_v8, %v2775_v60  ;;  %v13885_v8 = vld [vmem:[#allocation8_spill] sm:$0xff] }
 0x357   : > { %v3065_v30 = vadd.f32 %v11388_v49, %v3022_v51  ;;  %v13884_v51 = vld [vmem:[#allocation11_spill] sm:$0xff] }
 0x359   : > { %v3106_v5 = vmax.f32 %v3065_v30, 0.0 }
 0x35a   : > { %v2877_v38 = vpop.f32.mrf.mxu0 }
 0x35b   : > { %v2980_v54 = vadd.f32 %v2877_v38, %v11059_v2  ;;  %v11396_v14 = vmin.f32 %v3106_v5, 6.0 }
 0x35d   : > { %v3023_v32 = vmul.f32 %v11382_v44, %v2980_v54  ;;  %v2777_v54 = vrot.slane %v13885_v8, 3 }
 0x35f   : > { %v3066_v26 = vadd.f32 %v11388_v49, %v3023_v32 }
 0x361   : > { %v3107_v48 = vmax.f32 %v3066_v26, 0.0 }
 0x362   : > { %v2880_v41 = vpop.f32.mrf.mxu0 }
 0x363   : > { %v2981_v11 = vadd.f32 %v2880_v41, %v13883_v61  ;;  %v11399_v20 = vmin.f32 %v3107_v48, 6.0  ;;  %v2778_v41 = vsel %vm2755_vm5, %v2775_v60, %v2777_v54  ;;  %v13886_v61 = vld [vmem:[#allocation9_spill] sm:$0xff]  ;;  %v13888_v60 = vld [vmem:[#allocation12_spill] sm:$0xff] }
 0x365   : > { %2919 = vmatmul.bf16.gmra.mxu0 %v2776_v25  ;;  %v3024_v1 = vmul.f32 %v11382_v44, %v2981_v11 }
 0x367   : > { %v3067_v15 = vadd.f32 %v11388_v49, %v3024_v1  ;;  %v13889_v1 = vld [vmem:[#allocation20_spill] sm:$0xff] }
 0x369   : > { %v3108_v32 = vmax.f32 %v3067_v15, 0.0 }
 0x36a   : > { %v2882_v17 = vpop.f32.mrf.mxu0 }
 0x36b   : > { %v2982_v38 = vadd.f32 %v2882_v17, %v13884_v51  ;;  %v11410_v25 = vmin.f32 %v3108_v32, 6.0  ;;  %v2779_v32 = vrot.slane %v13888_v60, 3 }
 0x36d   : > { %v3025_v30 = vmul.f32 %v11382_v44, %v2982_v38  ;;  %v13887_v38 = vld [vmem:[#allocation10_spill] sm:$0xff] }
 0x36f   : > { %v3068_v5 = vadd.f32 %v11388_v49, %v3025_v30 }
 0x371   : > { %v3109_v26 = vmax.f32 %v3068_v5, 0.0 }
 0x372   : > { %v2885_v48 = vpop.f32.mrf.mxu0 }
 0x373   : > { %v2983_v11 = vadd.f32 %v2885_v48, %v13886_v61  ;;  %v11413_v2 = vmin.f32 %v3109_v26, 6.0 }
 0x375   : > { %2924 = vmatmul.bf16.gmra.mxu0 %v2778_v41  ;;  %v3026_v17 = vmul.f32 %v11382_v44, %v2983_v11  ;;  %v2780_v41 = vsel %vm2755_vm5, %v2777_v54, %v2779_v32  ;;  %v13891_v54 = vld [vmem:[#allocation17_spill] sm:$0xff] }
 0x377   : > { %v3069_v15 = vadd.f32 %v11388_v49, %v3026_v17  ;;  %v13892_v17 = vld [vmem:[#allocation13_spill] sm:$0xff] }
 0x379   : > { %v3110_v5 = vmax.f32 %v3069_v15, 0.0 }
 0x37a   : > { %v2887_v51 = vpop.f32.mrf.mxu0 }
 0x37b   : > { %v2984_v30 = vadd.f32 %v2887_v51, %v13887_v38  ;;  %v11424_v28 = vmin.f32 %v3110_v5, 6.0  ;;  %v2781_v5 = vrot.slane %v13891_v54, 3 }
 0x37d   : > { %v3027_v8 = vmul.f32 %v11382_v44, %v2984_v30  ;;  %v13890_v30 = vld [vmem:[#allocation16_spill] sm:$0xff] }
 0x37f   : > { %v3070_v48 = vadd.f32 %v11388_v49, %v3027_v8 }
 0x381   : > { %v3111_v26 = vmax.f32 %v3070_v48, 0.0 }
 0x382   : > { %v2890_v61 = vpop.f32.mrf.mxu0 }
 0x383   : > { %v2985_v11 = vadd.f32 %v2890_v61, %v13889_v1  ;;  %v11427_v59 = vmin.f32 %v3111_v26, 6.0 }
 0x385   : > { %2929 = vmatmul.bf16.gmra.mxu0 %v2780_v41  ;;  %v3028_v51 = vmul.f32 %v11382_v44, %v2985_v11  ;;  %v2782_v41 = vsel %vm2755_vm5, %v2779_v32, %v2781_v5  ;;  %v13894_v32 = vld [vmem:[#allocation22_spill] sm:$0xff] }
 0x387   : > { %v3071_v15 = vadd.f32 %v11388_v49, %v3028_v51  ;;  %v13895_v51 = vld [vmem:[#allocation25_spill] sm:$0xff] }
 0x389   : > { %v3112_v48 = vmax.f32 %v3071_v15, 0.0 }
 0x38a   : > { %v2892_v38 = vpop.f32.mrf.mxu0 }
 0x38b   : > { %v2986_v8 = vadd.f32 %v2892_v38, %v13890_v30  ;;  %v11438_v55 = vmin.f32 %v3112_v48, 6.0  ;;  %v2783_v48 = vrot.slane %v13894_v32, 3 }
 0x38d   : > { %v3029_v60 = vmul.f32 %v11382_v44, %v2986_v8  ;;  %v13893_v8 = vld [vmem:[#allocation14_spill] sm:$0xff] }
 0x38f   : > { %v3072_v1 = vadd.f32 %v11388_v49, %v3029_v60 }
 0x391   : > { %v3113_v26 = vmax.f32 %v3072_v1, 0.0 }
 0x392   : > { %v2895_v61 = vpop.f32.mrf.mxu0 }
 0x393   : > { %v2987_v11 = vadd.f32 %v2895_v61, %v13892_v17  ;;  %v11441_v4 = vmin.f32 %v3113_v26, 6.0 }
 0x395   : > { %2934 = vmatmul.bf16.gmra.mxu0 %v2782_v41  ;;  %v3030_v38 = vmul.f32 %v11382_v44, %v2987_v11  ;;  %v2784_v41 = vsel %vm2755_vm5, %v2781_v5, %v2783_v48  ;;  %v13897_v5 = vld [vmem:[#allocation27_spill] sm:$0xff] }
 0x397   : > { %v3073_v15 = vadd.f32 %v11388_v49, %v3030_v38 }
 0x399   : > { %v3114_v1 = vmax.f32 %v3073_v15, 0.0 }
 0x39a   : > { %v2897_v30 = vpop.f32.mrf.mxu0 }
 0x39b   : > { %v2988_v60 = vadd.f32 %v2897_v30, %v13893_v8  ;;  %v11452_v46 = vmin.f32 %v3114_v1, 6.0  ;;  %v2785_v1 = vrot.slane %v13897_v5, 3 }
 0x39d   : > { %v3031_v54 = vmul.f32 %v11382_v44, %v2988_v60  ;;  %v13896_v60 = vld [vmem:[#allocation21_spill] sm:$0xff] }
 0x39f   : > { %v3074_v17 = vadd.f32 %v11388_v49, %v3031_v54 }
 0x3a1   : > { %v3115_v26 = vmax.f32 %v3074_v17, 0.0 }
 0x3a2   : > { %v2900_v61 = vpop.f32.mrf.mxu0 }
 0x3a3   : > { %v2989_v11 = vadd.f32 %v2900_v61, %v13895_v51  ;;  %v11455_v9 = vmin.f32 %v3115_v26, 6.0 }
 0x3a5   : > { %2939 = vmatmul.bf16.gmra.mxu0 %v2784_v41  ;;  %v3032_v30 = vmul.f32 %v11382_v44, %v2989_v11  ;;  %v2786_v41 = vsel %vm2755_vm5, %v2783_v48, %v2785_v1 }
 0x3a7   : > { %v3075_v15 = vadd.f32 %v11388_v49, %v3032_v30 }
 0x3a9   : > { %v3116_v17 = vmax.f32 %v3075_v15, 0.0 }
 0x3aa   : > { %v2902_v8 = vpop.f32.mrf.mxu0 }
 0x3ab   : > { %v2990_v54 = vadd.f32 %v2902_v8, %v13896_v60  ;;  %v3157_v22 = vmin.f32 %v3116_v17, 6.0 }
 0x3ad   : > { %v3033_v32 = vmul.f32 %v11382_v44, %v2990_v54  ;;  %v13898_v54 = vld [vmem:[#allocation18_spill] sm:$0xff] }
 0x3af   : > { %v3076_v51 = vadd.f32 %v11388_v49, %v3033_v32  ;;  %v13899_v32 = vld [vmem:[#allocation32_spill] sm:$0xff] }
 0x3b1   : > { %v3117_v26 = vmax.f32 %v3076_v51, 0.0  ;;  %v2787_v51 = vrot.slane %v13899_v32, 3 }
 0x3b2   : > { %v2905_v61 = vpop.f32.mrf.mxu0 }
 0x3b3   : > { %v2991_v38 = vadd.f32 %v2905_v61, %v11136_v31  ;;  %v3158_v11 = vmin.f32 %v3117_v26, 6.0  ;;  %v2788_v31 = vsel %vm2755_vm5, %v2785_v1, %v2787_v51 }
 0x3b5   : > { %2944 = vmatmul.bf16.gmra.mxu0 %v2786_v41  ;;  %v3193_v34 = vpack.c.bf16 %v3158_v11, %v3157_v22  ;;  %v3034_v30 = vmul.f32 %v11382_v44, %v2991_v38 }
 0x3b7   : > { %v3077_v60 = vadd.f32 %v11388_v49, %v3034_v30 }
 0x3b9   : > { %v3118_v52 = vmax.f32 %v3077_v60, 0.0 }
 0x3ba   : > { %v2907_v8 = vpop.f32.mrf.mxu0 }
 0x3bb   : > { %v2992_v5 = vadd.f32 %v2907_v8, %v13898_v54  ;;  %v3159_v26 = vmin.f32 %v3118_v52, 6.0  ;;  %v13900_v8 = vld [vmem:[#allocation19_spill] sm:$0xff] }
 0x3bd   : > { %v3035_v15 = vmul.f32 %v11382_v44, %v2992_v5  ;;  %v13901_v5 = vld [vmem:[#allocation37_spill] sm:$0xff] }
 0x3bf   : > { %v3078_v48 = vadd.f32 %v11388_v49, %v3035_v15  ;;  %v2789_v15 = vrot.slane %v13901_v5, 3 }
 0x3c1   : > { %v3119_v17 = vmax.f32 %v3078_v48, 0.0 }
 0x3c2   : > { %v2910_v63 = vpop.f32.mrf.mxu0 }
 0x3c3   : > { %v2993_v22 = vadd.f32 %v2910_v63, %v11150_v0  ;;  %v3160_v38 = vmin.f32 %v3119_v17, 6.0  ;;  %v2790_v0 = vsel %vm2755_vm5, %v2787_v51, %v2789_v15 }
 0x3c5   : > { %2949 = vmatmul.bf16.gmra.mxu0 %v2788_v31  ;;  %v3194_v61 = vpack.c.bf16 %v3160_v38, %v3159_v26  ;;  %v3036_v41 = vmul.f32 %v11382_v44, %v2993_v22 }
 0x3c7   : > { %v3079_v30 = vadd.f32 %v11388_v49, %v3036_v41 }
 0x3c9   : > { %v3120_v32 = vmax.f32 %v3079_v30, 0.0 }
 0x3ca   : > { %v2912_v11 = vpop.f32.mrf.mxu0 }
 0x3cb   : > { %v2994_v54 = vadd.f32 %v2912_v11, %v13900_v8  ;;  %v3161_v63 = vmin.f32 %v3120_v32, 6.0  ;;  %v2791_v8 = vrot.slane %v13846_v16, 3  ;;  %v13902_v32 = vld [vmem:[#allocation23_spill] sm:$0xff] }
 0x3cd   : > { %v3037_v60 = vmul.f32 %v11382_v44, %v2994_v54  ;;  %v2792_v5 = vsel %vm2755_vm5, %v2789_v15, %v2791_v8 }
 0x3cf   : > { %v3080_v1 = vadd.f32 %v11388_v49, %v3037_v60 }
 0x3d1   : > { %v3121_v52 = vmax.f32 %v3080_v1, 0.0  ;;  %v13903_v1 = vld [vmem:[#allocation26_spill] sm:$0xff] }
 0x3d2   : > { %v2915_v48 = vpop.f32.mrf.mxu0 }
 0x3d3   : > { %v3162_v17 = vmin.f32 %v3121_v52, 6.0  ;;  %v2995_v31 = vadd.f32 %v2915_v48, %v11164_v56  ;;  %v2150_v52 = vadd.f32 %v13903_v1, %v13902_v32  ;;  %v13912_v32 = vld [vmem:[#allocation29_spill] sm:$0xff] }
 0x3d4   : > { %v2152_v1 = vadd.f32 %v13912_v32, %v11228_v62 }
 0x3d5   : > { %2954 = vmatmul.bf16.gmra.mxu0 %v2790_v0  ;;  %v3195_v26 = vpack.c.bf16 %v3162_v17, %v3161_v63  ;;  %v3038_v22 = vmul.f32 %v11382_v44, %v2995_v31  ;;  %v13904_v0 = vld [vmem:[#allocation24_spill] sm:$0xff]  ;;  %v13906_v63 = vld [vmem:[#allocation35_spill] sm:$0xff]  ;;  %v13907_v31 = vpack.c.bf16 %v11441_v4, %v11438_v55  ;;  %v13911_v4 = vpack.c.bf16 %v11413_v2, %v11410_v25 }
 0x3d6   : > { %v2380_v17 = vadd.f32 %v13906_v63, %v2150_v52  ;;  %v13913_v52 = vpack.c.bf16 %v11399_v20, %v11396_v14  ;;  %v2382_v2 = vadd.f32 %v11236_v43, %v2152_v1  ;;  %v13914_v14 = vld [vmem:[#allocation28_spill] sm:$0xff] }
 0x3d7   : > { %3390 = vmatpush.bf16.msra.mxu1 %v3195_v26  ;;  %v3081_v41 = vadd.f32 %v11388_v49, %v3038_v22  ;;  %v13908_v26 = vld [vmem:[#allocation31_spill] sm:$0xff]  ;;  %v2795_v20 = vrot.slane %v13914_v14, 3 }
 0x3d8   : > { %v2715_v22 = vadd.f32 %v13908_v26, %v2380_v17  ;;  %v2717_v62 = vadd.f32 %v11238_v50, %v2382_v2 }
 0x3d9   : > { %v3122_v51 = vmax.f32 %v3081_v41, 0.0  ;;  %v13909_v41 = vpack.c.bf16 %v11427_v59, %v11424_v28 }
 0x3da   : > { %v2917_v38 = vpop.f32.mrf.mxu0 }
 0x3db   : > { %v2996_v11 = vadd.f32 %v2917_v38, %v11178_v19  ;;  %3391 = vmatpush.bf16.msra.mxu1 %v3194_v61  ;;  %v11492_v48 = vmin.f32 %v3122_v51, 6.0  ;;  %v13905_v61 = vpack.c.bf16 %v11455_v9, %v11452_v46 }
 0x3dd   : > { %v3039_v30 = vmul.f32 %v11382_v44, %v2996_v11 }
 0x3df   : > { %v3082_v54 = vadd.f32 %v11388_v49, %v3039_v30  ;;  %3392 = vmatpush.bf16.msra.mxu1 %v3193_v34  ;;  %v13910_v30 = vld [vmem:[#allocation30_spill] sm:$0xff] }
 0x3e0   : > { %v2793_v51 = vrot.slane %v13910_v30, 3 }
 0x3e1   : > { %v3123_v56 = vmax.f32 %v3082_v54, 0.0 }
 0x3e2   : > { %v2920_v60 = vpop.f32.mrf.mxu0  ;;  %v2796_v26 = vsel %vm2755_vm5, %v2793_v51, %v2795_v20 }
 0x3e3   : > { %v2997_v19 = vadd.f32 %v2920_v60, %v13904_v0  ;;  %3393 = vmatpush.bf16.msra.mxu1 %v13905_v61  ;;  %v11498_v16 = vmin.f32 %v3123_v56, 6.0 }
 0x3e5   : > { %2959 = vmatmul.bf16.gmra.mxu0 %v2792_v5  ;;  %v3196_v34 = vpack.c.bf16 %v11498_v16, %v11492_v48  ;;  %v3040_v15 = vmul.f32 %v11382_v44, %v2997_v19  ;;  %v2794_v5 = vsel %vm2755_vm5, %v2791_v8, %v2793_v51 }
 0x3e7   : > { %3394 = vmatpush.bf16.msra.mxu1 %v13907_v31  ;;  %v3083_v9 = vadd.f32 %v11388_v49, %v3040_v15 }
 0x3e9   : > { %v3124_v54 = vmax.f32 %v3083_v9, 0.0 }
 0x3ea   : > { %v2922_v38 = vpop.f32.mrf.mxu0 }
 0x3eb   : > { %v2998_v46 = vadd.f32 %v2922_v38, %v2715_v22  ;;  %3395 = vmatpush.bf16.msra.mxu1 %v13909_v41  ;;  %v11521_v59 = vmin.f32 %v3124_v54, 6.0  ;;  %v2154_v22 = vadd.f32 %v11249_v12, %v11252_v6 }
 0x3ed   : > { %v3041_v11 = vmul.f32 %v11382_v44, %v2998_v46  ;;  %v2384_v46 = vadd.f32 %v11256_v35, %v2154_v22  ;;  %v2156_v35 = vadd.f32 %v11261_v45, %v11264_v7 }
 0x3ef   : > { %v3084_v56 = vadd.f32 %v11388_v49, %v3041_v11  ;;  %3396 = vmatpush.bf16.msra.mxu1 %v13911_v4  ;;  %v2719_v30 = vadd.f32 %v11258_v39, %v2384_v46  ;;  %v2386_v39 = vadd.f32 %v11270_v53, %v2156_v35  ;;  %v2158_v53 = vadd.f32 %v11276_v40, %v11279_v57 }
 0x3f1   : > { %v3125_v55 = vmax.f32 %v3084_v56, 0.0 }
 0x3f2   : > { %v2925_v60 = vpop.f32.mrf.mxu0 }
 0x3f3   : > { %v2999_v28 = vadd.f32 %v2925_v60, %v11230_v24  ;;  %3397 = vmatpush.bf16.msra.mxu1 %v13913_v52  ;;  %v11527_v0 = vmin.f32 %v3125_v55, 6.0  ;;  %v2721_v52 = vadd.f32 %v11272_v18, %v2386_v39  ;;  %v2388_v18 = vadd.f32 %v11284_v29, %v2158_v53 }
 0x3f4   : > { %v2160_v29 = vadd.f32 %v11290_v27, %v11293_v3 }
 0x3f5   : > { %2964 = vmatmul.bf16.gmra.mxu0 %v2794_v5  ;;  %v3197_v25 = vpack.c.bf16 %v11527_v0, %v11521_v59  ;;  %v3042_v8 = vmul.f32 %v11382_v44, %v2999_v28 }
 0x3f7   : > { %v3085_v61 = vadd.f32 %v11388_v49, %v3042_v8 }
 0x3f9   : > { %v3126_v17 = vmax.f32 %v3085_v61, 0.0 }
 0x3fa   : > { %v2927_v19 = vpop.f32.mrf.mxu0 }
 0x3fb   : > { %v3000_v24 = vadd.f32 %v2927_v19, %v2717_v62  ;;  %v11541_v38 = vmin.f32 %v3126_v17, 6.0 }
 0x3fd   : > { %v3043_v63 = vmul.f32 %v11382_v44, %v3000_v24 }
 0x3ff   : > { %v3086_v15 = vadd.f32 %v11388_v49, %v3043_v63 }
 0x401   : > { %v3127_v43 = vmax.f32 %v3086_v15, 0.0  ;;  %v2723_v15 = vadd.f32 %v11286_v21, %v2388_v18  ;;  %v2390_v21 = vadd.f32 %v11298_v36, %v2160_v29 }
 0x402   : > { %v2930_v31 = vpop.f32.mrf.mxu0 }
 0x403   : > { %v3001_v50 = vadd.f32 %v2930_v31, %v11254_v42  ;;  %v11544_v9 = vmin.f32 %v3127_v43, 6.0 }
 0x405   : > { %2969 = vmatmul.bf16.gmra.mxu0 %v2796_v26  ;;  %v3198_v41 = vpack.c.bf16 %v11544_v9, %v11541_v38  ;;  %v3044_v11 = vmul.f32 %v11382_v44, %v3001_v50  ;;  %v13930_v9 = vld [vmem:[#allocation50_spill] sm:$0xff] }
 0x407   : > { %v3087_v54 = vadd.f32 %v11388_v49, %v3044_v11 }
 0x409   : > { %v3128_v56 = vmax.f32 %v3087_v54, 0.0 }
 0x40a   : > { %v2932_v51 = vpop.f32.mrf.mxu0 }
 0x40b   : > { %v3002_v12 = vadd.f32 %v2932_v51, %v2719_v30  ;;  %v11556_v60 = vmin.f32 %v3128_v56, 6.0 }
 0x40d   : > { %v3045_v6 = vmul.f32 %v11382_v44, %v3002_v12  ;;  %v13915_v12 = vld [vmem:[#allocation40_spill] sm:$0xff] }
 0x40f   : > { %v3088_v42 = vadd.f32 %v11388_v49, %v3045_v6  ;;  %v2725_v6 = vadd.f32 %v13915_v12, %v2390_v21 }
 0x411   : > { %v3129_v4 = vmax.f32 %v3088_v42, 0.0 }
 0x412   : > { %v2935_v55 = vpop.f32.mrf.mxu0 }
 0x413   : > { %v3003_v5 = vadd.f32 %v2935_v55, %v11266_v33  ;;  %v11559_v32 = vmin.f32 %v3129_v4, 6.0 }
 0x415   : > { %2974 = vmatmul.bf16.gmra.mxu0 %v2795_v20  ;;  %v3199_v1 = vpack.c.bf16 %v11559_v32, %v11556_v60  ;;  %v3046_v28 = vmul.f32 %v11382_v44, %v3003_v5 }
 0x417   : > { %v3089_v8 = vadd.f32 %v11388_v49, %v3046_v28 }
 0x419   : > { %v3130_v62 = vmax.f32 %v3089_v8, 0.0 }
 0x41a   : > { %v2937_v2 = vpop.f32.mrf.mxu0 }
 0x41b   : > { %v3004_v45 = vadd.f32 %v2937_v2, %v2721_v52  ;;  %v11571_v24 = vmin.f32 %v3130_v62, 6.0  ;;  %v13916_v52 = vld [vmem:[#allocation36_spill] sm:$0xff] }
 0x41d   : > { %v3047_v7 = vmul.f32 %v11382_v44, %v3004_v45 }
 0x41f   : > { %v3090_v33 = vadd.f32 %v11388_v49, %v3047_v7  ;;  %v13917_v7 = vld [vmem:[#allocation33_spill] sm:$0xff] }
 0x421   : > { %v3131_v19 = vmax.f32 %v3090_v33, 0.0 }
 0x422   : > { %v2940_v61 = vpop.f32.mrf.mxu0 }
 0x423   : > { %v3005_v63 = vadd.f32 %v2940_v61, %v11281_v58  ;;  %v11574_v14 = vmin.f32 %v3131_v19, 6.0 }
 0x425   : > { %v3200_v20 = vpack.c.bf16 %v11574_v14, %v11571_v24  ;;  %v3048_v17 = vmul.f32 %v11382_v44, %v3005_v63 }
 0x427   : > { %v3091_v31 = vadd.f32 %v11388_v49, %v3048_v17 }
 0x429   : > { %v3132_v57 = vmax.f32 %v3091_v31, 0.0  ;;  %v13919_v31 = vld [vmem:[#allocation45_spill] sm:$0xff] }
 0x42a   : > { %v2942_v43 = vpop.f32.mrf.mxu0 }
 0x42b   : > { %v3006_v26 = vadd.f32 %v2942_v43, %v2723_v15  ;;  %v3173_v46 = vmin.f32 %v3132_v57, 6.0 }
 0x42d   : > { %v3049_v40 = vmul.f32 %v11382_v44, %v3006_v26 }
 0x42f   : > { %v3092_v58 = vadd.f32 %v11388_v49, %v3049_v40  ;;  %v13920_v40 = vld [vmem:[#allocation41_spill] sm:$0xff] }
 0x431   : > { %v3133_v22 = vmax.f32 %v3092_v58, 0.0 }
 0x432   : > { %v2945_v50 = vpop.f32.mrf.mxu0 }
 0x433   : > { %v3007_v11 = vadd.f32 %v2945_v50, %v11295_v10  ;;  %v3174_v30 = vmin.f32 %v3133_v22, 6.0  ;;  %v2162_v10 = vadd.f32 %v11304_v47, %v11307_v13  ;;  %v13921_v50 = vld [vmem:[#allocation38_spill] sm:$0xff] }
 0x435   : > { %v3201_v51 = vpack.c.bf16 %v3174_v30, %v3173_v46  ;;  %v3050_v54 = vmul.f32 %v11382_v44, %v3007_v11  ;;  %v2392_v2 = vadd.f32 %v13916_v52, %v2162_v10 }
 0x437   : > { %v3093_v42 = vadd.f32 %v11388_v49, %v3050_v54  ;;  %v2727_v62 = vadd.f32 %v13917_v7, %v2392_v2 }
 0x439   : > { %v3134_v35 = vmax.f32 %v3093_v42, 0.0  ;;  %v13923_v42 = vld [vmem:[#allocation42_spill] sm:$0xff] }
 0x43a   : > { %v2947_v56 = vpop.f32.mrf.mxu0 }
 0x43b   : > { %v3008_v4 = vadd.f32 %v2947_v56, %v2725_v6  ;;  %v3175_v36 = vmin.f32 %v3134_v35, 6.0  ;;  %v13922_v56 = vld [vmem:[#allocation39_spill] sm:$0xff] }
 0x43c   : > { %v13924_v35 = vld [vmem:[#allocation43_spill] sm:$0xff] }
 0x43d   : > { %v3051_v55 = vmul.f32 %v11382_v44, %v3008_v4  ;;  %v2166_v4 = vadd.f32 %v13923_v42, %v13922_v56  ;;  %v8256_v56 = vld [vmem:[%s13691_s4] sm:$0xf]  ;;  %v9850_v42 = vld [vmem:[%s13691_s4 + $0x8] sm:$0xf0] }
 0x43f   : > { %v3094_v27 = vadd.f32 %v11388_v49, %v3051_v55 }
 0x441   : > { %v3135_v3 = vmax.f32 %v3094_v27, 0.0 }
 0x442   : > { %v2950_v5 = vpop.f32.mrf.mxu0 }
 0x443   : > { %v3009_v39 = vadd.f32 %v2950_v5, %v11309_v37  ;;  %v3176_v28 = vmin.f32 %v3135_v3, 6.0  ;;  %v13918_v37 = vld [vmem:[#allocation34_spill] sm:$0xff]  ;;  %v13925_v5 = vld [vmem:[#allocation44_spill] sm:$0xff] }
 0x444   : > { %v2164_v17 = vadd.f32 %v13918_v37, %v11321_v23  ;;  %v2396_v10 = vadd.f32 %v13925_v5, %v2166_v4  ;;  %v13932_v37 = vld [vmem:[#allocation53_spill] sm:$0xff]  ;;  %v8257_v4 = vor.u32 %v9850_v42, %v8256_v56  ;;  %v9863_v42 = vld [vmem:[%s13691_s4 + $0x70] sm:$0xf0] }
 0x445   : > { %v3202_v8 = vpack.c.bf16 %v3176_v28, %v3175_v36  ;;  %v3052_v45 = vmul.f32 %v11382_v44, %v3009_v39  ;;  %v13926_v39 = vld [vmem:[#allocation47_spill] sm:$0xff]  ;;  %v8312_v56 = vld [vmem:[%s13691_s4 + $0x68] sm:$0xf] }
 0x446   : > { %v2394_v57 = vadd.f32 %v13920_v40, %v2164_v17  ;;  %v2731_v28 = vadd.f32 %v13926_v39, %v2396_v10  ;;  %v13933_v17 = vld [vmem:[#allocation52_spill] sm:$0xff]  ;;  %3398 = vmatmul.bf16.vlgmr.msra.gmra.mxu1 %v8257_v4  ;;  %v13937_v39 = vld [vmem:[#allocation57_spill] sm:$0xff]  ;;  %v8313_v4 = vor.u32 %v9863_v42, %v8312_v56 }
 0x447   : > { %v3095_v19 = vadd.f32 %v11388_v49, %v3052_v45  ;;  %v13928_v45 = vld [vmem:[#allocation46_spill] sm:$0xff]  ;;  %v9922_v42 = vld [vmem:[%s13688_s1 + $0x3c8] sm:$0xff] }
 0x448   : > { %v2729_v29 = vadd.f32 %v13921_v50, %v2394_v57  ;;  %v13935_v57 = vld [vmem:[#allocation55_spill] sm:$0xff] }
 0x449   : > { %v3136_v63 = vmax.f32 %v3095_v19, 0.0 }
 0x44a   : > { %v2952_v33 = vpop.f32.mrf.mxu0 }
 0x44b   : > { %v3010_v61 = vadd.f32 %v2952_v33, %v2727_v62  ;;  %v3177_v15 = vmin.f32 %v3136_v63, 6.0  ;;  %v13929_v33 = vld [vmem:[#allocation49_spill] sm:$0xff] }
 0x44d   : > { %v3053_v53 = vmul.f32 %v11382_v44, %v3010_v61 }
 0x44f   : > { %v3096_v47 = vadd.f32 %v11388_v49, %v3053_v53 }
 0x451   : > { %v3137_v13 = vmax.f32 %v3096_v47, 0.0 }
 0x452   : > { %v2955_v18 = vpop.f32.mrf.mxu0 }
 0x453   : > { %v3178_v43 = vmin.f32 %v3137_v13, 6.0  ;;  %v3011_v26 = vadd.f32 %v2955_v18, %v13919_v31  ;;  %v13934_v31 = vld [vmem:[#allocation54_spill] sm:$0xff] }
 0x455   : > { %v3203_v58 = vpack.c.bf16 %v3178_v43, %v3177_v15  ;;  %v3054_v22 = vmul.f32 %v11382_v44, %v3011_v26  ;;  %v2170_v15 = vadd.f32 %v13933_v17, %v13932_v37  ;;  %v8306_v37 = vld [vmem:[%s13691_s4 + $0x6c] sm:$0xf0] }
 0x457   : > { %3439 = vmatpush.bf16.msra.mxu2 %v3203_v58  ;;  %v3097_v11 = vadd.f32 %v11388_v49, %v3054_v22  ;;  %v2400_v58 = vadd.f32 %v13935_v57, %v2170_v15  ;;  %v8288_v15 = vld [vmem:[%s13691_s4 + $0x38] sm:$0xf] }
 0x459   : > { %v3138_v23 = vmax.f32 %v3097_v11, 0.0 }
 0x45a   : > { %v2957_v46 = vpop.f32.mrf.mxu0 }
 0x45b   : > { %v3012_v30 = vadd.f32 %v2957_v46, %v2729_v29  ;;  %3440 = vmatpush.bf16.msra.mxu2 %v3202_v8  ;;  %v11613_v55 = vmin.f32 %v3138_v23, 6.0  ;;  %v9849_v29 = vld [vmem:[%s13691_s4 + $0x4] sm:$0xf]  ;;  %v8258_v46 = vld [vmem:[%s13691_s4 + $0xc] sm:$0xf0] }
 0x45c   : > { %v8261_v11 = vor.u32 %v9849_v29, %v8258_v46  ;;  %v8300_v29 = vld [vmem:[%s13691_s4 + $0x50] sm:$0xf]  ;;  %v9860_v46 = vld [vmem:[%s13691_s4 + $0x58] sm:$0xf0] }
 0x45d   : > { %v3055_v21 = vmul.f32 %v11382_v44, %v3012_v30  ;;  %v13936_v30 = vld [vmem:[#allocation56_spill] sm:$0xff] }
 0x45f   : > { %v3098_v54 = vadd.f32 %v11388_v49, %v3055_v21  ;;  %3441 = vmatpush.bf16.msra.mxu2 %v3201_v51  ;;  %v2735_v21 = vadd.f32 %v13936_v30, %v2400_v58  ;;  %v9864_v58 = vld [vmem:[%s13691_s4 + $0x7c] sm:$0xf]  ;;  %v9865_v30 = vld [vmem:[%s13691_s4 + $0x80] sm:$0xf0] }
 0x461   : > { %v3139_v12 = vmax.f32 %v3098_v54, 0.0 }
 0x462   : > { %v2960_v6 = vpop.f32.mrf.mxu0 }
 0x463   : > { %v3013_v27 = vadd.f32 %v2960_v6, %v13924_v35  ;;  %3442 = vmatpush.bf16.msra.mxu2 %v3200_v20  ;;  %v11619_v3 = vmin.f32 %v3139_v12, 6.0 }
 0x465   : > { %v3204_v51 = vpack.c.bf16 %v11619_v3, %v11613_v55  ;;  %v3056_v36 = vmul.f32 %v11382_v44, %v3013_v27  ;;  %v9854_v55 = vld [vmem:[%s13691_s4 + $0x28] sm:$0xf0]  ;;  %v8292_v3 = vld [vmem:[%s13691_s4 + $0x48] sm:$0xf] }
 0x467   : > { %3443 = vmatpush.bf16.msra.mxu2 %v3199_v1  ;;  %v3099_v2 = vadd.f32 %v11388_v49, %v3056_v36  ;;  %v13927_v1 = vld [vmem:[#allocation48_spill] sm:$0xff] }
 0x468   : > { %v2168_v7 = vadd.f32 %v13928_v45, %v13927_v1 }
 0x469   : > { %v3140_v20 = vmax.f32 %v3099_v2, 0.0  ;;  %v9852_v2 = vld [vmem:[%s13691_s4 + $0x1c] sm:$0xf] }
 0x46a   : > { %v2962_v52 = vpop.f32.mrf.mxu0 }
 0x46b   : > { %v3014_v24 = vadd.f32 %v2962_v52, %v2731_v28  ;;  %3444 = vmatpush.bf16.msra.mxu2 %v3198_v41  ;;  %v11640_v62 = vmin.f32 %v3140_v20, 6.0  ;;  %v2398_v41 = vadd.f32 %v13930_v9, %v2168_v7 }
 0x46d   : > { %v3057_v14 = vmul.f32 %v11382_v44, %v3014_v24  ;;  %v8270_v24 = vld [vmem:[%s13691_s4 + $0x24] sm:$0xf0] }
 0x46f   : > { %v3100_v8 = vadd.f32 %v11388_v49, %v3057_v14  ;;  %3445 = vmatpush.bf16.msra.mxu2 %v3197_v25  ;;  %v13931_v25 = vld [vmem:[#allocation51_spill] sm:$0xff] }
 0x470   : > { %v2733_v61 = vadd.f32 %v13931_v25, %v2398_v41  ;;  %v8264_v41 = vld [vmem:[%s13691_s4 + $0x8] sm:$0xf]  ;;  %v8280_v25 = vld [vmem:[%s13691_s4 + $0x30] sm:$0xf] }
 0x471   : > { %v3141_v60 = vmax.f32 %v3100_v8, 0.0  ;;  %v8273_v8 = vor.u32 %v9852_v2, %v8270_v24  ;;  %v9870_v2 = vld [vmem:[%s13691_s4 + $0xac] sm:$0xf]  ;;  %v8342_v24 = vld [vmem:[%s13691_s4 + $0xb4] sm:$0xf0] }
 0x472   : > { %v2965_v32 = vpop.f32.mrf.mxu0 }
 0x473   : > { %v3015_v19 = vadd.f32 %v2965_v32, %v13929_v33  ;;  %3446 = vmatpush.bf16.msra.mxu2 %v3196_v34  ;;  %v11646_v38 = vmin.f32 %v3141_v60, 6.0  ;;  %v9853_v33 = vld [vmem:[%s13691_s4 + $0x20] sm:$0xf0] }
 0x475   : > { %v3205_v59 = vpack.c.bf16 %v11646_v38, %v11640_v62  ;;  %v3058_v0 = vmul.f32 %v11382_v44, %v3015_v19  ;;  %v8268_v62 = vld [vmem:[%s13691_s4 + $0x18] sm:$0xf]  ;;  %v8282_v38 = vld [vmem:[%s13691_s4 + $0x3c] sm:$0xf0] }
 0x476   : > { %3447 = vmatmul.bf16.vlgmr.msra.gmra.mxu2 %v8261_v11  ;;  %v8269_v19 = vor.u32 %v9853_v33, %v8268_v62  ;;  %v8316_v11 = vld [vmem:[%s13691_s4 + $0x78] sm:$0xf]  ;;  %v9877_v62 = vld [vmem:[%s13688_s1 + $0x260] sm:$0xff] }
 0x477   : > { %v3101_v63 = vadd.f32 %v11388_v49, %v3058_v0  ;;  %v9851_v0 = vld [vmem:[%s13691_s4 + $0x10] sm:$0xf0] }
 0x478   : > { %3403 = vmatmul.bf16.gmra.mxu1 %v8269_v19  ;;  %v9876_v19 = vld [vmem:[%s13688_s1 + $0x258] sm:$0xff] }
 0x479   : > { %v3142_v18 = vmax.f32 %v3101_v63, 0.0  ;;  %v8265_v63 = vor.u32 %v9851_v0, %v8264_v41  ;;  %v9887_v41 = vld [vmem:[%s13688_s1 + $0x2b0] sm:$0xff] }
 0x47a   : > { %v2967_v53 = vpop.f32.mrf.mxu0  ;;  %v9895_v0 = vld [vmem:[%s13688_s1 + $0x2f0] sm:$0xff] }
 0x47b   : > { %v3016_v47 = vadd.f32 %v2967_v53, %v2733_v61  ;;  %v3183_v43 = vmin.f32 %v3142_v18, 6.0  ;;  %v9856_v61 = vld [vmem:[%s13691_s4 + $0x38] sm:$0xf0]  ;;  %v8276_v18 = vld [vmem:[%s13691_s4 + $0x20] sm:$0xf] }
 0x47c   : > { %v8281_v53 = vor.u32 %v9856_v61, %v8280_v25  ;;  %v9874_v25 = vld [vmem:[%s13688_s1 + $0x248] sm:$0xff]  ;;  %v8348_v61 = vld [vmem:[%s13691_s4 + $0xb0] sm:$0xf] }
 0x47d   : > { %v3059_v13 = vmul.f32 %v11382_v44, %v3016_v47  ;;  %v8294_v47 = vld [vmem:[%s13691_s4 + $0x54] sm:$0xf0] }
 0x47f   : > { %v3102_v48 = vadd.f32 %v11388_v49, %v3059_v13 }
 0x481   : > { %v3143_v16 = vmax.f32 %v3102_v48, 0.0 }
 0x482   : > { %v2970_v34 = vpop.f32.mrf.mxu0 }
 0x483   : > { %v3017_v26 = vadd.f32 %v2970_v34, %v13934_v31  ;;  %v3184_v40 = vmin.f32 %v3143_v16, 6.0  ;;  %v8277_v16 = vor.u32 %v9854_v55, %v8276_v18  ;;  %v9861_v34 = vld [vmem:[%s13691_s4 + $0x64] sm:$0xf]  ;;  %v8304_v31 = vld [vmem:[%s13691_s4 + $0x60] sm:$0xf]  ;;  %v9886_v55 = vld [vmem:[%s13688_s1 + $0x2a8] sm:$0xff] }
 0x484   : > { %v8309_v17 = vor.u32 %v9861_v34, %v8306_v37 }
 0x485   : > { %v3206_v22 = vpack.c.bf16 %v3184_v40, %v3183_v43  ;;  %v3060_v50 = vmul.f32 %v11382_v44, %v3017_v26  ;;  %v9857_v43 = vld [vmem:[%s13691_s4 + $0x40] sm:$0xf0]  ;;  %v9862_v26 = vld [vmem:[%s13691_s4 + $0x68] sm:$0xf0] }
 0x486   : > { %3452 = vmatmul.bf16.gmra.mxu2 %v8273_v8  ;;  %v8305_v40 = vor.u32 %v9862_v26, %v8304_v31  ;;  %v8289_v57 = vor.u32 %v9857_v43, %v8288_v15  ;;  %v9871_v8 = vld [vmem:[%s13691_s4 + $0xb0] sm:$0xf0]  ;;  %v9890_v26 = vld [vmem:[%s13688_s1 + $0x2c8] sm:$0xff] }
 0x487   : > { %v3103_v54 = vadd.f32 %v11388_v49, %v3060_v50  ;;  %v9891_v15 = vld [vmem:[%s13688_s1 + $0x2d0] sm:$0xff] }
 0x488   : > { %3408 = vmatmul.bf16.gmra.mxu1 %v8281_v53  ;;  %v9872_v53 = vld [vmem:[%s13691_s4 + $0xb8] sm:$0xf0]  ;;  %v9927_v43 = vld [vmem:[%s13688_s1 + $0x3f0] sm:$0xff] }
 0x489   : > { %v3144_v35 = vmax.f32 %v3103_v54, 0.0  ;;  %v9867_v54 = vld [vmem:[%s13691_s4 + $0x94] sm:$0xf]  ;;  %v8349_v18 = vor.u32 %v9872_v53, %v8348_v61 }
 0x48a   : > { %v2972_v23 = vpop.f32.mrf.mxu0  ;;  %v9883_v31 = vld [vmem:[%s13688_s1 + $0x290] sm:$0xff] }
 0x48b   : > { %v3018_v12 = vadd.f32 %v2972_v23, %v2735_v21  ;;  %v3185_v36 = vmin.f32 %v3144_v35, 6.0  ;;  %v8317_v21 = vor.u32 %v9865_v30, %v8316_v11  ;;  %v8301_v23 = vor.u32 %v9860_v46, %v8300_v29  ;;  %v8328_v35 = vld [vmem:[%s13691_s4 + $0x90] sm:$0xf]  ;;  %v9889_v29 = vld [vmem:[%s13688_s1 + $0x2c0] sm:$0xff]  ;;  %v9924_v30 = vld [vmem:[%s13688_s1 + $0x3d8] sm:$0xff] }
 0x48c   : > { %v9925_v46 = vld [vmem:[%s13688_s1 + $0x3e0] sm:$0xff] }
 0x48d   : > { %v3061_v6 = vmul.f32 %v11382_v44, %v3018_v12  ;;  %v8330_v12 = vld [vmem:[%s13691_s4 + $0x9c] sm:$0xf0] }
 0x48f   : > { %v3104_v27 = vadd.f32 %v11388_v49, %v3061_v6  ;;  %v8333_v6 = vor.u32 %v9867_v54, %v8330_v12 }
 0x491   : > { %v3145_v5 = vmax.f32 %v3104_v27, 0.0  ;;  %v9868_v27 = vld [vmem:[%s13691_s4 + $0x98] sm:$0xf0] }
 0x492   : > { %v2975_v10 = vpop.f32.mrf.mxu0 }
 0x493   : > { %v3019_v28 = vadd.f32 %v2975_v10, %v13937_v39  ;;  %v3186_v52 = vmin.f32 %v3145_v5, 6.0  ;;  %v9880_v5 = vld [vmem:[%s13688_s1 + $0x278] sm:$0xff]  ;;  %v8329_v10 = vor.u32 %v9868_v27, %v8328_v35  ;;  %v8324_v39 = vld [vmem:[%s13691_s4 + $0x80] sm:$0xf] }
 0x494   : > { %3779 = vmatpush.bf16.msrb.mxu2 %v9880_v5  ;;  %v9921_v5 = vld [vmem:[%s13688_s1 + $0x3c0] sm:$0xff] }
 0x495   : > { %v3062_v14 = vmul.f32 %v11382_v44, %v3019_v28  ;;  %v3207_v20 = vpack.c.bf16 %v3186_v52, %v3185_v36  ;;  %v9879_v36 = vld [vmem:[%s13688_s1 + $0x270] sm:$0xff]  ;;  %v9866_v28 = vld [vmem:[%s13691_s4 + $0x88] sm:$0xf0] }
 0x496   : > { %v8325_v52 = vor.u32 %v9866_v28, %v8324_v39 }
 0x497   : > { %v3105_v60 = vadd.f32 %v11388_v49, %v3062_v14  ;;  %v9855_v49 = vld [vmem:[%s13691_s4 + $0x34] sm:$0xf]  ;;  %v8345_v14 = vor.u32 %v9870_v2, %v8342_v24 }
 0x498   : > { %v8285_v9 = vor.u32 %v9855_v49, %v8282_v38  ;;  %3780 = vmatpush.bf16.msrb.mxu2 %v9879_v36  ;;  %v9896_v49 = vld [vmem:[%s13688_s1 + $0x2f8] sm:$0xff] }
 0x499   : > { %v3146_v32 = vmax.f32 %v3105_v60, 0.0  ;;  %v9888_v38 = vld [vmem:[%s13688_s1 + $0x2b8] sm:$0xff] }
 0x49a   : > { %v2977_v1 = vpop.f32.mrf.mxu0  ;;  %3457 = vmatmul.bf16.gmra.mxu2 %v8285_v9  ;;  %v9875_v9 = vld [vmem:[%s13688_s1 + $0x250] sm:$0xff]  ;;  %3688 = vmatpush.bf16.msrb.mxu1 %v9888_v38 }
 0x49b   : > { %v3187_v45 = vmin.f32 %v3146_v32, 6.0  ;;  %v9878_v32 = vld [vmem:[%s13688_s1 + $0x268] sm:$0xff]  ;;  %v8336_v1 = vld [vmem:[%s13691_s4 + $0x98] sm:$0xf] }
 0x49c   : > { %3781 = vmatpush.bf16.msrb.mxu2 %v9878_v32 }
 0x49d   : > { %v3208_v7 = vpack.c.bf16 %v3187_v45, %v3187_v45  ;;  %v9869_v45 = vld [vmem:[%s13691_s4 + $0xa0] sm:$0xf0] }
 0x49e   : > { %3689 = vmatpush.bf16.msrb.mxu1 %v9887_v41 }
 0x49f   : > { %v3388_v44 = vsel %vm3386_vm6, %v3208_v7, 0  ;;  %v8337_v7 = vor.u32 %v9869_v45, %v8336_v1 }
 0x4a0   : > { %3491 = vmatpush.bf16.msra.mxu3 %v3388_v44  ;;  %3782 = vmatpush.bf16.msrb.mxu2 %v9877_v62 }
 0x4a2   : > { %3690 = vmatpush.bf16.msrb.mxu1 %v9886_v55 }
 0x4a4   : > { %3492 = vmatpush.bf16.msra.mxu3 %v3207_v20  ;;  %v8340_v20 = vld [vmem:[%s13691_s4 + $0xa8] sm:$0xf]  ;;  %3783 = vmatpush.bf16.msrb.mxu2 %v9876_v19 }
 0x4a5   : > { %v8341_v60 = vor.u32 %v9871_v8, %v8340_v20 }
 0x4a8   : > { %3493 = vmatpush.bf16.msra.mxu3 %v3206_v22  ;;  %v8318_v22 = vld [vmem:[%s13691_s4 + $0x84] sm:$0xf0]  ;;  %3784 = vmatpush.bf16.msrb.mxu2 %v9875_v9 }
 0x4a9   : > { %v8321_v50 = vor.u32 %v9864_v58, %v8318_v22 }
 0x4ac   : > { %3494 = vmatpush.bf16.msra.mxu3 %v3205_v59  ;;  %v9858_v59 = vld [vmem:[%s13691_s4 + $0x4c] sm:$0xf]  ;;  %3785 = vmatpush.bf16.msrb.mxu2 %v9874_v25 }
 0x4ad   : > { %v8297_v13 = vor.u32 %v9858_v59, %v8294_v47  ;;  %v9894_v47 = vld [vmem:[%s13688_s1 + $0x2e8] sm:$0xff] }
 0x4af   : > { %3462 = vmatmul.bf16.gmra.mxu2 %v8297_v13  ;;  %v9873_v13 = vld [vmem:[%s13688_s1 + $0x240] sm:$0xff] }
 0x4b0   : > { %3495 = vmatpush.bf16.msra.mxu3 %v3204_v51  ;;  %v9859_v51 = vld [vmem:[%s13691_s4 + $0x50] sm:$0xf0]  ;;  %3786 = vmatpush.bf16.msrb.mxu2 %v9873_v13 }
 0x4b1   : > { %v8293_v48 = vor.u32 %v9859_v51, %v8292_v3  ;;  %v9893_v3 = vld [vmem:[%s13688_s1 + $0x2e0] sm:$0xff] }
 0x4b2   : > { %v9885_v51 = vld [vmem:[%s13688_s1 + $0x2a0] sm:$0xff] }
 0x4b3   : > { %8350 = vmatmul.msk.bf16.vlgmr.msra.gmra.mxu3 %vm3361_vm7, %v8265_v63  ;;  %3413 = vmatmul.bf16.gmra.mxu1 %v8293_v48  ;;  %v9892_v48 = vld [vmem:[%s13688_s1 + $0x2d8] sm:$0xff] }
 0x4b4   : > { %3914 = vmatpush.bf16.msrb.mxu3 %v9896_v49  ;;  %3691 = vmatpush.bf16.msrb.mxu1 %v9885_v51 }
 0x4b8   : > { %3915 = vmatpush.bf16.msrb.mxu3 %v9895_v0 }
 0x4bc   : > { %3916 = vmatpush.bf16.msrb.mxu3 %v9894_v47 }
 0x4bf   : > { %3467 = vmatmul.bf16.gmra.mxu2 %v8309_v17  ;;  %v9884_v17 = vld [vmem:[%s13688_s1 + $0x298] sm:$0xff] }
 0x4c0   : > { %3917 = vmatpush.bf16.msrb.mxu3 %v9893_v3  ;;  %3692 = vmatpush.bf16.msrb.mxu1 %v9884_v17 }
 0x4c3   : > { %8351 = vmatmul.msk.bf16.gmra.mxu3 %vm3361_vm7, %v8277_v16  ;;  %3418 = vmatmul.bf16.gmra.mxu1 %v8305_v40  ;;  %v3399_v44 = vpop.f32.mrf.mxu1  ;;  %v9928_v16 = vld [vmem:[%s13688_s1 + $0x3f8] sm:$0xff]  ;;  %v9926_v40 = vld [vmem:[%s13688_s1 + $0x3e8] sm:$0xff] }
 0x4c4   : > { %3918 = vmatpush.bf16.msrb.mxu3 %v9892_v48  ;;  %4545 = vmatpush.bf16.msrb.mxu0 %v9928_v16 }
 0x4c5   : > { %3693 = vmatpush.bf16.msrb.mxu1 %v9883_v31 }
 0x4c8   : > { %3919 = vmatpush.bf16.msrb.mxu3 %v9891_v15  ;;  %4546 = vmatpush.bf16.msrb.mxu0 %v9927_v43 }
 0x4cb   : > { %v3401_v59 = vpop.f32.mrf.mxu1 }
 0x4cc   : > { %3920 = vmatpush.bf16.msrb.mxu3 %v9890_v26  ;;  %4547 = vmatpush.bf16.msrb.mxu0 %v9926_v40 }
 0x4cf   : > { %3472 = vmatmul.bf16.gmra.mxu2 %v8321_v50  ;;  %v9881_v50 = vld [vmem:[%s13688_s1 + $0x280] sm:$0xff] }
 0x4d0   : > { %3921 = vmatpush.bf16.msrb.mxu3 %v9889_v29  ;;  %4548 = vmatpush.bf16.msrb.mxu0 %v9925_v46 }
 0x4d3   : > { %8352 = vmatmul.msk.bf16.gmra.mxu3 %vm3361_vm7, %v8289_v57  ;;  %3423 = vmatmul.bf16.gmra.mxu1 %v8317_v21  ;;  %v9882_v57 = vld [vmem:[%s13688_s1 + $0x288] sm:$0xff]  ;;  %v9923_v21 = vld [vmem:[%s13688_s1 + $0x3d0] sm:$0xff] }
 0x4d4   : > { %3694 = vmatpush.bf16.msrb.mxu1 %v9882_v57  ;;  %4549 = vmatpush.bf16.msrb.mxu0 %v9924_v30 }
 0x4d8   : > { %3695 = vmatpush.bf16.msrb.mxu1 %v9881_v50  ;;  %4550 = vmatpush.bf16.msrb.mxu0 %v9923_v21 }
 0x4dc   : > { %4551 = vmatpush.bf16.msrb.mxu0 %v9922_v42 }
 0x4df   : > { %3477 = vmatmul.bf16.gmra.mxu2 %v8333_v6 }
 0x4e0   : > { %4552 = vmatpush.bf16.msrb.mxu0 %v9921_v5 }
 0x4e3   : > { %8353 = vmatmul.msk.bf16.gmra.mxu3 %vm3361_vm7, %v8301_v23  ;;  %3428 = vmatmul.bf16.gmra.mxu1 %v8329_v10 }
 0x4ef   : > { %3482 = vmatmul.bf16.gmra.mxu2 %v8345_v14 }
 0x4f3   : > { %8354 = vmatmul.msk.bf16.gmra.mxu3 %vm3361_vm7, %v8313_v4  ;;  %3433 = vmatmul.bf16.gmra.mxu1 %v8341_v60 }
 0x4f5   : > { %v3404_v37 = vpop.f32.mrf.mxu1 }
 0x4f9   : > { %v11829_v33 = vpop.f32.mrf.mxu2 }
 0x4fa   : > { %v3449_v23 = vadd.f32 %v11829_v33, %v3399_v44 }
 0x4fd   : > { %v3406_v22 = vpop.f32.mrf.mxu1 }
 0x501   : > { %v3450_v63 = vpop.f32.mrf.mxu2 }
 0x502   : > { %v3451_v6 = vadd.f32 %v3450_v63, %v3401_v59 }
 0x503   : > { %8355 = vmatmul.msk.bf16.gmra.mxu3 %vm3361_vm7, %v8325_v52 }
 0x505   : > { %v3409_v12 = vpop.f32.mrf.mxu1 }
 0x509   : > { %v3453_v34 = vpop.f32.mrf.mxu2 }
 0x50a   : > { %v3454_v10 = vadd.f32 %v3453_v34, %v3404_v37 }
 0x50d   : > { %v3411_v28 = vpop.f32.mrf.mxu1 }
 0x511   : > { %v3455_v58 = vpop.f32.mrf.mxu2 }
 0x512   : > { %v3456_v14 = vadd.f32 %v3455_v58, %v3406_v22 }
 0x513   : > { %8356 = vmatmul.msk.bf16.gmra.mxu3 %vm3361_vm7, %v8337_v7 }
 0x51d   : > { %v3458_v54 = vpop.f32.mrf.mxu2 }
 0x51e   : > { %v3459_v62 = vadd.f32 %v3458_v54, %v3409_v12 }
 0x523   : > { %8357 = vmatmul.msk.bf16.gmra.mxu3 %vm3361_vm7, %v8349_v18 }
 0x525   : > { %v3460_v36 = vpop.f32.mrf.mxu2 }
 0x526   : > { %v3461_v31 = vadd.f32 %v3460_v36, %v3411_v28 }
 0x530   : > { %v3414_v1 = vpop.f32.mrf.mxu1 }
 0x532   : > { %v3463_v60 = vpop.f32.mrf.mxu2 }
 0x533   : > { %v3464_v21 = vadd.f32 %v3463_v60, %v3414_v1 }
 0x536   : > { %v3497_v11 = vpop.f32.mrf.mxu3 }
 0x537   : > { %v3498_v4 = vadd.f32 %v3497_v11, %v3449_v23 }
 0x538   : > { %v3416_v48 = vpop.f32.mrf.mxu1 }
 0x53a   : > { %v3465_v55 = vpop.f32.mrf.mxu2 }
 0x53e   : > { %v3499_v56 = vpop.f32.mrf.mxu3 }
 0x53f   : > { %v3500_v35 = vadd.f32 %v3499_v56, %v3451_v6 }
 0x541   : > { %v3537_v27 = vpack.c.bf16 %v3500_v35, %v3498_v4  ;;  %v3419_v4 = vpop.f32.mrf.mxu1 }
 0x542   : > { %v3468_v54 = vpop.f32.mrf.mxu2 }
 0x543   : > { %3787 = vmatmul.bf16.vlgmr.msrb.gmra.mxu2 %v3537_v27  ;;  %v3581_v24 = vshll.u32 %v3537_v27, 16  ;;  %v3579_v7 = vshrl.u32 %v3537_v27, 16  ;;  %v3846_v44 = vrot.slane %v3537_v27, 1 }
 0x545   : > { %v3583_v32 = vrot.slane %v3581_v24, 1 }
 0x546   : > { %v3502_v39 = vpop.f32.mrf.mxu3 }
 0x547   : > { %v3503_v52 = vadd.f32 %v3502_v39, %v3454_v10  ;;  %v3584_v38 = vor.u32 %v3583_v32, %v3579_v7 }
 0x549   : > { %v3970_v2 = vpack.c.bf16 %v3503_v52, %v3500_v35 }
 0x54b   : > { %v4143_v61 = vshrl.u32 %v3970_v2, 16  ;;  %v4146_v53 = vshll.u32 %v3970_v2, 16  ;;  %v4001_v16 = vrot.slane %v3970_v2, 1  ;;  %v4332_v34 = vrot.slane %v3970_v2, 2 }
 0x54d   : > { %v4145_v3 = vrot.slane %v4143_v61, 1  ;;  %v4148_v51 = vrot.slane %v4146_v53, 2 }
 0x54e   : > { %v3504_v20 = vpop.f32.mrf.mxu3 }
 0x54f   : > { %v3505_v8 = vadd.f32 %v3504_v20, %v3456_v14  ;;  %v4149_v29 = vor.u32 %v4148_v51, %v4145_v3 }
 0x551   : > { %v11923_v45 = vpack.c.bf16 %v3505_v8, %v3503_v52 }
 0x553   : > { %v3586_v33 = vshll.u32 %v11923_v45, 16  ;;  %3792 = vmatmul.bf16.gmra.mxu2 %v11923_v45  ;;  %v3590_v19 = vshrl.u32 %v11923_v45, 16  ;;  %v3847_v49 = vrot.slane %v11923_v45, 1  ;;  %v4477_v35 = vrot.slane %v11923_v45, 2 }
 0x554   : > { %v4785_v27 = vrot.slane %v11923_v45, 3 }
 0x555   : > { %v3588_v9 = vrot.slane %v3586_v33, 1  ;;  %v4619_v41 = vrot.slane %v3590_v19, 2  ;;  %v3848_v0 = vsel %vm1061_vm1, %v3846_v44, %v3847_v49  ;;  %v4620_v25 = vrot.slane %v3586_v33, 3 }
 0x556   : > { %v3507_v63 = vpop.f32.mrf.mxu3  ;;  %3922 = vmatmul.bf16.vlgmr.msrb.gmra.mxu3 %v3848_v0  ;;  %v3466_v33 = vadd.f32 %v3465_v55, %v3416_v48  ;;  %v3421_v0 = vpop.f32.mrf.mxu1 }
 0x557   : > { %v3508_v59 = vadd.f32 %v3507_v63, %v3459_v62  ;;  %v3589_v47 = vsel %vm512_vm0, %v3584_v38, %v3588_v9  ;;  %v4621_v13 = vor.u32 %v4620_v25, %v4619_v41  ;;  %v3592_v42 = vor.u32 %v3590_v19, %v3588_v9  ;;  %v3470_v19 = vpop.f32.mrf.mxu2 }
 0x558   : > { %3696 = vmatmul.bf16.vlgmr.msrb.gmra.mxu1 %v3589_v47 }
 0x559   : > { %v3971_v18 = vpack.c.bf16 %v3508_v59, %v3505_v8 }
 0x55b   : > { %v4151_v37 = vshrl.u32 %v3971_v18, 16  ;;  %v4154_v17 = vshll.u32 %v3971_v18, 16  ;;  %v4002_v15 = vrot.slane %v3971_v18, 1  ;;  %v4333_v43 = vrot.slane %v3971_v18, 2  ;;  %v9912_v18 = vld [vmem:[%s13688_s1 + $0x378] sm:$0xff] }
 0x55c   : > { %4259 = vmatpush.bf16.msra.mxu2 %v9912_v18  ;;  %v9907_v18 = vld [vmem:[%s13688_s1 + $0x350] sm:$0xff] }
 0x55d   : > { %v4153_v26 = vrot.slane %v4151_v37, 1  ;;  %v4156_v40 = vrot.slane %v4154_v17, 2  ;;  %v11932_v57 = vsel %vm1061_vm1, %v4001_v16, %v4002_v15  ;;  %v11935_v58 = vsel %vm1907_vm3, %v4332_v34, %v4333_v43 }
 0x55e   : > { %v3509_v22 = vpop.f32.mrf.mxu3 }
 0x55f   : > { %v3510_v50 = vadd.f32 %v3509_v22, %v3461_v31  ;;  %v4157_v46 = vor.u32 %v4156_v40, %v4153_v26  ;;  %v3473_v22 = vpop.f32.mrf.mxu2 }
 0x561   : > { %v11937_v11 = vpack.c.bf16 %v3510_v50, %v3508_v59  ;;  %v11940_v30 = vsel %vm1573_vm2, %v4149_v29, %v4157_v46  ;;  %v3469_v59 = vadd.f32 %v3468_v54, %v3419_v4  ;;  %v3424_v29 = vpop.f32.mrf.mxu1 }
 0x563   : > { %v3594_v23 = vshll.u32 %v11937_v11, 16  ;;  %3797 = vmatmul.bf16.gmra.mxu2 %v11937_v11  ;;  %v3598_v12 = vshrl.u32 %v11937_v11, 16  ;;  %v3849_v6 = vrot.slane %v11937_v11, 1  ;;  %v4478_v56 = vrot.slane %v11937_v11, 2 }
 0x564   : > { %v4786_v5 = vrot.slane %v11937_v11, 3 }
 0x565   : > { %v3596_v10 = vrot.slane %v3594_v23, 1  ;;  %v4623_v36 = vrot.slane %v3594_v23, 3  ;;  %v4622_v39 = vrot.slane %v3598_v12, 2  ;;  %v3850_v28 = vsel %vm1061_vm1, %v3847_v49, %v3849_v6 }
 0x566   : > { %v3512_v52 = vpop.f32.mrf.mxu3  ;;  %3927 = vmatmul.bf16.gmra.mxu3 %v3850_v28  ;;  %v4479_v2 = vsel %vm1907_vm3, %v4477_v35, %v4478_v56  ;;  %v11953_v24 = vsel %vm2755_vm5, %v4785_v27, %v4786_v5 }
 0x567   : > { %v3513_v14 = vadd.f32 %v3512_v52, %v3464_v21  ;;  %v3597_v20 = vsel %vm512_vm0, %v3592_v42, %v3596_v10  ;;  %4553 = vmatmul.bf16.vlgmr.msrb.gmra.mxu0 %v4479_v2  ;;  %v4624_v8 = vor.u32 %v4623_v36, %v4622_v39  ;;  %v3600_v51 = vor.u32 %v3598_v12, %v3596_v10  ;;  %v9910_v21 = vld [vmem:[%s13688_s1 + $0x368] sm:$0xff]  ;;  %v9909_v39 = vld [vmem:[%s13688_s1 + $0x360] sm:$0xff]  ;;  %v3475_v2 = vpop.f32.mrf.mxu2 }
 0x568   : > { %3701 = vmatmul.bf16.gmra.mxu1 %v3597_v20  ;;  %v3471_v42 = vadd.f32 %v3470_v19, %v3421_v0  ;;  %v3474_v20 = vadd.f32 %v3473_v22, %v3424_v29 }
 0x569   : > { %v3972_v60 = vpack.c.bf16 %v3513_v14, %v3510_v50  ;;  %v11957_v32 = vsel %vm2420_vm4, %v4621_v13, %v4624_v8  ;;  %v9911_v50 = vld [vmem:[%s13688_s1 + $0x370] sm:$0xff] }
 0x56a   : > { %4260 = vmatpush.bf16.msra.mxu2 %v9911_v50 }
 0x56b   : > { %v4160_v1 = vshrl.u32 %v3972_v60, 16  ;;  %v4163_v45 = vshll.u32 %v3972_v60, 16  ;;  %v4004_v7 = vrot.slane %v3972_v60, 1  ;;  %v4335_v62 = vrot.slane %v3972_v60, 2 }
 0x56d   : > { %v4162_v44 = vrot.slane %v4160_v1, 1  ;;  %v4165_v49 = vrot.slane %v4163_v45, 2  ;;  %v11960_v38 = vsel %vm1061_vm1, %v4002_v15, %v4004_v7  ;;  %v11963_v9 = vsel %vm1907_vm3, %v4333_v43, %v4335_v62  ;;  %v9908_v45 = vld [vmem:[%s13688_s1 + $0x358] sm:$0xff] }
 0x56e   : > { %v3514_v41 = vpop.f32.mrf.mxu3  ;;  %4261 = vmatpush.bf16.msra.mxu2 %v9910_v21 }
 0x56f   : > { %v3515_v25 = vadd.f32 %v3514_v41, %v3466_v33  ;;  %v4166_v61 = vor.u32 %v4165_v49, %v4162_v44 }
 0x571   : > { %v11965_v53 = vpack.c.bf16 %v3515_v25, %v3513_v14  ;;  %v11968_v63 = vsel %vm1573_vm2, %v4157_v46, %v4166_v61 }
 0x572   : > { %4262 = vmatpush.bf16.msra.mxu2 %v9909_v39  ;;  %v9901_v39 = vld [vmem:[%s13688_s1 + $0x320] sm:$0xff] }
 0x573   : > { %v3602_v47 = vshll.u32 %v11965_v53, 16  ;;  %3802 = vmatmul.bf16.gmra.mxu2 %v11965_v53  ;;  %v3606_v13 = vshrl.u32 %v11965_v53, 16  ;;  %v3851_v55 = vrot.slane %v11965_v53, 1  ;;  %v4480_v3 = vrot.slane %v11965_v53, 2 }
 0x574   : > { %v4788_v48 = vrot.slane %v11965_v53, 3 }
 0x575   : > { %v3604_v16 = vrot.slane %v3602_v47, 1  ;;  %v3852_v34 = vsel %vm1061_vm1, %v3849_v6, %v3851_v55  ;;  %v4481_v37 = vsel %vm1907_vm3, %v4478_v56, %v4480_v3  ;;  %v4626_v17 = vrot.slane %v3606_v13, 2 }
 0x576   : > { %v3517_v15 = vpop.f32.mrf.mxu3  ;;  %3932 = vmatmul.bf16.gmra.mxu3 %v3852_v34  ;;  %v11982_v43 = vsel %vm2755_vm5, %v4786_v5, %v4788_v48  ;;  %v4627_v31 = vrot.slane %v3602_v47, 3  ;;  %4263 = vmatpush.bf16.msra.mxu2 %v9908_v45 }
 0x577   : > { %v3518_v26 = vadd.f32 %v3517_v15, %v3469_v59  ;;  %v3605_v40 = vsel %vm512_vm0, %v3600_v51, %v3604_v16  ;;  %4558 = vmatmul.bf16.gmra.mxu0 %v4481_v37  ;;  %v3608_v33 = vor.u32 %v3606_v13, %v3604_v16  ;;  %v9906_v16 = vld [vmem:[%s13688_s1 + $0x348] sm:$0xff]  ;;  %v9903_v37 = vld [vmem:[%s13688_s1 + $0x330] sm:$0xff] }
 0x578   : > { %3706 = vmatmul.bf16.gmra.mxu1 %v3605_v40  ;;  %v4628_v46 = vor.u32 %v4627_v31, %v4626_v17  ;;  %v9919_v17 = vld [vmem:[%s13688_s1 + $0x3b0] sm:$0xff] }
 0x579   : > { %v11988_v11 = vpack.c.bf16 %v3518_v26, %v3515_v25 }
 0x57a   : > { %v11994_v23 = vsel %vm2420_vm4, %v4624_v8, %v4628_v46  ;;  %v3426_v8 = vpop.f32.mrf.mxu1  ;;  %4264 = vmatpush.bf16.msra.mxu2 %v9907_v18 }
 0x57b   : > { %v4169_v54 = vshrl.u32 %v11988_v11, 16  ;;  %v4172_v12 = vshll.u32 %v11988_v11, 16  ;;  %v4006_v6 = vrot.slane %v11988_v11, 1  ;;  %v4337_v56 = vrot.slane %v11988_v11, 2 }
 0x57c   : > { %v3476_v50 = vadd.f32 %v3475_v2, %v3426_v8  ;;  %v9917_v2 = vld [vmem:[%s13688_s1 + $0x3a0] sm:$0xff] }
 0x57d   : > { %v4171_v4 = vrot.slane %v4169_v54, 1  ;;  %v4174_v35 = vrot.slane %v4172_v12, 2  ;;  %v12003_v27 = vsel %vm1061_vm1, %v4004_v7, %v4006_v6  ;;  %v12008_v5 = vsel %vm1907_vm3, %v4335_v62, %v4337_v56 }
 0x57e   : > { %v3519_v10 = vpop.f32.mrf.mxu3  ;;  %4265 = vmatpush.bf16.msra.mxu2 %v9906_v16 }
 0x57f   : > { %v3520_v36 = vadd.f32 %v3519_v10, %v3471_v42  ;;  %v12013_v28 = vor.u32 %v4174_v35, %v4171_v4  ;;  %v9902_v42 = vld [vmem:[%s13688_s1 + $0x328] sm:$0xff] }
 0x580   : > { %v9918_v4 = vld [vmem:[%s13688_s1 + $0x3a8] sm:$0xff] }
 0x581   : > { %v12015_v52 = vpack.c.bf16 %v3520_v36, %v3518_v26  ;;  %v12019_v14 = vsel %vm1573_vm2, %v4166_v61, %v12013_v28  ;;  %v9920_v61 = vld [vmem:[%s13688_s1 + $0x3b8] sm:$0xff] }
 0x582   : > { %4400 = vmatpush.bf16.msra.mxu3 %v9920_v61  ;;  %v3429_v34 = vpop.f32.mrf.mxu1 }
 0x583   : > { %v3610_v60 = vshll.u32 %v12015_v52, 16  ;;  %3807 = vmatmul.bf16.gmra.mxu2 %v12015_v52  ;;  %v3614_v1 = vshrl.u32 %v12015_v52, 16  ;;  %v3853_v7 = vrot.slane %v12015_v52, 1  ;;  %v4482_v62 = vrot.slane %v12015_v52, 2 }
 0x584   : > { %v4790_v19 = vrot.slane %v12015_v52, 3  ;;  %v9899_v52 = vld [vmem:[%s13688_s1 + $0x310] sm:$0xff] }
 0x585   : > { %v3612_v44 = vrot.slane %v3610_v60, 1  ;;  %v3854_v49 = vsel %vm1061_vm1, %v3851_v55, %v3853_v7  ;;  %v4483_v41 = vsel %vm1907_vm3, %v4480_v3, %v4482_v62  ;;  %v4630_v0 = vrot.slane %v3614_v1, 2  ;;  %v9904_v55 = vld [vmem:[%s13688_s1 + $0x338] sm:$0xff] }
 0x586   : > { %v3522_v25 = vpop.f32.mrf.mxu3  ;;  %3937 = vmatmul.bf16.gmra.mxu3 %v3854_v49  ;;  %v12044_v53 = vsel %vm2755_vm5, %v4788_v48, %v4790_v19  ;;  %v4631_v59 = vrot.slane %v3610_v60, 3  ;;  %v3478_v48 = vpop.f32.mrf.mxu2  ;;  %4069 = vmatpush.bf16.msra.mxu1 %v9904_v55 }
 0x587   : > { %v3523_v47 = vadd.f32 %v3522_v25, %v3474_v20  ;;  %v3613_v13 = vsel %vm512_vm0, %v3608_v33, %v3612_v44  ;;  %4563 = vmatmul.bf16.gmra.mxu0 %v4483_v41  ;;  %4401 = vmatpush.bf16.msra.mxu3 %v9919_v17  ;;  %v3616_v33 = vor.u32 %v3614_v1, %v3612_v44  ;;  %v9916_v1 = vld [vmem:[%s13688_s1 + $0x398] sm:$0xff] }
 0x588   : > { %3711 = vmatmul.bf16.gmra.mxu1 %v3613_v13  ;;  %v12053_v3 = vor.u32 %v4631_v59, %v4630_v0 }
 0x589   : > { %v12055_v51 = vpack.c.bf16 %v3523_v47, %v3520_v36  ;;  %v3479_v36 = vadd.f32 %v3478_v48, %v3429_v34 }
 0x58a   : > { %v12068_v15 = vsel %vm2420_vm4, %v4628_v46, %v12053_v3  ;;  %4070 = vmatpush.bf16.msra.mxu1 %v9903_v37  ;;  %v3431_v49 = vpop.f32.mrf.mxu1 }
 0x58b   : > { %v4178_v31 = vshrl.u32 %v12055_v51, 16  ;;  %v4181_v26 = vshll.u32 %v12055_v51, 16  ;;  %v4008_v40 = vrot.slane %v12055_v51, 1  ;;  %v4339_v22 = vrot.slane %v12055_v51, 2  ;;  %4402 = vmatpush.bf16.msra.mxu3 %v9918_v4 }
 0x58d   : > { %v4180_v29 = vrot.slane %v4178_v31, 1  ;;  %v4183_v21 = vrot.slane %v4181_v26, 2  ;;  %v12079_v46 = vsel %vm1061_vm1, %v4006_v6, %v4008_v40  ;;  %v12086_v54 = vsel %vm1907_vm3, %v4337_v56, %v4339_v22  ;;  %v9905_v6 = vld [vmem:[%s13688_s1 + $0x340] sm:$0xff] }
 0x58e   : > { %v3524_v12 = vpop.f32.mrf.mxu3  ;;  %4266 = vmatpush.bf16.msra.mxu2 %v9905_v6  ;;  %4071 = vmatpush.bf16.msra.mxu1 %v9902_v42  ;;  %v3480_v60 = vpop.f32.mrf.mxu2  ;;  %v9898_v42 = vld [vmem:[%s13688_s1 + $0x308] sm:$0xff] }
 0x58f   : > { %v3525_v35 = vadd.f32 %v3524_v12, %v3476_v50  ;;  %v12097_v10 = vor.u32 %v4183_v21, %v4180_v29  ;;  %4403 = vmatpush.bf16.msra.mxu3 %v9917_v2  ;;  %v3481_v37 = vadd.f32 %v3480_v60, %v3431_v49 }
 0x591   : > { %v12099_v11 = vpack.c.bf16 %v3525_v35, %v3523_v47  ;;  %v12104_v56 = vsel %vm1573_vm2, %v12013_v28, %v12097_v10 }
 0x592   : > { %4072 = vmatpush.bf16.msra.mxu1 %v9901_v39  ;;  %v3434_v4 = vpop.f32.mrf.mxu1  ;;  %v9914_v39 = vld [vmem:[%s13688_s1 + $0x388] sm:$0xff] }
 0x593   : > { %v3618_v20 = vshll.u32 %v12099_v11, 16  ;;  %3812 = vmatmul.bf16.gmra.mxu2 %v12099_v11  ;;  %v3622_v8 = vshrl.u32 %v12099_v11, 16  ;;  %v3855_v28 = vrot.slane %v12099_v11, 1  ;;  %v4484_v45 = vrot.slane %v12099_v11, 2  ;;  %4404 = vmatpush.bf16.msra.mxu3 %v9916_v1 }
 0x594   : > { %v4792_v41 = vrot.slane %v12099_v11, 3 }
 0x595   : > { %v3620_v0 = vrot.slane %v3618_v20, 1  ;;  %v3856_v25 = vsel %vm1061_vm1, %v3853_v7, %v3855_v28  ;;  %v4485_v61 = vsel %vm1907_vm3, %v4482_v62, %v4484_v45  ;;  %v4634_v59 = vrot.slane %v3622_v8, 2  ;;  %v9900_v62 = vld [vmem:[%s13688_s1 + $0x318] sm:$0xff] }
 0x596   : > { %v3527_v47 = vpop.f32.mrf.mxu3  ;;  %3942 = vmatmul.bf16.gmra.mxu3 %v3856_v25  ;;  %v12136_v7 = vsel %vm2755_vm5, %v4790_v19, %v4792_v41  ;;  %v4635_v44 = vrot.slane %v3618_v20, 3  ;;  %4073 = vmatpush.bf16.msra.mxu1 %v9900_v62  ;;  %v9915_v19 = vld [vmem:[%s13688_s1 + $0x390] sm:$0xff]  ;;  %v3483_v21 = vpop.f32.mrf.mxu2 }
 0x597   : > { %v3621_v13 = vsel %vm512_vm0, %v3616_v33, %v3620_v0  ;;  %v3528_v18 = vadd.f32 %v3527_v47, %v3479_v36  ;;  %4568 = vmatmul.bf16.gmra.mxu0 %v4485_v61  ;;  %4405 = vmatpush.bf16.msra.mxu3 %v9915_v19  ;;  %v3484_v33 = vadd.f32 %v3483_v21, %v3434_v4  ;;  %v9913_v47 = vld [vmem:[%s13688_s1 + $0x380] sm:$0xff] }
 0x598   : > { %3716 = vmatmul.bf16.gmra.mxu1 %v3621_v13  ;;  %v12142_v55 = vor.u32 %v4635_v44, %v4634_v59  ;;  %v3624_v61 = vor.u32 %v3622_v8, %v3620_v0 }
 0x599   : > { %v12144_v48 = vpack.c.bf16 %v3528_v18, %v3528_v18  ;;  %v3975_v16 = vpack.c.bf16 %v3528_v18, %v3525_v35 }
 0x59a   : > { %v12155_v34 = vsel %vm2420_vm4, %v12053_v3, %v12142_v55  ;;  %4074 = vmatpush.bf16.msra.mxu1 %v9899_v52 }
 0x59b   : > { %v4187_v17 = vshrl.u32 %v3975_v16, 16  ;;  %v4190_v31 = vshll.u32 %v3975_v16, 16  ;;  %v4010_v26 = vrot.slane %v3975_v16, 1  ;;  %v4341_v50 = vrot.slane %v3975_v16, 2  ;;  %4406 = vmatpush.bf16.msra.mxu3 %v9914_v39 }
 0x59c   : > { %v3626_v29 = vshll.u32 %v12144_v48, 16  ;;  %v3857_v35 = vrot.slane %v12144_v48, 1 }
 0x59d   : > { %v4189_v12 = vrot.slane %v4187_v17, 1  ;;  %v4192_v3 = vrot.slane %v4190_v31, 2  ;;  %v12165_v36 = vsel %vm1061_vm1, %v4008_v40, %v4010_v26  ;;  %v12173_v2 = vsel %vm1907_vm3, %v4339_v22, %v4341_v50  ;;  %v9897_v40 = vld [vmem:[%s13688_s1 + $0x300] sm:$0xff] }
 0x59e   : > { %v3529_v6 = vpop.f32.mrf.mxu3  ;;  %v3628_v59 = vrot.slane %v3626_v29, 1  ;;  %4075 = vmatpush.bf16.msra.mxu1 %v9898_v42  ;;  %v3858_v51 = vsel %vm1061_vm1, %v3855_v28, %v3857_v35  ;;  %v3436_v42 = vpop.f32.mrf.mxu1 }
 0x59f   : > { %v3530_v20 = vadd.f32 %v3529_v6, %v3481_v37  ;;  %v4193_v60 = vor.u32 %v4192_v3, %v4189_v12  ;;  %4407 = vmatpush.bf16.msra.mxu3 %v9913_v47 }
 0x5a0   : > { %v3629_v21 = vsel %vm512_vm0, %v3624_v61, %v3628_v59  ;;  %v3630_v61 = vshrl.u32 %v12144_v48, 16 }
 0x5a1   : > { %v12175_v49 = vpack.c.bf16 %v3530_v20, %v3530_v20  ;;  %v4456_v25 = vpack.c.bf16 %v3530_v20, %v3528_v18  ;;  %v12185_v22 = vsel %vm1573_vm2, %v12097_v10, %v4193_v60 }
 0x5a2   : > { %4076 = vmatpush.bf16.msra.mxu1 %v9897_v40 }
 0x5a3   : > { %3817 = vmatmul.bf16.gmra.mxu2 %v12144_v48  ;;  %v4196_v8 = vshrl.u32 %v12175_v49, 16  ;;  %v4199_v0 = vshll.u32 %v12175_v49, 16  ;;  %v4012_v1 = vrot.slane %v12175_v49, 1  ;;  %v4486_v44 = vrot.slane %v4456_v25, 2 }
 0x5a4   : > { %v4343_v28 = vrot.slane %v12175_v49, 2  ;;  %v4794_v13 = vrot.slane %v4456_v25, 3  ;;  %v4639_v18 = vshrl.u32 %v4456_v25, 16  ;;  %v4642_v10 = vshll.u32 %v4456_v25, 16 }
 0x5a5   : > { %v4198_v62 = vrot.slane %v4196_v8, 1  ;;  %v4201_v16 = vrot.slane %v4199_v0, 2  ;;  %v12198_v52 = vsel %vm1061_vm1, %v4010_v26, %v4012_v1  ;;  %v4487_v19 = vsel %vm1907_vm3, %v4484_v45, %v4486_v44  ;;  %v3485_v45 = vpop.f32.mrf.mxu2 }
 0x5a6   : > { %3947 = vmatmul.bf16.gmra.mxu3 %v3858_v51  ;;  %v3532_v37 = vpop.f32.mrf.mxu3  ;;  %v12206_v17 = vsel %vm1907_vm3, %v4341_v50, %v4343_v28  ;;  %v12211_v31 = vsel %vm2755_vm5, %v4792_v41, %v4794_v13  ;;  %v4641_v29 = vrot.slane %v4639_v18, 2  ;;  %v4644_v26 = vrot.slane %v4642_v10, 3 }
 0x5a7   : > { %v12214_v12 = vor.u32 %v4201_v16, %v4198_v62  ;;  %4573 = vmatmul.bf16.gmra.mxu0 %v4487_v19  ;;  %v3533_v3 = vadd.f32 %v3532_v37, %v3484_v33  ;;  %v3486_v41 = vadd.f32 %v3485_v45, %v3436_v42  ;;  %v3632_v0 = vor.u32 %v3630_v61, %v3628_v59  ;;  %v9942_v42 = vld [vmem:[%s13688_s1 + $0x468] sm:$0xff] }
 0x5a8   : > { %3721 = vmatmul.bf16.gmra.mxu1 %v3629_v21  ;;  %v4645_v4 = vor.u32 %v4644_v26, %v4641_v29  ;;  %v9943_v21 = vld [vmem:[%s13688_s1 + $0x470] sm:$0xff] }
 0x5a9   : > { %v12218_v50 = vsel %vm1573_vm2, %v4193_v60, %v12214_v12  ;;  %v4457_v6 = vpack.c.bf16 %v3533_v3, %v3533_v3 }
 0x5aa   : > { %v12222_v11 = vsel %vm2420_vm4, %v12142_v55, %v4645_v4 }
 0x5ab   : > { %v4488_v40 = vrot.slane %v4457_v6, 2  ;;  %v9941_v6 = vld [vmem:[%s13688_s1 + $0x460] sm:$0xff] }
 0x5ad   : > { %v4489_v18 = vsel %vm1907_vm3, %v4486_v44, %v4488_v40 }
 0x5ae   : > { %v3534_v39 = vpop.f32.mrf.mxu3 }
 0x5af   : > { %v3535_v20 = vadd.f32 %v3534_v39, %v3486_v41 }
 0x5b1   : > { %v12224_v25 = vpack.c.bf16 %v3535_v20, %v3533_v3  ;;  %v9940_v20 = vld [vmem:[%s13688_s1 + $0x458] sm:$0xff] }
 0x5b3   : > { %4267 = vmatmul.bf16.vlgmr.msra.gmra.mxu2 %v11940_v30  ;;  %v4648_v51 = vshrl.u32 %v12224_v25, 16  ;;  %v4651_v60 = vshll.u32 %v12224_v25, 16  ;;  %v4796_v33 = vrot.slane %v12224_v25, 3 }
 0x5b5   : > { %v12234_v55 = vsel %vm2755_vm5, %v4794_v13, %v4796_v33  ;;  %v4650_v47 = vrot.slane %v4648_v51, 2  ;;  %v4653_v8 = vrot.slane %v4651_v60, 3 }
 0x5b6   : > { %3952 = vmatmul.bf16.gmra.mxu3 %v3857_v35 }
 0x5b7   : > { %4578 = vmatmul.bf16.gmra.mxu0 %v4489_v18  ;;  %v12239_v30 = vor.u32 %v4653_v8, %v4650_v47  ;;  %v9939_v47 = vld [vmem:[%s13688_s1 + $0x450] sm:$0xff]  ;;  %v9938_v18 = vld [vmem:[%s13688_s1 + $0x448] sm:$0xff] }
 0x5b8   : > { %3726 = vmatmul.bf16.gmra.mxu1 %v3632_v0 }
 0x5b9   : > { %v12243_v10 = vsel %vm2420_vm4, %v4645_v4, %v12239_v30 }
 0x5c3   : > { %4272 = vmatmul.bf16.gmra.mxu2 %v11968_v63 }
 0x5c6   : > { %v3788_v13 = vpop.f32.mrf.mxu2  ;;  %4408 = vmatmul.bf16.vlgmr.msra.gmra.mxu3 %v11935_v58 }
 0x5c7   : > { %4583 = vmatmul.bf16.gmra.mxu0 %v4488_v40 }
 0x5c8   : > { %4077 = vmatmul.bf16.vlgmr.msra.gmra.mxu1 %v11932_v57  ;;  %v9944_v57 = vld [vmem:[%s13688_s1 + $0x478] sm:$0xff] }
 0x5c9   : > { %4853 = vmatpush.bf16.msrb.mxu2 %v9944_v57 }
 0x5cd   : > { %4854 = vmatpush.bf16.msrb.mxu2 %v9943_v21 }
 0x5ce   : > { %v3790_v48 = vpop.f32.mrf.mxu2 }
 0x5d1   : > { %4855 = vmatpush.bf16.msrb.mxu2 %v9942_v42 }
 0x5d3   : > { %4277 = vmatmul.bf16.gmra.mxu2 %v12019_v14 }
 0x5d5   : > { %v3697_v35 = vpop.f32.mrf.mxu1  ;;  %4856 = vmatpush.bf16.msrb.mxu2 %v9941_v6 }
 0x5d6   : > { %v3789_v59 = vadd.f32 %v3788_v13, %v3697_v35  ;;  %v3793_v44 = vpop.f32.mrf.mxu2  ;;  %4413 = vmatmul.bf16.gmra.mxu3 %v11963_v9 }
 0x5d8   : > { %4082 = vmatmul.bf16.gmra.mxu1 %v11960_v38 }
 0x5d9   : > { %v3923_v62 = vpop.f32.mrf.mxu3  ;;  %4857 = vmatpush.bf16.msrb.mxu2 %v9940_v20 }
 0x5da   : > { %v12251_v16 = vadd.f32 %v3923_v62, %v3789_v59  ;;  %v9934_v59 = vld [vmem:[%s13688_s1 + $0x428] sm:$0xff] }
 0x5dd   : > { %v3699_v63 = vpop.f32.mrf.mxu1  ;;  %4858 = vmatpush.bf16.msrb.mxu2 %v9939_v47 }
 0x5de   : > { %v3791_v19 = vadd.f32 %v3790_v48, %v3699_v63  ;;  %v3795_v37 = vpop.f32.mrf.mxu2  ;;  %v9933_v63 = vld [vmem:[%s13688_s1 + $0x420] sm:$0xff] }
 0x5e1   : > { %v3925_v58 = vpop.f32.mrf.mxu3  ;;  %4859 = vmatpush.bf16.msrb.mxu2 %v9938_v18 }
 0x5e2   : > { %v12253_v29 = vadd.f32 %v3925_v58, %v3791_v19 }
 0x5e3   : > { %4282 = vmatmul.bf16.gmra.mxu2 %v12104_v56 }
 0x5e4   : > { %v12259_v14 = vpop.f32.mrf.mxu0 }
 0x5e5   : > { %v3702_v9 = vpop.f32.mrf.mxu1 }
 0x5e6   : > { %v3794_v38 = vadd.f32 %v3793_v44, %v3702_v9  ;;  %v3798_v26 = vpop.f32.mrf.mxu2  ;;  %4418 = vmatmul.bf16.gmra.mxu3 %v12008_v5  ;;  %v9937_v44 = vld [vmem:[%s13688_s1 + $0x440] sm:$0xff]  ;;  %v9932_v9 = vld [vmem:[%s13688_s1 + $0x418] sm:$0xff] }
 0x5e7   : > { %4860 = vmatpush.bf16.msrb.mxu2 %v9937_v44 }
 0x5e8   : > { %4087 = vmatmul.bf16.gmra.mxu1 %v12003_v27 }
 0x5e9   : > { %v3928_v56 = vpop.f32.mrf.mxu3 }
 0x5ea   : > { %v12266_v45 = vadd.f32 %v3928_v56, %v3794_v38 }
 0x5ec   : > { %v12271_v4 = vpop.f32.mrf.mxu0 }
 0x5ed   : > { %v3704_v3 = vpop.f32.mrf.mxu1 }
 0x5ee   : > { %v3796_v41 = vadd.f32 %v3795_v37, %v3704_v3  ;;  %v3800_v5 = vpop.f32.mrf.mxu2 }
 0x5f1   : > { %v3930_v27 = vpop.f32.mrf.mxu3 }
 0x5f2   : > { %v12276_v39 = vadd.f32 %v3930_v27, %v3796_v41  ;;  %v9929_v41 = vld [vmem:[%s13688_s1 + $0x400] sm:$0xff] }
 0x5f3   : > { %4287 = vmatmul.bf16.gmra.mxu2 %v12185_v22  ;;  %v9936_v22 = vld [vmem:[%s13688_s1 + $0x438] sm:$0xff] }
 0x5f4   : > { %v12282_v61 = vpop.f32.mrf.mxu0  ;;  %4711 = vmatpush.bf16.msrb.mxu1 %v9936_v22 }
 0x5f5   : > { %v3707_v40 = vpop.f32.mrf.mxu1 }
 0x5f6   : > { %v3799_v51 = vadd.f32 %v3798_v26, %v3707_v40  ;;  %v3803_v60 = vpop.f32.mrf.mxu2  ;;  %4423 = vmatmul.bf16.gmra.mxu3 %v12086_v54  ;;  %v9935_v54 = vld [vmem:[%s13688_s1 + $0x430] sm:$0xff] }
 0x5f7   : > { %v9931_v26 = vld [vmem:[%s13688_s1 + $0x410] sm:$0xff] }
 0x5f8   : > { %4092 = vmatmul.bf16.gmra.mxu1 %v12079_v46 }
 0x5f9   : > { %v3933_v8 = vpop.f32.mrf.mxu3  ;;  %4712 = vmatpush.bf16.msrb.mxu1 %v9935_v54 }
 0x5fa   : > { %v12292_v0 = vadd.f32 %v3933_v8, %v3799_v51 }
 0x5fc   : > { %v12300_v13 = vpop.f32.mrf.mxu0 }
 0x5fd   : > { %v3709_v46 = vpop.f32.mrf.mxu1  ;;  %4713 = vmatpush.bf16.msrb.mxu1 %v9934_v59 }
 0x5fe   : > { %v12302_v48 = vadd.f32 %v3800_v5, %v3709_v46  ;;  %v3805_v35 = vpop.f32.mrf.mxu2 }
 0x601   : > { %v12310_v62 = vpop.f32.mrf.mxu3  ;;  %4714 = vmatpush.bf16.msrb.mxu1 %v9933_v63 }
 0x603   : > { %4292 = vmatmul.bf16.gmra.mxu2 %v12218_v50 }
 0x604   : > { %v12316_v19 = vpop.f32.mrf.mxu0 }
 0x605   : > { %v3712_v37 = vpop.f32.mrf.mxu1  ;;  %4715 = vmatpush.bf16.msrb.mxu1 %v9932_v9 }
 0x606   : > { %v3804_v58 = vadd.f32 %v3803_v60, %v3712_v37  ;;  %v3808_v57 = vpop.f32.mrf.mxu2  ;;  %4428 = vmatmul.bf16.gmra.mxu3 %v12173_v2 }
 0x608   : > { %4097 = vmatmul.bf16.gmra.mxu1 %v12165_v36  ;;  %v9930_v36 = vld [vmem:[%s13688_s1 + $0x408] sm:$0xff] }
 0x609   : > { %v3938_v38 = vpop.f32.mrf.mxu3  ;;  %4716 = vmatpush.bf16.msrb.mxu1 %v9931_v26 }
 0x60a   : > { %v12323_v50 = vadd.f32 %v3938_v38, %v3804_v58 }
 0x60c   : > { %v12328_v21 = vpop.f32.mrf.mxu0 }
 0x60d   : > { %v3714_v56 = vpop.f32.mrf.mxu1  ;;  %4717 = vmatpush.bf16.msrb.mxu1 %v9930_v36 }
 0x60e   : > { %v12330_v42 = vadd.f32 %v3805_v35, %v3714_v56  ;;  %v3810_v2 = vpop.f32.mrf.mxu2 }
 0x611   : > { %v12335_v3 = vpop.f32.mrf.mxu3  ;;  %4718 = vmatpush.bf16.msrb.mxu1 %v9929_v41 }
 0x613   : > { %4297 = vmatmul.bf16.gmra.mxu2 %v12214_v12 }
 0x614   : > { %v12341_v5 = vpop.f32.mrf.mxu0 }
 0x615   : > { %v3717_v6 = vpop.f32.mrf.mxu1 }
 0x616   : > { %v3809_v27 = vadd.f32 %v3808_v57, %v3717_v6  ;;  %v3813_v20 = vpop.f32.mrf.mxu2  ;;  %4433 = vmatmul.bf16.gmra.mxu3 %v12206_v17 }
 0x618   : > { %4102 = vmatmul.bf16.gmra.mxu1 %v12198_v52 }
 0x619   : > { %v3943_v40 = vpop.f32.mrf.mxu3 }
 0x61a   : > { %v12345_v51 = vadd.f32 %v3943_v40, %v3809_v27 }
 0x61c   : > { %v12347_v60 = vpop.f32.mrf.mxu0 }
 0x61d   : > { %v3719_v12 = vpop.f32.mrf.mxu1 }
 0x61e   : > { %v12349_v47 = vadd.f32 %v3810_v2, %v3719_v12  ;;  %v3815_v22 = vpop.f32.mrf.mxu2 }
 0x621   : > { %v12351_v8 = vpop.f32.mrf.mxu3 }
 0x623   : > { %4861 = vmatmul.bf16.vlgmr.msrb.gmra.mxu2 %v11953_v24 }
 0x624   : > { %v12354_v18 = vpop.f32.mrf.mxu0 }
 0x625   : > { %v3722_v54 = vpop.f32.mrf.mxu1 }
 0x626   : > { %v3814_v46 = vadd.f32 %v3813_v20, %v3722_v54  ;;  %v3818_v17 = vpop.f32.mrf.mxu2  ;;  %4438 = vmatmul.bf16.gmra.mxu3 %v4343_v28 }
 0x628   : > { %4107 = vmatmul.bf16.gmra.mxu1 %v4012_v1 }
 0x629   : > { %v3948_v52 = vpop.f32.mrf.mxu3 }
 0x62a   : > { %v12360_v35 = vadd.f32 %v3948_v52, %v3814_v46 }
 0x62c   : > { %v12362_v59 = vpop.f32.mrf.mxu0 }
 0x62d   : > { %v3724_v44 = vpop.f32.mrf.mxu1 }
 0x62e   : > { %v12364_v63 = vadd.f32 %v3815_v22, %v3724_v44  ;;  %v3820_v24 = vpop.f32.mrf.mxu2 }
 0x631   : > { %v12366_v37 = vpop.f32.mrf.mxu3 }
 0x633   : > { %4866 = vmatmul.bf16.gmra.mxu2 %v11982_v43 }
 0x634   : > { %v12369_v58 = vpop.f32.mrf.mxu0 }
 0x635   : > { %v3727_v57 = vpop.f32.mrf.mxu1 }
 0x636   : > { %v3819_v28 = vadd.f32 %v3818_v17, %v3727_v57  ;;  %v4268_v9 = vpop.f32.mrf.mxu2 }
 0x638   : > { %4719 = vmatmul.bf16.vlgmr.msrb.gmra.mxu1 %v11957_v32 }
 0x639   : > { %v3953_v49 = vpop.f32.mrf.mxu3 }
 0x63a   : > { %v12372_v1 = vadd.f32 %v3953_v49, %v3819_v28 }
 0x63c   : > { %v12374_v38 = vpop.f32.mrf.mxu0 }
 0x63d   : > { %v3729_v26 = vpop.f32.mrf.mxu1 }
 0x63e   : > { %v4270_v56 = vpop.f32.mrf.mxu2 }
 0x641   : > { %v3955_v2 = vpop.f32.mrf.mxu3 }
 0x643   : > { %4871 = vmatmul.bf16.gmra.mxu2 %v12044_v53 }
 0x644   : > { %v12377_v36 = vpop.f32.mrf.mxu0 }
 0x645   : > { %v4078_v43 = vpop.f32.mrf.mxu1 }
 0x646   : > { %v4112_v41 = vadd.f32 %v4078_v43, %v12251_v16  ;;  %v4273_v6 = vpop.f32.mrf.mxu2 }
 0x648   : > { %4724 = vmatmul.bf16.gmra.mxu1 %v11994_v23  ;;  %v4302_v27 = vadd.f32 %v4268_v9, %v4112_v41 }
 0x649   : > { %v4409_v32 = vpop.f32.mrf.mxu3 }
 0x64a   : > { %v12381_v20 = vadd.f32 %v4409_v32, %v4302_v27 }
 0x64c   : > { %v4586_v40 = vpop.f32.mrf.mxu0 }
 0x64d   : > { %v4080_v12 = vpop.f32.mrf.mxu1 }
 0x64e   : > { %v4113_v22 = vadd.f32 %v4080_v12, %v12253_v29  ;;  %v4275_v54 = vpop.f32.mrf.mxu2 }
 0x650   : > { %v12384_v46 = vadd.f32 %v4270_v56, %v4113_v22 }
 0x651   : > { %v12386_v53 = vpop.f32.mrf.mxu3 }
 0x653   : > { %4876 = vmatmul.bf16.gmra.mxu2 %v12136_v7 }
 0x655   : > { %v4083_v17 = vpop.f32.mrf.mxu1 }
 0x656   : > { %v4114_v16 = vadd.f32 %v4083_v17, %v12266_v45  ;;  %v4278_v52 = vpop.f32.mrf.mxu2 }
 0x658   : > { %4729 = vmatmul.bf16.gmra.mxu1 %v12068_v15  ;;  %v4304_v23 = vadd.f32 %v4273_v6, %v4114_v16 }
 0x659   : > { %v4414_v44 = vpop.f32.mrf.mxu3 }
 0x65a   : > { %v12391_v24 = vadd.f32 %v4414_v44, %v4304_v23 }
 0x65d   : > { %v4085_v57 = vpop.f32.mrf.mxu1 }
 0x65e   : > { %v4115_v29 = vadd.f32 %v4085_v57, %v12276_v39  ;;  %v12394_v28 = vpop.f32.mrf.mxu2 }
 0x660   : > { %v12396_v9 = vadd.f32 %v4275_v54, %v4115_v29 }
 0x661   : > { %v12398_v49 = vpop.f32.mrf.mxu3 }
 0x663   : > { %4881 = vmatmul.bf16.gmra.mxu2 %v12211_v31 }
 0x665   : > { %v4088_v7 = vpop.f32.mrf.mxu1 }
 0x666   : > { %v4116_v45 = vadd.f32 %v4088_v7, %v12292_v0  ;;  %v4283_v26 = vpop.f32.mrf.mxu2 }
 0x668   : > { %4734 = vmatmul.bf16.gmra.mxu1 %v12155_v34  ;;  %v4306_v15 = vadd.f32 %v4278_v52, %v4116_v45 }
 0x669   : > { %v4419_v56 = vpop.f32.mrf.mxu3 }
 0x66a   : > { %v12403_v2 = vadd.f32 %v4419_v56, %v4306_v15 }
 0x66d   : > { %v12405_v43 = vpop.f32.mrf.mxu1 }
 0x66e   : > { %v12407_v39 = vpop.f32.mrf.mxu2 }
 0x671   : > { %v12409_v41 = vpop.f32.mrf.mxu3 }
 0x673   : > { %4886 = vmatmul.bf16.gmra.mxu2 %v12234_v55 }
 0x675   : > { %v4093_v6 = vpop.f32.mrf.mxu1 }
 0x676   : > { %v4118_v31 = vadd.f32 %v4093_v6, %v12323_v50  ;;  %v4288_v27 = vpop.f32.mrf.mxu2 }
 0x678   : > { %4739 = vmatmul.bf16.gmra.mxu1 %v12222_v11  ;;  %v4308_v0 = vadd.f32 %v4283_v26, %v4118_v31 }
 0x679   : > { %v4424_v34 = vpop.f32.mrf.mxu3 }
 0x67a   : > { %v12414_v32 = vadd.f32 %v4424_v34, %v4308_v0 }
 0x67d   : > { %v12416_v40 = vpop.f32.mrf.mxu1 }
 0x67e   : > { %v12418_v12 = vpop.f32.mrf.mxu2 }
 0x681   : > { %v12420_v22 = vpop.f32.mrf.mxu3 }
 0x683   : > { %4891 = vmatmul.bf16.gmra.mxu2 %v4796_v33 }
 0x685   : > { %v4098_v55 = vpop.f32.mrf.mxu1 }
 0x686   : > { %v4120_v54 = vadd.f32 %v4098_v55, %v12345_v51  ;;  %v4293_v50 = vpop.f32.mrf.mxu2  ;;  %v4588_v55 = vadd.f32 %v12259_v14, %v12381_v20  ;;  %v12459_v14 = vld [vmem:[%s13690_s3 + $0x1] ss:$0 sm:$0xff] }
 0x688   : > { %4744 = vmatmul.bf16.gmra.mxu1 %v12243_v10  ;;  %v4310_v11 = vadd.f32 %v4288_v27, %v4120_v54 }
 0x689   : > { %v4429_v17 = vpop.f32.mrf.mxu3 }
 0x68a   : > { %v12426_v16 = vadd.f32 %v4429_v17, %v4310_v11  ;;  %v4444_v17 = vadd.f32 %v12386_v53, %v12384_v46 }
 0x68d   : > { %v12428_v52 = vpop.f32.mrf.mxu1 }
 0x68e   : > { %v12430_v23 = vpop.f32.mrf.mxu2 }
 0x691   : > { %v12432_v44 = vpop.f32.mrf.mxu3 }
 0x695   : > { %v4103_v57 = vpop.f32.mrf.mxu1 }
 0x696   : > { %v4122_v25 = vadd.f32 %v4103_v57, %v12360_v35  ;;  %v4298_v33 = vpop.f32.mrf.mxu2 }
 0x698   : > { %4749 = vmatmul.bf16.gmra.mxu1 %v12239_v30  ;;  %v4312_v51 = vadd.f32 %v4293_v50, %v4122_v25  ;;  %v4589_v25 = vadd.f32 %v12271_v4, %v4444_v17 }
 0x699   : > { %v4434_v29 = vpop.f32.mrf.mxu3 }
 0x69a   : > { %v12436_v7 = vadd.f32 %v4434_v29, %v4312_v51 }
 0x69d   : > { %v12438_v10 = vpop.f32.mrf.mxu1 }
 0x69e   : > { %v4300_v45 = vpop.f32.mrf.mxu2 }
 0x6a1   : > { %v12440_v26 = vpop.f32.mrf.mxu3 }
 0x6a5   : > { %v4108_v15 = vpop.f32.mrf.mxu1 }
 0x6a6   : > { %v4124_v56 = vadd.f32 %v4108_v15, %v12372_v1  ;;  %v4862_v6 = vpop.f32.mrf.mxu2  ;;  %v12452_v1 = vld [vmem:[%s13689_s2 + $0x1] ss:$0 sm:$0xff]  ;;  %v4590_v15 = vadd.f32 %v12282_v61, %v12391_v24 }
 0x6a8   : > { %v4314_v31 = vadd.f32 %v4298_v33, %v4124_v56 }
 0x6a9   : > { %v4439_v27 = vpop.f32.mrf.mxu3 }
 0x6aa   : > { %v12443_v0 = vadd.f32 %v4439_v27, %v4314_v31 }
 0x6ad   : > { %v4110_v35 = vpop.f32.mrf.mxu1 }
 0x6ae   : > { %v4864_v34 = vpop.f32.mrf.mxu2 }
 0x6b1   : > { %v4441_v30 = vpop.f32.mrf.mxu3 }
 0x6b2   : > { %v4446_v30 = vadd.f32 %v12398_v49, %v12396_v9 }
 0x6b4   : > { %v4591_v61 = vadd.f32 %v12300_v13, %v4446_v30 }
 0x6b5   : > { %v4720_v54 = vpop.f32.mrf.mxu1 }
 0x6b6   : > { %v4754_v50 = vadd.f32 %v4720_v54, %v4588_v55  ;;  %v4867_v11 = vpop.f32.mrf.mxu2 }
 0x6b8   : > { %v4896_v57 = vadd.f32 %v4862_v6, %v4754_v50 }
 0x6ba   : > { %v4911_v33 = vmul.f32 %v12452_v1, %v4896_v57  ;;  %v3962_v57 = vadd.f32 %v12310_v62, %v12302_v48 }
 0x6bc   : > { %v4926_v46 = vadd.f32 %v12459_v14, %v4911_v33  ;;  %v4117_v9 = vadd.f32 %v12405_v43, %v3962_v57 }
 0x6bd   : > { %v4722_v20 = vpop.f32.mrf.mxu1 }
 0x6be   : > { %v4755_v51 = vadd.f32 %v4722_v20, %v4589_v25  ;;  %v4869_v29 = vpop.f32.mrf.mxu2  ;;  %v4939_v56 = vmax.f32 %v4926_v46, 0.0  ;;  %v4307_v13 = vadd.f32 %v12394_v28, %v4117_v9 }
 0x6c0   : > { %v4897_v53 = vadd.f32 %v4864_v34, %v4755_v51  ;;  %v12468_v54 = vmin.f32 %v4939_v56, 6.0  ;;  %v4592_v51 = vadd.f32 %v12316_v19, %v12403_v2 }
 0x6c2   : > { %v4912_v45 = vmul.f32 %v12452_v1, %v4897_v53 }
 0x6c4   : > { %v4927_v4 = vadd.f32 %v12459_v14, %v4912_v45 }
 0x6c5   : > { %v4725_v6 = vpop.f32.mrf.mxu1 }
 0x6c6   : > { %v4756_v31 = vadd.f32 %v4725_v6, %v4590_v15  ;;  %v4872_v27 = vpop.f32.mrf.mxu2  ;;  %v4940_v35 = vmax.f32 %v4927_v4, 0.0  ;;  %v4448_v4 = vadd.f32 %v12409_v41, %v4307_v13 }
 0x6c8   : > { %v4898_v55 = vadd.f32 %v4867_v11, %v4756_v31  ;;  %v12470_v50 = vmin.f32 %v4940_v35, 6.0  ;;  %v4593_v19 = vadd.f32 %v12328_v21, %v4448_v4  ;;  %v3964_v31 = vadd.f32 %v12335_v3, %v12330_v42 }
 0x6ca   : > { %v4965_v34 = vpack.c.bf16 %v12470_v50, %v12468_v54  ;;  %v4913_v24 = vmul.f32 %v12452_v1, %v4898_v55  ;;  %v4119_v41 = vadd.f32 %v12416_v40, %v3964_v31  ;;  %v9949_v54 = vld [vmem:[%s13692_s5 + $0x20] sm:$0xff]  ;;  %v9950_v50 = vld [vmem:[%s13692_s5 + $0x28] sm:$0xff] }
 0x6cc   : > { %v4928_v49 = vadd.f32 %v12459_v14, %v4913_v24  ;;  %v4594_v24 = vadd.f32 %v12341_v5, %v12414_v32  ;;  %v4309_v21 = vadd.f32 %v12407_v39, %v4119_v41 }
 0x6cd   : > { %v4727_v17 = vpop.f32.mrf.mxu1 }
 0x6ce   : > { %v4757_v25 = vadd.f32 %v4727_v17, %v4591_v61  ;;  %v4874_v33 = vpop.f32.mrf.mxu2  ;;  %v4941_v53 = vmax.f32 %v4928_v49, 0.0  ;;  %v4450_v49 = vadd.f32 %v12420_v22, %v4309_v21  ;;  %v4598_v21 = vadd.f32 %v12369_v58, %v12436_v7 }
 0x6d0   : > { %v4899_v11 = vadd.f32 %v4869_v29, %v4757_v25  ;;  %v12486_v56 = vmin.f32 %v4941_v53, 6.0  ;;  %v4595_v5 = vadd.f32 %v12347_v60, %v4450_v49 }
 0x6d2   : > { %v4914_v20 = vmul.f32 %v12452_v1, %v4899_v11 }
 0x6d4   : > { %v4929_v46 = vadd.f32 %v12459_v14, %v4914_v20 }
 0x6d5   : > { %v4730_v45 = vpop.f32.mrf.mxu1 }
 0x6d6   : > { %v4758_v15 = vadd.f32 %v4730_v45, %v4592_v51  ;;  %v4877_v48 = vpop.f32.mrf.mxu2  ;;  %v4942_v62 = vmax.f32 %v4929_v46, 0.0  ;;  %v3966_v51 = vadd.f32 %v12351_v8, %v12349_v47 }
 0x6d8   : > { %v4900_v43 = vadd.f32 %v4872_v27, %v4758_v15  ;;  %v12488_v29 = vmin.f32 %v4942_v62, 6.0  ;;  %v4121_v22 = vadd.f32 %v12428_v52, %v3966_v51 }
 0x6da   : > { %v4966_v6 = vpack.c.bf16 %v12488_v29, %v12486_v56  ;;  %v4915_v28 = vmul.f32 %v12452_v1, %v4900_v43  ;;  %v4311_v60 = vadd.f32 %v12418_v12, %v4121_v22  ;;  %v3968_v12 = vadd.f32 %v12366_v37, %v12364_v63  ;;  %v9959_v56 = vld [vmem:[%s13688_s1 + $0x4b0] sm:$0xff]  ;;  %v9958_v29 = vld [vmem:[%s13688_s1 + $0x4a8] sm:$0xff] }
 0x6dc   : > { %v4930_v27 = vadd.f32 %v12459_v14, %v4915_v28  ;;  %v4452_v28 = vadd.f32 %v12432_v44, %v4311_v60 }
 0x6dd   : > { %v4732_v2 = vpop.f32.mrf.mxu1 }
 0x6de   : > { %v4759_v35 = vadd.f32 %v4732_v2, %v4593_v19  ;;  %v4879_v30 = vpop.f32.mrf.mxu2  ;;  %v4943_v57 = vmax.f32 %v4930_v27, 0.0 }
 0x6e0   : > { %v4901_v55 = vadd.f32 %v4874_v33, %v4759_v35  ;;  %v12504_v11 = vmin.f32 %v4943_v57, 6.0 }
 0x6e2   : > { %v4916_v61 = vmul.f32 %v12452_v1, %v4901_v55  ;;  %v4123_v55 = vadd.f32 %v12438_v10, %v3968_v12  ;;  %v9974_v12 = vld [vmem:[%s13688_s1 + $0x528] sm:$0xff] }
 0x6e4   : > { %v4931_v17 = vadd.f32 %v12459_v14, %v4916_v61 }
 0x6e5   : > { %v4735_v25 = vpop.f32.mrf.mxu1 }
 0x6e6   : > { %v4760_v9 = vadd.f32 %v4735_v25, %v4594_v24  ;;  %v4882_v42 = vpop.f32.mrf.mxu2  ;;  %v4944_v3 = vmax.f32 %v4931_v17, 0.0 }
 0x6e8   : > { %v4902_v40 = vadd.f32 %v4877_v48, %v4760_v9  ;;  %v12506_v33 = vmin.f32 %v4944_v3, 6.0  ;;  %v4596_v48 = vadd.f32 %v12354_v18, %v12426_v16 }
 0x6ea   : > { %v4967_v20 = vpack.c.bf16 %v12506_v33, %v12504_v11  ;;  %v4917_v39 = vmul.f32 %v12452_v1, %v4902_v40  ;;  %v9951_v11 = vld [vmem:[%s13692_s5 + $0x30] sm:$0xff]  ;;  %v9956_v33 = vld [vmem:[%s13688_s1 + $0x498] sm:$0xff] }
 0x6ec   : > { %v4932_v53 = vadd.f32 %v12459_v14, %v4917_v39 }
 0x6ed   : > { %v4737_v32 = vpop.f32.mrf.mxu1 }
 0x6ee   : > { %v4761_v13 = vadd.f32 %v4737_v32, %v4595_v5  ;;  %v4884_v46 = vpop.f32.mrf.mxu2  ;;  %v4945_v4 = vmax.f32 %v4932_v53, 0.0 }
 0x6f0   : > { %v4903_v45 = vadd.f32 %v4879_v30, %v4761_v13  ;;  %v4958_v2 = vmin.f32 %v4945_v4, 6.0  ;;  %v4597_v30 = vadd.f32 %v12362_v59, %v4452_v28  ;;  %v4313_v59 = vadd.f32 %v12430_v23, %v4123_v55  ;;  %v9952_v55 = vld [vmem:[%s13692_s5 + $0x38] sm:$0xff] }
 0x6f2   : > { %v4918_v15 = vmul.f32 %v12452_v1, %v4903_v45 }
 0x6f4   : > { %v4933_v62 = vadd.f32 %v12459_v14, %v4918_v15 }
 0x6f5   : > { %v4740_v43 = vpop.f32.mrf.mxu1 }
 0x6f6   : > { %v4762_v19 = vadd.f32 %v4740_v43, %v4596_v48  ;;  %v4887_v47 = vpop.f32.mrf.mxu2  ;;  %v4946_v8 = vmax.f32 %v4933_v62, 0.0 }
 0x6f8   : > { %v4904_v52 = vadd.f32 %v4882_v42, %v4762_v19  ;;  %v4959_v31 = vmin.f32 %v4946_v8, 6.0  ;;  %v4454_v42 = vadd.f32 %v12440_v26, %v4313_v59  ;;  %v4600_v26 = vadd.f32 %v12377_v36, %v12443_v0  ;;  %v9945_v36 = vld [vmem:[%s13692_s5] sm:$0xff]  ;;  %v9946_v0 = vld [vmem:[%s13692_s5 + $0x8] sm:$0xff]  ;;  %v9972_v59 = vld [vmem:[%s13688_s1 + $0x518] sm:$0xff] }
 0x6fa   : > { %v4968_v35 = vpack.c.bf16 %v4959_v31, %v4958_v2  ;;  %v4919_v41 = vmul.f32 %v12452_v1, %v4904_v52  ;;  %v4599_v5 = vadd.f32 %v12374_v38, %v4454_v42  ;;  %v9955_v2 = vld [vmem:[%s13688_s1 + $0x490] sm:$0xff]  ;;  %v9968_v31 = vld [vmem:[%s13688_s1 + $0x4f8] sm:$0xff]  ;;  %v9962_v42 = vld [vmem:[%s13688_s1 + $0x4c8] sm:$0xff] }
 0x6fb   : > { %5256 = vmatpush.bf16.msra.mxu0 %v9968_v31 }
 0x6fc   : > { %v4934_v61 = vadd.f32 %v12459_v14, %v4919_v41  ;;  %v9954_v41 = vld [vmem:[%s13688_s1 + $0x488] sm:$0xff] }
 0x6fd   : > { %v4742_v18 = vpop.f32.mrf.mxu1 }
 0x6fe   : > { %v4763_v16 = vadd.f32 %v4742_v18, %v4597_v30  ;;  %v4889_v27 = vpop.f32.mrf.mxu2  ;;  %v4947_v57 = vmax.f32 %v4934_v61, 0.0  ;;  %v9975_v30 = vld [vmem:[%s13688_s1 + $0x530] sm:$0xff]  ;;  %v9984_v18 = vld [vmem:[%s13688_s1 + $0x578] sm:$0xff] }
 0x6ff   : > { %v9983_v61 = vld [vmem:[%s13688_s1 + $0x570] sm:$0xff] }
 0x700   : > { %v4905_v24 = vadd.f32 %v4884_v46, %v4763_v16  ;;  %v4960_v3 = vmin.f32 %v4947_v57, 6.0  ;;  %v9953_v16 = vld [vmem:[%s13688_s1 + $0x480] sm:$0xff] }
 0x701   : > { %v9981_v57 = vld [vmem:[%s13688_s1 + $0x560] sm:$0xff] }
 0x702   : > { %v4920_v44 = vmul.f32 %v12452_v1, %v4905_v24  ;;  %v9973_v24 = vld [vmem:[%s13688_s1 + $0x520] sm:$0xff] }
 0x704   : > { %v4935_v17 = vadd.f32 %v12459_v14, %v4920_v44  ;;  %v9965_v44 = vld [vmem:[%s13688_s1 + $0x4e0] sm:$0xff] }
 0x705   : > { %v4745_v25 = vpop.f32.mrf.mxu1 }
 0x706   : > { %v4764_v9 = vadd.f32 %v4745_v25, %v4598_v21  ;;  %v4892_v63 = vpop.f32.mrf.mxu2  ;;  %v4948_v37 = vmax.f32 %v4935_v17, 0.0  ;;  %v9982_v21 = vld [vmem:[%s13688_s1 + $0x568] sm:$0xff]  ;;  %v9964_v17 = vld [vmem:[%s13688_s1 + $0x4d8] sm:$0xff]  ;;  %v9971_v25 = vld [vmem:[%s13688_s1 + $0x510] sm:$0xff] }
 0x708   : > { %v4906_v10 = vadd.f32 %v4887_v47, %v4764_v9  ;;  %v4961_v49 = vmin.f32 %v4948_v37, 6.0  ;;  %v9963_v9 = vld [vmem:[%s13688_s1 + $0x4d0] sm:$0xff]  ;;  %v9970_v37 = vld [vmem:[%s13688_s1 + $0x508] sm:$0xff] }
 0x70a   : > { %v4969_v40 = vpack.c.bf16 %v4961_v49, %v4960_v3  ;;  %v4921_v39 = vmul.f32 %v12452_v1, %v4906_v10  ;;  %v9961_v10 = vld [vmem:[%s13688_s1 + $0x4c0] sm:$0xff]  ;;  %v9979_v3 = vld [vmem:[%s13688_s1 + $0x550] sm:$0xff] }
 0x70b   : > { %v9969_v49 = vld [vmem:[%s13688_s1 + $0x500] sm:$0xff] }
 0x70c   : > { %v4936_v32 = vadd.f32 %v12459_v14, %v4921_v39  ;;  %v9977_v39 = vld [vmem:[%s13688_s1 + $0x540] sm:$0xff] }
 0x70d   : > { %v4747_v58 = vpop.f32.mrf.mxu1 }
 0x70e   : > { %v4765_v7 = vadd.f32 %v4747_v58, %v4599_v5  ;;  %v4894_v23 = vpop.f32.mrf.mxu2  ;;  %v4949_v46 = vmax.f32 %v4936_v32, 0.0 }
 0x710   : > { %v4907_v51 = vadd.f32 %v4889_v27, %v4765_v7  ;;  %v4962_v38 = vmin.f32 %v4949_v46, 6.0  ;;  %v9966_v27 = vld [vmem:[%s13688_s1 + $0x4e8] sm:$0xff] }
 0x712   : > { %v4922_v13 = vmul.f32 %v12452_v1, %v4907_v51 }
 0x714   : > { %v4937_v22 = vadd.f32 %v12459_v14, %v4922_v13 }
 0x715   : > { %v4750_v53 = vpop.f32.mrf.mxu1 }
 0x716   : > { %v4950_v45 = vmax.f32 %v4937_v22, 0.0  ;;  %v4766_v15 = vadd.f32 %v4750_v53, %v4600_v26 }
 0x718   : > { %v4908_v48 = vadd.f32 %v4892_v63, %v4766_v15  ;;  %v4963_v60 = vmin.f32 %v4950_v45, 6.0  ;;  %v9980_v63 = vld [vmem:[%s13688_s1 + $0x558] sm:$0xff] }
 0x71a   : > { %v4923_v62 = vmul.f32 %v12452_v1, %v4908_v48  ;;  %v4970_v4 = vpack.c.bf16 %v4963_v60, %v4962_v38  ;;  %v9947_v1 = vld [vmem:[%s13692_s5 + $0x10] sm:$0xff] }
 0x71c   : > { %v4938_v43 = vadd.f32 %v12459_v14, %v4923_v62  ;;  %v9948_v14 = vld [vmem:[%s13692_s5 + $0x18] sm:$0xff] }
 0x71d   : > { %v4752_v19 = vpop.f32.mrf.mxu1 }
 0x71e   : > { %v4951_v47 = vmax.f32 %v4938_v43, 0.0 }
 0x720   : > { %v4964_v8 = vmin.f32 %v4951_v47, 6.0 }
 0x722   : > { %v4971_v28 = vpack.c.bf16 %v4964_v8, %v4964_v8 }
 0x724   : > { %v5054_v52 = vsel %vm3386_vm6, %v4971_v28, 0 }
 0x725   : > { %5057 = vmatpush.bf16.msrb.mxu3 %v5054_v52 }
 0x729   : > { %5058 = vmatpush.bf16.msrb.mxu3 %v4970_v4 }
 0x72d   : > { %5059 = vmatpush.bf16.msrb.mxu3 %v4969_v40  ;;  %v9978_v40 = vld [vmem:[%s13688_s1 + $0x548] sm:$0xff] }
 0x731   : > { %5060 = vmatpush.bf16.msrb.mxu3 %v4968_v35  ;;  %v9967_v35 = vld [vmem:[%s13688_s1 + $0x4f0] sm:$0xff] }
 0x732   : > { %5257 = vmatpush.bf16.msra.mxu0 %v9967_v35 }
 0x735   : > { %5061 = vmatpush.bf16.msrb.mxu3 %v4967_v20  ;;  %v9976_v20 = vld [vmem:[%s13688_s1 + $0x538] sm:$0xff] }
 0x736   : > { %5482 = vmatpush.bf16.msra.mxu2 %v9976_v20  ;;  %5258 = vmatpush.bf16.msra.mxu0 %v9966_v27 }
 0x739   : > { %5062 = vmatpush.bf16.msrb.mxu3 %v4966_v6  ;;  %v9957_v6 = vld [vmem:[%s13688_s1 + $0x4a0] sm:$0xff] }
 0x73a   : > { %5483 = vmatpush.bf16.msra.mxu2 %v9975_v30  ;;  %5259 = vmatpush.bf16.msra.mxu0 %v9965_v44 }
 0x73d   : > { %5063 = vmatpush.bf16.msrb.mxu3 %v4965_v34  ;;  %v9960_v34 = vld [vmem:[%s13688_s1 + $0x4b8] sm:$0xff] }
 0x73e   : > { %5347 = vmatpush.bf16.msra.mxu1 %v9960_v34  ;;  %5484 = vmatpush.bf16.msra.mxu2 %v9974_v12 }
 0x73f   : > { %5260 = vmatpush.bf16.msra.mxu0 %v9964_v17 }
 0x740   : > { %8822 = vmatmul.msk.bf16.vlgmr.msrb.gmra.mxu3 %vm5028_vm8, %v9945_v36 }
 0x741   : > { %5637 = vmatpush.bf16.msra.mxu3 %v9984_v18 }
 0x742   : > { %5348 = vmatpush.bf16.msra.mxu1 %v9959_v56  ;;  %5485 = vmatpush.bf16.msra.mxu2 %v9973_v24 }
 0x743   : > { %5261 = vmatpush.bf16.msra.mxu0 %v9963_v9 }
 0x745   : > { %5638 = vmatpush.bf16.msra.mxu3 %v9983_v61 }
 0x746   : > { %5349 = vmatpush.bf16.msra.mxu1 %v9958_v29  ;;  %5486 = vmatpush.bf16.msra.mxu2 %v9972_v59 }
 0x747   : > { %5262 = vmatpush.bf16.msra.mxu0 %v9962_v42 }
 0x749   : > { %5639 = vmatpush.bf16.msra.mxu3 %v9982_v21 }
 0x74a   : > { %5350 = vmatpush.bf16.msra.mxu1 %v9957_v6  ;;  %5487 = vmatpush.bf16.msra.mxu2 %v9971_v25 }
 0x74b   : > { %5263 = vmatpush.bf16.msra.mxu0 %v9961_v10 }
 0x74d   : > { %5640 = vmatpush.bf16.msra.mxu3 %v9981_v57 }
 0x74e   : > { %5351 = vmatpush.bf16.msra.mxu1 %v9956_v33  ;;  %5488 = vmatpush.bf16.msra.mxu2 %v9970_v37 }
 0x750   : > { %8823 = vmatmul.msk.bf16.gmra.mxu3 %vm5028_vm8, %v9946_v0 }
 0x751   : > { %5641 = vmatpush.bf16.msra.mxu3 %v9980_v63 }
 0x752   : > { %5352 = vmatpush.bf16.msra.mxu1 %v9955_v2  ;;  %5489 = vmatpush.bf16.msra.mxu2 %v9969_v49 }
 0x755   : > { %5642 = vmatpush.bf16.msra.mxu3 %v9979_v3 }
 0x756   : > { %5353 = vmatpush.bf16.msra.mxu1 %v9954_v41 }
 0x759   : > { %5643 = vmatpush.bf16.msra.mxu3 %v9978_v40 }
 0x75a   : > { %5354 = vmatpush.bf16.msra.mxu1 %v9953_v16 }
 0x75d   : > { %5644 = vmatpush.bf16.msra.mxu3 %v9977_v39 }
 0x760   : > { %8824 = vmatmul.msk.bf16.gmra.mxu3 %vm5028_vm8, %v9947_v1 }
 0x770   : > { %8825 = vmatmul.msk.bf16.gmra.mxu3 %vm5028_vm8, %v9948_v14 }
 0x780   : > { %8826 = vmatmul.msk.bf16.gmra.mxu3 %vm5028_vm8, %v9949_v54 }
 0x790   : > { %8827 = vmatmul.msk.bf16.gmra.mxu3 %vm5028_vm8, %v9950_v50 }
 0x7a0   : > { %8828 = vmatmul.msk.bf16.gmra.mxu3 %vm5028_vm8, %v9951_v11 }
 0x7b0   : > { %8829 = vmatmul.msk.bf16.gmra.mxu3 %vm5028_vm8, %v9952_v55 }
 0x7c3   : > { %v5065_v5 = vpop.f32.mrf.mxu3 }
 0x7cb   : > { %v5067_v58 = vpop.f32.mrf.mxu3 }
 0x7cc   : > { %v5105_v7 = vpack.c.bf16 %v5067_v58, %v5065_v5 }
 0x7ce   : > { %5355 = vmatmul.bf16.vlgmr.msra.gmra.mxu1 %v5105_v7  ;;  %v5149_v32 = vshll.u32 %v5105_v7, 16  ;;  %v5147_v22 = vshrl.u32 %v5105_v7, 16  ;;  %v5414_v15 = vrot.slane %v5105_v7, 1 }
 0x7d0   : > { %v5151_v51 = vrot.slane %v5149_v32, 1 }
 0x7d2   : > { %v5152_v48 = vor.u32 %v5151_v51, %v5147_v22 }
 0x7d3   : > { %v5070_v23 = vpop.f32.mrf.mxu3 }
 0x7d4   : > { %v5538_v26 = vpack.c.bf16 %v5070_v23, %v5067_v58 }
 0x7d6   : > { %v5711_v19 = vshrl.u32 %v5538_v26, 16  ;;  %v5714_v47 = vshll.u32 %v5538_v26, 16  ;;  %v5569_v0 = vrot.slane %v5538_v26, 1  ;;  %v5900_v54 = vrot.slane %v5538_v26, 2 }
 0x7d8   : > { %v5713_v1 = vrot.slane %v5711_v19, 1  ;;  %v5716_v14 = vrot.slane %v5714_v47, 2 }
 0x7da   : > { %v5717_v2 = vor.u32 %v5716_v14, %v5713_v1 }
 0x7db   : > { %v5072_v13 = vpop.f32.mrf.mxu3 }
 0x7dc   : > { %v5106_v46 = vpack.c.bf16 %v5072_v13, %v5070_v23 }
 0x7de   : > { %v5154_v53 = vshll.u32 %v5106_v46, 16  ;;  %v5158_v45 = vshrl.u32 %v5106_v46, 16  ;;  %v5415_v38 = vrot.slane %v5106_v46, 1  ;;  %5360 = vmatmul.bf16.gmra.mxu1 %v5106_v46  ;;  %v6045_v61 = vrot.slane %v5106_v46, 2 }
 0x7df   : > { %v6353_v24 = vrot.slane %v5106_v46, 3 }
 0x7e0   : > { %v5156_v60 = vrot.slane %v5154_v53, 1  ;;  %v6187_v62 = vrot.slane %v5158_v45, 2  ;;  %v5416_v4 = vsel %vm1061_vm1, %v5414_v15, %v5415_v38  ;;  %v6188_v43 = vrot.slane %v5154_v53, 3  ;;  %v10000_v15 = vld [vmem:[%s13688_s1 + $0x5f8] sm:$0xff] }
 0x7e1   : > { %5490 = vmatmul.bf16.vlgmr.msra.gmra.mxu2 %v5416_v4  ;;  %5968 = vmatpush.bf16.msrb.mxu1 %v10000_v15 }
 0x7e2   : > { %v5157_v8 = vsel %vm512_vm0, %v5152_v48, %v5156_v60  ;;  %v6189_v28 = vor.u32 %v6188_v43, %v6187_v62  ;;  %v5160_v55 = vor.u32 %v5158_v45, %v5156_v60 }
 0x7e3   : > { %v5075_v52 = vpop.f32.mrf.mxu3  ;;  %5264 = vmatmul.bf16.vlgmr.msra.gmra.mxu0 %v5157_v8 }
 0x7e4   : > { %v5539_v36 = vpack.c.bf16 %v5075_v52, %v5072_v13 }
 0x7e6   : > { %v5570_v50 = vrot.slane %v5539_v36, 1  ;;  %v5719_v34 = vshrl.u32 %v5539_v36, 16  ;;  %v5722_v56 = vshll.u32 %v5539_v36, 16  ;;  %v5901_v29 = vrot.slane %v5539_v36, 2 }
 0x7e8   : > { %v5721_v6 = vrot.slane %v5719_v34, 1  ;;  %v5724_v11 = vrot.slane %v5722_v56, 2  ;;  %v5571_v33 = vsel %vm1061_vm1, %v5569_v0, %v5570_v50  ;;  %v12685_v20 = vsel %vm1907_vm3, %v5900_v54, %v5901_v29  ;;  %v9998_v56 = vld [vmem:[%s13688_s1 + $0x5e8] sm:$0xff] }
 0x7e9   : > { %5645 = vmatmul.bf16.vlgmr.msra.gmra.mxu3 %v5571_v33 }
 0x7ea   : > { %v5725_v31 = vor.u32 %v5724_v11, %v5721_v6 }
 0x7eb   : > { %v5077_v35 = vpop.f32.mrf.mxu3 }
 0x7ec   : > { %v5107_v30 = vpack.c.bf16 %v5077_v35, %v5075_v52  ;;  %v12688_v41 = vsel %vm1573_vm2, %v5717_v2, %v5725_v31  ;;  %v9999_v52 = vld [vmem:[%s13688_s1 + $0x5f0] sm:$0xff] }
 0x7ed   : > { %5969 = vmatpush.bf16.msrb.mxu1 %v9999_v52  ;;  %v9993_v52 = vld [vmem:[%s13688_s1 + $0x5c0] sm:$0xff] }
 0x7ee   : > { %v5162_v18 = vshll.u32 %v5107_v30, 16  ;;  %v5166_v12 = vshrl.u32 %v5107_v30, 16  ;;  %v5417_v16 = vrot.slane %v5107_v30, 1  ;;  %5365 = vmatmul.bf16.gmra.mxu1 %v5107_v30  ;;  %v6046_v27 = vrot.slane %v5107_v30, 2 }
 0x7ef   : > { %v6354_v44 = vrot.slane %v5107_v30, 3 }
 0x7f0   : > { %v5164_v21 = vrot.slane %v5162_v18, 1  ;;  %v6191_v59 = vrot.slane %v5162_v18, 3  ;;  %v6190_v17 = vrot.slane %v5166_v12, 2  ;;  %v5418_v57 = vsel %vm1061_vm1, %v5415_v38, %v5417_v16 }
 0x7f1   : > { %5495 = vmatmul.bf16.gmra.mxu2 %v5418_v57  ;;  %v12692_v25 = vsel %vm1907_vm3, %v6045_v61, %v6046_v27  ;;  %v12695_v9 = vsel %vm2755_vm5, %v6353_v24, %v6354_v44  ;;  %5970 = vmatpush.bf16.msrb.mxu1 %v9998_v56  ;;  %v9996_v61 = vld [vmem:[%s13688_s1 + $0x5d8] sm:$0xff] }
 0x7f2   : > { %v5165_v63 = vsel %vm512_vm0, %v5160_v55, %v5164_v21  ;;  %v6192_v37 = vor.u32 %v6191_v59, %v6190_v17  ;;  %v5168_v48 = vor.u32 %v5166_v12, %v5164_v21 }
 0x7f3   : > { %v5080_v42 = vpop.f32.mrf.mxu3  ;;  %5269 = vmatmul.bf16.gmra.mxu0 %v5165_v63 }
 0x7f4   : > { %v5540_v10 = vpack.c.bf16 %v5080_v42, %v5077_v35  ;;  %v12699_v3 = vsel %vm2420_vm4, %v6189_v28, %v6192_v37  ;;  %v9997_v35 = vld [vmem:[%s13688_s1 + $0x5e0] sm:$0xff] }
 0x7f5   : > { %5971 = vmatpush.bf16.msrb.mxu1 %v9997_v35 }
 0x7f6   : > { %v5572_v49 = vrot.slane %v5540_v10, 1  ;;  %v5728_v40 = vshrl.u32 %v5540_v10, 16  ;;  %v5731_v5 = vshll.u32 %v5540_v10, 16  ;;  %v5903_v39 = vrot.slane %v5540_v10, 2 }
 0x7f8   : > { %v5573_v58 = vsel %vm1061_vm1, %v5570_v50, %v5572_v49  ;;  %v5730_v7 = vrot.slane %v5728_v40, 1  ;;  %v5733_v23 = vrot.slane %v5731_v5, 2  ;;  %v12703_v32 = vsel %vm1907_vm3, %v5901_v29, %v5903_v39  ;;  %v9995_v40 = vld [vmem:[%s13688_s1 + $0x5d0] sm:$0xff] }
 0x7f9   : > { %5650 = vmatmul.bf16.gmra.mxu3 %v5573_v58  ;;  %5972 = vmatpush.bf16.msrb.mxu1 %v9996_v61 }
 0x7fa   : > { %v5734_v51 = vor.u32 %v5733_v23, %v5730_v7  ;;  %v9991_v23 = vld [vmem:[%s13688_s1 + $0x5b0] sm:$0xff] }
 0x7fb   : > { %v5082_v13 = vpop.f32.mrf.mxu3 }
 0x7fc   : > { %v5108_v46 = vpack.c.bf16 %v5082_v13, %v5080_v42  ;;  %v12706_v22 = vsel %vm1573_vm2, %v5725_v31, %v5734_v51 }
 0x7fd   : > { %5973 = vmatpush.bf16.msrb.mxu1 %v9995_v40 }
 0x7fe   : > { %v5170_v26 = vshll.u32 %v5108_v46, 16  ;;  %v5174_v53 = vshrl.u32 %v5108_v46, 16  ;;  %v5419_v45 = vrot.slane %v5108_v46, 1  ;;  %5370 = vmatmul.bf16.gmra.mxu1 %v5108_v46  ;;  %v6048_v38 = vrot.slane %v5108_v46, 2 }
 0x7ff   : > { %v6356_v60 = vrot.slane %v5108_v46, 3 }
 0x800   : > { %v5172_v62 = vrot.slane %v5170_v26, 1  ;;  %v5420_v4 = vsel %vm1061_vm1, %v5417_v16, %v5419_v45  ;;  %v12713_v43 = vsel %vm1907_vm3, %v6046_v27, %v6048_v38  ;;  %v6194_v19 = vrot.slane %v5174_v53, 2 }
 0x801   : > { %5500 = vmatmul.bf16.gmra.mxu2 %v5420_v4  ;;  %v6195_v47 = vrot.slane %v5170_v26, 3  ;;  %v12716_v8 = vsel %vm2755_vm5, %v6354_v44, %v6356_v60  ;;  %v9990_v4 = vld [vmem:[%s13688_s1 + $0x5a8] sm:$0xff] }
 0x802   : > { %v5173_v28 = vsel %vm512_vm0, %v5168_v48, %v5172_v62  ;;  %v5176_v44 = vor.u32 %v5174_v53, %v5172_v62 }
 0x803   : > { %v5085_v36 = vpop.f32.mrf.mxu3  ;;  %5274 = vmatmul.bf16.gmra.mxu0 %v5173_v28  ;;  %v6196_v0 = vor.u32 %v6195_v47, %v6194_v19  ;;  %v10016_v19 = vld [vmem:[%s13688_s1 + $0x678] sm:$0xff]  ;;  %v10006_v47 = vld [vmem:[%s13688_s1 + $0x628] sm:$0xff] }
 0x804   : > { %v5541_v1 = vpack.c.bf16 %v5085_v36, %v5082_v13  ;;  %6279 = vmatpush.bf16.msrb.mxu3 %v10016_v19 }
 0x805   : > { %v12723_v14 = vsel %vm2420_vm4, %v6192_v37, %v6196_v0  ;;  %v10008_v37 = vld [vmem:[%s13688_s1 + $0x638] sm:$0xff] }
 0x806   : > { %v5574_v54 = vrot.slane %v5541_v1, 1  ;;  %v5737_v50 = vshrl.u32 %v5541_v1, 16  ;;  %v5740_v34 = vshll.u32 %v5541_v1, 16  ;;  %v5905_v29 = vrot.slane %v5541_v1, 2  ;;  %6113 = vmatpush.bf16.msrb.mxu2 %v10008_v37 }
 0x808   : > { %v5575_v6 = vsel %vm1061_vm1, %v5572_v49, %v5574_v54  ;;  %v5739_v11 = vrot.slane %v5737_v50, 1  ;;  %v5742_v33 = vrot.slane %v5740_v34, 2  ;;  %v12730_v2 = vsel %vm1907_vm3, %v5903_v39, %v5905_v29  ;;  %v9992_v39 = vld [vmem:[%s13688_s1 + $0x5b8] sm:$0xff]  ;;  %v10015_v50 = vld [vmem:[%s13688_s1 + $0x670] sm:$0xff]  ;;  %v10005_v34 = vld [vmem:[%s13688_s1 + $0x620] sm:$0xff] }
 0x809   : > { %5655 = vmatmul.bf16.gmra.mxu3 %v5575_v6  ;;  %5827 = vmatpush.bf16.msrb.mxu0 %v9992_v39 }
 0x80a   : > { %v5743_v31 = vor.u32 %v5742_v33, %v5739_v11  ;;  %6280 = vmatpush.bf16.msrb.mxu3 %v10015_v50 }
 0x80b   : > { %v5087_v30 = vpop.f32.mrf.mxu3 }
 0x80c   : > { %v12735_v18 = vpack.c.bf16 %v5087_v30, %v5085_v36  ;;  %v12738_v12 = vsel %vm1573_vm2, %v5734_v51, %v5743_v31  ;;  %v10007_v51 = vld [vmem:[%s13688_s1 + $0x630] sm:$0xff] }
 0x80d   : > { %6114 = vmatpush.bf16.msrb.mxu2 %v10007_v51  ;;  %5828 = vmatpush.bf16.msrb.mxu0 %v9991_v23 }
 0x80e   : > { %v5178_v16 = vshll.u32 %v12735_v18, 16  ;;  %v5182_v27 = vshrl.u32 %v12735_v18, 16  ;;  %v5421_v55 = vrot.slane %v12735_v18, 1  ;;  %5375 = vmatmul.bf16.gmra.mxu1 %v12735_v18  ;;  %v6050_v24 = vrot.slane %v12735_v18, 2 }
 0x80f   : > { %v6358_v21 = vrot.slane %v12735_v18, 3  ;;  %v9987_v18 = vld [vmem:[%s13688_s1 + $0x590] sm:$0xff] }
 0x810   : > { %v5180_v59 = vrot.slane %v5178_v16, 1  ;;  %v5422_v17 = vsel %vm1061_vm1, %v5419_v45, %v5421_v55  ;;  %v12755_v57 = vsel %vm1907_vm3, %v6048_v38, %v6050_v24  ;;  %v6198_v63 = vrot.slane %v5182_v27, 2  ;;  %v9994_v45 = vld [vmem:[%s13688_s1 + $0x5c8] sm:$0xff] }
 0x811   : > { %5505 = vmatmul.bf16.gmra.mxu2 %v5422_v17  ;;  %v6199_v42 = vrot.slane %v5178_v16, 3  ;;  %v12763_v10 = vsel %vm2755_vm5, %v6356_v60, %v6358_v21  ;;  %5974 = vmatpush.bf16.msrb.mxu1 %v9994_v45 }
 0x812   : > { %v5181_v49 = vsel %vm512_vm0, %v5176_v44, %v5180_v59  ;;  %6115 = vmatpush.bf16.msrb.mxu2 %v10006_v47  ;;  %5829 = vmatpush.bf16.msrb.mxu0 %v9990_v4  ;;  %v5184_v33 = vor.u32 %v5182_v27, %v5180_v59  ;;  %v10014_v27 = vld [vmem:[%s13688_s1 + $0x668] sm:$0xff]  ;;  %v10004_v44 = vld [vmem:[%s13688_s1 + $0x618] sm:$0xff] }
 0x813   : > { %v5090_v5 = vpop.f32.mrf.mxu3  ;;  %5279 = vmatmul.bf16.gmra.mxu0 %v5181_v49  ;;  %v12772_v58 = vor.u32 %v6199_v42, %v6198_v63  ;;  %v9988_v63 = vld [vmem:[%s13688_s1 + $0x598] sm:$0xff]  ;;  %6281 = vmatpush.bf16.msrb.mxu3 %v10014_v27  ;;  %v10003_v49 = vld [vmem:[%s13688_s1 + $0x610] sm:$0xff] }
 0x814   : > { %v12774_v7 = vpack.c.bf16 %v5090_v5, %v5087_v30 }
 0x815   : > { %v12784_v13 = vsel %vm2420_vm4, %v6196_v0, %v12772_v58  ;;  %5975 = vmatpush.bf16.msrb.mxu1 %v9993_v52 }
 0x816   : > { %v5576_v46 = vrot.slane %v12774_v7, 1  ;;  %v5746_v26 = vshrl.u32 %v12774_v7, 16  ;;  %v5749_v53 = vshll.u32 %v12774_v7, 16  ;;  %v5907_v15 = vrot.slane %v12774_v7, 2  ;;  %6116 = vmatpush.bf16.msrb.mxu2 %v10005_v34  ;;  %v9985_v7 = vld [vmem:[%s13688_s1 + $0x580] sm:$0xff]  ;;  %v10011_v34 = vld [vmem:[%s13688_s1 + $0x650] sm:$0xff] }
 0x818   : > { %v5577_v38 = vsel %vm1061_vm1, %v5574_v54, %v5576_v46  ;;  %v5748_v48 = vrot.slane %v5746_v26, 1  ;;  %v5751_v60 = vrot.slane %v5749_v53, 2  ;;  %v12799_v62 = vsel %vm1907_vm3, %v5905_v29, %v5907_v15  ;;  %v9989_v54 = vld [vmem:[%s13688_s1 + $0x5a0] sm:$0xff] }
 0x819   : > { %5660 = vmatmul.bf16.gmra.mxu3 %v5577_v38  ;;  %5830 = vmatpush.bf16.msrb.mxu0 %v9989_v54 }
 0x81a   : > { %v12810_v28 = vor.u32 %v5751_v60, %v5748_v48  ;;  %6117 = vmatpush.bf16.msrb.mxu2 %v10004_v44  ;;  %v10012_v48 = vld [vmem:[%s13688_s1 + $0x658] sm:$0xff]  ;;  %v10002_v60 = vld [vmem:[%s13688_s1 + $0x608] sm:$0xff] }
 0x81b   : > { %v5092_v36 = vpop.f32.mrf.mxu3 }
 0x81c   : > { %v12815_v0 = vpack.c.bf16 %v5092_v36, %v5090_v5  ;;  %v12819_v1 = vsel %vm1573_vm2, %v5743_v31, %v12810_v28 }
 0x81d   : > { %5831 = vmatpush.bf16.msrb.mxu0 %v9988_v63 }
 0x81e   : > { %v5186_v56 = vshll.u32 %v12815_v0, 16  ;;  %v5190_v29 = vshrl.u32 %v12815_v0, 16  ;;  %v5423_v6 = vrot.slane %v12815_v0, 1  ;;  %5380 = vmatmul.bf16.gmra.mxu1 %v12815_v0  ;;  %v6052_v11 = vrot.slane %v12815_v0, 2  ;;  %6118 = vmatpush.bf16.msrb.mxu2 %v10003_v49 }
 0x81f   : > { %v6360_v31 = vrot.slane %v12815_v0, 3  ;;  %v10009_v0 = vld [vmem:[%s13688_s1 + $0x640] sm:$0xff] }
 0x820   : > { %v5188_v35 = vrot.slane %v5186_v56, 1  ;;  %v5424_v30 = vsel %vm1061_vm1, %v5421_v55, %v5423_v6  ;;  %v12846_v16 = vsel %vm1907_vm3, %v6050_v24, %v6052_v11  ;;  %v6202_v61 = vrot.slane %v5190_v29, 2 }
 0x821   : > { %5510 = vmatmul.bf16.gmra.mxu2 %v5424_v30  ;;  %v6203_v59 = vrot.slane %v5186_v56, 3  ;;  %v12859_v55 = vsel %vm2755_vm5, %v6358_v21, %v6360_v31  ;;  %v10013_v21 = vld [vmem:[%s13688_s1 + $0x660] sm:$0xff]  ;;  %5832 = vmatpush.bf16.msrb.mxu0 %v9987_v18  ;;  %v10010_v18 = vld [vmem:[%s13688_s1 + $0x648] sm:$0xff] }
 0x822   : > { %v5189_v24 = vsel %vm512_vm0, %v5184_v33, %v5188_v35  ;;  %6282 = vmatpush.bf16.msrb.mxu3 %v10013_v21  ;;  %6119 = vmatpush.bf16.msrb.mxu2 %v10002_v60  ;;  %v5192_v50 = vor.u32 %v5190_v29, %v5188_v35  ;;  %v10001_v56 = vld [vmem:[%s13688_s1 + $0x600] sm:$0xff] }
 0x823   : > { %5284 = vmatmul.bf16.gmra.mxu0 %v5189_v24  ;;  %v5095_v17 = vpop.f32.mrf.mxu3  ;;  %v12865_v37 = vor.u32 %v6203_v59, %v6202_v61 }
 0x824   : > { %v12867_v42 = vpack.c.bf16 %v5095_v17, %v5092_v36  ;;  %v12883_v5 = vpack.c.bf16 %v5095_v17, %v5095_v17 }
 0x825   : > { %v12881_v40 = vsel %vm2420_vm4, %v12772_v58, %v12865_v37  ;;  %v9986_v58 = vld [vmem:[%s13688_s1 + $0x588] sm:$0xff] }
 0x826   : > { %v5578_v39 = vrot.slane %v12867_v42, 1  ;;  %v5755_v23 = vshrl.u32 %v12867_v42, 16  ;;  %v5758_v51 = vshll.u32 %v12867_v42, 16  ;;  %v5909_v26 = vrot.slane %v12867_v42, 2  ;;  %6283 = vmatpush.bf16.msrb.mxu3 %v10012_v48  ;;  %5833 = vmatpush.bf16.msrb.mxu0 %v9986_v58 }
 0x827   : > { %v5194_v4 = vshll.u32 %v12883_v5, 16  ;;  %v5425_v54 = vrot.slane %v12883_v5, 1  ;;  %6120 = vmatpush.bf16.msrb.mxu2 %v10001_v56 }
 0x828   : > { %v5579_v53 = vsel %vm1061_vm1, %v5576_v46, %v5578_v39  ;;  %v5757_v45 = vrot.slane %v5755_v23, 1  ;;  %v5760_v38 = vrot.slane %v5758_v51, 2  ;;  %v12906_v46 = vsel %vm1907_vm3, %v5907_v15, %v5909_v26 }
 0x829   : > { %5665 = vmatmul.bf16.gmra.mxu3 %v5579_v53  ;;  %v5196_v33 = vrot.slane %v5194_v4, 1  ;;  %v5426_v59 = vsel %vm1061_vm1, %v5423_v6, %v5425_v54  ;;  %v5198_v4 = vshrl.u32 %v12883_v5, 16 }
 0x82a   : > { %v5761_v47 = vor.u32 %v5760_v38, %v5757_v45  ;;  %6284 = vmatpush.bf16.msrb.mxu3 %v10011_v34  ;;  %5834 = vmatpush.bf16.msrb.mxu0 %v9985_v7 }
 0x82b   : > { %v5097_v19 = vpop.f32.mrf.mxu3 }
 0x82c   : > { %v12909_v52 = vpack.c.bf16 %v5097_v19, %v5097_v19  ;;  %v12911_v36 = vpack.c.bf16 %v5097_v19, %v5095_v17  ;;  %v12919_v15 = vsel %vm1573_vm2, %v12810_v28, %v5761_v47 }
 0x82e   : > { %5385 = vmatmul.bf16.gmra.mxu1 %v12883_v5  ;;  %v5764_v29 = vshrl.u32 %v12909_v52, 16  ;;  %v5767_v35 = vshll.u32 %v12909_v52, 16  ;;  %v6054_v30 = vrot.slane %v12911_v36, 2  ;;  %v6207_v28 = vshrl.u32 %v12911_v36, 16  ;;  %6285 = vmatpush.bf16.msrb.mxu3 %v10010_v18 }
 0x82f   : > { %v6210_v61 = vshll.u32 %v12911_v36, 16  ;;  %v5911_v27 = vrot.slane %v12909_v52, 2  ;;  %v6362_v44 = vrot.slane %v12911_v36, 3  ;;  %v5580_v45 = vrot.slane %v12909_v52, 1 }
 0x830   : > { %v5766_v24 = vrot.slane %v5764_v29, 1  ;;  %v5769_v17 = vrot.slane %v5767_v35, 2  ;;  %v12943_v63 = vsel %vm1907_vm3, %v6052_v11, %v6054_v30  ;;  %v6209_v21 = vrot.slane %v6207_v28, 2 }
 0x831   : > { %5515 = vmatmul.bf16.gmra.mxu2 %v5426_v59  ;;  %v6212_v49 = vrot.slane %v6210_v61, 3  ;;  %v12951_v6 = vsel %vm1907_vm3, %v5909_v26, %v5911_v27  ;;  %v12956_v23 = vsel %vm2755_vm5, %v6360_v31, %v6362_v44  ;;  %v5197_v11 = vsel %vm512_vm0, %v5192_v50, %v5196_v33 }
 0x832   : > { %v12959_v51 = vor.u32 %v5769_v17, %v5766_v24  ;;  %6286 = vmatpush.bf16.msrb.mxu3 %v10009_v0  ;;  %v5581_v38 = vsel %vm1061_vm1, %v5578_v39, %v5580_v45  ;;  %v5200_v39 = vor.u32 %v5198_v4, %v5196_v33 }
 0x833   : > { %5289 = vmatmul.bf16.gmra.mxu0 %v5197_v11  ;;  %v12961_v53 = vpop.f32.mrf.mxu3  ;;  %v6213_v58 = vor.u32 %v6212_v49, %v6209_v21 }
 0x834   : > { %v12966_v26 = vsel %vm1573_vm2, %v5761_v47, %v12959_v51 }
 0x835   : > { %v12973_v31 = vsel %vm2420_vm4, %v12865_v37, %v6213_v58 }
 0x839   : > { %5670 = vmatmul.bf16.gmra.mxu3 %v5581_v38 }
 0x83b   : > { %v5102_v48 = vpop.f32.mrf.mxu3 }
 0x83c   : > { %v12979_v60 = vpack.c.bf16 %v5102_v48, %v12961_v53  ;;  %v10024_v48 = vld [vmem:[%s13688_s1 + $0x6b8] sm:$0xff] }
 0x83d   : > { %6421 = vmatpush.bf16.msra.mxu0 %v10024_v48 }
 0x83e   : > { %5976 = vmatmul.bf16.vlgmr.msrb.gmra.mxu1 %v12685_v20  ;;  %v6216_v19 = vshrl.u32 %v12979_v60, 16  ;;  %v6219_v47 = vshll.u32 %v12979_v60, 16  ;;  %v6364_v37 = vrot.slane %v12979_v60, 3 }
 0x840   : > { %v6218_v50 = vrot.slane %v6216_v19, 2  ;;  %v6221_v7 = vrot.slane %v6219_v47, 3  ;;  %v12989_v42 = vsel %vm2755_vm5, %v6362_v44, %v6364_v37 }
 0x841   : > { %5520 = vmatmul.bf16.gmra.mxu2 %v5425_v54 }
 0x842   : > { %v12991_v34 = vor.u32 %v6221_v7, %v6218_v50 }
 0x843   : > { %5294 = vmatmul.bf16.gmra.mxu0 %v5200_v39 }
 0x844   : > { %v12995_v20 = vsel %vm2420_vm4, %v6213_v58, %v12991_v34 }
 0x849   : > { %5675 = vmatmul.bf16.gmra.mxu3 %v5580_v45 }
 0x84b   : > { %v5356_v5 = vpop.f32.mrf.mxu1 }
 0x84e   : > { %5981 = vmatmul.bf16.gmra.mxu1 %v12703_v32 }
 0x851   : > { %6121 = vmatmul.bf16.vlgmr.msrb.gmra.mxu2 %v12692_v25 }
 0x853   : > { %5835 = vmatmul.bf16.vlgmr.msrb.gmra.mxu0 %v12688_v41  ;;  %v5358_v56 = vpop.f32.mrf.mxu1 }
 0x859   : > { %6287 = vmatmul.bf16.vlgmr.msrb.gmra.mxu3 %v12699_v3 }
 0x85b   : > { %v5361_v33 = vpop.f32.mrf.mxu1 }
 0x85e   : > { %5986 = vmatmul.bf16.gmra.mxu1 %v12730_v2 }
 0x860   : > { %v5265_v54 = vpop.f32.mrf.mxu0 }
 0x861   : > { %6126 = vmatmul.bf16.gmra.mxu2 %v12713_v43  ;;  %v5357_v29 = vadd.f32 %v5356_v5, %v5265_v54 }
 0x863   : > { %5840 = vmatmul.bf16.gmra.mxu0 %v12706_v22  ;;  %v5363_v35 = vpop.f32.mrf.mxu1 }
 0x864   : > { %v5491_v28 = vpop.f32.mrf.mxu2 }
 0x865   : > { %v5525_v61 = vadd.f32 %v5491_v28, %v5357_v29 }
 0x868   : > { %v5267_v32 = vpop.f32.mrf.mxu0 }
 0x869   : > { %6292 = vmatmul.bf16.gmra.mxu3 %v12723_v14  ;;  %v5359_v25 = vadd.f32 %v5358_v56, %v5267_v32  ;;  %v10019_v32 = vld [vmem:[%s13688_s1 + $0x690] sm:$0xff] }
 0x86b   : > { %v5366_v41 = vpop.f32.mrf.mxu1 }
 0x86c   : > { %v5646_v44 = vpop.f32.mrf.mxu3  ;;  %v5493_v59 = vpop.f32.mrf.mxu2 }
 0x86d   : > { %v13005_v3 = vadd.f32 %v5646_v44, %v5525_v61  ;;  %v5526_v24 = vadd.f32 %v5493_v59, %v5359_v25 }
 0x86e   : > { %5991 = vmatmul.bf16.gmra.mxu1 %v12799_v62 }
 0x870   : > { %v5270_v2 = vpop.f32.mrf.mxu0 }
 0x871   : > { %6131 = vmatmul.bf16.gmra.mxu2 %v12755_v57  ;;  %v5362_v43 = vadd.f32 %v5361_v33, %v5270_v2  ;;  %v10021_v33 = vld [vmem:[%s13688_s1 + $0x6a0] sm:$0xff] }
 0x873   : > { %5845 = vmatmul.bf16.gmra.mxu0 %v12738_v12  ;;  %v13010_v22 = vpop.f32.mrf.mxu1 }
 0x874   : > { %v5648_v17 = vpop.f32.mrf.mxu3  ;;  %v5496_v18 = vpop.f32.mrf.mxu2 }
 0x875   : > { %v13012_v14 = vadd.f32 %v5648_v17, %v5526_v24  ;;  %v5527_v21 = vadd.f32 %v5496_v18, %v5362_v43 }
 0x878   : > { %v5272_v49 = vpop.f32.mrf.mxu0 }
 0x879   : > { %6297 = vmatmul.bf16.gmra.mxu3 %v12784_v13  ;;  %v5364_v11 = vadd.f32 %v5363_v35, %v5272_v49 }
 0x87b   : > { %v5371_v58 = vpop.f32.mrf.mxu1 }
 0x87c   : > { %v5651_v45 = vpop.f32.mrf.mxu3  ;;  %v5498_v62 = vpop.f32.mrf.mxu2 }
 0x87d   : > { %v13015_v0 = vadd.f32 %v5651_v45, %v5527_v21  ;;  %v5528_v57 = vadd.f32 %v5498_v62, %v5364_v11 }
 0x87e   : > { %5996 = vmatmul.bf16.gmra.mxu1 %v12906_v46  ;;  %v10023_v46 = vld [vmem:[%s13688_s1 + $0x6b0] sm:$0xff] }
 0x87f   : > { %6422 = vmatpush.bf16.msra.mxu0 %v10023_v46 }
 0x880   : > { %v5275_v12 = vpop.f32.mrf.mxu0 }
 0x881   : > { %6136 = vmatmul.bf16.gmra.mxu2 %v12846_v16  ;;  %v5367_v38 = vadd.f32 %v5366_v41, %v5275_v12 }
 0x883   : > { %5850 = vmatmul.bf16.gmra.mxu0 %v12819_v1  ;;  %v13023_v13 = vpop.f32.mrf.mxu1  ;;  %v10022_v1 = vld [vmem:[%s13688_s1 + $0x6a8] sm:$0xff] }
 0x884   : > { %v5653_v4 = vpop.f32.mrf.mxu3  ;;  %v5501_v19 = vpop.f32.mrf.mxu2  ;;  %6423 = vmatpush.bf16.msra.mxu0 %v10022_v1 }
 0x885   : > { %v13025_v47 = vadd.f32 %v5653_v4, %v5528_v57  ;;  %v5529_v50 = vadd.f32 %v5501_v19, %v5367_v38 }
 0x888   : > { %v13030_v16 = vpop.f32.mrf.mxu0  ;;  %6424 = vmatpush.bf16.msra.mxu0 %v10021_v33 }
 0x889   : > { %6302 = vmatmul.bf16.gmra.mxu3 %v12881_v40  ;;  %v10020_v40 = vld [vmem:[%s13688_s1 + $0x698] sm:$0xff] }
 0x88b   : > { %v5376_v7 = vpop.f32.mrf.mxu1 }
 0x88c   : > { %v5656_v39 = vpop.f32.mrf.mxu3  ;;  %v13036_v5 = vpop.f32.mrf.mxu2  ;;  %6425 = vmatpush.bf16.msra.mxu0 %v10020_v40 }
 0x88d   : > { %v13038_v56 = vadd.f32 %v5656_v39, %v5529_v50 }
 0x88e   : > { %6001 = vmatmul.bf16.gmra.mxu1 %v12951_v6 }
 0x890   : > { %v5280_v54 = vpop.f32.mrf.mxu0  ;;  %6426 = vmatpush.bf16.msra.mxu0 %v10019_v32 }
 0x891   : > { %6141 = vmatmul.bf16.gmra.mxu2 %v12943_v63  ;;  %v5372_v29 = vadd.f32 %v5371_v58, %v5280_v54  ;;  %v10018_v63 = vld [vmem:[%s13688_s1 + $0x688] sm:$0xff] }
 0x893   : > { %5855 = vmatmul.bf16.gmra.mxu0 %v12919_v15  ;;  %v13049_v35 = vpop.f32.mrf.mxu1  ;;  %v6025_v15 = vpack.c.bf16 %v12961_v53, %v12961_v53  ;;  %v10017_v53 = vld [vmem:[%s13688_s1 + $0x680] sm:$0xff] }
 0x894   : > { %v13051_v28 = vpop.f32.mrf.mxu3  ;;  %v5506_v6 = vpop.f32.mrf.mxu2  ;;  %6427 = vmatpush.bf16.msra.mxu0 %v10018_v63 }
 0x895   : > { %v5531_v61 = vadd.f32 %v5506_v6, %v5372_v29  ;;  %v6056_v44 = vrot.slane %v6025_v15, 2 }
 0x898   : > { %v13056_v25 = vpop.f32.mrf.mxu0  ;;  %6428 = vmatpush.bf16.msra.mxu0 %v10017_v53 }
 0x899   : > { %6307 = vmatmul.bf16.gmra.mxu3 %v12973_v31  ;;  %v6057_v31 = vsel %vm1907_vm3, %v6054_v30, %v6056_v44 }
 0x89b   : > { %v5381_v41 = vpop.f32.mrf.mxu1 }
 0x89c   : > { %v5661_v59 = vpop.f32.mrf.mxu3  ;;  %v13064_v24 = vpop.f32.mrf.mxu2 }
 0x89d   : > { %v13066_v2 = vadd.f32 %v5661_v59, %v5531_v61 }
 0x89e   : > { %6006 = vmatmul.bf16.gmra.mxu1 %v5911_v27 }
 0x8a0   : > { %v5285_v43 = vpop.f32.mrf.mxu0 }
 0x8a1   : > { %6146 = vmatmul.bf16.gmra.mxu2 %v6057_v31  ;;  %v5377_v17 = vadd.f32 %v5376_v7, %v5285_v43 }
 0x8a3   : > { %5860 = vmatmul.bf16.gmra.mxu0 %v12966_v26  ;;  %v13077_v18 = vpop.f32.mrf.mxu1 }
 0x8a4   : > { %v13079_v21 = vpop.f32.mrf.mxu3  ;;  %v5511_v52 = vpop.f32.mrf.mxu2 }
 0x8a5   : > { %v5533_v27 = vadd.f32 %v5511_v52, %v5377_v17 }
 0x8a8   : > { %v13081_v49 = vpop.f32.mrf.mxu0 }
 0x8a9   : > { %6312 = vmatmul.bf16.gmra.mxu3 %v12995_v20 }
 0x8ab   : > { %v5386_v11 = vpop.f32.mrf.mxu1 }
 0x8ac   : > { %v5666_v58 = vpop.f32.mrf.mxu3  ;;  %v13084_v36 = vpop.f32.mrf.mxu2 }
 0x8ad   : > { %v13086_v30 = vadd.f32 %v5666_v58, %v5533_v27 }
 0x8b0   : > { %v5290_v45 = vpop.f32.mrf.mxu0 }
 0x8b1   : > { %v5382_v62 = vadd.f32 %v5381_v41, %v5290_v45  ;;  %6151 = vmatmul.bf16.gmra.mxu2 %v6056_v44 }
 0x8b3   : > { %5865 = vmatmul.bf16.gmra.mxu0 %v12959_v51  ;;  %v5388_v26 = vpop.f32.mrf.mxu1 }
 0x8b4   : > { %v13089_v57 = vpop.f32.mrf.mxu3  ;;  %v5516_v12 = vpop.f32.mrf.mxu2 }
 0x8b5   : > { %v5535_v38 = vadd.f32 %v5516_v12, %v5382_v62 }
 0x8b8   : > { %v13091_v48 = vpop.f32.mrf.mxu0 }
 0x8b9   : > { %6317 = vmatmul.bf16.gmra.mxu3 %v12991_v34 }
 0x8bb   : > { %v5977_v20 = vpop.f32.mrf.mxu1 }
 0x8bc   : > { %v5671_v4 = vpop.f32.mrf.mxu3  ;;  %v13094_v19 = vpop.f32.mrf.mxu2 }
 0x8bd   : > { %v13096_v50 = vadd.f32 %v5671_v4, %v5535_v38 }
 0x8c0   : > { %v5295_v46 = vpop.f32.mrf.mxu0 }
 0x8c1   : > { %v5387_v1 = vadd.f32 %v5386_v11, %v5295_v46 }
 0x8c3   : > { %6429 = vmatmul.bf16.vlgmr.msra.gmra.mxu0 %v12695_v9  ;;  %v13099_v51 = vpop.f32.mrf.mxu1 }
 0x8c4   : > { %v13101_v7 = vpop.f32.mrf.mxu3  ;;  %v5521_v39 = vpop.f32.mrf.mxu2 }
 0x8c5   : > { %v5537_v33 = vadd.f32 %v5521_v39, %v5387_v1 }
 0x8c8   : > { %v5297_v54 = vpop.f32.mrf.mxu0 }
 0x8cb   : > { %v5982_v29 = vpop.f32.mrf.mxu1 }
 0x8cc   : > { %v5676_v40 = vpop.f32.mrf.mxu3  ;;  %v5523_v34 = vpop.f32.mrf.mxu2 }
 0x8cd   : > { %v13103_v6 = vadd.f32 %v5676_v40, %v5537_v33 }
 0x8d0   : > { %v5836_v61 = vpop.f32.mrf.mxu0 }
 0x8d1   : > { %v5870_v32 = vadd.f32 %v5836_v61, %v13005_v3 }
 0x8d3   : > { %6434 = vmatmul.bf16.gmra.mxu0 %v12716_v8  ;;  %v6011_v15 = vadd.f32 %v5977_v20, %v5870_v32  ;;  %v13107_v63 = vpop.f32.mrf.mxu1 }
 0x8d4   : > { %v5678_v9 = vpop.f32.mrf.mxu3  ;;  %v6122_v41 = vpop.f32.mrf.mxu2 }
 0x8d5   : > { %v6156_v44 = vadd.f32 %v6122_v41, %v6011_v15 }
 0x8d8   : > { %v5838_v59 = vpop.f32.mrf.mxu0 }
 0x8d9   : > { %v13110_v53 = vadd.f32 %v5838_v59, %v13012_v14 }
 0x8db   : > { %v5987_v43 = vpop.f32.mrf.mxu1 }
 0x8dc   : > { %v6288_v31 = vpop.f32.mrf.mxu3  ;;  %v13112_v17 = vpop.f32.mrf.mxu2 }
 0x8dd   : > { %v13114_v52 = vadd.f32 %v6288_v31, %v6156_v44 }
 0x8e0   : > { %v5841_v27 = vpop.f32.mrf.mxu0 }
 0x8e1   : > { %v5872_v3 = vadd.f32 %v5841_v27, %v13015_v0 }
 0x8e3   : > { %6439 = vmatmul.bf16.gmra.mxu0 %v12763_v10  ;;  %v6013_v8 = vadd.f32 %v5982_v29, %v5872_v3  ;;  %v13118_v11 = vpop.f32.mrf.mxu1 }
 0x8e4   : > { %v13120_v58 = vpop.f32.mrf.mxu3  ;;  %v6127_v45 = vpop.f32.mrf.mxu2 }
 0x8e5   : > { %v6158_v62 = vadd.f32 %v6127_v45, %v6013_v8 }
 0x8e8   : > { %v5843_v14 = vpop.f32.mrf.mxu0 }
 0x8e9   : > { %v13123_v26 = vadd.f32 %v5843_v14, %v13025_v47 }
 0x8eb   : > { %v5992_v12 = vpop.f32.mrf.mxu1 }
 0x8ec   : > { %v6293_v38 = vpop.f32.mrf.mxu3  ;;  %v13125_v20 = vpop.f32.mrf.mxu2 }
 0x8ed   : > { %v13127_v4 = vadd.f32 %v6293_v38, %v6158_v62 }
 0x8f0   : > { %v5846_v0 = vpop.f32.mrf.mxu0 }
 0x8f1   : > { %v5874_v10 = vadd.f32 %v5846_v0, %v13038_v56 }
 0x8f3   : > { %6444 = vmatmul.bf16.gmra.mxu0 %v12859_v55  ;;  %v6015_v46 = vadd.f32 %v5987_v43, %v5874_v10  ;;  %v13131_v1 = vpop.f32.mrf.mxu1 }
 0x8f4   : > { %v13133_v39 = vpop.f32.mrf.mxu3  ;;  %v6132_v33 = vpop.f32.mrf.mxu2 }
 0x8f5   : > { %v6160_v54 = vadd.f32 %v6132_v33, %v6015_v46 }
 0x8f8   : > { %v13135_v47 = vpop.f32.mrf.mxu0 }
 0x8fb   : > { %v5997_v29 = vpop.f32.mrf.mxu1 }
 0x8fc   : > { %v6298_v40 = vpop.f32.mrf.mxu3  ;;  %v13137_v34 = vpop.f32.mrf.mxu2 }
 0x8fd   : > { %v13139_v61 = vadd.f32 %v6298_v40, %v6160_v54 }
 0x900   : > { %v5851_v32 = vpop.f32.mrf.mxu0 }
 0x901   : > { %v5876_v56 = vadd.f32 %v5851_v32, %v13066_v2 }
 0x903   : > { %6449 = vmatmul.bf16.gmra.mxu0 %v12956_v23  ;;  %v6017_v55 = vadd.f32 %v5992_v12, %v5876_v56  ;;  %v5999_v15 = vpop.f32.mrf.mxu1  ;;  %v5379_v12 = vadd.f32 %v13049_v35, %v13081_v49 }
 0x904   : > { %v13143_v9 = vpop.f32.mrf.mxu3  ;;  %v6137_v41 = vpop.f32.mrf.mxu2 }
 0x905   : > { %v6162_v44 = vadd.f32 %v6137_v41, %v6017_v55  ;;  %v5534_v0 = vadd.f32 %v13084_v36, %v5379_v12  ;;  %v5384_v55 = vadd.f32 %v13077_v18, %v13091_v48 }
 0x907   : > { %v5689_v46 = vadd.f32 %v13089_v57, %v5534_v0 }
 0x908   : > { %v13145_v59 = vpop.f32.mrf.mxu0 }
 0x90b   : > { %v6002_v43 = vpop.f32.mrf.mxu1 }
 0x90c   : > { %v6303_v31 = vpop.f32.mrf.mxu3  ;;  %v13147_v27 = vpop.f32.mrf.mxu2 }
 0x90d   : > { %v13149_v3 = vadd.f32 %v6303_v31, %v6162_v44  ;;  %v5536_v44 = vadd.f32 %v13094_v19, %v5384_v55  ;;  %v13190_v55 = vld [vmem:[%s13690_s3 + $0x2] ss:$0 sm:$0xff] }
 0x910   : > { %v5856_v8 = vpop.f32.mrf.mxu0 }
 0x911   : > { %v5878_v45 = vadd.f32 %v5856_v8, %v13086_v30 }
 0x913   : > { %6454 = vmatmul.bf16.gmra.mxu0 %v12989_v42  ;;  %v6019_v23 = vadd.f32 %v5997_v29, %v5878_v45  ;;  %v6004_v2 = vpop.f32.mrf.mxu1 }
 0x914   : > { %v13153_v62 = vpop.f32.mrf.mxu3  ;;  %v6142_v14 = vpop.f32.mrf.mxu2 }
 0x915   : > { %v6164_v38 = vadd.f32 %v6142_v14, %v6019_v23 }
 0x918   : > { %v5858_v10 = vpop.f32.mrf.mxu0 }
 0x919   : > { %v5879_v33 = vadd.f32 %v5858_v10, %v5689_v46 }
 0x91b   : > { %v6007_v54 = vpop.f32.mrf.mxu1  ;;  %v6020_v42 = vadd.f32 %v5999_v15, %v5879_v33  ;;  %v5691_v15 = vadd.f32 %v13101_v7, %v5536_v44  ;;  %v6014_v44 = vadd.f32 %v13107_v63, %v13123_v26 }
 0x91c   : > { %v6308_v40 = vpop.f32.mrf.mxu3  ;;  %v6144_v30 = vpop.f32.mrf.mxu2 }
 0x91d   : > { %v13159_v32 = vadd.f32 %v6308_v40, %v6164_v38  ;;  %v6165_v35 = vadd.f32 %v6144_v30, %v6020_v42  ;;  %v6012_v30 = vadd.f32 %v13099_v51, %v13110_v53 }
 0x920   : > { %v5861_v29 = vpop.f32.mrf.mxu0 }
 0x921   : > { %v5880_v56 = vadd.f32 %v5861_v29, %v13096_v50  ;;  %v6157_v29 = vadd.f32 %v13112_v17, %v6012_v30 }
 0x923   : > { %6459 = vmatmul.bf16.gmra.mxu0 %v6364_v37  ;;  %v6021_v49 = vadd.f32 %v6002_v43, %v5880_v56  ;;  %v6009_v36 = vpop.f32.mrf.mxu1 }
 0x924   : > { %v6310_v57 = vpop.f32.mrf.mxu3  ;;  %v6147_v41 = vpop.f32.mrf.mxu2 }
 0x925   : > { %v13167_v31 = vadd.f32 %v6310_v57, %v6165_v35  ;;  %v6166_v8 = vadd.f32 %v6147_v41, %v6021_v49  ;;  %v6323_v35 = vadd.f32 %v13120_v58, %v6157_v29 }
 0x928   : > { %v5863_v45 = vpop.f32.mrf.mxu0 }
 0x929   : > { %v5881_v50 = vadd.f32 %v5863_v45, %v5691_v15 }
 0x92b   : > { %v6022_v23 = vadd.f32 %v6004_v2, %v5881_v50  ;;  %v6159_v50 = vadd.f32 %v13125_v20, %v6014_v44 }
 0x92c   : > { %v6313_v14 = vpop.f32.mrf.mxu3  ;;  %v6149_v18 = vpop.f32.mrf.mxu2 }
 0x92d   : > { %v13170_v48 = vadd.f32 %v6313_v14, %v6166_v8  ;;  %v6167_v60 = vadd.f32 %v6149_v18, %v6022_v23  ;;  %v5369_v14 = vadd.f32 %v13010_v22, %v13030_v16  ;;  %v6325_v18 = vadd.f32 %v13133_v39, %v6159_v50 }
 0x92f   : > { %v5530_v63 = vadd.f32 %v13036_v5, %v5369_v14 }
 0x930   : > { %v5866_v37 = vpop.f32.mrf.mxu0 }
 0x931   : > { %v5882_v43 = vadd.f32 %v5866_v37, %v13103_v6  ;;  %v13183_v6 = vld [vmem:[%s13689_s2 + $0x2] ss:$0 sm:$0xff] }
 0x933   : > { %v6023_v12 = vadd.f32 %v6007_v54, %v5882_v43 }
 0x934   : > { %v6315_v38 = vpop.f32.mrf.mxu3  ;;  %v6152_v0 = vpop.f32.mrf.mxu2 }
 0x935   : > { %v13173_v19 = vadd.f32 %v6315_v38, %v6167_v60  ;;  %v6168_v10 = vadd.f32 %v6152_v0, %v6023_v12 }
 0x938   : > { %v5868_v46 = vpop.f32.mrf.mxu0 }
 0x93c   : > { %v6318_v33 = vpop.f32.mrf.mxu3  ;;  %v6154_v7 = vpop.f32.mrf.mxu2 }
 0x93d   : > { %v13175_v40 = vadd.f32 %v6318_v33, %v6168_v10  ;;  %v5374_v33 = vadd.f32 %v13023_v13, %v13056_v25 }
 0x940   : > { %v6430_v2 = vpop.f32.mrf.mxu0 }
 0x941   : > { %v6464_v42 = vadd.f32 %v6430_v2, %v13114_v52 }
 0x943   : > { %v6479_v56 = vmul.f32 %v13183_v6, %v6464_v42 }
 0x944   : > { %v6320_v54 = vpop.f32.mrf.mxu3 }
 0x945   : > { %v6494_v53 = vadd.f32 %v13190_v55, %v6479_v56 }
 0x947   : > { %v6507_v36 = vmax.f32 %v6494_v53, 0.0 }
 0x948   : > { %v6432_v51 = vpop.f32.mrf.mxu0 }
 0x949   : > { %v6465_v52 = vadd.f32 %v6432_v51, %v6323_v35  ;;  %v13198_v8 = vmin.f32 %v6507_v36, 6.0 }
 0x94b   : > { %v6480_v49 = vmul.f32 %v13183_v6, %v6465_v52 }
 0x94d   : > { %v6495_v57 = vadd.f32 %v13190_v55, %v6480_v49 }
 0x94f   : > { %v6508_v41 = vmax.f32 %v6495_v57, 0.0 }
 0x950   : > { %v6435_v17 = vpop.f32.mrf.mxu0 }
 0x951   : > { %v13200_v15 = vmin.f32 %v6508_v41, 6.0  ;;  %v6466_v58 = vadd.f32 %v6435_v17, %v13127_v4  ;;  %v5685_v4 = vadd.f32 %v13051_v28, %v5530_v63 }
 0x953   : > { %v6533_v45 = vpack.c.bf16 %v13200_v15, %v13198_v8  ;;  %v6481_v23 = vmul.f32 %v13183_v6, %v6466_v58  ;;  %v5875_v12 = vadd.f32 %v13135_v47, %v5685_v4 }
 0x955   : > { %v6496_v26 = vadd.f32 %v13190_v55, %v6481_v23  ;;  %v6016_v22 = vadd.f32 %v13118_v11, %v5875_v12  ;;  %v5532_v11 = vadd.f32 %v13064_v24, %v5374_v33 }
 0x957   : > { %v6509_v20 = vmax.f32 %v6496_v26, 0.0  ;;  %v6161_v46 = vadd.f32 %v13137_v34, %v6016_v22 }
 0x958   : > { %v6437_v60 = vpop.f32.mrf.mxu0 }
 0x959   : > { %v6467_v37 = vadd.f32 %v6437_v60, %v6325_v18  ;;  %v13217_v16 = vmin.f32 %v6509_v20, 6.0  ;;  %v6327_v7 = vadd.f32 %v13143_v9, %v6161_v46 }
 0x95b   : > { %v6482_v43 = vmul.f32 %v13183_v6, %v6467_v37 }
 0x95d   : > { %v6497_v38 = vadd.f32 %v13190_v55, %v6482_v43 }
 0x95f   : > { %v6510_v0 = vmax.f32 %v6497_v38, 0.0 }
 0x960   : > { %v6440_v10 = vpop.f32.mrf.mxu0 }
 0x961   : > { %v13219_v39 = vmin.f32 %v6510_v0, 6.0  ;;  %v6468_v5 = vadd.f32 %v6440_v10, %v13139_v61  ;;  %v5687_v61 = vadd.f32 %v13079_v21, %v5532_v11 }
 0x963   : > { %v6534_v28 = vpack.c.bf16 %v13219_v39, %v13217_v16  ;;  %v6483_v47 = vmul.f32 %v13183_v6, %v6468_v5  ;;  %v5877_v29 = vadd.f32 %v13145_v59, %v5687_v61  ;;  %v6546_v16 = vld [vmem:[%s13693_s6 + $0x18] sm:$0xf]  ;;  %v10034_v39 = vld [vmem:[%s13688_s1 + $0x6f0] sm:$0xff] }
 0x964   : > { %v6560_v8 = vunpack.c.l.b16 %v6546_v16 }
 0x965   : > { %v6498_v30 = vadd.f32 %v13190_v55, %v6483_v47  ;;  %v6018_v13 = vadd.f32 %v13131_v1, %v5877_v29 }
 0x966   : > { %v6564_v15 = vpack.c.b16 %v6560_v8, %v6560_v8 }
 0x967   : > { %v6511_v34 = vmax.f32 %v6498_v30, 0.0  ;;  %v6163_v52 = vadd.f32 %v13147_v27, %v6018_v13  ;;  %v10074_v13 = vld [vmem:[%s13688_s1 + $0x830] sm:$0xff] }
 0x968   : > { %v6442_v2 = vpop.f32.mrf.mxu0 }
 0x969   : > { %v6469_v42 = vadd.f32 %v6442_v2, %v6327_v7  ;;  %v6524_v25 = vmin.f32 %v6511_v34, 6.0  ;;  %v6329_v49 = vadd.f32 %v13153_v62, %v6163_v52  ;;  %v10072_v52 = vld [vmem:[%s13688_s1 + $0x820] sm:$0xff] }
 0x96b   : > { %v6484_v54 = vmul.f32 %v13183_v6, %v6469_v42 }
 0x96d   : > { %v6499_v56 = vadd.f32 %v13190_v55, %v6484_v54 }
 0x96f   : > { %v6512_v35 = vmax.f32 %v6499_v56, 0.0 }
 0x970   : > { %v6445_v51 = vpop.f32.mrf.mxu0 }
 0x971   : > { %v6525_v9 = vmin.f32 %v6512_v35, 6.0  ;;  %v6470_v24 = vadd.f32 %v6445_v51, %v13149_v3  ;;  %v10075_v35 = vld [vmem:[%s13688_s1 + $0x838] sm:$0xff]  ;;  %v10032_v51 = vld [vmem:[%s13688_s1 + $0x6e0] sm:$0xff] }
 0x972   : > { %7201 = vmatpush.bf16.msrb.mxu0 %v10075_v35  ;;  %v10047_v35 = vld [vmem:[%s13688_s1 + $0x758] sm:$0xff] }
 0x973   : > { %v6535_v53 = vpack.c.bf16 %v6525_v9, %v6524_v25  ;;  %v6485_v21 = vmul.f32 %v13183_v6, %v6470_v24  ;;  %v10031_v25 = vld [vmem:[%s13688_s1 + $0x6d8] sm:$0xff]  ;;  %v10073_v9 = vld [vmem:[%s13688_s1 + $0x828] sm:$0xff] }
 0x974   : > { %v10059_v24 = vld [vmem:[%s13688_s1 + $0x7b8] sm:$0xff] }
 0x975   : > { %v6500_v59 = vadd.f32 %v13190_v55, %v6485_v21  ;;  %v10043_v21 = vld [vmem:[%s13688_s1 + $0x738] sm:$0xff] }
 0x976   : > { %7202 = vmatpush.bf16.msrb.mxu0 %v10074_v13  ;;  %6719 = vmatpush.bf16.msra.mxu2 %v10043_v21  ;;  %v10046_v13 = vld [vmem:[%s13688_s1 + $0x750] sm:$0xff] }
 0x977   : > { %v6513_v17 = vmax.f32 %v6500_v59, 0.0  ;;  %v10029_v59 = vld [vmem:[%s13688_s1 + $0x6c8] sm:$0xff] }
 0x978   : > { %v6447_v36 = vpop.f32.mrf.mxu0 }
 0x979   : > { %v6471_v57 = vadd.f32 %v6447_v36, %v6329_v49  ;;  %v6526_v50 = vmin.f32 %v6513_v17, 6.0  ;;  %v10042_v49 = vld [vmem:[%s13688_s1 + $0x730] sm:$0xff]  ;;  %v10028_v17 = vld [vmem:[%s13688_s1 + $0x6c0] sm:$0xff] }
 0x97a   : > { %7203 = vmatpush.bf16.msrb.mxu0 %v10073_v9  ;;  %v10058_v36 = vld [vmem:[%s13688_s1 + $0x7b0] sm:$0xff]  ;;  %6720 = vmatpush.bf16.msra.mxu2 %v10042_v49 }
 0x97b   : > { %v6486_v41 = vmul.f32 %v13183_v6, %v6471_v57  ;;  %v10071_v57 = vld [vmem:[%s13688_s1 + $0x818] sm:$0xff] }
 0x97d   : > { %v6501_v1 = vadd.f32 %v13190_v55, %v6486_v41  ;;  %v10057_v41 = vld [vmem:[%s13688_s1 + $0x7a8] sm:$0xff] }
 0x97e   : > { %7204 = vmatpush.bf16.msrb.mxu0 %v10072_v52 }
 0x97f   : > { %v6514_v44 = vmax.f32 %v6501_v1, 0.0  ;;  %v10070_v1 = vld [vmem:[%s13688_s1 + $0x810] sm:$0xff] }
 0x980   : > { %v6450_v58 = vpop.f32.mrf.mxu0 }
 0x981   : > { %v6527_v3 = vmin.f32 %v6514_v44, 6.0  ;;  %v6472_v23 = vadd.f32 %v6450_v58, %v13159_v32  ;;  %v10041_v44 = vld [vmem:[%s13688_s1 + $0x728] sm:$0xff]  ;;  %v10040_v58 = vld [vmem:[%s13688_s1 + $0x720] sm:$0xff] }
 0x982   : > { %7205 = vmatpush.bf16.msrb.mxu0 %v10071_v57  ;;  %6721 = vmatpush.bf16.msra.mxu2 %v10041_v44 }
 0x983   : > { %v6536_v27 = vpack.c.bf16 %v6527_v3, %v6526_v50  ;;  %v6487_v14 = vmul.f32 %v13183_v6, %v6472_v23  ;;  %v10056_v50 = vld [vmem:[%s13688_s1 + $0x7a0] sm:$0xff]  ;;  %v10069_v3 = vld [vmem:[%s13688_s1 + $0x808] sm:$0xff]  ;;  %v10055_v23 = vld [vmem:[%s13688_s1 + $0x798] sm:$0xff] }
 0x985   : > { %v6502_v62 = vadd.f32 %v13190_v55, %v6487_v14  ;;  %v10039_v14 = vld [vmem:[%s13688_s1 + $0x718] sm:$0xff] }
 0x986   : > { %7206 = vmatpush.bf16.msrb.mxu0 %v10070_v1  ;;  %6722 = vmatpush.bf16.msra.mxu2 %v10040_v58  ;;  %v10044_v58 = vld [vmem:[%s13688_s1 + $0x740] sm:$0xff] }
 0x987   : > { %v6515_v26 = vmax.f32 %v6502_v62, 0.0  ;;  %v10054_v62 = vld [vmem:[%s13688_s1 + $0x790] sm:$0xff] }
 0x988   : > { %v6452_v18 = vpop.f32.mrf.mxu0 }
 0x989   : > { %v6473_v60 = vadd.f32 %v6452_v18, %v13167_v31  ;;  %v6528_v12 = vmin.f32 %v6515_v26, 6.0  ;;  %v10038_v18 = vld [vmem:[%s13688_s1 + $0x710] sm:$0xff]  ;;  %v10036_v26 = vld [vmem:[%s13688_s1 + $0x700] sm:$0xff] }
 0x98a   : > { %7207 = vmatpush.bf16.msrb.mxu0 %v10069_v3  ;;  %6723 = vmatpush.bf16.msra.mxu2 %v10039_v14  ;;  %v10099_v14 = vld [vmem:[%s13688_s1 + $0x8f8] sm:$0xff] }
 0x98b   : > { %v6488_v63 = vmul.f32 %v13183_v6, %v6473_v60  ;;  %v10053_v60 = vld [vmem:[%s13688_s1 + $0x788] sm:$0xff] }
 0x98d   : > { %v6503_v37 = vadd.f32 %v13190_v55, %v6488_v63  ;;  %v10037_v63 = vld [vmem:[%s13688_s1 + $0x708] sm:$0xff] }
 0x98e   : > { %6724 = vmatpush.bf16.msra.mxu2 %v10038_v18 }
 0x98f   : > { %v6516_v4 = vmax.f32 %v6503_v37, 0.0  ;;  %v10052_v37 = vld [vmem:[%s13688_s1 + $0x780] sm:$0xff] }
 0x990   : > { %v6455_v43 = vpop.f32.mrf.mxu0 }
 0x991   : > { %v6529_v20 = vmin.f32 %v6516_v4, 6.0  ;;  %v6474_v38 = vadd.f32 %v6455_v43, %v13170_v48  ;;  %v10067_v4 = vld [vmem:[%s13688_s1 + $0x7f8] sm:$0xff]  ;;  %v10066_v43 = vld [vmem:[%s13688_s1 + $0x7f0] sm:$0xff] }
 0x992   : > { %6725 = vmatpush.bf16.msra.mxu2 %v10037_v63 }
 0x993   : > { %v6537_v32 = vpack.c.bf16 %v6529_v20, %v6528_v12  ;;  %v6489_v0 = vmul.f32 %v13183_v6, %v6474_v38  ;;  %v10065_v20 = vld [vmem:[%s13688_s1 + $0x7e8] sm:$0xff]  ;;  %v10064_v38 = vld [vmem:[%s13688_s1 + $0x7e0] sm:$0xff] }
 0x995   : > { %v6504_v22 = vadd.f32 %v13190_v55, %v6489_v0 }
 0x996   : > { %6726 = vmatpush.bf16.msra.mxu2 %v10036_v26 }
 0x997   : > { %v6517_v46 = vmax.f32 %v6504_v22, 0.0  ;;  %v10091_v22 = vld [vmem:[%s13688_s1 + $0x8b8] sm:$0xff] }
 0x998   : > { %v6457_v10 = vpop.f32.mrf.mxu0 }
 0x999   : > { %v6475_v5 = vadd.f32 %v6457_v10, %v13173_v19  ;;  %v6530_v2 = vmin.f32 %v6517_v46, 6.0  ;;  %v10063_v10 = vld [vmem:[%s13688_s1 + $0x7d8] sm:$0xff] }
 0x99a   : > { %v10051_v46 = vld [vmem:[%s13688_s1 + $0x778] sm:$0xff] }
 0x99b   : > { %v6490_v31 = vmul.f32 %v13183_v6, %v6475_v5  ;;  %v10062_v5 = vld [vmem:[%s13688_s1 + $0x7d0] sm:$0xff]  ;;  %6889 = vmatpush.bf16.msrb.mxu2 %v10051_v46 }
 0x99d   : > { %v6505_v47 = vadd.f32 %v13190_v55, %v6490_v31 }
 0x99f   : > { %v6518_v33 = vmax.f32 %v6505_v47, 0.0 }
 0x9a0   : > { %v6460_v7 = vpop.f32.mrf.mxu0 }
 0x9a1   : > { %v6531_v11 = vmin.f32 %v6518_v33, 6.0  ;;  %v6476_v30 = vadd.f32 %v6460_v7, %v13175_v40  ;;  %v10025_v40 = vld [vmem:[%s13693_s6] sm:$0xff]  ;;  %v10050_v33 = vld [vmem:[%s13688_s1 + $0x770] sm:$0xff] }
 0x9a2   : > { %v10090_v7 = vld [vmem:[%s13688_s1 + $0x8b0] sm:$0xff]  ;;  %6890 = vmatpush.bf16.msrb.mxu2 %v10050_v33 }
 0x9a3   : > { %v6491_v48 = vmul.f32 %v13183_v6, %v6476_v30  ;;  %v6538_v42 = vpack.c.bf16 %v6531_v11, %v6530_v2  ;;  %v10026_v6 = vld [vmem:[%s13693_s6 + $0x8] sm:$0xff] }
 0x9a4   : > { %v10061_v2 = vld [vmem:[%s13688_s1 + $0x7c8] sm:$0xff] }
 0x9a5   : > { %v6506_v61 = vadd.f32 %v13190_v55, %v6491_v48  ;;  %v10027_v55 = vld [vmem:[%s13693_s6 + $0x10] sm:$0xff]  ;;  %v10049_v30 = vld [vmem:[%s13688_s1 + $0x768] sm:$0xff] }
 0x9a6   : > { %v10089_v48 = vld [vmem:[%s13688_s1 + $0x8a8] sm:$0xff]  ;;  %6891 = vmatpush.bf16.msrb.mxu2 %v10049_v30 }
 0x9a7   : > { %v6519_v54 = vmax.f32 %v6506_v61, 0.0 }
 0x9a8   : > { %v6462_v29 = vpop.f32.mrf.mxu0 }
 0x9a9   : > { %v6532_v34 = vmin.f32 %v6519_v54, 6.0 }
 0x9ab   : > { %v6539_v19 = vpack.c.bf16 %v6532_v34, %v6532_v34  ;;  %v10048_v34 = vld [vmem:[%s13688_s1 + $0x760] sm:$0xff] }
 0x9ac   : > { %6892 = vmatpush.bf16.msrb.mxu2 %v10048_v34  ;;  %v10082_v34 = vld [vmem:[%s13688_s1 + $0x870] sm:$0xff] }
 0x9ad   : > { %v6578_v56 = vsel %vm3386_vm6, %v6539_v19, 0  ;;  %v10088_v19 = vld [vmem:[%s13688_s1 + $0x8a0] sm:$0xff] }
 0x9ae   : > { %6581 = vmatpush.bf16.msra.mxu1 %v6578_v56 }
 0x9b0   : > { %6893 = vmatpush.bf16.msrb.mxu2 %v10047_v35 }
 0x9b2   : > { %6582 = vmatpush.bf16.msra.mxu1 %v6538_v42  ;;  %v10060_v42 = vld [vmem:[%s13688_s1 + $0x7c0] sm:$0xff] }
 0x9b4   : > { %6894 = vmatpush.bf16.msrb.mxu2 %v10046_v13 }
 0x9b6   : > { %6583 = vmatpush.bf16.msra.mxu1 %v6537_v32 }
 0x9ba   : > { %6584 = vmatpush.bf16.msra.mxu1 %v6536_v27  ;;  %v10068_v27 = vld [vmem:[%s13688_s1 + $0x800] sm:$0xff] }
 0x9bb   : > { %7208 = vmatpush.bf16.msrb.mxu0 %v10068_v27 }
 0x9be   : > { %6585 = vmatpush.bf16.msra.mxu1 %v6535_v53  ;;  %v10030_v53 = vld [vmem:[%s13688_s1 + $0x6d0] sm:$0xff] }
 0x9c2   : > { %6586 = vmatpush.bf16.msra.mxu1 %v6534_v28  ;;  %v10033_v28 = vld [vmem:[%s13688_s1 + $0x6e8] sm:$0xff] }
 0x9c6   : > { %6587 = vmatpush.bf16.msra.mxu1 %v6533_v45  ;;  %v10035_v45 = vld [vmem:[%s13688_s1 + $0x6f8] sm:$0xff] }
 0x9c7   : > { %6790 = vmatpush.bf16.msra.mxu3 %v10035_v45  ;;  %v10087_v45 = vld [vmem:[%s13688_s1 + $0x898] sm:$0xff] }
 0x9c9   : > { %9274 = vmatmul.msk.bf16.vlgmr.msra.gmra.mxu1 %vm5028_vm8, %v10025_v40 }
 0x9ca   : > { %6992 = vmatpush.bf16.msrb.mxu1 %v10059_v24 }
 0x9cb   : > { %6791 = vmatpush.bf16.msra.mxu3 %v10034_v39 }
 0x9ce   : > { %6993 = vmatpush.bf16.msrb.mxu1 %v10058_v36  ;;  %v10045_v36 = vld [vmem:[%s13688_s1 + $0x748] sm:$0xff] }
 0x9cf   : > { %6792 = vmatpush.bf16.msra.mxu3 %v10033_v28  ;;  %6895 = vmatpush.bf16.msrb.mxu2 %v10045_v36 }
 0x9d2   : > { %6994 = vmatpush.bf16.msrb.mxu1 %v10057_v41 }
 0x9d3   : > { %6793 = vmatpush.bf16.msra.mxu3 %v10032_v51  ;;  %6896 = vmatpush.bf16.msrb.mxu2 %v10044_v58 }
 0x9d6   : > { %6995 = vmatpush.bf16.msrb.mxu1 %v10056_v50  ;;  %v10084_v50 = vld [vmem:[%s13688_s1 + $0x880] sm:$0xff] }
 0x9d7   : > { %6794 = vmatpush.bf16.msra.mxu3 %v10031_v25  ;;  %v10086_v25 = vld [vmem:[%s13688_s1 + $0x890] sm:$0xff] }
 0x9d9   : > { %9275 = vmatmul.msk.bf16.gmra.mxu1 %vm5028_vm8, %v10026_v6 }
 0x9da   : > { %6996 = vmatpush.bf16.msrb.mxu1 %v10055_v23 }
 0x9db   : > { %6795 = vmatpush.bf16.msra.mxu3 %v10030_v53 }
 0x9de   : > { %6997 = vmatpush.bf16.msrb.mxu1 %v10054_v62 }
 0x9df   : > { %6796 = vmatpush.bf16.msra.mxu3 %v10029_v59  ;;  %v10085_v59 = vld [vmem:[%s13688_s1 + $0x888] sm:$0xff] }
 0x9e2   : > { %6998 = vmatpush.bf16.msrb.mxu1 %v10053_v60 }
 0x9e3   : > { %6797 = vmatpush.bf16.msra.mxu3 %v10028_v17 }
 0x9e6   : > { %6999 = vmatpush.bf16.msrb.mxu1 %v10052_v37  ;;  %v10098_v37 = vld [vmem:[%s13688_s1 + $0x8f0] sm:$0xff] }
 0x9e7   : > { %7105 = vmatpush.bf16.msrb.mxu3 %v10067_v4 }
 0x9e9   : > { %9276 = vmatmul.msk.bf16.gmra.mxu1 %vm5028_vm8, %v10027_v55 }
 0x9ea   : > { %7428 = vmatpush.bf16.msra.mxu1 %v10091_v22  ;;  %v10096_v22 = vld [vmem:[%s13688_s1 + $0x8e0] sm:$0xff] }
 0x9eb   : > { %7106 = vmatpush.bf16.msrb.mxu3 %v10066_v43 }
 0x9ee   : > { %7429 = vmatpush.bf16.msra.mxu1 %v10090_v7  ;;  %v10095_v7 = vld [vmem:[%s13688_s1 + $0x8d8] sm:$0xff] }
 0x9ef   : > { %7107 = vmatpush.bf16.msrb.mxu3 %v10065_v20  ;;  %v10097_v20 = vld [vmem:[%s13688_s1 + $0x8e8] sm:$0xff] }
 0x9f2   : > { %7430 = vmatpush.bf16.msra.mxu1 %v10089_v48  ;;  %v10094_v48 = vld [vmem:[%s13688_s1 + $0x8d0] sm:$0xff] }
 0x9f3   : > { %7108 = vmatpush.bf16.msrb.mxu3 %v10064_v38 }
 0x9f6   : > { %7431 = vmatpush.bf16.msra.mxu1 %v10088_v19 }
 0x9f7   : > { %7109 = vmatpush.bf16.msrb.mxu3 %v10063_v10 }
 0x9f9   : > { %9277 = vmatmul.msk.bf16.gmra.mxu1 %vm5028_vm8, %v6564_v15 }
 0x9fa   : > { %7432 = vmatpush.bf16.msra.mxu1 %v10087_v45 }
 0x9fb   : > { %7110 = vmatpush.bf16.msrb.mxu3 %v10062_v5 }
 0x9fe   : > { %7433 = vmatpush.bf16.msra.mxu1 %v10086_v25 }
 0x9ff   : > { %7111 = vmatpush.bf16.msrb.mxu3 %v10061_v2 }
 0xa02   : > { %7434 = vmatpush.bf16.msra.mxu1 %v10085_v59 }
 0xa03   : > { %7112 = vmatpush.bf16.msrb.mxu3 %v10060_v42  ;;  %v10083_v42 = vld [vmem:[%s13688_s1 + $0x878] sm:$0xff] }
 0xa06   : > { %7435 = vmatpush.bf16.msra.mxu1 %v10084_v50 }
 0xa46   : > { %v6589_v12 = vpop.f32.mrf.mxu1 }
 0xa4e   : > { %v6591_v32 = vpop.f32.mrf.mxu1 }
 0xa4f   : > { %v13389_v0 = vpack.c.bf16 %v6591_v32, %v6589_v12 }
 0xa51   : > { %6798 = vmatmul.bf16.vlgmr.msra.gmra.mxu3 %v13389_v0  ;;  %v6648_v11 = vshll.u32 %v13389_v0, 16  ;;  %v6646_v56 = vshrl.u32 %v13389_v0, 16  ;;  %v6936_v55 = vrot.slane %v13389_v0, 3 }
 0xa52   : > { %7530 = vmatpush.bf16.msra.mxu3 %v10099_v14 }
 0xa53   : > { %v6650_v29 = vrot.slane %v6648_v11, 1  ;;  %v7038_v38 = vrot.slane %v6646_v56, 3 }
 0xa55   : > { %v6651_v16 = vor.u32 %v6650_v29, %v6646_v56 }
 0xa56   : > { %v6594_v31 = vpop.f32.mrf.mxu1  ;;  %7531 = vmatpush.bf16.msra.mxu3 %v10098_v37 }
 0xa57   : > { %v13404_v47 = vpack.c.bf16 %v6594_v31, %v6591_v32  ;;  %v7039_v32 = vrot.slane %v6648_v11, 4 }
 0xa59   : > { %7209 = vmatmul.bf16.vlgmr.msrb.gmra.mxu0 %v13404_v47  ;;  %v7249_v24 = vrot.slane %v13404_v47, 2  ;;  %v7474_v52 = vrot.slane %v13404_v47, 3  ;;  %v7040_v5 = vor.u32 %v7039_v32, %v7038_v38 }
 0xa5a   : > { %7532 = vmatpush.bf16.msra.mxu3 %v10097_v20 }
 0xa5e   : > { %v6596_v61 = vpop.f32.mrf.mxu1  ;;  %7533 = vmatpush.bf16.msra.mxu3 %v10096_v22 }
 0xa5f   : > { %v13426_v54 = vpack.c.bf16 %v6596_v61, %v6594_v31 }
 0xa61   : > { %v6653_v40 = vshll.u32 %v13426_v54, 16  ;;  %6803 = vmatmul.bf16.gmra.mxu3 %v13426_v54  ;;  %v6937_v6 = vrot.slane %v13426_v54, 3  ;;  %v6657_v3 = vshrl.u32 %v13426_v54, 16 }
 0xa62   : > { %7534 = vmatpush.bf16.msra.mxu3 %v10095_v7 }
 0xa63   : > { %v6655_v8 = vrot.slane %v6653_v40, 1  ;;  %v6938_v15 = vsel %vm2755_vm5, %v6936_v55, %v6937_v6  ;;  %v7041_v43 = vrot.slane %v6657_v3, 3  ;;  %v7042_v12 = vrot.slane %v6653_v40, 4  ;;  %v10093_v40 = vld [vmem:[%s13688_s1 + $0x8c8] sm:$0xff] }
 0xa64   : > { %7000 = vmatmul.bf16.vlgmr.msrb.gmra.mxu1 %v6938_v15  ;;  %v7355_v55 = vshll.u32 %v13404_v47, 16 }
 0xa65   : > { %v6656_v39 = vsel %vm512_vm0, %v6651_v16, %v6655_v8  ;;  %v6659_v62 = vor.u32 %v6657_v3, %v6655_v8  ;;  %v7043_v10 = vor.u32 %v7042_v12, %v7041_v43  ;;  %v10081_v8 = vld [vmem:[%s13688_s1 + $0x868] sm:$0xff] }
 0xa66   : > { %6727 = vmatmul.bf16.vlgmr.msra.gmra.mxu2 %v6656_v39  ;;  %v6599_v28 = vpop.f32.mrf.mxu1  ;;  %7535 = vmatpush.bf16.msra.mxu3 %v10094_v48  ;;  %v10092_v39 = vld [vmem:[%s13688_s1 + $0x8c0] sm:$0xff]  ;;  %v7357_v35 = vrot.slane %v7355_v55, 3 }
 0xa67   : > { %v13449_v51 = vpack.c.bf16 %v6599_v28, %v6596_v61  ;;  %v13457_v9 = vpack.c.bf16 %v6599_v28, %v6599_v28  ;;  %v7044_v33 = vsel %vm7037_vm9, %v7040_v5, %v7043_v10  ;;  %7305 = vmatpush.bf16.msra.mxu2 %v10083_v42 }
 0xa69   : > { %v7250_v53 = vrot.slane %v13449_v51, 2  ;;  %7214 = vmatmul.bf16.gmra.mxu0 %v13449_v51  ;;  %v7475_v21 = vrot.slane %v13449_v51, 3  ;;  %v6661_v41 = vshll.u32 %v13457_v9, 16  ;;  %v6665_v46 = vshrl.u32 %v13457_v9, 16 }
 0xa6a   : > { %v7360_v19 = vshrl.u32 %v13449_v51, 16  ;;  %v7363_v56 = vshll.u32 %v13449_v51, 16  ;;  %7536 = vmatpush.bf16.msra.mxu3 %v10093_v40 }
 0xa6b   : > { %v13465_v49 = vsel %vm1907_vm3, %v7249_v24, %v7250_v53  ;;  %v13476_v57 = vsel %vm2755_vm5, %v7474_v52, %v7475_v21  ;;  %v6663_v23 = vrot.slane %v6661_v41, 1  ;;  %7306 = vmatpush.bf16.msra.mxu2 %v10082_v34  ;;  %v6834_v24 = vrot.slane %v13426_v54, 1  ;;  %v10078_v54 = vld [vmem:[%s13688_s1 + $0x850] sm:$0xff] }
 0xa6c   : > { %v7362_v15 = vrot.slane %v7360_v19, 2  ;;  %v7365_v45 = vrot.slane %v7363_v56, 3  ;;  %v6833_v52 = vrot.slane %v13389_v0, 1 }
 0xa6d   : > { %v6664_v26 = vsel %vm512_vm0, %v6659_v62, %v6663_v23  ;;  %v6667_v2 = vor.u32 %v6665_v46, %v6663_v23  ;;  %v10076_v23 = vld [vmem:[%s13688_s1 + $0x840] sm:$0xff] }
 0xa6e   : > { %v13479_v17 = vpop.f32.mrf.mxu1  ;;  %7537 = vmatpush.bf16.msra.mxu3 %v10092_v39  ;;  %v7366_v25 = vor.u32 %v7365_v45, %v7362_v15  ;;  %v6835_v41 = vsel %vm1061_vm1, %v6833_v52, %v6834_v24 }
 0xa6f   : > { %v6917_v1 = vpack.c.bf16 %v13479_v17, %v6599_v28  ;;  %v13484_v44 = vpack.c.bf16 %v13479_v17, %v13479_v17  ;;  %7307 = vmatpush.bf16.msra.mxu2 %v10081_v8 }
 0xa71   : > { %6808 = vmatmul.bf16.gmra.mxu3 %v13457_v9  ;;  %v7252_v27 = vrot.slane %v13484_v44, 2  ;;  %v6939_v18 = vrot.slane %v6917_v1, 3  ;;  %v7046_v11 = vshrl.u32 %v6917_v1, 16  ;;  %v7049_v30 = vshll.u32 %v6917_v1, 16  ;;  %v10079_v1 = vld [vmem:[%s13688_s1 + $0x858] sm:$0xff] }
 0xa73   : > { %v6940_v60 = vsel %vm2755_vm5, %v6937_v6, %v6939_v18  ;;  %v13502_v63 = vsel %vm1907_vm3, %v7250_v53, %v7252_v27  ;;  %v7048_v61 = vrot.slane %v7046_v11, 3  ;;  %v7051_v29 = vrot.slane %v7049_v30, 4 }
 0xa74   : > { %7005 = vmatmul.bf16.gmra.mxu1 %v6940_v60  ;;  %v7352_v6 = vshrl.u32 %v13404_v47, 16  ;;  %v10080_v47 = vld [vmem:[%s13688_s1 + $0x860] sm:$0xff] }
 0xa75   : > { %v7052_v16 = vor.u32 %v7051_v29, %v7048_v61  ;;  %7308 = vmatpush.bf16.msra.mxu2 %v10080_v47 }
 0xa76   : > { %6732 = vmatmul.bf16.gmra.mxu2 %v6664_v26  ;;  %v6604_v4 = vpop.f32.mrf.mxu1  ;;  %v7354_v28 = vrot.slane %v7352_v6, 2 }
 0xa77   : > { %v7053_v13 = vsel %vm7037_vm9, %v7043_v10, %v7052_v16  ;;  %v7333_v59 = vpack.c.bf16 %v6604_v4, %v13479_v17  ;;  %v10077_v17 = vld [vmem:[%s13688_s1 + $0x848] sm:$0xff] }
 0xa78   : > { %v7358_v53 = vor.u32 %v7357_v35, %v7354_v28 }
 0xa79   : > { %7219 = vmatmul.bf16.gmra.mxu0 %v13484_v44  ;;  %7309 = vmatpush.bf16.msra.mxu2 %v10079_v1  ;;  %v7369_v58 = vshrl.u32 %v7333_v59, 16  ;;  %v7372_v0 = vshll.u32 %v7333_v59, 16  ;;  %v7477_v26 = vrot.slane %v7333_v59, 3 }
 0xa7a   : > { %v7367_v36 = vsel %vm2420_vm4, %v7358_v53, %v7366_v25 }
 0xa7b   : > { %v7371_v50 = vrot.slane %v7369_v58, 2  ;;  %v7374_v3 = vrot.slane %v7372_v0, 3  ;;  %v7478_v37 = vsel %vm2755_vm5, %v7475_v21, %v7477_v26 }
 0xa7d   : > { %7310 = vmatpush.bf16.msra.mxu2 %v10078_v54  ;;  %v7375_v14 = vor.u32 %v7374_v3, %v7371_v50 }
 0xa7e   : > { %v6606_v31 = vpop.f32.mrf.mxu1 }
 0xa7f   : > { %v7376_v62 = vsel %vm2420_vm4, %v7366_v25, %v7375_v14 }
 0xa81   : > { %7113 = vmatmul.bf16.vlgmr.msrb.gmra.mxu3 %v7044_v33  ;;  %7311 = vmatpush.bf16.msra.mxu2 %v10077_v17 }
 0xa84   : > { %7010 = vmatmul.bf16.gmra.mxu1 %v6939_v18  ;;  %v6836_v18 = vrot.slane %v13457_v9, 1 }
 0xa85   : > { %7312 = vmatpush.bf16.msra.mxu2 %v10076_v23 }
 0xa86   : > { %6737 = vmatmul.bf16.gmra.mxu2 %v6667_v2  ;;  %v6837_v60 = vsel %vm1061_vm1, %v6834_v24, %v6836_v18 }
 0xa91   : > { %7118 = vmatmul.bf16.gmra.mxu3 %v7053_v13 }
 0xa94   : > { %7436 = vmatmul.bf16.vlgmr.msra.gmra.mxu1 %v7367_v36 }
 0xa96   : > { %6897 = vmatmul.bf16.vlgmr.msrb.gmra.mxu2 %v6835_v41 }
 0xaa1   : > { %7123 = vmatmul.bf16.gmra.mxu3 %v7052_v16 }
 0xaa4   : > { %7441 = vmatmul.bf16.gmra.mxu1 %v7376_v62 }
 0xaa6   : > { %6902 = vmatmul.bf16.gmra.mxu2 %v6837_v60 }
 0xab1   : > { %7538 = vmatmul.bf16.vlgmr.msra.gmra.mxu3 %v13476_v57 }
 0xab4   : > { %7446 = vmatmul.bf16.gmra.mxu1 %v7375_v14 }
 0xab6   : > { %6907 = vmatmul.bf16.gmra.mxu2 %v6836_v18 }
 0xac1   : > { %7543 = vmatmul.bf16.gmra.mxu3 %v7478_v37 }
 0xac6   : > { %7313 = vmatmul.bf16.vlgmr.msra.gmra.mxu2 %v13465_v49 }
 0xad1   : > { %7548 = vmatmul.bf16.gmra.mxu3 %v7477_v26 }
 0xad4   : > { %v6799_v9 = vpop.f32.mrf.mxu3 }
 0xad6   : > { %7318 = vmatmul.bf16.gmra.mxu2 %v13502_v63  ;;  %v13574_v4 = vpop.f32.mrf.mxu0 }
 0xadc   : > { %v6801_v43 = vpop.f32.mrf.mxu3 }
 0xade   : > { %v13576_v12 = vpop.f32.mrf.mxu0 }
 0xae1   : > { %v7001_v57 = vpop.f32.mrf.mxu1 }
 0xae4   : > { %v6804_v20 = vpop.f32.mrf.mxu3 }
 0xae6   : > { %7323 = vmatmul.bf16.gmra.mxu2 %v7252_v27  ;;  %v13580_v51 = vpop.f32.mrf.mxu0 }
 0xae9   : > { %v6728_v21 = vpop.f32.mrf.mxu2  ;;  %v7003_v32 = vpop.f32.mrf.mxu1 }
 0xaea   : > { %v6800_v38 = vadd.f32 %v6799_v9, %v6728_v21 }
 0xaec   : > { %v6806_v49 = vpop.f32.mrf.mxu3 }
 0xaee   : > { %v13582_v10 = vpop.f32.mrf.mxu0 }
 0xaf1   : > { %v6730_v22 = vpop.f32.mrf.mxu2  ;;  %v7006_v5 = vpop.f32.mrf.mxu1 }
 0xaf2   : > { %v6802_v63 = vadd.f32 %v6801_v43, %v6730_v22 }
 0xaf4   : > { %v6809_v31 = vpop.f32.mrf.mxu3 }
 0xaf6   : > { %v13584_v46 = vpop.f32.mrf.mxu0 }
 0xaf9   : > { %v6733_v33 = vpop.f32.mrf.mxu2  ;;  %v7008_v2 = vpop.f32.mrf.mxu1 }
 0xafa   : > { %v6805_v7 = vadd.f32 %v6804_v20, %v6733_v33 }
 0xafc   : > { %v6811_v11 = vpop.f32.mrf.mxu3 }
 0xafe   : > { %v7222_v44 = vpop.f32.mrf.mxu0 }
 0xb01   : > { %v6735_v27 = vpop.f32.mrf.mxu2  ;;  %v7011_v48 = vpop.f32.mrf.mxu1 }
 0xb02   : > { %v6807_v30 = vadd.f32 %v6806_v49, %v6735_v27  ;;  %v10162_v49 = vld [vmem:[%s13689_s2 + $0x3] ss:$0 sm:$0xff] }
 0xb04   : > { %v7114_v42 = vpop.f32.mrf.mxu3 }
 0xb09   : > { %v6738_v61 = vpop.f32.mrf.mxu2  ;;  %v7013_v34 = vpop.f32.mrf.mxu1 }
 0xb0a   : > { %v6810_v29 = vadd.f32 %v6809_v31, %v6738_v61  ;;  %v10163_v31 = vld [vmem:[%s13690_s3 + $0x3] ss:$0 sm:$0xff] }
 0xb0c   : > { %v7116_v19 = vpop.f32.mrf.mxu3 }
 0xb11   : > { %v6740_v56 = vpop.f32.mrf.mxu2  ;;  %v7437_v40 = vpop.f32.mrf.mxu1 }
 0xb14   : > { %v7119_v6 = vpop.f32.mrf.mxu3 }
 0xb19   : > { %v6898_v55 = vpop.f32.mrf.mxu2  ;;  %v7439_v8 = vpop.f32.mrf.mxu1 }
 0xb1a   : > { %v6912_v16 = vadd.f32 %v6898_v55, %v6800_v38 }
 0xb1c   : > { %v7015_v15 = vadd.f32 %v7001_v57, %v6912_v16  ;;  %v7121_v45 = vpop.f32.mrf.mxu3 }
 0xb1e   : > { %v7128_v39 = vadd.f32 %v7114_v42, %v7015_v15 }
 0xb20   : > { %v7224_v43 = vadd.f32 %v13574_v4, %v7128_v39 }
 0xb21   : > { %v6900_v28 = vpop.f32.mrf.mxu2  ;;  %v7442_v13 = vpop.f32.mrf.mxu1 }
 0xb22   : > { %v6913_v35 = vadd.f32 %v6900_v28, %v6802_v63 }
 0xb24   : > { %v7016_v47 = vadd.f32 %v7003_v32, %v6913_v35  ;;  %v7124_v25 = vpop.f32.mrf.mxu3 }
 0xb26   : > { %v7129_v24 = vadd.f32 %v7116_v19, %v7016_v47  ;;  %v10106_v47 = vld [vmem:[%s13695_s8 + $0x30] sm:$0xff] }
 0xb28   : > { %v7225_v22 = vadd.f32 %v13576_v12, %v7129_v24 }
 0xb29   : > { %v6903_v53 = vpop.f32.mrf.mxu2  ;;  %v7444_v36 = vpop.f32.mrf.mxu1 }
 0xb2a   : > { %v6914_v52 = vadd.f32 %v6903_v53, %v6805_v7 }
 0xb2c   : > { %v7017_v59 = vadd.f32 %v7006_v5, %v6914_v52  ;;  %v7126_v41 = vpop.f32.mrf.mxu3 }
 0xb2e   : > { %v7130_v1 = vadd.f32 %v7119_v6, %v7017_v59  ;;  %v10105_v59 = vld [vmem:[%s13695_s8 + $0x28] sm:$0xff] }
 0xb30   : > { %v7226_v27 = vadd.f32 %v13580_v51, %v7130_v1  ;;  %v10107_v51 = vld [vmem:[%s13695_s8 + $0x38] sm:$0xff] }
 0xb31   : > { %v6905_v54 = vpop.f32.mrf.mxu2  ;;  %v7447_v0 = vpop.f32.mrf.mxu1  ;;  %7672 = vmatpush.bf16.msrb.mxu2 %v10107_v51 }
 0xb32   : > { %v6915_v58 = vadd.f32 %v6905_v54, %v6807_v30 }
 0xb34   : > { %v7018_v17 = vadd.f32 %v7008_v2, %v6915_v58  ;;  %v7539_v50 = vpop.f32.mrf.mxu3 }
 0xb35   : > { %7673 = vmatpush.bf16.msrb.mxu2 %v10106_v47 }
 0xb36   : > { %v7131_v3 = vadd.f32 %v7121_v45, %v7018_v17  ;;  %v10104_v17 = vld [vmem:[%s13695_s8 + $0x20] sm:$0xff] }
 0xb38   : > { %v7227_v6 = vadd.f32 %v13582_v10, %v7131_v3 }
 0xb39   : > { %v6908_v23 = vpop.f32.mrf.mxu2  ;;  %v7449_v18 = vpop.f32.mrf.mxu1  ;;  %7674 = vmatpush.bf16.msrb.mxu2 %v10105_v59 }
 0xb3a   : > { %v6916_v14 = vadd.f32 %v6908_v23, %v6810_v29 }
 0xb3c   : > { %v7019_v62 = vadd.f32 %v7011_v48, %v6916_v14  ;;  %v7541_v60 = vpop.f32.mrf.mxu3 }
 0xb3d   : > { %7675 = vmatpush.bf16.msrb.mxu2 %v10104_v17 }
 0xb3e   : > { %v7132_v26 = vadd.f32 %v7124_v25, %v7019_v62  ;;  %v10102_v62 = vld [vmem:[%s13695_s8 + $0x10] sm:$0xff] }
 0xb41   : > { %v6910_v37 = vpop.f32.mrf.mxu2 }
 0xb42   : > { %v7585_v37 = vld [vmem:[%s13694_s7] sm:$0x1] }
 0xb44   : > { %v7544_v9 = vpop.f32.mrf.mxu3 }
 0xb49   : > { %v7314_v57 = vpop.f32.mrf.mxu2 }
 0xb4a   : > { %v7328_v20 = vadd.f32 %v7314_v57, %v7224_v43  ;;  %v10115_v43 = vld [vmem:[%s13697_s10 + $0x38] sm:$0xff]  ;;  %v10114_v57 = vld [vmem:[%s13697_s10 + $0x30] sm:$0xff] }
 0xb4b   : > { %7751 = vmatpush.bf16.msrb.mxu1 %v10115_v43 }
 0xb4c   : > { %v7451_v21 = vadd.f32 %v7437_v40, %v7328_v20  ;;  %v7546_v38 = vpop.f32.mrf.mxu3  ;;  %v10113_v20 = vld [vmem:[%s13697_s10 + $0x28] sm:$0xff] }
 0xb4e   : > { %v7553_v32 = vadd.f32 %v7539_v50, %v7451_v21  ;;  %v10112_v21 = vld [vmem:[%s13697_s10 + $0x20] sm:$0xff] }
 0xb4f   : > { %7752 = vmatpush.bf16.msrb.mxu1 %v10114_v57 }
 0xb50   : > { %v7560_v5 = vmul.f32 %v10162_v49, %v7553_v32  ;;  %v10110_v32 = vld [vmem:[%s13697_s10 + $0x10] sm:$0xff] }
 0xb51   : > { %v7316_v63 = vpop.f32.mrf.mxu2 }
 0xb52   : > { %v7329_v33 = vadd.f32 %v7316_v63, %v7225_v22  ;;  %v7567_v2 = vadd.f32 %v10163_v31, %v7560_v5 }
 0xb53   : > { %7753 = vmatpush.bf16.msrb.mxu1 %v10113_v20 }
 0xb54   : > { %v7452_v7 = vadd.f32 %v7439_v8, %v7329_v33  ;;  %v7549_v4 = vpop.f32.mrf.mxu3  ;;  %v7572_v48 = vmax.f32 %v7567_v2, 0.0  ;;  %v7623_v33 = vld [vmem:[%s13696_s9] sm:$0x1] }
 0xb56   : > { %v7554_v11 = vadd.f32 %v7541_v60, %v7452_v7  ;;  %v7577_v19 = vmin.f32 %v7572_v48, 6.0 }
 0xb57   : > { %7754 = vmatpush.bf16.msrb.mxu1 %v10112_v21 }
 0xb58   : > { %v7561_v44 = vmul.f32 %v10162_v49, %v7554_v11 }
 0xb59   : > { %v7319_v30 = vpop.f32.mrf.mxu2 }
 0xb5a   : > { %v7568_v42 = vadd.f32 %v10163_v31, %v7561_v44  ;;  %v7330_v61 = vadd.f32 %v7319_v30, %v7226_v27  ;;  %v7702_v44 = vld [vmem:[%s13698_s11] sm:$0x1] }
 0xb5c   : > { %v7573_v29 = vmax.f32 %v7568_v42, 0.0  ;;  %v7453_v12 = vadd.f32 %v7442_v13, %v7330_v61  ;;  %v7551_v34 = vpop.f32.mrf.mxu3  ;;  %v7228_v13 = vadd.f32 %v13584_v46, %v7132_v26  ;;  %v10101_v26 = vld [vmem:[%s13695_s8 + $0x8] sm:$0xff] }
 0xb5e   : > { %v7578_v56 = vmin.f32 %v7573_v29, 6.0  ;;  %v7555_v40 = vadd.f32 %v7544_v9, %v7453_v12  ;;  %v10100_v9 = vld [vmem:[%s13695_s8] sm:$0xff] }
 0xb60   : > { %v7582_v55 = vpack.c.bf16 %v7578_v56, %v7577_v19  ;;  %v7562_v8 = vmul.f32 %v10162_v49, %v7555_v40 }
 0xb61   : > { %v7321_v16 = vpop.f32.mrf.mxu2 }
 0xb62   : > { %v7331_v15 = vadd.f32 %v7321_v16, %v7227_v6  ;;  %v7569_v39 = vadd.f32 %v10163_v31, %v7562_v8 }
 0xb64   : > { %v7454_v45 = vadd.f32 %v7444_v36, %v7331_v15  ;;  %v7574_v25 = vmax.f32 %v7569_v39, 0.0 }
 0xb66   : > { %v7556_v28 = vadd.f32 %v7546_v38, %v7454_v45  ;;  %v7579_v41 = vmin.f32 %v7574_v25, 6.0  ;;  %v10111_v38 = vld [vmem:[%s13697_s10 + $0x18] sm:$0xff] }
 0xb67   : > { %7755 = vmatpush.bf16.msrb.mxu1 %v10111_v38 }
 0xb68   : > { %v7563_v35 = vmul.f32 %v10162_v49, %v7556_v28 }
 0xb69   : > { %v7324_v10 = vpop.f32.mrf.mxu2 }
 0xb6a   : > { %v7570_v24 = vadd.f32 %v10163_v31, %v7563_v35  ;;  %v7332_v53 = vadd.f32 %v7324_v10, %v7228_v13 }
 0xb6b   : > { %7756 = vmatpush.bf16.msrb.mxu1 %v10110_v32 }
 0xb6c   : > { %v7575_v52 = vmax.f32 %v7570_v24, 0.0  ;;  %v7455_v36 = vadd.f32 %v7447_v0, %v7332_v53  ;;  %v10103_v0 = vld [vmem:[%s13695_s8 + $0x18] sm:$0xff] }
 0xb6d   : > { %7676 = vmatpush.bf16.msrb.mxu2 %v10103_v0 }
 0xb6e   : > { %v7580_v1 = vmin.f32 %v7575_v52, 6.0  ;;  %v7557_v54 = vadd.f32 %v7549_v4, %v7455_v36 }
 0xb70   : > { %v7564_v46 = vmul.f32 %v10162_v49, %v7557_v54  ;;  %v7583_v58 = vpack.c.bf16 %v7580_v1, %v7579_v41  ;;  %v10109_v49 = vld [vmem:[%s13697_s10 + $0x8] sm:$0xff] }
 0xb71   : > { %v7326_v50 = vpop.f32.mrf.mxu2  ;;  %7677 = vmatpush.bf16.msrb.mxu2 %v10102_v62  ;;  %7757 = vmatpush.bf16.msrb.mxu1 %v10109_v49 }
 0xb72   : > { %v7571_v3 = vadd.f32 %v10163_v31, %v7564_v46  ;;  %v10108_v31 = vld [vmem:[%s13697_s10] sm:$0xff] }
 0xb74   : > { %v7576_v23 = vmax.f32 %v7571_v3, 0.0 }
 0xb75   : > { %7678 = vmatpush.bf16.msrb.mxu2 %v10101_v26  ;;  %7758 = vmatpush.bf16.msrb.mxu1 %v10108_v31 }
 0xb76   : > { %v7581_v14 = vmin.f32 %v7576_v23, 6.0 }
 0xb78   : > { %v7584_v18 = vpack.c.bf16 %v7581_v14, %v7581_v14 }
 0xb79   : > { %7679 = vmatpush.bf16.msrb.mxu2 %v10100_v9 }
 0xb7a   : > { %v7591_v60 = vsel %vm3386_vm6, %v7584_v18, 0 }
 0xb7b   : > { %7598 = vmatpush.bf16.msra.mxu0 %v7591_v60 }
 0xb7f   : > { %7599 = vmatpush.bf16.msra.mxu0 %v7583_v58 }
 0xb83   : > { %7600 = vmatpush.bf16.msra.mxu0 %v7582_v55 }
 0xb86   : > { %9710 = vmatmul.msk.bf16.vlgmr.msra.gmra.mxu0 %vm7586_vm10, %v7585_v37 }
 0xc03   : > { %v7602_v22 = vpop.f32.mrf.mxu0 }
 0xc04   : > { %v7606_v63 = vpack.c.bf16 %v7602_v22, %v7602_v22 }
 0xc06   : > { %7680 = vmatmul.bf16.vlgmr.msrb.gmra.mxu2 %v7606_v63 }
 0xc0b   : > { %v7604_v5 = vpop.f32.mrf.mxu0 }
 0xc89   : > { %v7681_v7 = vpop.f32.mrf.mxu2 }
 0xc8a   : > { %v7682_v4 = vadd.f32 %v7681_v7, %v7623_v33 }
 0xc8c   : > { %v7685_v2 = vpack.c.bf16 %v7682_v4, %v7682_v4 }
 0xc8e   : > { %7759 = vmatmul.bf16.vlgmr.msrb.gmra.mxu1 %v7685_v2 }
 0xc91   : > { %v7683_v11 = vpop.f32.mrf.mxu2 }
 0xd0b   : > { %v7760_v27 = vpop.f32.mrf.mxu1 }
 0xd0c   : > { %v7761_v30 = vadd.f32 %v7760_v27, %v7702_v44 }
 0xd0e   : > { %7764 = vst [vmem:[%s405_s19] sm:$0x1] %v7761_v30 }
 0xd0f   : > { %10192 = shalt.err (!%p10189_p3)
}
 0xd10   : > { %10117 = dma.vmem_to_hbm [thread:$0]  (%p10332_p5), %s7777_s20, 16, %s7779_s17, %s7766_s26  }
 0xd13   : > { %v7762_v48 = vpop.f32.mrf.mxu1 }
 0xd14 PF: > { %p10123_p4 = scmp.ge.s32.totalorder %s10227_s24, 2  ;;  %s7790_s27 = sand.u32 1, %s10215_s21  }
 0xd15   : > { %s7791_s16 = scalar_lea.sflag [#allocation3], %s7790_s27 }
 0xd16   : > { %p10120_p7 = pnand %p10123_p4, %p10336_p6 }
 0xd18   : > { %p10121_p8 = pneg %p10120_p7 }
 0xd1a   : > { %10210 = dma.done.wait (%p10121_p8), %s7791_s16, 16  }
 0xd1b   : > { %10212 = vsyncadd (%p10121_p8), %s7791_s16, 4294967280  ;;  %s13938_s24 = sld [smem:[#allocation6_spill]]  ;;  %s13941_s21 = smov %s10219_s22 }
 0xd1c   : > { %s13939_s19 = sld [smem:[#allocation5_spill]] }
 0xd1d   : > { %s13940_s23 = sld [smem:[#allocation7_spill]] }
 0xd21   : > { %p22_p9 = scmp.ge.s32.totalorder %s13938_s24, 4  }
 0xd22   : > { %s13942_s22 = smov %s13939_s19 }
 0xd23   :  { %24 = sbr.rel (!%p22_p9) target bundleno = 3 (0x3), region = 138 }
 0xd28   :  { %7796 = vsyncpa [#allocation3], 1 }
 0xd29   :  { %7798 = vsyncpa [#allocation3 + $0x1], 1 }

</bundles_post_ra>
